<compile_context>
chip_gen: v7x
topology: tpu7x:2x2x1
jax: 0.10.0
libtpu: 0.0.40
codegen_flags: <defaults>
</compile_context>

<pallas_src>
import functools
import math

import jax
import jax.numpy as jnp
from jax.experimental import pallas as pl
from jax.experimental.pallas import tpu as pltpu

NUM_GROUPS = 32                      # nn.GroupNorm(num_groups=32, ...)
EPS = 1e-6
_HI = jax.lax.Precision.HIGHEST      # only for the tiny (B,C)@(C,C) statistics matmuls


def _round_up(v, m):
    return ((v + m - 1) // m) * m


# --------------------------------------------------------------------------- kernel
def _residual_block_kernel(has_proj, bf16_elem, x_ref, g1_ref, b1_ref, A1_ref, W1_ref,
                           c1_ref, g2_ref, b2_ref, A2_ref, W2_ref, c2_ref, *rest):
    if has_proj:
        Wup_ref, bup_ref, o_ref, pad1_ref, pad2_ref = rest
    else:
        o_ref, pad1_ref, pad2_ref = rest

    B, H, W, Cin = x_ref.shape
    Cout = o_ref.shape[3]
    HW = H * W
    Wp = pad1_ref.shape[2]           # scratch width, padded to a multiple of 8 sublanes

    x = x_ref[...].astype(jnp.float32).reshape(B, HW, Cin)

    def gn_stats(h, A_ref, g_ref, b_ref):
        # h: (B, HW, C) f32.  Per-image channel stats, averaged within each group via a
        # small (C, C) group-averaging matmul, folded into one (scale, shift) pair.
        ch_mean = jnp.mean(h, axis=1)                                  # (B, C)
        ch_msq = jnp.mean(h * h, axis=1)                               # (B, C)
        g_mean = jnp.dot(ch_mean, A_ref[...], precision=_HI,
                         preferred_element_type=jnp.float32)
        g_msq = jnp.dot(ch_msq, A_ref[...], precision=_HI,
                        preferred_element_type=jnp.float32)
        # E[x^2]-E[x]^2 in f32 with a >=0 clamp; the cancellation error (~1e-7*|x|^2) is
        # far below the bf16 conv noise floor.
        # TODO(synk): switch to a centered two-pass variance if tighter accuracy is needed.
        var = jnp.maximum(g_msq - g_mean * g_mean, 0.0)
        inv = jax.lax.rsqrt(var + EPS)
        scale = inv * g_ref[...]                                       # (B, C)
        shift = b_ref[...] - g_mean * scale                            # (B, C)
        return scale, shift

    def norm_swish_into_pad(h, scale, shift, pad_ref, C):
        # normalize (single FMA) + Swish, cast to bf16 and write straight into the padded
        # scratch interior -- no separate full-resolution temporary is kept around.
        if bf16_elem:        # v6e/v7x: bf16 VALU + bf16 EUP -> packed elementwise
            hb = h.astype(jnp.bfloat16)
            hn = (hb * scale.astype(jnp.bfloat16)[:, None, :]
                  + shift.astype(jnp.bfloat16)[:, None, :])
            act = hn * jax.nn.sigmoid(hn)
        else:                # v5e and older: no bf16 VPU/EUP -> stay f32, cast at store
            hn = h * scale[:, None, :] + shift[:, None, :]
            act = (hn * jax.nn.sigmoid(hn)).astype(jnp.bfloat16)
        pad_ref[:, 1:H + 1, 1:W + 1, :] = act.reshape(B, H, W, C)

    def clear_halo(pad_ref, zrow, zcol):
        # Interior is always fully overwritten; only the halo ring must be zero.
        # Row clears span the full (Wp, C) tile -> unmasked stores.
        pad_ref[:, 0:1, :, :] = zrow
        pad_ref[:, H + 1:H + 2, :, :] = zrow
        pad_ref[:, :, 0:1, :] = zcol
        pad_ref[:, :, W + 1:W + 2, :] = zcol

    def conv3x3(pad_ref, Wf_ref, bias_ref, C_in):
        # 9 accumulating bf16 MXU dots on shifted views of the padded scratch
        # (no im2col slab, no activation duplication through the vst slot).
        acc = None
        k = 0
        for dy in range(3):
            for dx in range(3):
                patch = pad_ref[:, dy:dy + H, dx:dx + W, :].reshape(B * HW, C_in)
                part = jnp.dot(patch, Wf_ref[k * C_in:(k + 1) * C_in, :],
                               preferred_element_type=jnp.float32)
                acc = part if acc is None else acc + part
                k += 1
        return acc + bias_ref[...]                                     # (B*HW, Cout) f32

    # halo zeros, hoisted (JAX does not CSE broadcast_in_dim)
    zrow1 = jnp.zeros((B, 1, Wp, Cin), jnp.bfloat16)
    zcol1 = jnp.zeros((B, H + 2, 1, Cin), jnp.bfloat16)
    if Cin == Cout:
        zrow2, zcol2 = zrow1, zcol1
    else:
        zrow2 = jnp.zeros((B, 1, Wp, Cout), jnp.bfloat16)
        zcol2 = jnp.zeros((B, H + 2, 1, Cout), jnp.bfloat16)

    # --- GroupNorm -> Swish -> Conv3x3 (x2) ---
    clear_halo(pad1_ref, zrow1, zcol1)
    s1, t1 = gn_stats(x, A1_ref, g1_ref, b1_ref)
    norm_swish_into_pad(x, s1, t1, pad1_ref, Cin)
    h = conv3x3(pad1_ref, W1_ref, c1_ref, Cin)                          # (B*HW, Cout) f32

    clear_halo(pad2_ref, zrow2, zcol2)
    s2, t2 = gn_stats(h.reshape(B, HW, Cout), A2_ref, g2_ref, b2_ref)
    norm_swish_into_pad(h.reshape(B, HW, Cout), s2, t2, pad2_ref, Cout)
    h = conv3x3(pad2_ref, W2_ref, c2_ref, Cout)                         # (B*HW, Cout) f32

    if has_proj:   # channel_up 1x1 conv on the residual path (in_channels != out_channels)
        res = jnp.dot(x.reshape(B * HW, Cin).astype(jnp.bfloat16), Wup_ref[...],
                      preferred_element_type=jnp.float32) + bup_ref[...]
    else:          # identity residual: no matmul at all
        res = x.reshape(B * HW, Cin)

    o_ref[...] = (res + h).reshape(B, H, W, Cout).astype(o_ref.dtype)


# --------------------------------------------------------------------------- wrapper
def _pick_block_batch(N, HW, target_rows=512, max_rows=2048):
    """Images per grid step.  Targets a matmul M dim (B*H*W) of >= target_rows, caps the
    VMEM footprint at max_rows, allows a ragged batch (caller pads), and keeps at least
    two grid programs whenever N >= 2 so both v7x TensorCores get work."""
    b = max(1, min(pl.cdiv(target_rows, HW), max(1, max_rows // HW)))
    b = min(b, N)
    if N >= 2:
        b = min(b, pl.cdiv(N, 2))
    return b, pl.cdiv(N, b)


def _const_spec(shape, single_buffer):
    nd = len(shape)
    idx = lambda n, _nd=nd: (0,) * _nd
    if single_buffer:
        # constants never change across the grid -> no need to double-buffer them
        return pl.BlockSpec(shape, idx, pipeline_mode=pl.Buffered(1))
    return pl.BlockSpec(shape, idx)


@functools.lru_cache(maxsize=1)
def _single_buffer_consts_supported():
    """Probe pl.Buffered(1) once on a tiny throwaway pallas_call so the real kernel
    launch never needs a broad try/except around it."""
    try:
        def probe(a_ref, o_ref):
            o_ref[...] = a_ref[...] + 1.0

        f = pl.pallas_call(
            probe,
            out_shape=jax.ShapeDtypeStruct((8, 128), jnp.float32),
            grid=(2,),
            in_specs=[pl.BlockSpec((8, 128), lambda i: (0, 0),
                                   pipeline_mode=pl.Buffered(1))],
            out_specs=pl.BlockSpec((8, 128), lambda i: (0, 0)))
        jax.block_until_ready(f(jnp.zeros((8, 128), jnp.float32)))
        return True
    except Exception:
        return False


@functools.lru_cache(maxsize=1)
def _bf16_elementwise_ok():
    """bf16 VALU/EUP exists on v6e/v7x; keep f32 elementwise on v5e and older."""
    try:
        kind = jax.devices()[0].device_kind.lower()
    except Exception:
        return False
    return ("v6" in kind) or ("v7" in kind)


def residual_block(x, params, out_dtype=jnp.bfloat16):
    N, H, W, Cin = x.shape
    Cout = params["c2"].shape[1]
    has_proj = "Wup" in params
    HW = H * W

    B, grid_n = _pick_block_batch(N, HW)
    N_pad = B * grid_n
    if N_pad != N:   # ragged batch: pad, compute, slice (padded images are discarded)
        x = jnp.concatenate([x, jnp.zeros((N_pad - N, H, W, Cin), x.dtype)], axis=0)

    Wp = _round_up(W + 2, 8)   # full sublane tiles: no hidden padding, aligned row clears

    # bf16 weights for the MXU; conv weights reshaped to (9*C, Cout) so tap k uses the
    # contiguous row slice [k*C, (k+1)*C).
    W1f = params["W1"].reshape(9 * Cin, Cout).astype(jnp.bfloat16)
    W2f = params["W2"].reshape(9 * Cout, Cout).astype(jnp.bfloat16)

    args = [x, params["g1"], params["b1"], params["A_in"], W1f, params["c1"],
            params["g2"], params["b2"], params["A_out"], W2f, params["c2"]]
    if has_proj:
        args += [params["Wup"].astype(jnp.bfloat16), params["bup"]]

    scratch_shapes = [
        pltpu.VMEM((B, H + 2, Wp, Cin), jnp.bfloat16),    # padded conv1 input
        pltpu.VMEM((B, H + 2, Wp, Cout), jnp.bfloat16),   # padded conv2 input
    ]                                                     # (no im2col slab any more)

    x_spec = pl.BlockSpec((B, H, W, Cin), lambda n: (n, 0, 0, 0))
    out_specs = pl.BlockSpec((B, H, W, Cout), lambda n: (n, 0, 0, 0))
    out_shape = jax.ShapeDtypeStruct((N_pad, H, W, Cout), out_dtype)

    single_buf = _single_buffer_consts_supported()
    in_specs = [x_spec] + [_const_spec(a.shape, single_buf) for a in args[1:]]

    # ---- VMEM budget (raise the scoped limit only when the estimate needs it) ----
    const_raw = sum(a.size * a.dtype.itemsize for a in args[1:])
    const_bytes = const_raw if single_buf else 2 * const_raw
    io_bytes = 2 * B * HW * (Cin * x.dtype.itemsize + Cout * jnp.dtype(out_dtype).itemsize)
    scratch_bytes = 2 * B * (H + 2) * Wp * (Cin + Cout)
    work_bytes = 4 * B * HW * (Cin + 3 * Cout)            # f32 temps (x, acc, h, out)
    vmem_est = const_bytes + io_bytes + scratch_bytes + work_bytes

    cp_kwargs = dict(dimension_semantics=("parallel",))   # batch axis -> megacore
    if vmem_est > (16 << 20):
        try:
            vmem_cap = int(pltpu.get_tpu_info().vmem_capacity_bytes)
        except Exception:
            vmem_cap = 64 << 20                           # v7x per-TC capacity (lower bound)
        cp_kwargs["vmem_limit_bytes"] = min(int(vmem_est * 13 // 10),
                                            int(vmem_cap * 4 // 5))
    compiler_params = pltpu.CompilerParams(**cp_kwargs)

    # advisory cost model so XLA schedules neighbouring HLO around the custom call
    M_total = N_pad * HW
    flops = 2 * M_total * Cout * (9 * Cin + 9 * Cout + (Cin if has_proj else 0))
    cost = pl.CostEstimate(
        flops=int(flops),
        transcendentals=int(M_total * (Cin + Cout)),      # the two Swish sigmoids
        bytes_accessed=int(x.size * x.dtype.itemsize
                           + M_total * Cout * jnp.dtype(out_dtype).itemsize
                           + const_raw))

    kernel = functools.partial(_residual_block_kernel, has_proj, _bf16_elementwise_ok())
    grid_spec = pltpu.PrefetchScalarGridSpec(
        num_scalar_prefetch=0, grid=(grid_n,),
        in_specs=in_specs, out_specs=out_specs, scratch_shapes=scratch_shapes)

    out = pl.pallas_call(kernel, out_shape=out_shape, grid_spec=grid_spec,
                         compiler_params=compiler_params, cost_estimate=cost)(*args)
    return out[:N] if N_pad != N else out


# --------------------------------------------------------------------------- params
def _group_avg_matrix(C, G=NUM_GROUPS):
    gs = C // G
    gid = jnp.arange(C) // gs
    return (gid[:, None] == gid[None, :]).astype(jnp.float32) / gs


def init_params(key, Cin, Cout):
    ks = jax.random.split(key, 10)
    p = {
        "g1": 1.0 + 0.1 * jax.random.normal(ks[0], (1, Cin), jnp.float32),
        "b1": 0.1 * jax.random.normal(ks[1], (1, Cin), jnp.float32),
        "W1": jax.random.normal(ks[2], (9, Cin, Cout), jnp.float32) / math.sqrt(9 * Cin),
        "c1": 0.1 * jax.random.normal(ks[3], (1, Cout), jnp.float32),
        "g2": 1.0 + 0.1 * jax.random.normal(ks[4], (1, Cout), jnp.float32),
        "b2": 0.1 * jax.random.normal(ks[5], (1, Cout), jnp.float32),
        "W2": jax.random.normal(ks[6], (9, Cout, Cout), jnp.float32) / math.sqrt(9 * Cout),
        "c2": 0.1 * jax.random.normal(ks[7], (1, Cout), jnp.float32),
        "A_in": _group_avg_matrix(Cin),
        "A_out": _group_avg_matrix(Cout),
    }
    if Cin != Cout:   # channel_up exists only in this case (as in the PyTorch module)
        p["Wup"] = jax.random.normal(ks[8], (Cin, Cout), jnp.float32) / math.sqrt(Cin)
        p["bup"] = 0.1 * jax.random.normal(ks[9], (1, Cout), jnp.float32)
    return p


# --------------------------------------------------------------------------- pure-JAX reference
def _group_norm_ref(x, gamma, beta, G=NUM_GROUPS, eps=EPS):
    N, H, W, C = x.shape
    xg = x.reshape(N, H, W, G, C // G)
    mean = xg.mean(axis=(1, 2, 4), keepdims=True)
    var = ((xg - mean) ** 2).mean(axis=(1, 2, 4), keepdims=True)
    xn = ((xg - mean) / jnp.sqrt(var + eps)).reshape(N, H, W, C)
    return xn * gamma.reshape(1, 1, 1, C) + beta.reshape(1, 1, 1, C)


def _conv3x3_ref(x, w9, b):
    Cin, Cout = w9.shape[1], w9.shape[2]
    w = w9.reshape(3, 3, Cin, Cout)
    y = jax.lax.conv_general_dilated(x, w, (1, 1), "SAME",
                                     dimension_numbers=("NHWC", "HWIO", "NHWC"),
                                     precision=_HI)
    return y + b.reshape(1, 1, 1, Cout)


def residual_block_ref(x, p):
    h = _group_norm_ref(x, p["g1"], p["b1"])
    h = h * jax.nn.sigmoid(h)
    h = _conv3x3_ref(h, p["W1"], p["c1"])
    h = _group_norm_ref(h, p["g2"], p["b2"])
    h = h * jax.nn.sigmoid(h)
    h = _conv3x3_ref(h, p["W2"], p["c2"])
    if "Wup" in p:
        res = jnp.einsum("nhwc,cd->nhwd", x, p["Wup"],
                         precision=_HI) + p["bup"].reshape(1, 1, 1, -1)
    else:
        res = x
    return res + h


# --------------------------------------------------------------------------- main
if __name__ == "__main__":
    key = jax.random.PRNGKey(0)
    k1, k2, k3, k4 = jax.random.split(key, 4)

    # Case 1: in_channels != out_channels -> channel_up (1x1 conv) residual path.
    # Channels >= 128 keep loads / matmuls / stores lane-dense.
    N, H, W, Cin, Cout = 2, 8, 8, 128, 256
    x = jax.random.normal(k1, (N, H, W, Cin), jnp.float32)        # NHWC
    params = init_params(k2, Cin, Cout)
    out = jax.block_until_ready(residual_block(x, params))
    ref = residual_block_ref(x, params)
    assert out.shape == (N, H, W, Cout)
    # convs + (on v6e/v7x) the GroupNorm/Swish epilogue run in bf16 and the output is
    # emitted in bf16, so the tolerance scales with the output magnitude (bf16 rounding).
    err1 = float(jnp.max(jnp.abs(out.astype(jnp.float32) - ref)))
    tol1 = 2.5e-1 + 2.5e-2 * float(jnp.max(jnp.abs(ref)))
    assert err1 < tol1, f"channel_up case: max abs err {err1} (tol {tol1})"

    # Case 2: in_channels == out_channels -> identity residual (no 1x1 matmul).
    Cin2 = Cout2 = 128
    x2 = jax.random.normal(k3, (N, H, W, Cin2), jnp.float32)
    params2 = init_params(k4, Cin2, Cout2)
    out2 = jax.block_until_ready(residual_block(x2, params2))
    ref2 = residual_block_ref(x2, params2)
    assert out2.shape == (N, H, W, Cout2)
    err2 = float(jnp.max(jnp.abs(out2.astype(jnp.float32) - ref2)))
    tol2 = 2.5e-1 + 2.5e-2 * float(jnp.max(jnp.abs(ref2)))
    assert err2 < tol2, f"identity case: max abs err {err2} (tol {tol2})"

    print("KERNEL_OK")
</pallas_src>

<mosaic_0001>
module attributes {stable_mosaic.version = 11 : i64} {
  func.func @probe(%arg0: i32, %arg1: memref<8x128xf32, #tpu.memory_space<vmem>>, %arg2: memref<8x128xf32, #tpu.memory_space<vmem>>) attributes {dimension_semantics = [#tpu.dimension_semantics<arbitrary>], iteration_bounds = array<i64: 2>, scalar_prefetch = 0 : i64, scratch_operands = 0 : i64, tpu.core_type = #tpu.core_type<tc>, window_params = [{pipeline_mode = #tpu.pipeline_mode<synchronous>, transform_indices = @transform_0, window_bounds = array<i64: 8, 128>}, {pipeline_mode = #tpu.pipeline_mode<synchronous>, transform_indices = @transform_1, window_bounds = array<i64: 8, 128>}]} {
    %c0 = arith.constant 0 : index
    %c0_0 = arith.constant 0 : index
    %0 = vector.load %arg1[%c0, %c0_0] : memref<8x128xf32, #tpu.memory_space<vmem>>, vector<8x128xf32>
    %cst = arith.constant 1.000000e+00 : f32
    %1 = vector.broadcast %cst : f32 to vector<8x128xf32>
    %2 = arith.addf %0, %1 : vector<8x128xf32>
    %c0_1 = arith.constant 0 : index
    %c0_2 = arith.constant 0 : index
    %3 = vector.load %arg2[%c0_1, %c0_2] : memref<8x128xf32, #tpu.memory_space<vmem>>, vector<8x128xf32>
    tpu.vector_store %arg2[%c0_1, %c0_2], %2 {strides = array<i32>} : memref<8x128xf32, #tpu.memory_space<vmem>>, vector<8x128xf32>,
    return
  }
  func.func @transform_0(%arg0: i32) -> (i32, i32) {
    %c0_i32 = arith.constant 0 : i32
    %c0_i32_0 = arith.constant 0 : i32
    %c0_i32_1 = arith.constant 0 : i32
    return %c0_i32, %c0_i32_0 : i32, i32
  }
  func.func @transform_1(%arg0: i32) -> (i32, i32) {
    %c0_i32 = arith.constant 0 : i32
    %c0_i32_0 = arith.constant 0 : i32
    %c0_i32_1 = arith.constant 0 : i32
    return %c0_i32, %c0_i32_0 : i32, i32
  }
}

module attributes {stable_mosaic.version = 11 : i64} {
  func.func @_residual_block_kernel(%arg0: i32, %arg1: memref<1x8x8x128xf32, #tpu.memory_space<vmem>>, %arg2: memref<1x128xf32, #tpu.memory_space<vmem>>, %arg3: memref<1x128xf32, #tpu.memory_space<vmem>>, %arg4: memref<128x128xf32, #tpu.memory_space<vmem>>, %arg5: memref<1152x256xbf16, #tpu.memory_space<vmem>>, %arg6: memref<1x256xf32, #tpu.memory_space<vmem>>, %arg7: memref<1x256xf32, #tpu.memory_space<vmem>>, %arg8: memref<1x256xf32, #tpu.memory_space<vmem>>, %arg9: memref<256x256xf32, #tpu.memory_space<vmem>>, %arg10: memref<2304x256xbf16, #tpu.memory_space<vmem>>, %arg11: memref<1x256xf32, #tpu.memory_space<vmem>>, %arg12: memref<128x256xbf16, #tpu.memory_space<vmem>>, %arg13: memref<1x256xf32, #tpu.memory_space<vmem>>, %arg14: memref<1x8x8x256xbf16, #tpu.memory_space<vmem>>, %arg15: memref<1x10x16x128xbf16, #tpu.memory_space<vmem>>, %arg16: memref<1x10x16x256xbf16, #tpu.memory_space<vmem>>) attributes {dimension_semantics = [#tpu.dimension_semantics<parallel>], iteration_bounds = array<i64: 2>, scalar_prefetch = 0 : i64, scratch_operands = 2 : i64, tpu.core_type = #tpu.core_type<tc>, window_params = [{transform_indices = @transform_0, window_bounds = array<i64: 1, 8, 8, 128>}, {pipeline_mode = #tpu.pipeline_mode<synchronous>, transform_indices = @transform_1, window_bounds = array<i64: 1, 128>}, {pipeline_mode = #tpu.pipeline_mode<synchronous>, transform_indices = @transform_2, window_bounds = array<i64: 1, 128>}, {pipeline_mode = #tpu.pipeline_mode<synchronous>, transform_indices = @transform_3, window_bounds = array<i64: 128, 128>}, {pipeline_mode = #tpu.pipeline_mode<synchronous>, transform_indices = @transform_4, window_bounds = array<i64: 1152, 256>}, {pipeline_mode = #tpu.pipeline_mode<synchronous>, transform_indices = @transform_5, window_bounds = array<i64: 1, 256>}, {pipeline_mode = #tpu.pipeline_mode<synchronous>, transform_indices = @transform_6, window_bounds = array<i64: 1, 256>}, {pipeline_mode = #tpu.pipeline_mode<synchronous>, transform_indices = @transform_7, window_bounds = array<i64: 1, 256>}, {pipeline_mode = #tpu.pipeline_mode<synchronous>, transform_indices = @transform_8, window_bounds = array<i64: 256, 256>}, {pipeline_mode = #tpu.pipeline_mode<synchronous>, transform_indices = @transform_9, window_bounds = array<i64: 2304, 256>}, {pipeline_mode = #tpu.pipeline_mode<synchronous>, transform_indices = @transform_10, window_bounds = array<i64: 1, 256>}, {pipeline_mode = #tpu.pipeline_mode<synchronous>, transform_indices = @transform_11, window_bounds = array<i64: 128, 256>}, {pipeline_mode = #tpu.pipeline_mode<synchronous>, transform_indices = @transform_12, window_bounds = array<i64: 1, 256>}, {transform_indices = @transform_13, window_bounds = array<i64: 1, 8, 8, 256>}]} {
    %c0 = arith.constant 0 : index
    %c0_0 = arith.constant 0 : index
    %c0_1 = arith.constant 0 : index
    %c0_2 = arith.constant 0 : index
    %0 = vector.load %arg1[%c0, %c0_0, %c0_1, %c0_2] : memref<1x8x8x128xf32, #tpu.memory_space<vmem>>, vector<1x8x8x128xf32>
    %1 = vector.shape_cast %0 : vector<1x8x8x128xf32> to vector<1x64x128xf32>
    %cst = arith.constant 0.000000e+00 : bf16
    %2 = vector.broadcast %cst : bf16 to vector<1x1x16x128xbf16>
    %cst_3 = arith.constant 0.000000e+00 : bf16
    %3 = vector.broadcast %cst_3 : bf16 to vector<1x10x1x128xbf16>
    %cst_4 = arith.constant 0.000000e+00 : bf16
    %4 = vector.broadcast %cst_4 : bf16 to vector<1x1x16x256xbf16>
    %cst_5 = arith.constant 0.000000e+00 : bf16
    %5 = vector.broadcast %cst_5 : bf16 to vector<1x10x1x256xbf16>
    %c0_6 = arith.constant 0 : index
    %c0_7 = arith.constant 0 : index
    %c0_8 = arith.constant 0 : index
    %c0_9 = arith.constant 0 : index
    %6 = vector.load %arg15[%c0_6, %c0_7, %c0_8, %c0_9] : memref<1x10x16x128xbf16, #tpu.memory_space<vmem>>, vector<1x1x16x128xbf16>
    tpu.vector_store %arg15[%c0_6, %c0_7, %c0_8, %c0_9], %2 {strides = array<i32>} : memref<1x10x16x128xbf16, #tpu.memory_space<vmem>>, vector<1x1x16x128xbf16>,
    %c0_10 = arith.constant 0 : index
    %c9 = arith.constant 9 : index
    %c0_11 = arith.constant 0 : index
    %c0_12 = arith.constant 0 : index
    %7 = vector.load %arg15[%c0_10, %c9, %c0_11, %c0_12] : memref<1x10x16x128xbf16, #tpu.memory_space<vmem>>, vector<1x1x16x128xbf16>
    tpu.vector_store %arg15[%c0_10, %c9, %c0_11, %c0_12], %2 {strides = array<i32>} : memref<1x10x16x128xbf16, #tpu.memory_space<vmem>>, vector<1x1x16x128xbf16>,
    %c0_13 = arith.constant 0 : index
    %c0_14 = arith.constant 0 : index
    %c0_15 = arith.constant 0 : index
    %c0_16 = arith.constant 0 : index
    %8 = vector.load %arg15[%c0_13, %c0_14, %c0_15, %c0_16] : memref<1x10x16x128xbf16, #tpu.memory_space<vmem>>, vector<1x10x1x128xbf16>
    tpu.vector_store %arg15[%c0_13, %c0_14, %c0_15, %c0_16], %3 {strides = array<i32>} : memref<1x10x16x128xbf16, #tpu.memory_space<vmem>>, vector<1x10x1x128xbf16>,
    %c0_17 = arith.constant 0 : index
    %c0_18 = arith.constant 0 : index
    %c9_19 = arith.constant 9 : index
    %c0_20 = arith.constant 0 : index
    %9 = vector.load %arg15[%c0_17, %c0_18, %c9_19, %c0_20] : memref<1x10x16x128xbf16, #tpu.memory_space<vmem>>, vector<1x10x1x128xbf16>
    tpu.vector_store %arg15[%c0_17, %c0_18, %c9_19, %c0_20], %3 {strides = array<i32>} : memref<1x10x16x128xbf16, #tpu.memory_space<vmem>>, vector<1x10x1x128xbf16>,
    %cst_21 = arith.constant dense<0.000000e+00> : vector<1x128xf32>
    %10 = vector.multi_reduction <add>, %1, %cst_21 [1] : vector<1x64x128xf32> to vector<1x128xf32>
    %cst_22 = arith.constant 6.400000e+01 : f32
    %11 = vector.broadcast %cst_22 : f32 to vector<1x128xf32>
    %12 = arith.divf %10, %11 : vector<1x128xf32>
    %13 = arith.mulf %1, %1 : vector<1x64x128xf32>
    %cst_23 = arith.constant dense<0.000000e+00> : vector<1x128xf32>
    %14 = vector.multi_reduction <add>, %13, %cst_23 [1] : vector<1x64x128xf32> to vector<1x128xf32>
    %cst_24 = arith.constant 6.400000e+01 : f32
    %15 = vector.broadcast %cst_24 : f32 to vector<1x128xf32>
    %16 = arith.divf %14, %15 : vector<1x128xf32>
    %c0_25 = arith.constant 0 : index
    %c0_26 = arith.constant 0 : index
    %17 = vector.load %arg4[%c0_25, %c0_26] : memref<128x128xf32, #tpu.memory_space<vmem>>, vector<128x128xf32>
    %cst_27 = arith.constant dense<0.000000e+00> : vector<1x128xf32>
    %18 = tpu.matmul %12, %17, %cst_27 {dimension_numbers = #tpu.dot_dimension_numbers<[1], [0], [0], [1], [0, 0, 1, 1], [], []>, precision = #tpu.contract_precision<fp32>} : vector<1x128xf32>, vector<128x128xf32>, vector<1x128xf32> -> vector<1x128xf32>
    %c0_28 = arith.constant 0 : index
    %c0_29 = arith.constant 0 : index
    %19 = vector.load %arg4[%c0_28, %c0_29] : memref<128x128xf32, #tpu.memory_space<vmem>>, vector<128x128xf32>
    %cst_30 = arith.constant dense<0.000000e+00> : vector<1x128xf32>
    %20 = tpu.matmul %16, %19, %cst_30 {dimension_numbers = #tpu.dot_dimension_numbers<[1], [0], [0], [1], [0, 0, 1, 1], [], []>, precision = #tpu.contract_precision<fp32>} : vector<1x128xf32>, vector<128x128xf32>, vector<1x128xf32> -> vector<1x128xf32>
    %21 = arith.mulf %18, %18 : vector<1x128xf32>
    %22 = arith.subf %20, %21 : vector<1x128xf32>
    %cst_31 = arith.constant 0.000000e+00 : f32
    %23 = vector.broadcast %cst_31 : f32 to vector<1x128xf32>
    %24 = arith.maximumf %22, %23 : vector<1x128xf32>
    %cst_32 = arith.constant 9.99999997E-7 : f32
    %25 = vector.broadcast %cst_32 : f32 to vector<1x128xf32>
    %26 = arith.addf %24, %25 : vector<1x128xf32>
    %27 = math.rsqrt %26 : vector<1x128xf32>
    %c0_33 = arith.constant 0 : index
    %c0_34 = arith.constant 0 : index
    %28 = vector.load %arg2[%c0_33, %c0_34] : memref<1x128xf32, #tpu.memory_space<vmem>>, vector<1x128xf32>
    %29 = arith.mulf %27, %28 : vector<1x128xf32>
    %c0_35 = arith.constant 0 : index
    %c0_36 = arith.constant 0 : index
    %30 = vector.load %arg3[%c0_35, %c0_36] : memref<1x128xf32, #tpu.memory_space<vmem>>, vector<1x128xf32>
    %31 = arith.mulf %18, %29 : vector<1x128xf32>
    %32 = arith.subf %30, %31 : vector<1x128xf32>
    %33 = vector.shape_cast %29 : vector<1x128xf32> to vector<1x1x128xf32>
    %34 = vector.broadcast %33 : vector<1x1x128xf32> to vector<1x64x128xf32>
    %35 = arith.mulf %1, %34 : vector<1x64x128xf32>
    %36 = vector.shape_cast %32 : vector<1x128xf32> to vector<1x1x128xf32>
    %37 = vector.broadcast %36 : vector<1x1x128xf32> to vector<1x64x128xf32>
    %38 = arith.addf %35, %37 : vector<1x64x128xf32>
    %39 = arith.negf %38 : vector<1x64x128xf32>
    %40 = math.exp %39 : vector<1x64x128xf32>
    %cst_37 = arith.constant 1.000000e+00 : f32
    %41 = vector.broadcast %cst_37 : f32 to vector<1x64x128xf32>
    %42 = arith.addf %41, %40 : vector<1x64x128xf32>
    %43 = arith.divf %41, %42 : vector<1x64x128xf32>
    %44 = arith.mulf %38, %43 : vector<1x64x128xf32>
    %45 = arith.truncf %44 : vector<1x64x128xf32> to vector<1x64x128xbf16>
    %46 = vector.shape_cast %45 : vector<1x64x128xbf16> to vector<1x8x8x128xbf16>
    %c0_38 = arith.constant 0 : index
    %c1 = arith.constant 1 : index
    %c1_39 = arith.constant 1 : index
    %c0_40 = arith.constant 0 : index
    %47 = vector.load %arg15[%c0_38, %c1, %c1_39, %c0_40] : memref<1x10x16x128xbf16, #tpu.memory_space<vmem>>, vector<1x8x8x128xbf16>
    tpu.vector_store %arg15[%c0_38, %c1, %c1_39, %c0_40], %46 {strides = array<i32>} : memref<1x10x16x128xbf16, #tpu.memory_space<vmem>>, vector<1x8x8x128xbf16>,
    %c0_41 = arith.constant 0 : index
    %c0_42 = arith.constant 0 : index
    %c0_43 = arith.constant 0 : index
    %c0_44 = arith.constant 0 : index
    %48 = vector.load %arg15[%c0_41, %c0_42, %c0_43, %c0_44] : memref<1x10x16x128xbf16, #tpu.memory_space<vmem>>, vector<1x8x8x128xbf16>
    %49 = vector.shape_cast %48 : vector<1x8x8x128xbf16> to vector<64x128xbf16>
    %c0_45 = arith.constant 0 : index
    %c0_46 = arith.constant 0 : index
    %50 = vector.load %arg5[%c0_45, %c0_46] : memref<1152x256xbf16, #tpu.memory_space<vmem>>, vector<128x256xbf16>
    %cst_47 = arith.constant dense<0.000000e+00> : vector<64x256xf32>
    %51 = tpu.matmul %49, %50, %cst_47 {dimension_numbers = #tpu.dot_dimension_numbers<[1], [0], [0], [1], [0, 0, 1, 1], [], []>} : vector<64x128xbf16>, vector<128x256xbf16>, vector<64x256xf32> -> vector<64x256xf32>
    %c0_48 = arith.constant 0 : index
    %c0_49 = arith.constant 0 : index
    %c1_50 = arith.constant 1 : index
    %c0_51 = arith.constant 0 : index
    %52 = vector.load %arg15[%c0_48, %c0_49, %c1_50, %c0_51] : memref<1x10x16x128xbf16, #tpu.memory_space<vmem>>, vector<1x8x8x128xbf16>
    %53 = vector.shape_cast %52 : vector<1x8x8x128xbf16> to vector<64x128xbf16>
    %c128 = arith.constant 128 : index
    %c0_52 = arith.constant 0 : index
    %54 = vector.load %arg5[%c128, %c0_52] : memref<1152x256xbf16, #tpu.memory_space<vmem>>, vector<128x256xbf16>
    %cst_53 = arith.constant dense<0.000000e+00> : vector<64x256xf32>
    %55 = tpu.matmul %53, %54, %cst_53 {dimension_numbers = #tpu.dot_dimension_numbers<[1], [0], [0], [1], [0, 0, 1, 1], [], []>} : vector<64x128xbf16>, vector<128x256xbf16>, vector<64x256xf32> -> vector<64x256xf32>
    %56 = arith.addf %51, %55 : vector<64x256xf32>
    %c0_54 = arith.constant 0 : index
    %c0_55 = arith.constant 0 : index
    %c2 = arith.constant 2 : index
    %c0_56 = arith.constant 0 : index
    %57 = vector.load %arg15[%c0_54, %c0_55, %c2, %c0_56] : memref<1x10x16x128xbf16, #tpu.memory_space<vmem>>, vector<1x8x8x128xbf16>
    %58 = vector.shape_cast %57 : vector<1x8x8x128xbf16> to vector<64x128xbf16>
    %c256 = arith.constant 256 : index
    %c0_57 = arith.constant 0 : index
    %59 = vector.load %arg5[%c256, %c0_57] : memref<1152x256xbf16, #tpu.memory_space<vmem>>, vector<128x256xbf16>
    %cst_58 = arith.constant dense<0.000000e+00> : vector<64x256xf32>
    %60 = tpu.matmul %58, %59, %cst_58 {dimension_numbers = #tpu.dot_dimension_numbers<[1], [0], [0], [1], [0, 0, 1, 1], [], []>} : vector<64x128xbf16>, vector<128x256xbf16>, vector<64x256xf32> -> vector<64x256xf32>
    %61 = arith.addf %56, %60 : vector<64x256xf32>
    %c0_59 = arith.constant 0 : index
    %c1_60 = arith.constant 1 : index
    %c0_61 = arith.constant 0 : index
    %c0_62 = arith.constant 0 : index
    %62 = vector.load %arg15[%c0_59, %c1_60, %c0_61, %c0_62] : memref<1x10x16x128xbf16, #tpu.memory_space<vmem>>, vector<1x8x8x128xbf16>
    %63 = vector.shape_cast %62 : vector<1x8x8x128xbf16> to vector<64x128xbf16>
    %c384 = arith.constant 384 : index
    %c0_63 = arith.constant 0 : index
    %64 = vector.load %arg5[%c384, %c0_63] : memref<1152x256xbf16, #tpu.memory_space<vmem>>, vector<128x256xbf16>
    %cst_64 = arith.constant dense<0.000000e+00> : vector<64x256xf32>
    %65 = tpu.matmul %63, %64, %cst_64 {dimension_numbers = #tpu.dot_dimension_numbers<[1], [0], [0], [1], [0, 0, 1, 1], [], []>} : vector<64x128xbf16>, vector<128x256xbf16>, vector<64x256xf32> -> vector<64x256xf32>
    %66 = arith.addf %61, %65 : vector<64x256xf32>
    %c0_65 = arith.constant 0 : index
    %c1_66 = arith.constant 1 : index
    %c1_67 = arith.constant 1 : index
    %c0_68 = arith.constant 0 : index
    %67 = vector.load %arg15[%c0_65, %c1_66, %c1_67, %c0_68] : memref<1x10x16x128xbf16, #tpu.memory_space<vmem>>, vector<1x8x8x128xbf16>
    %68 = vector.shape_cast %67 : vector<1x8x8x128xbf16> to vector<64x128xbf16>
    %c512 = arith.constant 512 : index
    %c0_69 = arith.constant 0 : index
    %69 = vector.load %arg5[%c512, %c0_69] : memref<1152x256xbf16, #tpu.memory_space<vmem>>, vector<128x256xbf16>
    %cst_70 = arith.constant dense<0.000000e+00> : vector<64x256xf32>
    %70 = tpu.matmul %68, %69, %cst_70 {dimension_numbers = #tpu.dot_dimension_numbers<[1], [0], [0], [1], [0, 0, 1, 1], [], []>} : vector<64x128xbf16>, vector<128x256xbf16>, vector<64x256xf32> -> vector<64x256xf32>
    %71 = arith.addf %66, %70 : vector<64x256xf32>
    %c0_71 = arith.constant 0 : index
    %c1_72 = arith.constant 1 : index
    %c2_73 = arith.constant 2 : index
    %c0_74 = arith.constant 0 : index
    %72 = vector.load %arg15[%c0_71, %c1_72, %c2_73, %c0_74] : memref<1x10x16x128xbf16, #tpu.memory_space<vmem>>, vector<1x8x8x128xbf16>
    %73 = vector.shape_cast %72 : vector<1x8x8x128xbf16> to vector<64x128xbf16>
    %c640 = arith.constant 640 : index
    %c0_75 = arith.constant 0 : index
    %74 = vector.load %arg5[%c640, %c0_75] : memref<1152x256xbf16, #tpu.memory_space<vmem>>, vector<128x256xbf16>
    %cst_76 = arith.constant dense<0.000000e+00> : vector<64x256xf32>
    %75 = tpu.matmul %73, %74, %cst_76 {dimension_numbers = #tpu.dot_dimension_numbers<[1], [0], [0], [1], [0, 0, 1, 1], [], []>} : vector<64x128xbf16>, vector<128x256xbf16>, vector<64x256xf32> -> vector<64x256xf32>
    %76 = arith.addf %71, %75 : vector<64x256xf32>
    %c0_77 = arith.constant 0 : index
    %c2_78 = arith.constant 2 : index
    %c0_79 = arith.constant 0 : index
    %c0_80 = arith.constant 0 : index
    %77 = vector.load %arg15[%c0_77, %c2_78, %c0_79, %c0_80] : memref<1x10x16x128xbf16, #tpu.memory_space<vmem>>, vector<1x8x8x128xbf16>
    %78 = vector.shape_cast %77 : vector<1x8x8x128xbf16> to vector<64x128xbf16>
    %c768 = arith.constant 768 : index
    %c0_81 = arith.constant 0 : index
    %79 = vector.load %arg5[%c768, %c0_81] : memref<1152x256xbf16, #tpu.memory_space<vmem>>, vector<128x256xbf16>
    %cst_82 = arith.constant dense<0.000000e+00> : vector<64x256xf32>
    %80 = tpu.matmul %78, %79, %cst_82 {dimension_numbers = #tpu.dot_dimension_numbers<[1], [0], [0], [1], [0, 0, 1, 1], [], []>} : vector<64x128xbf16>, vector<128x256xbf16>, vector<64x256xf32> -> vector<64x256xf32>
    %81 = arith.addf %76, %80 : vector<64x256xf32>
    %c0_83 = arith.constant 0 : index
    %c2_84 = arith.constant 2 : index
    %c1_85 = arith.constant 1 : index
    %c0_86 = arith.constant 0 : index
    %82 = vector.load %arg15[%c0_83, %c2_84, %c1_85, %c0_86] : memref<1x10x16x128xbf16, #tpu.memory_space<vmem>>, vector<1x8x8x128xbf16>
    %83 = vector.shape_cast %82 : vector<1x8x8x128xbf16> to vector<64x128xbf16>
    %c896 = arith.constant 896 : index
    %c0_87 = arith.constant 0 : index
    %84 = vector.load %arg5[%c896, %c0_87] : memref<1152x256xbf16, #tpu.memory_space<vmem>>, vector<128x256xbf16>
    %cst_88 = arith.constant dense<0.000000e+00> : vector<64x256xf32>
    %85 = tpu.matmul %83, %84, %cst_88 {dimension_numbers = #tpu.dot_dimension_numbers<[1], [0], [0], [1], [0, 0, 1, 1], [], []>} : vector<64x128xbf16>, vector<128x256xbf16>, vector<64x256xf32> -> vector<64x256xf32>
    %86 = arith.addf %81, %85 : vector<64x256xf32>
    %c0_89 = arith.constant 0 : index
    %c2_90 = arith.constant 2 : index
    %c2_91 = arith.constant 2 : index
    %c0_92 = arith.constant 0 : index
    %87 = vector.load %arg15[%c0_89, %c2_90, %c2_91, %c0_92] : memref<1x10x16x128xbf16, #tpu.memory_space<vmem>>, vector<1x8x8x128xbf16>
    %88 = vector.shape_cast %87 : vector<1x8x8x128xbf16> to vector<64x128xbf16>
    %c1024 = arith.constant 1024 : index
    %c0_93 = arith.constant 0 : index
    %89 = vector.load %arg5[%c1024, %c0_93] : memref<1152x256xbf16, #tpu.memory_space<vmem>>, vector<128x256xbf16>
    %cst_94 = arith.constant dense<0.000000e+00> : vector<64x256xf32>
    %90 = tpu.matmul %88, %89, %cst_94 {dimension_numbers = #tpu.dot_dimension_numbers<[1], [0], [0], [1], [0, 0, 1, 1], [], []>} : vector<64x128xbf16>, vector<128x256xbf16>, vector<64x256xf32> -> vector<64x256xf32>
    %91 = arith.addf %86, %90 : vector<64x256xf32>
    %c0_95 = arith.constant 0 : index
    %c0_96 = arith.constant 0 : index
    %92 = vector.load %arg6[%c0_95, %c0_96] : memref<1x256xf32, #tpu.memory_space<vmem>>, vector<1x256xf32>
    %93 = vector.broadcast %92 : vector<1x256xf32> to vector<64x256xf32>
    %94 = arith.addf %91, %93 : vector<64x256xf32>
    %c0_97 = arith.constant 0 : index
    %c0_98 = arith.constant 0 : index
    %c0_99 = arith.constant 0 : index
    %c0_100 = arith.constant 0 : index
    %95 = vector.load %arg16[%c0_97, %c0_98, %c0_99, %c0_100] : memref<1x10x16x256xbf16, #tpu.memory_space<vmem>>, vector<1x1x16x256xbf16>
    tpu.vector_store %arg16[%c0_97, %c0_98, %c0_99, %c0_100], %4 {strides = array<i32>} : memref<1x10x16x256xbf16, #tpu.memory_space<vmem>>, vector<1x1x16x256xbf16>,
    %c0_101 = arith.constant 0 : index
    %c9_102 = arith.constant 9 : index
    %c0_103 = arith.constant 0 : index
    %c0_104 = arith.constant 0 : index
    %96 = vector.load %arg16[%c0_101, %c9_102, %c0_103, %c0_104] : memref<1x10x16x256xbf16, #tpu.memory_space<vmem>>, vector<1x1x16x256xbf16>
    tpu.vector_store %arg16[%c0_101, %c9_102, %c0_103, %c0_104], %4 {strides = array<i32>} : memref<1x10x16x256xbf16, #tpu.memory_space<vmem>>, vector<1x1x16x256xbf16>,
    %c0_105 = arith.constant 0 : index
    %c0_106 = arith.constant 0 : index
    %c0_107 = arith.constant 0 : index
    %c0_108 = arith.constant 0 : index
    %97 = vector.load %arg16[%c0_105, %c0_106, %c0_107, %c0_108] : memref<1x10x16x256xbf16, #tpu.memory_space<vmem>>, vector<1x10x1x256xbf16>
    tpu.vector_store %arg16[%c0_105, %c0_106, %c0_107, %c0_108], %5 {strides = array<i32>} : memref<1x10x16x256xbf16, #tpu.memory_space<vmem>>, vector<1x10x1x256xbf16>,
    %c0_109 = arith.constant 0 : index
    %c0_110 = arith.constant 0 : index
    %c9_111 = arith.constant 9 : index
    %c0_112 = arith.constant 0 : index
    %98 = vector.load %arg16[%c0_109, %c0_110, %c9_111, %c0_112] : memref<1x10x16x256xbf16, #tpu.memory_space<vmem>>, vector<1x10x1x256xbf16>
    tpu.vector_store %arg16[%c0_109, %c0_110, %c9_111, %c0_112], %5 {strides = array<i32>} : memref<1x10x16x256xbf16, #tpu.memory_space<vmem>>, vector<1x10x1x256xbf16>,
    %99 = vector.shape_cast %94 : vector<64x256xf32> to vector<1x64x256xf32>
    %cst_113 = arith.constant dense<0.000000e+00> : vector<1x256xf32>
    %100 = vector.multi_reduction <add>, %99, %cst_113 [1] : vector<1x64x256xf32> to vector<1x256xf32>
    %cst_114 = arith.constant 6.400000e+01 : f32
    %101 = vector.broadcast %cst_114 : f32 to vector<1x256xf32>
    %102 = arith.divf %100, %101 : vector<1x256xf32>
    %103 = arith.mulf %99, %99 : vector<1x64x256xf32>
    %cst_115 = arith.constant dense<0.000000e+00> : vector<1x256xf32>
    %104 = vector.multi_reduction <add>, %103, %cst_115 [1] : vector<1x64x256xf32> to vector<1x256xf32>
    %cst_116 = arith.constant 6.400000e+01 : f32
    %105 = vector.broadcast %cst_116 : f32 to vector<1x256xf32>
    %106 = arith.divf %104, %105 : vector<1x256xf32>
    %c0_117 = arith.constant 0 : index
    %c0_118 = arith.constant 0 : index
    %107 = vector.load %arg9[%c0_117, %c0_118] : memref<256x256xf32, #tpu.memory_space<vmem>>, vector<256x256xf32>
    %cst_119 = arith.constant dense<0.000000e+00> : vector<1x256xf32>
    %108 = tpu.matmul %102, %107, %cst_119 {dimension_numbers = #tpu.dot_dimension_numbers<[1], [0], [0], [1], [0, 0, 1, 1], [], []>, precision = #tpu.contract_precision<fp32>} : vector<1x256xf32>, vector<256x256xf32>, vector<1x256xf32> -> vector<1x256xf32>
    %c0_120 = arith.constant 0 : index
    %c0_121 = arith.constant 0 : index
    %109 = vector.load %arg9[%c0_120, %c0_121] : memref<256x256xf32, #tpu.memory_space<vmem>>, vector<256x256xf32>
    %cst_122 = arith.constant dense<0.000000e+00> : vector<1x256xf32>
    %110 = tpu.matmul %106, %109, %cst_122 {dimension_numbers = #tpu.dot_dimension_numbers<[1], [0], [0], [1], [0, 0, 1, 1], [], []>, precision = #tpu.contract_precision<fp32>} : vector<1x256xf32>, vector<256x256xf32>, vector<1x256xf32> -> vector<1x256xf32>
    %111 = arith.mulf %108, %108 : vector<1x256xf32>
    %112 = arith.subf %110, %111 : vector<1x256xf32>
    %cst_123 = arith.constant 0.000000e+00 : f32
    %113 = vector.broadcast %cst_123 : f32 to vector<1x256xf32>
    %114 = arith.maximumf %112, %113 : vector<1x256xf32>
    %cst_124 = arith.constant 9.99999997E-7 : f32
    %115 = vector.broadcast %cst_124 : f32 to vector<1x256xf32>
    %116 = arith.addf %114, %115 : vector<1x256xf32>
    %117 = math.rsqrt %116 : vector<1x256xf32>
    %c0_125 = arith.constant 0 : index
    %c0_126 = arith.constant 0 : index
    %118 = vector.load %arg7[%c0_125, %c0_126] : memref<1x256xf32, #tpu.memory_space<vmem>>, vector<1x256xf32>
    %119 = arith.mulf %117, %118 : vector<1x256xf32>
    %c0_127 = arith.constant 0 : index
    %c0_128 = arith.constant 0 : index
    %120 = vector.load %arg8[%c0_127, %c0_128] : memref<1x256xf32, #tpu.memory_space<vmem>>, vector<1x256xf32>
    %121 = arith.mulf %108, %119 : vector<1x256xf32>
    %122 = arith.subf %120, %121 : vector<1x256xf32>
    %123 = vector.shape_cast %94 : vector<64x256xf32> to vector<1x64x256xf32>
    %124 = vector.shape_cast %119 : vector<1x256xf32> to vector<1x1x256xf32>
    %125 = vector.broadcast %124 : vector<1x1x256xf32> to vector<1x64x256xf32>
    %126 = arith.mulf %123, %125 : vector<1x64x256xf32>
    %127 = vector.shape_cast %122 : vector<1x256xf32> to vector<1x1x256xf32>
    %128 = vector.broadcast %127 : vector<1x1x256xf32> to vector<1x64x256xf32>
    %129 = arith.addf %126, %128 : vector<1x64x256xf32>
    %130 = arith.negf %129 : vector<1x64x256xf32>
    %131 = math.exp %130 : vector<1x64x256xf32>
    %cst_129 = arith.constant 1.000000e+00 : f32
    %132 = vector.broadcast %cst_129 : f32 to vector<1x64x256xf32>
    %133 = arith.addf %132, %131 : vector<1x64x256xf32>
    %134 = arith.divf %132, %133 : vector<1x64x256xf32>
    %135 = arith.mulf %129, %134 : vector<1x64x256xf32>
    %136 = arith.truncf %135 : vector<1x64x256xf32> to vector<1x64x256xbf16>
    %137 = vector.shape_cast %136 : vector<1x64x256xbf16> to vector<1x8x8x256xbf16>
    %c0_130 = arith.constant 0 : index
    %c1_131 = arith.constant 1 : index
    %c1_132 = arith.constant 1 : index
    %c0_133 = arith.constant 0 : index
    %138 = vector.load %arg16[%c0_130, %c1_131, %c1_132, %c0_133] : memref<1x10x16x256xbf16, #tpu.memory_space<vmem>>, vector<1x8x8x256xbf16>
    tpu.vector_store %arg16[%c0_130, %c1_131, %c1_132, %c0_133], %137 {strides = array<i32>} : memref<1x10x16x256xbf16, #tpu.memory_space<vmem>>, vector<1x8x8x256xbf16>,
    %c0_134 = arith.constant 0 : index
    %c0_135 = arith.constant 0 : index
    %c0_136 = arith.constant 0 : index
    %c0_137 = arith.constant 0 : index
    %139 = vector.load %arg16[%c0_134, %c0_135, %c0_136, %c0_137] : memref<1x10x16x256xbf16, #tpu.memory_space<vmem>>, vector<1x8x8x256xbf16>
    %140 = vector.shape_cast %139 : vector<1x8x8x256xbf16> to vector<64x256xbf16>
    %c0_138 = arith.constant 0 : index
    %c0_139 = arith.constant 0 : index
    %141 = vector.load %arg10[%c0_138, %c0_139] : memref<2304x256xbf16, #tpu.memory_space<vmem>>, vector<256x256xbf16>
    %cst_140 = arith.constant dense<0.000000e+00> : vector<64x256xf32>
    %142 = tpu.matmul %140, %141, %cst_140 {dimension_numbers = #tpu.dot_dimension_numbers<[1], [0], [0], [1], [0, 0, 1, 1], [], []>} : vector<64x256xbf16>, vector<256x256xbf16>, vector<64x256xf32> -> vector<64x256xf32>
    %c0_141 = arith.constant 0 : index
    %c0_142 = arith.constant 0 : index
    %c1_143 = arith.constant 1 : index
    %c0_144 = arith.constant 0 : index
    %143 = vector.load %arg16[%c0_141, %c0_142, %c1_143, %c0_144] : memref<1x10x16x256xbf16, #tpu.memory_space<vmem>>, vector<1x8x8x256xbf16>
    %144 = vector.shape_cast %143 : vector<1x8x8x256xbf16> to vector<64x256xbf16>
    %c256_145 = arith.constant 256 : index
    %c0_146 = arith.constant 0 : index
    %145 = vector.load %arg10[%c256_145, %c0_146] : memref<2304x256xbf16, #tpu.memory_space<vmem>>, vector<256x256xbf16>
    %cst_147 = arith.constant dense<0.000000e+00> : vector<64x256xf32>
    %146 = tpu.matmul %144, %145, %cst_147 {dimension_numbers = #tpu.dot_dimension_numbers<[1], [0], [0], [1], [0, 0, 1, 1], [], []>} : vector<64x256xbf16>, vector<256x256xbf16>, vector<64x256xf32> -> vector<64x256xf32>
    %147 = arith.addf %142, %146 : vector<64x256xf32>
    %c0_148 = arith.constant 0 : index
    %c0_149 = arith.constant 0 : index
    %c2_150 = arith.constant 2 : index
    %c0_151 = arith.constant 0 : index
    %148 = vector.load %arg16[%c0_148, %c0_149, %c2_150, %c0_151] : memref<1x10x16x256xbf16, #tpu.memory_space<vmem>>, vector<1x8x8x256xbf16>
    %149 = vector.shape_cast %148 : vector<1x8x8x256xbf16> to vector<64x256xbf16>
    %c512_152 = arith.constant 512 : index
    %c0_153 = arith.constant 0 : index
    %150 = vector.load %arg10[%c512_152, %c0_153] : memref<2304x256xbf16, #tpu.memory_space<vmem>>, vector<256x256xbf16>
    %cst_154 = arith.constant dense<0.000000e+00> : vector<64x256xf32>
    %151 = tpu.matmul %149, %150, %cst_154 {dimension_numbers = #tpu.dot_dimension_numbers<[1], [0], [0], [1], [0, 0, 1, 1], [], []>} : vector<64x256xbf16>, vector<256x256xbf16>, vector<64x256xf32> -> vector<64x256xf32>
    %152 = arith.addf %147, %151 : vector<64x256xf32>
    %c0_155 = arith.constant 0 : index
    %c1_156 = arith.constant 1 : index
    %c0_157 = arith.constant 0 : index
    %c0_158 = arith.constant 0 : index
    %153 = vector.load %arg16[%c0_155, %c1_156, %c0_157, %c0_158] : memref<1x10x16x256xbf16, #tpu.memory_space<vmem>>, vector<1x8x8x256xbf16>
    %154 = vector.shape_cast %153 : vector<1x8x8x256xbf16> to vector<64x256xbf16>
    %c768_159 = arith.constant 768 : index
    %c0_160 = arith.constant 0 : index
    %155 = vector.load %arg10[%c768_159, %c0_160] : memref<2304x256xbf16, #tpu.memory_space<vmem>>, vector<256x256xbf16>
    %cst_161 = arith.constant dense<0.000000e+00> : vector<64x256xf32>
    %156 = tpu.matmul %154, %155, %cst_161 {dimension_numbers = #tpu.dot_dimension_numbers<[1], [0], [0], [1], [0, 0, 1, 1], [], []>} : vector<64x256xbf16>, vector<256x256xbf16>, vector<64x256xf32> -> vector<64x256xf32>
    %157 = arith.addf %152, %156 : vector<64x256xf32>
    %c0_162 = arith.constant 0 : index
    %c1_163 = arith.constant 1 : index
    %c1_164 = arith.constant 1 : index
    %c0_165 = arith.constant 0 : index
    %158 = vector.load %arg16[%c0_162, %c1_163, %c1_164, %c0_165] : memref<1x10x16x256xbf16, #tpu.memory_space<vmem>>, vector<1x8x8x256xbf16>
    %159 = vector.shape_cast %158 : vector<1x8x8x256xbf16> to vector<64x256xbf16>
    %c1024_166 = arith.constant 1024 : index
    %c0_167 = arith.constant 0 : index
    %160 = vector.load %arg10[%c1024_166, %c0_167] : memref<2304x256xbf16, #tpu.memory_space<vmem>>, vector<256x256xbf16>
    %cst_168 = arith.constant dense<0.000000e+00> : vector<64x256xf32>
    %161 = tpu.matmul %159, %160, %cst_168 {dimension_numbers = #tpu.dot_dimension_numbers<[1], [0], [0], [1], [0, 0, 1, 1], [], []>} : vector<64x256xbf16>, vector<256x256xbf16>, vector<64x256xf32> -> vector<64x256xf32>
    %162 = arith.addf %157, %161 : vector<64x256xf32>
    %c0_169 = arith.constant 0 : index
    %c1_170 = arith.constant 1 : index
    %c2_171 = arith.constant 2 : index
    %c0_172 = arith.constant 0 : index
    %163 = vector.load %arg16[%c0_169, %c1_170, %c2_171, %c0_172] : memref<1x10x16x256xbf16, #tpu.memory_space<vmem>>, vector<1x8x8x256xbf16>
    %164 = vector.shape_cast %163 : vector<1x8x8x256xbf16> to vector<64x256xbf16>
    %c1280 = arith.constant 1280 : index
    %c0_173 = arith.constant 0 : index
    %165 = vector.load %arg10[%c1280, %c0_173] : memref<2304x256xbf16, #tpu.memory_space<vmem>>, vector<256x256xbf16>
    %cst_174 = arith.constant dense<0.000000e+00> : vector<64x256xf32>
    %166 = tpu.matmul %164, %165, %cst_174 {dimension_numbers = #tpu.dot_dimension_numbers<[1], [0], [0], [1], [0, 0, 1, 1], [], []>} : vector<64x256xbf16>, vector<256x256xbf16>, vector<64x256xf32> -> vector<64x256xf32>
    %167 = arith.addf %162, %166 : vector<64x256xf32>
    %c0_175 = arith.constant 0 : index
    %c2_176 = arith.constant 2 : index
    %c0_177 = arith.constant 0 : index
    %c0_178 = arith.constant 0 : index
    %168 = vector.load %arg16[%c0_175, %c2_176, %c0_177, %c0_178] : memref<1x10x16x256xbf16, #tpu.memory_space<vmem>>, vector<1x8x8x256xbf16>
    %169 = vector.shape_cast %168 : vector<1x8x8x256xbf16> to vector<64x256xbf16>
    %c1536 = arith.constant 1536 : index
    %c0_179 = arith.constant 0 : index
    %170 = vector.load %arg10[%c1536, %c0_179] : memref<2304x256xbf16, #tpu.memory_space<vmem>>, vector<256x256xbf16>
    %cst_180 = arith.constant dense<0.000000e+00> : vector<64x256xf32>
    %171 = tpu.matmul %169, %170, %cst_180 {dimension_numbers = #tpu.dot_dimension_numbers<[1], [0], [0], [1], [0, 0, 1, 1], [], []>} : vector<64x256xbf16>, vector<256x256xbf16>, vector<64x256xf32> -> vector<64x256xf32>
    %172 = arith.addf %167, %171 : vector<64x256xf32>
    %c0_181 = arith.constant 0 : index
    %c2_182 = arith.constant 2 : index
    %c1_183 = arith.constant 1 : index
    %c0_184 = arith.constant 0 : index
    %173 = vector.load %arg16[%c0_181, %c2_182, %c1_183, %c0_184] : memref<1x10x16x256xbf16, #tpu.memory_space<vmem>>, vector<1x8x8x256xbf16>
    %174 = vector.shape_cast %173 : vector<1x8x8x256xbf16> to vector<64x256xbf16>
    %c1792 = arith.constant 1792 : index
    %c0_185 = arith.constant 0 : index
    %175 = vector.load %arg10[%c1792, %c0_185] : memref<2304x256xbf16, #tpu.memory_space<vmem>>, vector<256x256xbf16>
    %cst_186 = arith.constant dense<0.000000e+00> : vector<64x256xf32>
    %176 = tpu.matmul %174, %175, %cst_186 {dimension_numbers = #tpu.dot_dimension_numbers<[1], [0], [0], [1], [0, 0, 1, 1], [], []>} : vector<64x256xbf16>, vector<256x256xbf16>, vector<64x256xf32> -> vector<64x256xf32>
    %177 = arith.addf %172, %176 : vector<64x256xf32>
    %c0_187 = arith.constant 0 : index
    %c2_188 = arith.constant 2 : index
    %c2_189 = arith.constant 2 : index
    %c0_190 = arith.constant 0 : index
    %178 = vector.load %arg16[%c0_187, %c2_188, %c2_189, %c0_190] : memref<1x10x16x256xbf16, #tpu.memory_space<vmem>>, vector<1x8x8x256xbf16>
    %179 = vector.shape_cast %178 : vector<1x8x8x256xbf16> to vector<64x256xbf16>
    %c2048 = arith.constant 2048 : index
    %c0_191 = arith.constant 0 : index
    %180 = vector.load %arg10[%c2048, %c0_191] : memref<2304x256xbf16, #tpu.memory_space<vmem>>, vector<256x256xbf16>
    %cst_192 = arith.constant dense<0.000000e+00> : vector<64x256xf32>
    %181 = tpu.matmul %179, %180, %cst_192 {dimension_numbers = #tpu.dot_dimension_numbers<[1], [0], [0], [1], [0, 0, 1, 1], [], []>} : vector<64x256xbf16>, vector<256x256xbf16>, vector<64x256xf32> -> vector<64x256xf32>
    %182 = arith.addf %177, %181 : vector<64x256xf32>
    %c0_193 = arith.constant 0 : index
    %c0_194 = arith.constant 0 : index
    %183 = vector.load %arg11[%c0_193, %c0_194] : memref<1x256xf32, #tpu.memory_space<vmem>>, vector<1x256xf32>
    %184 = vector.broadcast %183 : vector<1x256xf32> to vector<64x256xf32>
    %185 = arith.addf %182, %184 : vector<64x256xf32>
    %186 = vector.shape_cast %1 : vector<1x64x128xf32> to vector<64x128xf32>
    %187 = arith.truncf %186 : vector<64x128xf32> to vector<64x128xbf16>
    %c0_195 = arith.constant 0 : index
    %c0_196 = arith.constant 0 : index
    %188 = vector.load %arg12[%c0_195, %c0_196] : memref<128x256xbf16, #tpu.memory_space<vmem>>, vector<128x256xbf16>
    %cst_197 = arith.constant dense<0.000000e+00> : vector<64x256xf32>
    %189 = tpu.matmul %187, %188, %cst_197 {dimension_numbers = #tpu.dot_dimension_numbers<[1], [0], [0], [1], [0, 0, 1, 1], [], []>} : vector<64x128xbf16>, vector<128x256xbf16>, vector<64x256xf32> -> vector<64x256xf32>
    %c0_198 = arith.constant 0 : index
    %c0_199 = arith.constant 0 : index
    %190 = vector.load %arg13[%c0_198, %c0_199] : memref<1x256xf32, #tpu.memory_space<vmem>>, vector<1x256xf32>
    %191 = vector.broadcast %190 : vector<1x256xf32> to vector<64x256xf32>
    %192 = arith.addf %189, %191 : vector<64x256xf32>
    %193 = arith.addf %192, %185 : vector<64x256xf32>
    %194 = vector.shape_cast %193 : vector<64x256xf32> to vector<1x8x8x256xf32>
    %195 = arith.truncf %194 : vector<1x8x8x256xf32> to vector<1x8x8x256xbf16>
    %c0_200 = arith.constant 0 : index
    %c0_201 = arith.constant 0 : index
    %c0_202 = arith.constant 0 : index
    %c0_203 = arith.constant 0 : index
    %196 = vector.load %arg14[%c0_200, %c0_201, %c0_202, %c0_203] : memref<1x8x8x256xbf16, #tpu.memory_space<vmem>>, vector<1x8x8x256xbf16>
    tpu.vector_store %arg14[%c0_200, %c0_201, %c0_202, %c0_203], %195 {strides = array<i32>} : memref<1x8x8x256xbf16, #tpu.memory_space<vmem>>, vector<1x8x8x256xbf16>,
    return
  }
  func.func @transform_0(%arg0: i32) -> (i32, i32, i32, i32) {
    %c0_i32 = arith.constant 0 : i32
    %c0_i32_0 = arith.constant 0 : i32
    %c0_i32_1 = arith.constant 0 : i32
    %c0_i32_2 = arith.constant 0 : i32
    return %arg0, %c0_i32, %c0_i32_0, %c0_i32_1 : i32, i32, i32, i32
  }
  func.func @transform_1(%arg0: i32) -> (i32, i32) {
    %c0_i32 = arith.constant 0 : i32
    %c0_i32_0 = arith.constant 0 : i32
    %c0_i32_1 = arith.constant 0 : i32
    return %c0_i32, %c0_i32_0 : i32, i32
  }
  func.func @transform_2(%arg0: i32) -> (i32, i32) {
    %c0_i32 = arith.constant 0 : i32
    %c0_i32_0 = arith.constant 0 : i32
    %c0_i32_1 = arith.constant 0 : i32
    return %c0_i32, %c0_i32_0 : i32, i32
  }
  func.func @transform_3(%arg0: i32) -> (i32, i32) {
    %c0_i32 = arith.constant 0 : i32
    %c0_i32_0 = arith.constant 0 : i32
    %c0_i32_1 = arith.constant 0 : i32
    return %c0_i32, %c0_i32_0 : i32, i32
  }
  func.func @transform_4(%arg0: i32) -> (i32, i32) {
    %c0_i32 = arith.constant 0 : i32
    %c0_i32_0 = arith.constant 0 : i32
    %c0_i32_1 = arith.constant 0 : i32
    return %c0_i32, %c0_i32_0 : i32, i32
  }
  func.func @transform_5(%arg0: i32) -> (i32, i32) {
    %c0_i32 = arith.constant 0 : i32
    %c0_i32_0 = arith.constant 0 : i32
    %c0_i32_1 = arith.constant 0 : i32
    return %c0_i32, %c0_i32_0 : i32, i32
  }
  func.func @transform_6(%arg0: i32) -> (i32, i32) {
    %c0_i32 = arith.constant 0 : i32
    %c0_i32_0 = arith.constant 0 : i32
    %c0_i32_1 = arith.constant 0 : i32
    return %c0_i32, %c0_i32_0 : i32, i32
  }
  func.func @transform_7(%arg0: i32) -> (i32, i32) {
    %c0_i32 = arith.constant 0 : i32
    %c0_i32_0 = arith.constant 0 : i32
    %c0_i32_1 = arith.constant 0 : i32
    return %c0_i32, %c0_i32_0 : i32, i32
  }
  func.func @transform_8(%arg0: i32) -> (i32, i32) {
    %c0_i32 = arith.constant 0 : i32
    %c0_i32_0 = arith.constant 0 : i32
    %c0_i32_1 = arith.constant 0 : i32
    return %c0_i32, %c0_i32_0 : i32, i32
  }
  func.func @transform_9(%arg0: i32) -> (i32, i32) {
    %c0_i32 = arith.constant 0 : i32
    %c0_i32_0 = arith.constant 0 : i32
    %c0_i32_1 = arith.constant 0 : i32
    return %c0_i32, %c0_i32_0 : i32, i32
  }
  func.func @transform_10(%arg0: i32) -> (i32, i32) {
    %c0_i32 = arith.constant 0 : i32
    %c0_i32_0 = arith.constant 0 : i32
    %c0_i32_1 = arith.constant 0 : i32
    return %c0_i32, %c0_i32_0 : i32, i32
  }
  func.func @transform_11(%arg0: i32) -> (i32, i32) {
    %c0_i32 = arith.constant 0 : i32
    %c0_i32_0 = arith.constant 0 : i32
    %c0_i32_1 = arith.constant 0 : i32
    return %c0_i32, %c0_i32_0 : i32, i32
  }
  func.func @transform_12(%arg0: i32) -> (i32, i32) {
    %c0_i32 = arith.constant 0 : i32
    %c0_i32_0 = arith.constant 0 : i32
    %c0_i32_1 = arith.constant 0 : i32
    return %c0_i32, %c0_i32_0 : i32, i32
  }
  func.func @transform_13(%arg0: i32) -> (i32, i32, i32, i32) {
    %c0_i32 = arith.constant 0 : i32
    %c0_i32_0 = arith.constant 0 : i32
    %c0_i32_1 = arith.constant 0 : i32
    %c0_i32_2 = arith.constant 0 : i32
    return %arg0, %c0_i32, %c0_i32_0, %c0_i32_1 : i32, i32, i32, i32
  }
}

</mosaic_0001>

<bundles_post_ra>
// kernel: tpu_custom_call.1
= control target key start
LH: loop header
LB: loop body
LE: loop exit
PB: predicated region body
PF: predicated region fallthrough
CT: control target
= control target key end

     0   :  { %6 = vsyncpa [#allocation3], 0  ;;  %s341_s0 = inlined_call_operand.hbm [shape: f32[8,128], index: 0, kind: input, shape index: {}]   ;;  %s342_s1 = inlined_call_operand.hbm [shape: f32[8,128], index: 1, kind: output, shape index: {}]  }
   0x1   :  { %7 = vsyncpa [#allocation4], 0  ;;  %s262_s6 = smov 0  }
   0x2 LB: > { %s145_s7 = sadd.s32 4294967295, %s248_s6   ;;  %p146_p0 = scmp.ge.s32.totalorder %s248_s6, 1  ;;  %s248_s6 = sphi %s262_s6, %s13_s6  }
   0x3   : > { %p60_p1 = scmp.lt.s32.totalorder %s248_s6, 3  ;;  %p276_p3 = scmp.eq.s32.totalorder %s145_s7, 0 }
   0x4   : > { %s250_s10 = smov [#allocation2]   ;;  %s180_s15 = scalar_lea.hbm %s341_s0, 128 }
   0x5   : > { %p270_p2 = pnand %p146_p0, %p60_p1  ;;  %s73_s11 = sshll.u32 %s250_s10, 4  ;;  %s74_s11 = int_to_ptr.vmem [resolvable:$true] %s73_s11 }
   0x6   : > { %s347_s9 = scalar_select %p276_p3, 1, 0 }
   0x7   : > { %s346_s8 = scalar_select %p270_p2, 1, 0 }
   0x8   : > { %p162_p4 = pneg %p270_p2  ;;  %p181_p6 = scmp.ne.s32.totalorder %s341_s0, %s180_s15 }
   0x9   : > { %p187_p10 = scmp.lt.u32.totalorder %s180_s15, %s341_s0 }
   0xa   : > { %p284_p5 = pnand %p276_p3, %p162_p4 }
   0xc   : > { %p182_p7 = pneg %p284_p5 }
   0xe   : > { %p183_p8 = pnand %p182_p7, %p181_p6 }
  0x10   : > { %p184_p9 = pneg %p183_p8 }
  0x12   : > { %p189_p11 = pnand %p187_p10, %p184_p9 }
  0x14   : > { %192 = shalt.err (!%p189_p11)
}
  0x15   : > { %s193_s20 = scalar_lea.vmem %s74_s11, 128  ;;  %p201_p1 = scmp.lt.s32.totalorder %s74_s11, %s74_s11 }
  0x16   : > { %p194_p12 = scmp.ne.s32.totalorder %s74_s11, %s193_s20  ;;  %p202_p4 = scmp.lt.s32.totalorder %s193_s20, %s193_s20 }
  0x18   : > { %p196_p13 = pnand %p194_p12, %p182_p7  ;;  %p203_p3 = por %p202_p4, %p201_p1 }
  0x1a   : > { %p197_p0 = pneg %p196_p13 }
  0x1c   : > { %p204_p2 = pnand %p203_p3, %p197_p0 }
  0x1e   : > { %207 = shalt.err (!%p204_p2)
}
  0x1f   : > { %165 = dma.hbm_to_vmem [thread:$0]  (!%p284_p5), %s341_s0, 128, %s74_s11, [#allocation3]  }
  0x20   : > { %p349_p6 = scmp.ne.s32.totalorder %s346_s8, 0 }
  0x21   : > { %p350_p8 = scmp.ne.s32.totalorder (!%p349_p6), %s347_s9, 0 }
  0x22   : > { %86 = sbr.rel (%p349_p6) target bundleno = 67 (0x43), region = 24 }
  0x29   : > { %239 = dma.done.wait (%p350_p8), [#allocation3], 128  }
  0x2a   : > { %241 = vsyncadd (%p350_p8), [#allocation3], 4294967168  ;;  %s251_s23 = smov [#allocation5]   ;;  %v96_v0 = vld [vmem:[#allocation2] sm:$0xff]  ;;  %p312_p2 = scmp.eq.s32.totalorder %s145_s7, 1 }
  0x2b   : > { %s106_s24 = sshll.u32 %s251_s23, 4  ;;  %v97_v1 = vadd.f32 1.0, %v96_v0  ;;  %s107_s24 = int_to_ptr.vmem [resolvable:$true] %s106_s24 }
  0x2c   : > { %s208_s26 = scalar_lea.vmem %s107_s24, 128  ;;  %p215_p9 = scmp.lt.s32.totalorder %s107_s24, %s107_s24 }
  0x2d   : > { %98 = vst [vmem:[#allocation5] sm:$0xff] %v97_v1  ;;  %p209_p3 = scmp.ne.s32.totalorder %s107_s24, %s208_s26  ;;  %p216_p10 = scmp.lt.s32.totalorder %s208_s26, %s208_s26 }
  0x2f   : > { %p210_p5 = pnand %p209_p3, %p312_p2  ;;  %p217_p11 = por %p216_p10, %p215_p9 }
  0x31   : > { %p211_p7 = pneg %p210_p5 }
  0x33   : > { %p218_p12 = pnand %p217_p11, %p211_p7 }
  0x35   : > { %221 = shalt.err (!%p218_p12)
}
  0x36   : > { %s222_s29 = scalar_lea.hbm %s342_s1, 128 }
  0x37   : > { %p223_p13 = scmp.ne.s32.totalorder %s342_s1, %s222_s29  ;;  %p228_p4 = scmp.lt.u32.totalorder %s222_s29, %s342_s1 }
  0x39   : > { %p224_p0 = pnand %p223_p13, %p312_p2 }
  0x3b   : > { %p225_p1 = pneg %p224_p0 }
  0x3d   : > { %p230_p6 = pnand %p228_p4, %p225_p1 }
  0x3f   : > { %233 = shalt.err (!%p230_p6)
}
  0x40   : > { %159 = dma.vmem_to_hbm [thread:$0]  (%p312_p2), %s107_s24, 128, %s342_s1, [#allocation4]  }
  0x41   : > { %243 = dma.done.wait (%p312_p2), [#allocation4], 128  }
  0x42   : > { %245 = vsyncadd (%p312_p2), [#allocation4], 4294967168 }
  0x43 PF: > { %s13_s6 = sadd.s32 1, %s248_s6  }
  0x44   : > { %p10_p8 = scmp.ge.s32.totalorder %s13_s6, 4  }
  0x46   :  { %12 = sbr.rel (!%p10_p8) target bundleno = 2 (0x2), region = 53 }
  0x4d   :  { %119 = vsyncpa [#allocation3], 1 }
  0x4e   :  { %121 = vsyncpa [#allocation3 + $0x1], 1 }
  0x4f   :  { %122 = vsyncpa [#allocation4], 1 }
  0x50   :  { %124 = vsyncpa [#allocation4 + $0x1], 1 }

// kernel: tpu_custom_call.1
= control target key start
LH: loop header
LB: loop body
LE: loop exit
PB: predicated region body
PF: predicated region fallthrough
CT: control target
= control target key end

     0   :  { %s20218_s0 = inlined_call_operand.hbm [shape: f32[2,8,8,128], index: 0, kind: input, shape index: {}]   ;;  %s20219_s1 = inlined_call_operand.hbm [shape: f32[1,128], index: 1, kind: input, shape index: {}]   ;;  %s20220_s2 = inlined_call_operand.hbm [shape: f32[1,128], index: 2, kind: input, shape index: {}]   ;;  %s20221_s3 = inlined_call_operand.hbm [shape: f32[128,128], index: 3, kind: input, shape index: {}]   ;;  %s20222_s4 = inlined_call_operand.hbm [shape: bf16[1152,256], index: 4, kind: input, shape index: {}]   ;;  %s20223_s5 = inlined_call_operand.hbm [shape: f32[1,256], index: 5, kind: input, shape index: {}]   ;;  %s20224_s6 = inlined_call_operand.hbm [shape: f32[1,256], index: 6, kind: input, shape index: {}]   ;;  %s20225_s7 = inlined_call_operand.hbm [shape: f32[1,256], index: 7, kind: input, shape index: {}]   ;;  %s20226_s8 = inlined_call_operand.hbm [shape: f32[256,256], index: 8, kind: input, shape index: {}]   ;;  %s20227_s9 = inlined_call_operand.hbm [shape: bf16[2304,256], index: 9, kind: input, shape index: {}]   ;;  %s20228_s10 = inlined_call_operand.hbm [shape: f32[1,256], index: 10, kind: input, shape index: {}]   ;;  %s20229_s11 = inlined_call_operand.hbm [shape: bf16[128,256], index: 11, kind: input, shape index: {}]   ;;  %s20230_s12 = inlined_call_operand.hbm [shape: f32[1,256], index: 12, kind: input, shape index: {}]   ;;  %s20231_s13 = inlined_call_operand.hbm [shape: bf16[2,8,8,256], index: 13, kind: output, shape index: {}]  }
   0x1   :  { %20534 = sst [smem:[#allocation174_spill]] %s20218_s0 }
   0x2   :  { %20535 = sst [smem:[#allocation175_spill]] %s20219_s1 }
   0x3   :  { %20536 = sst [smem:[#allocation176_spill]] %s20220_s2 }
   0x4   :  { %20537 = sst [smem:[#allocation177_spill]] %s20221_s3 }
   0x5   :  { %20538 = sst [smem:[#allocation178_spill]] %s20222_s4 }
   0x6   :  { %20539 = sst [smem:[#allocation179_spill]] %s20223_s5 }
   0x7   :  { %20540 = sst [smem:[#allocation180_spill]] %s20231_s13 }
   0x8   :  { %18 = vsyncpa [#allocation5], 0 }
   0x9   :  { %20 = vsyncpa [#allocation5 + $0x1], 0 }
   0xa   :  { %21 = vsyncpa [#allocation8], 0 }
   0xb   :  { %22 = vsyncpa [#allocation11], 0 }
   0xc   :  { %23 = vsyncpa [#allocation14], 0 }
   0xd   :  { %24 = vsyncpa [#allocation17], 0 }
   0xe   :  { %25 = vsyncpa [#allocation20], 0 }
   0xf   :  { %26 = vsyncpa [#allocation23], 0 }
  0x10   :  { %27 = vsyncpa [#allocation6], 0 }
  0x11   :  { %29 = vsyncpa [#allocation6 + $0x1], 0  ;;  %s17125_s25 = smov 0   ;;  %s17127_s26 = smov 0  }
  0x12   :  { %s17129_s27 = smov 0   ;;  %s17131_s28 = smov 0  }
  0x13 LB: > { %s17030_s29 = smov [#allocation7]   ;;  %s17146_s14 = sadd.s32 4294967295, %s17028_s28   ;;  %s17028_s28 = sphi %s17131_s28, %s21055_s28   ;;  %s17024_s27 = sphi %s17129_s27, %s21054_s27   ;;  %s17020_s26 = sphi %s17127_s26, %s21053_s26   ;;  %s17016_s25 = sphi %s17125_s25, %s21052_s25  }
  0x14   : > { %s357_s30 = sshll.u32 %s17030_s29, 4  ;;  %p12380_p0 = scmp.ge.s32.totalorder %s17028_s28, 1  ;;  %s17151_s30 = int_to_ptr.vmem [resolvable:$true] %s357_s30 }
  0x15   : > { %p20239_p1 = scmp.eq.s32.totalorder %s17146_s14, 0  ;;  %p344_p2 = scmp.lt.s32.totalorder %s17028_s28, 3 }
  0x16   : > { %s17031_s16 = smov [#allocation10]   ;;  %s17032_s19 = smov [#allocation13]  }
  0x17   : > { %p17153_p3 = pnand %p12380_p0, %p344_p2  ;;  %s378_s17 = sshll.u32 %s17031_s16, 4  ;;  %s17160_s17 = int_to_ptr.vmem [resolvable:$true] %s378_s17 }
  0x18   : > { %s405_s20 = sshll.u32 %s17032_s19, 4  ;;  %s20544_s1 = sld [smem:[#allocation175_spill]]  ;;  %s17168_s20 = int_to_ptr.vmem [resolvable:$true] %s405_s20 }
  0x19   : > { %s20541_s15 = scalar_select %p17153_p3, 1, 0 }
  0x1a   : > { %p15378_p5 = pneg %p17153_p3 }
  0x1b   : > { %20542 = sst [smem:[#allocation34_spill]] %s20541_s15 }
  0x1c   : > { %p17164_p6 = pnand %p15378_p5, %p20239_p1 }
  0x1e   : > { %s16572_s23 = scalar_lea.hbm %s20544_s1, 16  ;;  %p17178_p8 = pneg %p17164_p6 }
  0x1f   : > { %p16573_p7 = scmp.ne.s32.totalorder %s20544_s1, %s16572_s23  ;;  %p16579_p11 = scmp.lt.u32.totalorder %s16572_s23, %s20544_s1 }
  0x21   : > { %p16575_p9 = pnand %p17178_p8, %p16573_p7 }
  0x23   : > { %p16576_p10 = pneg %p16575_p9 }
  0x25   : > { %p16581_p12 = pnand %p16579_p11, %p16576_p10 }
  0x27   : > { %16584 = shalt.err (!%p16581_p12)
}
  0x28   : > { %s16585_s21 = scalar_lea.vmem %s17151_s30, 16  ;;  %s16592_s22 = scalar_lea.vmem %s17151_s30, 32 }
  0x29   : > { %p16586_p13 = scmp.ne.s32.totalorder %s17151_s30, %s16585_s21  ;;  %p16593_p5 = scmp.lt.s32.totalorder %s17151_s30, %s17151_s30 }
  0x2a   : > { %p16594_p7 = scmp.lt.s32.totalorder %s16592_s22, %s16585_s21 }
  0x2b   : > { %p16588_p0 = pnand %p16586_p13, %p17178_p8 }
  0x2c   : > { %p16595_p9 = por %p16594_p7, %p16593_p5 }
  0x2d   : > { %p16589_p2 = pneg %p16588_p0 }
  0x2f   : > { %p16596_p4 = pnand %p16595_p9, %p16589_p2 }
  0x31   : > { %16599 = shalt.err (!%p16596_p4)
}
  0x32   : > { %15381 = dma.hbm_to_vmem [thread:$0]  (!%p17164_p6), %s20544_s1, 16, %s17151_s30, [#allocation8]  }
  0x33   : > { %s20546_s3 = sld [smem:[#allocation177_spill]] }
  0x39   : > { %s16600_s19 = scalar_lea.hbm %s20546_s3, 2048 }
  0x3a   : > { %p16601_p10 = scmp.ne.s32.totalorder %s20546_s3, %s16600_s19  ;;  %p16607_p4 = scmp.lt.u32.totalorder %s16600_s19, %s20546_s3 }
  0x3c   : > { %p16603_p11 = pnand %p16601_p10, %p17178_p8 }
  0x3e   : > { %p16604_p12 = pneg %p16603_p11 }
  0x40   : > { %p16609_p13 = pnand %p16607_p4, %p16604_p12 }
  0x42   : > { %16612 = shalt.err (!%p16609_p13)
}
  0x43   : > { %s16613_s30 = scalar_lea.vmem %s17160_s17, 2048  ;;  %p16621_p7 = scmp.lt.s32.totalorder %s17160_s17, %s17160_s17 }
  0x44   : > { %p16614_p0 = scmp.ne.s32.totalorder %s17160_s17, %s16613_s30  ;;  %p16622_p9 = scmp.lt.s32.totalorder %s16613_s30, %s16613_s30 }
  0x46   : > { %p16616_p2 = pnand %p16614_p0, %p17178_p8  ;;  %p16623_p10 = por %p16622_p9, %p16621_p7 }
  0x48   : > { %p16617_p5 = pneg %p16616_p2 }
  0x4a   : > { %p16624_p11 = pnand %p16623_p10, %p16617_p5 }
  0x4c   : > { %16627 = shalt.err (!%p16624_p11)
}
  0x4d   : > { %s20235_s0 = smov 128   ;;  %s20237_s15 = smov 8  }
  0x4e   : > { %15387 = dma.hbm_to_vmem [thread:$0]  (!%p17164_p6), %s20546_s3, 2048, %s17160_s17, [#allocation11], %s20235_s0, %s20235_s0, %s20237_s15  }
  0x4f   : > { %s20547_s5 = sld [smem:[#allocation179_spill]] }
  0x55   : > { %s16628_s19 = scalar_lea.hbm %s20547_s5, 32 }
  0x56   : > { %p16629_p12 = scmp.ne.s32.totalorder %s20547_s5, %s16628_s19  ;;  %p16635_p0 = scmp.lt.u32.totalorder %s16628_s19, %s20547_s5 }
  0x58   : > { %p16631_p4 = pnand %p16629_p12, %p17178_p8 }
  0x5a   : > { %p16632_p13 = pneg %p16631_p4 }
  0x5c   : > { %p16637_p2 = pnand %p16635_p0, %p16632_p13 }
  0x5e   : > { %16640 = shalt.err (!%p16637_p2)
}
  0x5f   : > { %s16641_s17 = scalar_lea.vmem %s17168_s20, 32  ;;  %p16649_p10 = scmp.lt.s32.totalorder %s17168_s20, %s17168_s20 }
  0x60   : > { %p16642_p5 = scmp.ne.s32.totalorder %s17168_s20, %s16641_s17  ;;  %p16650_p11 = scmp.lt.s32.totalorder %s16641_s17, %s16641_s17 }
  0x62   : > { %p16644_p7 = pnand %p16642_p5, %p17178_p8  ;;  %p16651_p12 = por %p16650_p11, %p16649_p10 }
  0x64   : > { %p16645_p9 = pneg %p16644_p7 }
  0x66   : > { %p16652_p4 = pnand %p16651_p12, %p16645_p9 }
  0x68   : > { %16655 = shalt.err (!%p16652_p4)
}
  0x69   : > { %15393 = dma.hbm_to_vmem [thread:$0]  (!%p17164_p6), %s20547_s5, 32, %s17168_s20, [#allocation14]  }
  0x6a   : > { %s17035_s23 = smov [#allocation16]   ;;  %s17036_s29 = smov [#allocation19]  }
  0x6b   : > { %s427_s24 = sshll.u32 %s17035_s23, 4  ;;  %s450_s19 = sshll.u32 %s17036_s29, 4  ;;  %s428_s24 = int_to_ptr.vmem [resolvable:$true] %s427_s24  ;;  %s451_s19 = int_to_ptr.vmem [resolvable:$true] %s450_s19 }
  0x6c   : > { %s16656_s30 = scalar_lea.hbm %s20225_s7, 32 }
  0x6d   : > { %p16657_p13 = scmp.ne.s32.totalorder %s20225_s7, %s16656_s30  ;;  %p16663_p5 = scmp.lt.u32.totalorder %s16656_s30, %s20225_s7 }
  0x6f   : > { %p16659_p0 = pnand %p16657_p13, %p17178_p8 }
  0x71   : > { %p16660_p2 = pneg %p16659_p0 }
  0x73   : > { %p16665_p7 = pnand %p16663_p5, %p16660_p2 }
  0x75   : > { %16668 = shalt.err (!%p16665_p7)
}
  0x76   : > { %s16669_s20 = scalar_lea.vmem %s428_s24, 32  ;;  %p16677_p12 = scmp.lt.s32.totalorder %s428_s24, %s428_s24 }
  0x77   : > { %p16670_p9 = scmp.ne.s32.totalorder %s428_s24, %s16669_s20  ;;  %p16678_p4 = scmp.lt.s32.totalorder %s16669_s20, %s16669_s20 }
  0x79   : > { %p16672_p10 = pnand %p16670_p9, %p17178_p8  ;;  %p16679_p1 = por %p16678_p4, %p16677_p12 }
  0x7b   : > { %p16673_p11 = pneg %p16672_p10 }
  0x7d   : > { %p16680_p3 = pnand %p16679_p1, %p16673_p11 }
  0x7f   : > { %16683 = shalt.err (!%p16680_p3)
}
  0x80   : > { %15399 = dma.hbm_to_vmem [thread:$0]  (!%p17164_p6), %s20225_s7, 32, %s428_s24, [#allocation17]  }
  0x81   : > { %s16684_s29 = scalar_lea.hbm %s20227_s9, 36864 }
  0x82   : > { %p16685_p13 = scmp.ne.s32.totalorder %s20227_s9, %s16684_s29  ;;  %p16691_p3 = scmp.lt.u32.totalorder %s16684_s29, %s20227_s9 }
  0x84   : > { %p16687_p0 = pnand %p16685_p13, %p17178_p8 }
  0x86   : > { %p16688_p1 = pneg %p16687_p0 }
  0x88   : > { %p16693_p2 = pnand %p16691_p3, %p16688_p1 }
  0x8a   : > { %16696 = shalt.err (!%p16693_p2)
}
  0x8b   : > { %s16697_s1 = scalar_lea.vmem %s451_s19, 36864  ;;  %p16705_p10 = scmp.lt.s32.totalorder %s451_s19, %s451_s19 }
  0x8c   : > { %p16698_p5 = scmp.ne.s32.totalorder %s451_s19, %s16697_s1  ;;  %p16706_p11 = scmp.lt.s32.totalorder %s16697_s1, %s16697_s1 }
  0x8e   : > { %p16700_p7 = pnand %p16698_p5, %p17178_p8  ;;  %p16707_p12 = por %p16706_p11, %p16705_p10 }
  0x90   : > { %p16701_p9 = pneg %p16700_p7 }
  0x92   : > { %p16708_p4 = pnand %p16707_p12, %p16701_p9 }
  0x94   : > { %16711 = shalt.err (!%p16708_p4)
}
  0x95   : > { %s20548_s24 = smov 8   ;;  %s20549_s20 = smov 128  }
  0x96   : > { %15405 = dma.hbm_to_vmem [thread:$0]  (!%p17164_p6), %s20227_s9, 36864, %s451_s19, [#allocation20], %s20549_s20, %s20549_s20, %s20548_s24  }
  0x97   : > { %s17037_s15 = smov [#allocation22]   ;;  %s17038_s29 = smov [#allocation9]  }
  0x98   : > { %s474_s23 = sshll.u32 %s17037_s15, 4  ;;  %s368_s21 = sshll.u32 %s17038_s29, 4  ;;  %s475_s23 = int_to_ptr.vmem [resolvable:$true] %s474_s23  ;;  %s369_s21 = int_to_ptr.vmem [resolvable:$true] %s368_s21 }
  0x99   : > { %s16712_s17 = scalar_lea.hbm %s20229_s11, 2048 }
  0x9a   : > { %p16713_p13 = scmp.ne.s32.totalorder %s20229_s11, %s16712_s17  ;;  %p16719_p3 = scmp.lt.u32.totalorder %s16712_s17, %s20229_s11 }
  0x9c   : > { %p16715_p0 = pnand %p16713_p13, %p17178_p8 }
  0x9e   : > { %p16716_p1 = pneg %p16715_p0 }
  0xa0   : > { %p16721_p2 = pnand %p16719_p3, %p16716_p1 }
  0xa2   : > { %16724 = shalt.err (!%p16721_p2)
}
  0xa3   : > { %s16725_s19 = scalar_lea.vmem %s475_s23, 2048  ;;  %p16733_p10 = scmp.lt.s32.totalorder %s475_s23, %s475_s23 }
  0xa4   : > { %p16726_p5 = scmp.ne.s32.totalorder %s475_s23, %s16725_s19  ;;  %p16734_p11 = scmp.lt.s32.totalorder %s16725_s19, %s16725_s19 }
  0xa6   : > { %p16728_p7 = pnand %p16726_p5, %p17178_p8  ;;  %p16735_p12 = por %p16734_p11, %p16733_p10 }
  0xa8   : > { %p16729_p9 = pneg %p16728_p7 }
  0xaa   : > { %p16736_p4 = pnand %p16735_p12, %p16729_p9 }
  0xac   : > { %16739 = shalt.err (!%p16736_p4)
}
  0xad   : > { %15411 = dma.hbm_to_vmem [thread:$0]  (!%p17164_p6), %s20229_s11, 2048, %s475_s23, [#allocation23], %s20549_s20, %s20549_s20, %s20548_s24  }
  0xae   : > { %s20550_s2 = sld [smem:[#allocation176_spill]] }
  0xb4   : > { %s16740_s29 = scalar_lea.hbm %s20550_s2, 16 }
  0xb5   : > { %p16741_p13 = scmp.ne.s32.totalorder %s20550_s2, %s16740_s29  ;;  %p16747_p3 = scmp.lt.u32.totalorder %s16740_s29, %s20550_s2 }
  0xb7   : > { %p16743_p0 = pnand %p16741_p13, %p17178_p8 }
  0xb9   : > { %p16744_p1 = pneg %p16743_p0 }
  0xbb   : > { %p16749_p2 = pnand %p16747_p3, %p16744_p1 }
  0xbd   : > { %16752 = shalt.err (!%p16749_p2)
}
  0xbe   : > { %s16753_s0 = scalar_lea.vmem %s369_s21, 16  ;;  %s16760_s23 = scalar_lea.vmem %s369_s21, 32 }
  0xbf   : > { %p16754_p5 = scmp.ne.s32.totalorder %s369_s21, %s16753_s0  ;;  %p16761_p10 = scmp.lt.s32.totalorder %s369_s21, %s369_s21 }
  0xc0   : > { %p16762_p11 = scmp.lt.s32.totalorder %s16760_s23, %s16753_s0 }
  0xc1   : > { %p16756_p7 = pnand %p16754_p5, %p17178_p8 }
  0xc2   : > { %p16763_p12 = por %p16762_p11, %p16761_p10 }
  0xc3   : > { %p16757_p9 = pneg %p16756_p7 }
  0xc5   : > { %p16764_p4 = pnand %p16763_p12, %p16757_p9 }
  0xc7   : > { %16767 = shalt.err (!%p16764_p4)
}
  0xc8   : > { %15384 = dma.hbm_to_vmem [thread:$0]  (!%p17164_p6), %s20550_s2, 16, %s369_s21, [#allocation8]  }
  0xc9   : > { %s17039_s5 = smov [#allocation12]   ;;  %s17040_s15 = smov [#allocation15]  }
  0xca   : > { %s391_s13 = sshll.u32 %s17039_s5, 4  ;;  %s416_s29 = sshll.u32 %s17040_s15, 4  ;;  %s392_s13 = int_to_ptr.vmem [resolvable:$true] %s391_s13  ;;  %s417_s29 = int_to_ptr.vmem [resolvable:$true] %s416_s29 }
  0xcb   : > { %s20551_s4 = sld [smem:[#allocation178_spill]] }
  0xd1   : > { %s16768_s17 = scalar_lea.hbm %s20551_s4, 18432 }
  0xd2   : > { %p16769_p13 = scmp.ne.s32.totalorder %s20551_s4, %s16768_s17  ;;  %p16775_p3 = scmp.lt.u32.totalorder %s16768_s17, %s20551_s4 }
  0xd4   : > { %p16771_p0 = pnand %p16769_p13, %p17178_p8 }
  0xd6   : > { %p16772_p1 = pneg %p16771_p0 }
  0xd8   : > { %p16777_p2 = pnand %p16775_p3, %p16772_p1 }
  0xda   : > { %16780 = shalt.err (!%p16777_p2)
}
  0xdb   : > { %s16781_s21 = scalar_lea.vmem %s392_s13, 18432  ;;  %p16789_p10 = scmp.lt.s32.totalorder %s392_s13, %s392_s13 }
  0xdc   : > { %p16782_p5 = scmp.ne.s32.totalorder %s392_s13, %s16781_s21  ;;  %p16790_p11 = scmp.lt.s32.totalorder %s16781_s21, %s16781_s21 }
  0xde   : > { %p16784_p7 = pnand %p16782_p5, %p17178_p8  ;;  %p16791_p12 = por %p16790_p11, %p16789_p10 }
  0xe0   : > { %p16785_p9 = pneg %p16784_p7 }
  0xe2   : > { %p16792_p4 = pnand %p16791_p12, %p16785_p9 }
  0xe4   : > { %16795 = shalt.err (!%p16792_p4)
}
  0xe5   : > { %15390 = dma.hbm_to_vmem [thread:$0]  (!%p17164_p6), %s20551_s4, 18432, %s392_s13, [#allocation11], %s20549_s20, %s20549_s20, %s20548_s24  }
  0xe6   : > { %s16796_s30 = scalar_lea.hbm %s20224_s6, 32 }
  0xe7   : > { %p16797_p13 = scmp.ne.s32.totalorder %s20224_s6, %s16796_s30  ;;  %p16803_p3 = scmp.lt.u32.totalorder %s16796_s30, %s20224_s6 }
  0xe9   : > { %p16799_p0 = pnand %p16797_p13, %p17178_p8 }
  0xeb   : > { %p16800_p1 = pneg %p16799_p0 }
  0xed   : > { %p16805_p2 = pnand %p16803_p3, %p16800_p1 }
  0xef   : > { %16808 = shalt.err (!%p16805_p2)
}
  0xf0   : > { %s16809_s19 = scalar_lea.vmem %s417_s29, 32  ;;  %p16817_p10 = scmp.lt.s32.totalorder %s417_s29, %s417_s29 }
  0xf1   : > { %p16810_p5 = scmp.ne.s32.totalorder %s417_s29, %s16809_s19  ;;  %p16818_p11 = scmp.lt.s32.totalorder %s16809_s19, %s16809_s19 }
  0xf3   : > { %p16812_p7 = pnand %p16810_p5, %p17178_p8  ;;  %p16819_p12 = por %p16818_p11, %p16817_p10 }
  0xf5   : > { %p16813_p9 = pneg %p16812_p7 }
  0xf7   : > { %p16820_p4 = pnand %p16819_p12, %p16813_p9 }
  0xf9   : > { %16823 = shalt.err (!%p16820_p4)
}
  0xfa   : > { %15396 = dma.hbm_to_vmem [thread:$0]  (!%p17164_p6), %s20224_s6, 32, %s417_s29, [#allocation14]  }
  0xfb   : > { %s17041_s3 = smov [#allocation18]   ;;  %s16824_s30 = scalar_lea.hbm %s20226_s8, 8192 }
  0xfc   : > { %s437_s5 = sshll.u32 %s17041_s3, 4  ;;  %p16825_p13 = scmp.ne.s32.totalorder %s20226_s8, %s16824_s30  ;;  %s438_s5 = int_to_ptr.vmem [resolvable:$true] %s437_s5 }
  0xfd   : > { %p16831_p3 = scmp.lt.u32.totalorder %s16824_s30, %s20226_s8 }
  0xfe   : > { %p16827_p0 = pnand %p16825_p13, %p17178_p8 }
 0x100   : > { %p16828_p1 = pneg %p16827_p0 }
 0x102   : > { %p16833_p2 = pnand %p16831_p3, %p16828_p1 }
 0x104   : > { %16836 = shalt.err (!%p16833_p2)
}
 0x105   : > { %s16837_s29 = scalar_lea.vmem %s438_s5, 8192  ;;  %p16845_p10 = scmp.lt.s32.totalorder %s438_s5, %s438_s5 }
 0x106   : > { %p16838_p5 = scmp.ne.s32.totalorder %s438_s5, %s16837_s29  ;;  %p16846_p11 = scmp.lt.s32.totalorder %s16837_s29, %s16837_s29 }
 0x108   : > { %p16840_p7 = pnand %p16838_p5, %p17178_p8  ;;  %p16847_p12 = por %p16846_p11, %p16845_p10 }
 0x10a   : > { %p16841_p9 = pneg %p16840_p7 }
 0x10c   : > { %p16848_p4 = pnand %p16847_p12, %p16841_p9 }
 0x10e   : > { %16851 = shalt.err (!%p16848_p4)
}
 0x10f   : > { %s17042_s19 = smov 256   ;;  %s17043_s13 = smov 16  }
 0x110   : > { %15402 = dma.hbm_to_vmem [thread:$0]  (!%p17164_p6), %s20226_s8, 8192, %s438_s5, [#allocation17], %s17042_s19, %s17042_s19, %s17043_s13  }
 0x111   : > { %s17044_s15 = smov [#allocation21]   ;;  %s17045_s30 = smov [#allocation24]  }
 0x112   : > { %s464_s22 = sshll.u32 %s17044_s15, 4  ;;  %s488_s17 = sshll.u32 %s17045_s30, 4  ;;  %s465_s22 = int_to_ptr.vmem [resolvable:$true] %s464_s22  ;;  %s17384_s17 = int_to_ptr.vmem [resolvable:$true] %s488_s17 }
 0x113   : > { %s16852_s23 = scalar_lea.hbm %s20228_s10, 32 }
 0x114   : > { %p16853_p13 = scmp.ne.s32.totalorder %s20228_s10, %s16852_s23  ;;  %p16859_p3 = scmp.lt.u32.totalorder %s16852_s23, %s20228_s10 }
 0x116   : > { %p16855_p0 = pnand %p16853_p13, %p17178_p8 }
 0x118   : > { %p16856_p1 = pneg %p16855_p0 }
 0x11a   : > { %p16861_p2 = pnand %p16859_p3, %p16856_p1 }
 0x11c   : > { %16864 = shalt.err (!%p16861_p2)
}
 0x11d   : > { %s16865_s19 = scalar_lea.vmem %s465_s22, 32  ;;  %p16873_p10 = scmp.lt.s32.totalorder %s465_s22, %s465_s22 }
 0x11e   : > { %p16866_p5 = scmp.ne.s32.totalorder %s465_s22, %s16865_s19  ;;  %p16874_p11 = scmp.lt.s32.totalorder %s16865_s19, %s16865_s19 }
 0x120   : > { %p16868_p7 = pnand %p16866_p5, %p17178_p8  ;;  %p16875_p12 = por %p16874_p11, %p16873_p10 }
 0x122   : > { %p16869_p9 = pneg %p16868_p7 }
 0x124   : > { %p16876_p4 = pnand %p16875_p12, %p16869_p9 }
 0x126   : > { %16879 = shalt.err (!%p16876_p4)
}
 0x127   : > { %15408 = dma.hbm_to_vmem [thread:$0]  (!%p17164_p6), %s20228_s10, 32, %s465_s22, [#allocation20]  }
 0x128   : > { %s16880_s30 = scalar_lea.hbm %s20230_s12, 32 }
 0x129   : > { %p16881_p13 = scmp.ne.s32.totalorder %s20230_s12, %s16880_s30  ;;  %p16887_p3 = scmp.lt.u32.totalorder %s16880_s30, %s20230_s12 }
 0x12b   : > { %p16883_p0 = pnand %p16881_p13, %p17178_p8 }
 0x12d   : > { %p16884_p1 = pneg %p16883_p0 }
 0x12f   : > { %p16889_p2 = pnand %p16887_p3, %p16884_p1 }
 0x131   : > { %16892 = shalt.err (!%p16889_p2)
}
 0x132   : > { %s16893_s22 = scalar_lea.vmem %s17384_s17, 32  ;;  %p16901_p10 = scmp.lt.s32.totalorder %s17384_s17, %s17384_s17 }
 0x133   : > { %p16894_p5 = scmp.ne.s32.totalorder %s17384_s17, %s16893_s22  ;;  %p16902_p11 = scmp.lt.s32.totalorder %s16893_s22, %s16893_s22 }
 0x135   : > { %p16896_p7 = pnand %p16894_p5, %p17178_p8  ;;  %p16903_p12 = por %p16902_p11, %p16901_p10 }
 0x137   : > { %p16897_p9 = pneg %p16896_p7 }
 0x139   : > { %p16904_p4 = pnand %p16903_p12, %p16897_p9 }
 0x13b   : > { %16907 = shalt.err (!%p16904_p4)
}
 0x13c   : > { %15414 = dma.hbm_to_vmem [thread:$0]  (!%p17164_p6), %s20230_s12, 32, %s17384_s17, [#allocation23]  }
 0x13d   : > { %s12379_s18 = sadd.s32 4294967294, %s17028_s28   ;;  %s17429_s16 = sadd.s32 1, %s17028_s28  }
 0x13e   : > { %s39_s19 = ssub.s32 %s17028_s28, %s17429_s16  ;;  %s42_s2 = sadd.s32 1, %s17024_s27 }
 0x13f   : > { %p40_p8 = scmp.eq.s32.totalorder %s39_s19, 0  ;;  %p49_p13 = scmp.ne.s32.totalorder %s17024_s27, %s17020_s26 }
 0x140   : > { %p50_p0 = scmp.eq.s32.totalorder %s17028_s28, 0  ;;  %p55_p1 = scmp.ne.s32.totalorder %s17020_s26, %s17016_s25 }
 0x141   : > { %s17440_s13 = scalar_select %p40_p8, %s17024_s27, %s42_s2  }
 0x142   : > { %p17442_p3 = por %p50_p0, %p49_p13  ;;  %p20553_p2 = scmp.eq.s32.totalorder %s17146_s14, 0 }
 0x143   : > { %p331_p5 = scmp.eq.s32.totalorder %s17146_s14, 1  ;;  %p337_p7 = scmp.eq.s32.totalorder %s12379_s18, 1 }
 0x144   : > { %p17448_p6 = por %p20553_p2, %p55_p1  ;;  %p15435_p9 = scmp.lt.s32.totalorder %s17028_s28, 2 }
 0x145   : > { %s499_s15 = sand.u32 1, %s17024_s27   ;;  %p17455_p10 = por %p331_p5, %p49_p13 }
 0x146   : > { %p17459_p11 = por %p337_p7, %p55_p1  ;;  %s12394_s0 = sshll.u32 %s499_s15, 6 }
 0x147   : > { %s20555_s30 = scalar_select %p17455_p10, 1, 0 }
 0x148   : > { %s20556_s1 = scalar_select %p17459_p11, 1, 0 }
 0x149   : > { %s13269_s23 = sshll.u32 %s17028_s28, 10  ;;  %s20557_s21 = sld [smem:[#allocation174_spill]] }
 0x14a   : > { %s503_s18 = scalar_lea.vmem [#allocation4], %s12394_s0  ;;  %p17473_p12 = pnand %p15435_p9, %p17442_p3 }
 0x14b   : > { %s510_s19 = sshll.u32 %s503_s18, 4  ;;  %s17477_s4 = scalar_lea.sflag [#allocation5], %s499_s15  ;;  %s17469_s19 = int_to_ptr.vmem [resolvable:$true] %s510_s19 }
 0x14c   : > { %p16910_p8 = pneg %p17473_p12 }
 0x14f   : > { %s17467_s5 = scalar_lea.hbm %s20557_s21, %s13269_s23  ;;  %s16913_s3 = scalar_lea.hbm %s20557_s21, 2048 }
 0x150   : > { %s16908_s29 = scalar_lea.hbm %s17467_s5, 1024  ;;  %p16914_p1 = scmp.lt.u32.totalorder %s17467_s5, %s20557_s21 }
 0x151   : > { %p16909_p4 = scmp.ne.s32.totalorder %s17467_s5, %s16908_s29  ;;  %p16915_p3 = scmp.lt.u32.totalorder %s16913_s3, %s16908_s29 }
 0x152   : > { %p16917_p5 = scmp.lt.u32.totalorder %s16908_s29, %s17467_s5 }
 0x153   : > { %p16911_p13 = pnand %p16910_p8, %p16909_p4  ;;  %p16916_p2 = por %p16915_p3, %p16914_p1 }
 0x155   : > { %p16912_p0 = pneg %p16911_p13  ;;  %p16918_p7 = por %p16917_p5, %p16916_p2 }
 0x157   : > { %p16919_p9 = pnand %p16918_p7, %p16912_p0 }
 0x159   : > { %16922 = shalt.err (!%p16919_p9)
}
 0x15a   : > { %s16923_s15 = scalar_lea.vmem %s17469_s19, 1024  ;;  %s17046_s0 = smov [#allocation4]  }
 0x15b   : > { %p16924_p4 = scmp.ne.s32.totalorder %s17469_s19, %s16923_s15  ;;  %s16928_s23 = sshll.u32 %s17046_s0, 4  ;;  %s16929_s23 = int_to_ptr.vmem [resolvable:$false] %s16928_s23 }
 0x15c   : > { %s16930_s22 = scalar_lea.vmem %s16929_s23, 2048  ;;  %p16931_p10 = scmp.lt.s32.totalorder %s17469_s19, %s16929_s23 }
 0x15d   : > { %p16926_p13 = pnand %p16924_p4, %p16910_p8  ;;  %p16932_p1 = scmp.lt.s32.totalorder %s16930_s22, %s16923_s15 }
 0x15f   : > { %p16927_p11 = pneg %p16926_p13  ;;  %p16933_p3 = por %p16932_p1, %p16931_p10 }
 0x161   : > { %p16934_p2 = pnand %p16933_p3, %p16927_p11 }
 0x163   : > { %16937 = shalt.err (!%p16934_p2)
}
 0x164   : > { %15418 = dma.hbm_to_vmem [thread:$0]  (!%p17473_p12), %s17467_s5, 1024, %s17469_s19, %s17477_s4, %s20549_s20, %s20549_s20, %s20548_s24  }
 0x165   : > { %s20559_s29 = sld [smem:[#allocation34_spill]] }
 0x16b   : > { %p20560_p8 = scmp.ne.s32.totalorder %s20559_s29, 0 }
 0x16d   : > { %522 = sbr.rel (%p20560_p8) target bundleno = 3045 (0xbe5), region = 72 }
 0x174   : > { %s17511_s3 = sand.u32 1, %s17020_s26  }
 0x175   : > { %s12398_s18 = sshll.u32 %s17511_s3, 6  ;;  %s525_s15 = scalar_lea.sflag [#allocation5], %s17511_s3 }
 0x176   : > { %s17517_s2 = scalar_lea.vmem [#allocation4], %s12398_s18 }
 0x177   : > { %16983 = dma.done.wait (%p17448_p6), %s525_s15, 1024  }
 0x178   : > { %16985 = vsyncadd (%p17448_p6), %s525_s15, 4294966272  ;;  %p20561_p10 = scmp.eq.s32.totalorder %s17146_s14, 0 }
 0x17a   : > { %16987 = dma.done.wait (%p20561_p10), [#allocation8], 32   ;;  %p20562_p11 = pmov %p20561_p10 }
 0x17b   : > { %p20563_p12 = pmov %p20561_p10 }
 0x17c   : > { %16989 = vsyncadd (%p20562_p11), [#allocation8], 4294967264 }
 0x17d   : > { %16991 = dma.done.wait (%p20563_p12), [#allocation11], 20480   ;;  %p20564_p0 = pmov %p20561_p10 }
 0x17f   : > { %16993 = vsyncadd (%p20564_p0), [#allocation11], 4294946816  ;;  %p20565_p5 = pmov %p20564_p0 }
 0x180   : > { %p20566_p7 = pmov %p20564_p0 }
 0x181   : > { %16995 = dma.done.wait (%p20565_p5), [#allocation14], 64  }
 0x182   : > { %16997 = vsyncadd (%p20566_p7), [#allocation14], 4294967232  ;;  %p20567_p6 = pmov %p20564_p0 }
 0x183   : > { %p20568_p9 = pmov %p20564_p0 }
 0x184   : > { %16999 = dma.done.wait (%p20567_p6), [#allocation17], 8224  }
 0x185   : > { %17001 = vsyncadd (%p20568_p9), [#allocation17], 4294959072  ;;  %p20569_p4 = pmov %p20564_p0 }
 0x186   : > { %p20570_p13 = pmov %p20564_p0 }
 0x187   : > { %17003 = dma.done.wait (%p20569_p4), [#allocation20], 36896  }
 0x188   : > { %17005 = vsyncadd (%p20570_p13), [#allocation20], 4294930400  ;;  %p20571_p1 = pmov %p20564_p0 }
 0x189   : > { %p20572_p3 = pmov %p20564_p0 }
 0x18a   : > { %17007 = dma.done.wait (%p20571_p1), [#allocation23], 2080  }
 0x18b   : > { %17009 = vsyncadd (%p20572_p3), [#allocation23], 4294965216  ;;  %v17047_v0 = vmov 0.0|0.0   ;;  %vm17048_vm0 = vmmov 0   ;;  %v20242_v1 = vmov 0.0   ;;  %v734_v2 = vld [vmem:[#allocation10] sm:$0xff] }
 0x18c   : > { %13927 = vmatprep.subr.bf16.mxu0 %v17047_v0  ;;  %14095 = vmatprep.subr.bf16.mxu1 %v17047_v0  ;;  %v735_v3 = vld [vmem:[#allocation10 + $0x8] sm:$0xff]  ;;  %v736_v4 = vld [vmem:[#allocation10 + $0x10] sm:$0xff]  ;;  %v751_v5 = vand.u32 4294901760, %v734_v2  ;;  %v737_v7 = vld [vmem:[#allocation10 + $0x18] sm:$0xff]  ;;  %vm631_vm1 = vcmask 1040384   ;;  %vm664_vm4 = vcmask 1044484  }
 0x18d   : > { %13539 = vmatprep.mubr.msk.f32.mxu0 %vm17048_vm0, %v20242_v1  ;;  %13784 = vmatprep.mubr.msk.f32.mxu1 %vm17048_vm0, %v20242_v1  ;;  %v754_v6 = vand.u32 4294901760, %v735_v3  ;;  %v757_v8 = vand.u32 4294901760, %v736_v4  ;;  %v738_v9 = vld [vmem:[#allocation10 + $0x20] sm:$0xff]  ;;  %v739_v10 = vld [vmem:[#allocation10 + $0x28] sm:$0xff]  ;;  %v760_v11 = vand.u32 4294901760, %v737_v7  ;;  %v740_v14 = vld [vmem:[#allocation10 + $0x30] sm:$0xff] }
 0x18e   : > { %v763_v12 = vand.u32 4294901760, %v738_v9  ;;  %v766_v13 = vand.u32 4294901760, %v739_v10  ;;  %v17555_v16 = vsub.f32 %v734_v2, %v751_v5  ;;  %v741_v19 = vld [vmem:[#allocation10 + $0x38] sm:$0xff]  ;;  %v742_v23 = vld [vmem:[#allocation10 + $0x40] sm:$0xff]  ;;  %v769_v27 = vand.u32 4294901760, %v740_v14  ;;  %v743_v28 = vld [vmem:[#allocation10 + $0x48] sm:$0xff] }
 0x18f   : > { %v17553_v15 = vpack.c.bf16 %v754_v6, %v751_v5  ;;  %v17557_v17 = vsub.f32 %v735_v3, %v754_v6  ;;  %v17559_v18 = vsub.f32 %v736_v4, %v757_v8  ;;  %v17561_v20 = vpack.c.bf16 %v760_v11, %v757_v8  ;;  %v17586_v37 = vld [vmem:[#allocation10 + $0x50] sm:$0xff]  ;;  %v745_v42 = vld [vmem:[#allocation10 + $0x58] sm:$0xff]  ;;  %v17596_v47 = vld [vmem:[#allocation10 + $0x60] sm:$0xff]  ;;  %s20157_s4 = scalar_lea.vmem [#allocation25], %s12398_s18  ;;  %s13302_s20 = sshll.u32 %s17146_s14, 10 }
 0x190   : > { %v17563_v21 = vpack.c.bf16 %v766_v13, %v763_v12  ;;  %v17565_v22 = vsub.f32 %v737_v7, %v760_v11  ;;  %v844_v24 = vand.u32 4294901760, %v17555_v16  ;;  %v772_v30 = vand.u32 4294901760, %v741_v19  ;;  %v17598_v48 = vld [vmem:[#allocation10 + $0x68] sm:$0xff]  ;;  %v17617_v61 = vld [vmem:[#allocation10 + $0x70] sm:$0xff]  ;;  %v17633_v6 = vld [vmem:[#allocation10 + $0x78] sm:$0xff]  ;;  %s12192_s24 = sshll.u32 %s20157_s4, 4  ;;  %s20167_s24 = int_to_ptr.vmem [resolvable:$true] %s12192_s24 }
 0x191   : > { %13929 = vmatpush3.bf16.msra.mxu0 %v17553_v15  ;;  %v851_v25 = vand.u32 4294901760, %v17557_v17  ;;  %v858_v26 = vand.u32 4294901760, %v17559_v18  ;;  %v17573_v31 = vsub.f32 %v738_v9, %v763_v12  ;;  %v17575_v32 = vsub.f32 %v739_v10, %v766_v13  ;;  %s21048_s19 = sld [smem:[#allocation180_spill]]  ;;  %s12179_s23 = scalar_lea.sflag [#allocation6], %s17511_s3 }
 0x192   : > { %13930 = vmatprep.subr.bf16.mxu0 %v17047_v0  ;;  %v865_v29 = vand.u32 4294901760, %v17565_v22  ;;  %v845_v33 = vsub.f32 %v17555_v16, %v844_v24  ;;  %v775_v36 = vand.u32 4294901760, %v742_v23  ;;  %v778_v41 = vand.u32 4294901760, %v743_v28  ;;  %s16938_s22 = scalar_lea.vmem %s20167_s24, 1024  ;;  %p21049_p8 = scmp.ne.s32.totalorder %s20555_s30, 0 }
 0x193   : > { %v852_v34 = vsub.f32 %v17557_v17, %v851_v25  ;;  %v859_v35 = vsub.f32 %v17559_v18, %v858_v26  ;;  %v872_v39 = vand.u32 4294901760, %v17573_v31  ;;  %v879_v40 = vand.u32 4294901760, %v17575_v32  ;;  %p16939_p2 = scmp.ne.s32.totalorder %s20167_s24, %s16938_s22  ;;  %s17052_s14 = smov [#allocation25]  }
 0x194   : > { %v866_v38 = vsub.f32 %v17565_v22, %v865_v29  ;;  %v846_v43 = vand.u32 4294901760, %v845_v33  ;;  %v17594_v46 = vsub.f32 %v740_v14, %v769_v27  ;;  %v17601_v50 = vpack.c.bf16 %v772_v30, %v769_v27  ;;  %s16942_s29 = sshll.u32 %s17052_s14, 4  ;;  %s16943_s29 = int_to_ptr.vmem [resolvable:$false] %s16942_s29 }
 0x195   : > { %13932 = vmatpush3.bf16.msra.mxu0 %v17561_v20  ;;  %v853_v44 = vand.u32 4294901760, %v852_v34  ;;  %v860_v45 = vand.u32 4294901760, %v859_v35  ;;  %v873_v51 = vsub.f32 %v17573_v31, %v872_v39  ;;  %v880_v52 = vsub.f32 %v17575_v32, %v879_v40  ;;  %p16940_p10 = pnand %p16939_p2, %p21049_p8  ;;  %s16944_s18 = scalar_lea.vmem %s16943_s29, 2048 }
 0x196   : > { %13933 = vmatprep.subr.bf16.mxu0 %v17047_v0  ;;  %v867_v49 = vand.u32 4294901760, %v866_v38  ;;  %v886_v54 = vand.u32 4294901760, %v17594_v46  ;;  %v17612_v55 = vsub.f32 %v741_v19, %v772_v30  ;;  %v781_v56 = vand.u32 4294901760, %v17586_v37  ;;  %v620_v19 = vld [vmem:[%s17517_s2] sm:$0xff]  ;;  %v622_v38 = vld [vmem:[%s17517_s2 + $0x10] sm:$0xff]  ;;  %p16945_p12 = scmp.lt.s32.totalorder %s20167_s24, %s16943_s29  ;;  %p16946_p0 = scmp.lt.s32.totalorder %s16944_s18, %s16938_s22 }
 0x197   : > { %v17609_v53 = vpack.c.bf16 %v853_v44, %v846_v43  ;;  %v874_v58 = vand.u32 4294901760, %v873_v51  ;;  %v881_v59 = vand.u32 4294901760, %v880_v52  ;;  %v784_v60 = vand.u32 4294901760, %v745_v42  ;;  %s20172_s0 = scalar_lea.hbm %s21048_s19, %s13302_s20  ;;  %p16941_p11 = pneg %p16940_p10 }
 0x198   : > { %v17615_v57 = vpack.c.bf16 %v867_v49, %v860_v45  ;;  %v887_v62 = vsub.f32 %v17594_v46, %v886_v54  ;;  %v20250_v63 = vand.u32 4294901760, %v17612_v55  ;;  %v17625_v2 = vsub.f32 %v742_v23, %v775_v36  ;;  %v621_v23 = vld [vmem:[%s17517_s2 + $0x8] sm:$0xff]  ;;  %p16947_p5 = por %p16946_p0, %p16945_p12 }
 0x199   : > { %14097 = vmatpush3.bf16.msra.mxu1 %v17609_v53  ;;  %13935 = vmatpush3.bf16.msra.mxu0 %v17563_v21  ;;  %v17627_v3 = vsub.f32 %v743_v28, %v778_v41  ;;  %v787_v4 = vand.u32 4294901760, %v17596_v47  ;;  %v790_v5 = vand.u32 4294901760, %v17598_v48  ;;  %v17640_v11 = vpack.c.bf16 %v881_v59, %v874_v58 }
 0x19a   : > { %14098 = vmatprep.subr.bf16.mxu1 %v17047_v0  ;;  %13936 = vmatprep.subr.bf16.mxu0 %v17047_v0  ;;  %v888_v7 = vand.u32 4294901760, %v887_v62  ;;  %v894_v8 = vsub.f32 %v17612_v55, %v20250_v63  ;;  %v20249_v9 = vand.u32 4294901760, %v17625_v2  ;;  %v17642_v12 = vpack.c.bf16 %v778_v41, %v775_v36  ;;  %p16948_p7 = pnand %p16947_p5, %p16941_p11 }
 0x19b   : > { %v20248_v10 = vand.u32 4294901760, %v17627_v3  ;;  %v17645_v13 = vsub.f32 %v17586_v37, %v781_v56  ;;  %v17647_v14 = vsub.f32 %v745_v42, %v784_v60  ;;  %v793_v33 = vand.u32 4294901760, %v17617_v61 }
 0x19c   : > { %v895_v27 = vand.u32 4294901760, %v894_v8  ;;  %v901_v28 = vsub.f32 %v17625_v2, %v20249_v9  ;;  %v17665_v36 = vsub.f32 %v17596_v47, %v787_v4  ;;  %v17668_v37 = vsub.f32 %v17598_v48, %v790_v5  ;;  %v623_v48 = vld [vmem:[%s17517_s2 + $0x18] sm:$0xff] }
 0x19d   : > { %14100 = vmatpush3.bf16.msra.mxu1 %v17615_v57  ;;  %13938 = vmatpush3.bf16.msra.mxu0 %v17601_v50  ;;  %v908_v30 = vsub.f32 %v17627_v3, %v20248_v10  ;;  %v20247_v34 = vand.u32 4294901760, %v17645_v13  ;;  %v20244_v35 = vand.u32 4294901760, %v17647_v14  ;;  %v17673_v42 = vpack.c.bf16 %v784_v60, %v781_v56  ;;  %v624_v60 = vld [vmem:[%s17517_s2 + $0x20] sm:$0xff]  ;;  %v627_v10 = vld [vmem:[%s17517_s2 + $0x38] sm:$0xff] }
 0x19e   : > { %14101 = vmatprep.subr.bf16.mxu1 %v17047_v0  ;;  %13939 = vmatprep.subr.bf16.mxu0 %v17047_v0  ;;  %v17671_v41 = vpack.c.bf16 %v895_v27, %v888_v7  ;;  %v902_v43 = vand.u32 4294901760, %v901_v28  ;;  %v796_v44 = vand.u32 4294901760, %v17633_v6  ;;  %v20246_v47 = vand.u32 4294901760, %v17665_v36 }
 0x19f   : > { %v909_v45 = vand.u32 4294901760, %v908_v30  ;;  %v915_v49 = vsub.f32 %v17645_v13, %v20247_v34  ;;  %v20245_v51 = vand.u32 4294901760, %v17668_v37  ;;  %v922_v52 = vsub.f32 %v17647_v14, %v20244_v35  ;;  %v625_v30 = vld [vmem:[%s17517_s2 + $0x28] sm:$0xff] }
 0x1a0   : > { %v697_v56 = vadd.f32 %v621_v23, %v620_v19  ;;  %v17688_v58 = vsub.f32 %v17617_v61, %v793_v33  ;;  %v929_v59 = vsub.f32 %v17665_v36, %v20246_v47  ;;  %v17701_v61 = vsub.f32 %v17633_v6, %v796_v44  ;;  %v626_v6 = vld [vmem:[%s17517_s2 + $0x30] sm:$0xff] }
 0x1a1   : > { %14103 = vmatpush3.bf16.msra.mxu1 %v17640_v11  ;;  %13941 = vmatpush3.bf16.msra.mxu0 %v17642_v12  ;;  %v936_v62 = vsub.f32 %v17668_v37, %v20245_v51  ;;  %v17703_v27 = vpack.c.bf16 %v909_v45, %v902_v43  ;;  %v17705_v28 = vpack.c.bf16 %v790_v5, %v787_v4  ;;  %v916_v51 = vand.u32 4294901760, %v915_v49 }
 0x1a2   : > { %14104 = vmatprep.subr.bf16.mxu1 %v17047_v0  ;;  %13942 = vmatprep.subr.bf16.mxu0 %v17047_v0  ;;  %v698_v7 = vadd.f32 %v697_v56, %v622_v38  ;;  %v942_v8 = vand.u32 4294901760, %v17688_v58  ;;  %v712_v1 = vmul.f32 %v620_v19, %v620_v19  ;;  %v713_v35 = vmul.f32 %v621_v23, %v621_v23 }
 0x1a3   : > { %v923_v56 = vand.u32 4294901760, %v922_v52  ;;  %v949_v34 = vand.u32 4294901760, %v17701_v61  ;;  %v714_v4 = vmul.f32 %v622_v38, %v622_v38  ;;  %v930_v5 = vand.u32 4294901760, %v929_v59 }
 0x1a4   : > { %v699_v47 = vadd.f32 %v698_v7, %v623_v48  ;;  %v937_v43 = vand.u32 4294901760, %v936_v62  ;;  %v943_v23 = vsub.f32 %v17688_v58, %v942_v8  ;;  %v17715_v45 = vpack.c.bf16 %v796_v44, %v793_v33 }
 0x1a5   : > { %14106 = vmatpush3.bf16.msra.mxu1 %v17671_v41  ;;  %13944 = vmatpush3.bf16.msra.mxu0 %v17673_v42  ;;  %v715_v9 = vmul.f32 %v623_v48, %v623_v48  ;;  %v720_v49 = vadd.f32 %v713_v35, %v712_v1  ;;  %v17720_v52 = vpack.c.bf16 %v923_v56, %v916_v51  ;;  %vm632_vm2 = vsmask.f32 256 }
 0x1a6   : > { %14107 = vmatprep.subr.bf16.mxu1 %v17047_v0  ;;  %13945 = vmatprep.subr.bf16.mxu0 %v17047_v0  ;;  %v700_v19 = vadd.f32 %v699_v47, %v624_v60  ;;  %v950_v63 = vsub.f32 %v17701_v61, %v949_v34  ;;  %v716_v38 = vmul.f32 %v624_v60, %v624_v60  ;;  %v944_v48 = vand.u32 4294901760, %v943_v23  ;;  %vm17985_vm3 = vmand %vm631_vm1, %vm632_vm2 }
 0x1a7   : > { %v721_v47 = vadd.f32 %v720_v49, %v714_v4  ;;  %v17725_v33 = vpack.c.bf16 %v937_v43, %v930_v5  ;;  %v717_v1 = vmul.f32 %v625_v30, %v625_v30  ;;  %v718_v35 = vmul.f32 %v626_v6, %v626_v6 }
 0x1a8   : > { %v701_v7 = vadd.f32 %v700_v19, %v625_v30  ;;  %v17731_v51 = vpack.c.bf16 %v851_v25, %v844_v24  ;;  %v17737_v62 = vpack.c.bf16 %v865_v29, %v858_v26  ;;  %v951_v30 = vand.u32 4294901760, %v950_v63 }
 0x1a9   : > { %14109 = vmatpush3.bf16.msra.mxu1 %v17703_v27  ;;  %13947 = vmatpush3.bf16.msra.mxu0 %v17705_v28  ;;  %v722_v59 = vadd.f32 %v721_v47, %v715_v9  ;;  %v17745_v9 = vpack.c.bf16 %v879_v40, %v872_v39  ;;  %v20573_v24 = vand.u32 4294901760, %v17612_v55  ;;  %v20574_v29 = vand.u32 4294901760, %v17625_v2 }
 0x1aa   : > { %14110 = vmatprep.subr.bf16.mxu1 %v17047_v0  ;;  %13948 = vmatprep.subr.bf16.mxu0 %v17047_v0  ;;  %v702_v44 = vadd.f32 %v701_v7, %v626_v6  ;;  %v20575_v63 = vand.u32 4294901760, %v17627_v3  ;;  %v20576_v39 = vand.u32 4294901760, %v17645_v13  ;;  %v20577_v40 = vand.u32 4294901760, %v17647_v14 }
 0x1ab   : > { %v17751_v25 = vpack.c.bf16 %v20573_v24, %v886_v54  ;;  %v723_v26 = vadd.f32 %v722_v59, %v716_v38  ;;  %v20578_v54 = vand.u32 4294901760, %v17665_v36  ;;  %v20579_v5 = vand.u32 4294901760, %v17668_v37 }
 0x1ac   : > { %v703_v60 = vadd.f32 %v702_v44, %v627_v10  ;;  %v17759_v56 = vpack.c.bf16 %v20575_v63, %v20574_v29  ;;  %v17765_v6 = vpack.c.bf16 %v20577_v40, %v20576_v39  ;;  %v17773_v19 = vpack.c.bf16 %v949_v34, %v942_v8 }
 0x1ad   : > { %14112 = vmatpush3.bf16.msra.mxu1 %v17720_v52  ;;  %13950 = vmatpush3.bf16.msra.mxu0 %v17715_v45  ;;  %v17771_v43 = vpack.c.bf16 %v20579_v5, %v20578_v54  ;;  %v719_v23 = vmul.f32 %v627_v10, %v627_v10  ;;  %v724_v49 = vadd.f32 %v723_v26, %v717_v1  ;;  %vm665_vm5 = vsmask.f32 7954 }
 0x1ae   : > { %14113 = vmatprep.subr.bf16.mxu1 %v17047_v0  ;;  %13951 = vmatprep.subr.bf16.mxu0 %v17047_v0  ;;  %v704_v4 = vrot.slane %v703_v60, 4  ;;  %v17776_v38 = vpack.c.bf16 %v951_v30, %v944_v48  ;;  %v13976_v54 = vpack.c.bf16 %v17557_v17, %v17555_v16  ;;  %v13982_v16 = vpack.c.bf16 %v17575_v32, %v17573_v31  ;;  %vm17991_vm6 = vmand %vm664_vm4, %vm665_vm5 }
 0x1af   : > { %v725_v47 = vadd.f32 %v724_v49, %v718_v35  ;;  %v13979_v49 = vpack.c.bf16 %v17565_v22, %v17559_v18  ;;  %v13985_v17 = vpack.c.bf16 %v17612_v55, %v17594_v46  ;;  %v13988_v18 = vpack.c.bf16 %v17627_v3, %v17625_v2  ;;  %v637_v3 = vld [vmem:[#allocation2 + $0x8] sm:$0x1] }
 0x1b0   : > { %v705_v7 = vadd.f32 %v704_v4, %v703_v60  ;;  %v13991_v22 = vpack.c.bf16 %v17647_v14, %v17645_v13  ;;  %v13994_v31 = vpack.c.bf16 %v17668_v37, %v17665_v36  ;;  %v13997_v32 = vpack.c.bf16 %v17701_v61, %v17688_v58  ;;  %v640_v13 = vld [vmem:[#allocation2 + $0x10] sm:$0x1]  ;;  %v15507_v58 = vld [vmem:[#allocation12 + $0x90] ss:$8 sps:$4 sm:$0xff]  }
 0x1b1   : > { %14115 = vmatpush3.bf16.msra.mxu1 %v17725_v33  ;;  %v726_v59 = vadd.f32 %v725_v47, %v719_v23  ;;  %v20581_v2 = vmov 0  ;;  %v15509_v14 = vld [vmem:[#allocation12 + $0x94] ss:$8 sps:$4 sm:$0xff]   ;;  %v17050_v36 = vmov 0   ;;  %v682_v47 = vld [vmem:[#allocation2 + $0x28] sm:$0x10] }
 0x1b2   : > { %14116 = vmatprep.subr.bf16.mxu1 %v17047_v0  ;;  %v706_v44 = vrot.slane %v705_v7, 2  ;;  %v20582_v2 = vsel %vm17985_vm3, 4294967295, %v20581_v2  ;;  %628 = vst [vmem:[#allocation2] sm:$0xff] %v17050_v36  ;;  %630 = vst [vmem:[#allocation2 + $0x48] sm:$0xff] %v17050_v36  ;;  %vm2213_vm7 = vcmask 1044480   ;;  %vm2837_vm13 = vcmask 1042432  }
 0x1b3   : > { %v727_v29 = vrot.slane %v726_v59, 4  ;;  %20583 = vst [vmem:[#allocation35_spill] sm:$0xff] %v20582_v2  ;;  %4820 = vst [vmem:[#allocation3] sm:$0xff] %v17050_v36  ;;  %vm2214_vm8 = vsmask.f32 4354  ;;  %vm2838_vm14 = vcmask 1046532  }
 0x1b4   : > { %v707_v24 = vadd.f32 %v706_v44, %v705_v7  ;;  %v20580_v7 = vmov 0.0   ;;  %4821 = vst [vmem:[#allocation3 + $0x8] sm:$0xff] %v17050_v36  ;;  %4823 = vst [vmem:[#allocation3 + $0x90] sm:$0xff] %v17050_v36  ;;  %v15518_v44 = vld [vmem:[#allocation12 + $0xc4] ss:$8 sps:$4 sm:$0xff]  }
 0x1b5   : > { %14118 = vmatpush3.bf16.msra.mxu1 %v17776_v38  ;;  %v728_v8 = vadd.f32 %v727_v29, %v726_v59  ;;  %4824 = vst [vmem:[#allocation3 + $0x98] sm:$0xff] %v17050_v36  ;;  %vm18084_vm9 = vmand %vm2213_vm7, %vm2214_vm8  ;;  %vm2312_vm10 = vsmask.f32 3328  ;;  %vm2313_vm11 = vsmask.f32 7440 }
 0x1b6   : > { %14119 = vmatprep.subr.bf16.mxu1 %v17047_v0  ;;  %v708_v34 = vrot.slane %v707_v24, 1  ;;  %vm18113_vm12 = vmor %vm2312_vm10, %vm2313_vm11 }
 0x1b7   : > { %v729_v1 = vrot.slane %v728_v8, 2  ;;  %vm18142_vm15 = vmor %vm2837_vm13, %vm2838_vm14 }
 0x1b8   : > { %v709_v10 = vadd.f32 %v708_v34, %v707_v24 }
 0x1b9   : > { %v730_v63 = vadd.f32 %v729_v1, %v728_v8  ;;  %v634_v59 = vld [vmem:[#allocation2] sm:$0x1]  ;;  %v667_v29 = vld [vmem:[#allocation2] sm:$0x10]  ;;  %v683_v8 = vsel %vm17991_vm6, 0, %v682_v47  ;;  %v16559_v47 = vld [vmem:[%s17517_s2 + $0x28] sm:$0xff] }
 0x1ba   : > { %v711_v26 = vmul.f32 0.015625, %v709_v10  ;;  %v635_v24 = vsel %vm17985_vm3, 0, %v634_v59  ;;  %v668_v34 = vsel %vm17991_vm6, 0, %v667_v29  ;;  %v15516_v10 = vld [vmem:[#allocation12 + $0xc0] ss:$8 sps:$4 sm:$0xff]   ;;  %v16560_v59 = vld [vmem:[%s17517_s2 + $0x30] sm:$0xff] }
 0x1bb   : > { %v731_v48 = vrot.slane %v730_v63, 1  ;;  %636 = vst [vmem:[#allocation2] sm:$0x1] %v635_v24  ;;  %669 = vst [vmem:[#allocation2] sm:$0x10] %v668_v34  ;;  %v16561_v29 = vld [vmem:[%s17517_s2 + $0x38] sm:$0xff] }
 0x1bc   : > { %v17781_v60 = vand.u32 4294901760, %v711_v26  ;;  %684 = vst [vmem:[#allocation2 + $0x28] sm:$0x10] %v683_v8  ;;  %v652_v1 = vld [vmem:[#allocation2 + $0x30] sm:$0x1] }
 0x1bd   : > { %v732_v35 = vadd.f32 %v731_v48, %v730_v63  ;;  %v15521_v63 = vld [vmem:[#allocation12 + $0xd4] ss:$8 sps:$4 sm:$0xff]  }
 0x1be   : > { %v17784_v30 = vsub.f32 %v711_v26, %v17781_v60  ;;  %v655_v26 = vld [vmem:[#allocation2 + $0x38] sm:$0x1] }
 0x1bf   : > { %v733_v40 = vmul.f32 0.015625, %v732_v35  ;;  %v656_v48 = vsel %vm17985_vm3, 0, %v655_v26  ;;  %v688_v35 = vld [vmem:[#allocation2 + $0x38] sm:$0x10] }
 0x1c0   : > { %v833_v39 = vand.u32 4294901760, %v17784_v30  ;;  %657 = vst [vmem:[#allocation2 + $0x38] sm:$0x1] %v656_v48 }
 0x1c1   : > { %v17792_v5 = vand.u32 4294901760, %v733_v40 }
 0x1c2   : > { %v834_v4 = vsub.f32 %v17784_v30, %v833_v39 }
 0x1c3   : > { %13785 = vmatmul.mubr.f32.vlgmr.msra.gmra.mrb[0].mxu1 %v17792_v5  ;;  %v1473_v46 = vsub.f32 %v733_v40, %v17792_v5  ;;  %v689_v40 = vsel %vm17991_vm6, 0, %v688_v35 }
 0x1c4   : > { %v835_v23 = vand.u32 4294901760, %v834_v4  ;;  %14121 = vmatpush3.bf16.msra.mxu1 %v13976_v54  ;;  %13819 = vmatprep.mubr.msk.f32.mxu1 %vm17048_vm0, %v20580_v7  ;;  %v15519_v4 = vld [vmem:[#allocation12 + $0xd0] ss:$8 sps:$4 sm:$0xff]   ;;  %690 = vst [vmem:[#allocation2 + $0x38] sm:$0x10] %v689_v40 }
 0x1c5   : > { %14122 = vmatprep.subr.bf16.mxu1 %v17047_v0 }
 0x1c6   : > { %13540 = vmatmul.mubr.f32.vlgmr.msra.gmra.mrb[0].mxu0 %v835_v23  ;;  %v15527_v23 = vld [vmem:[#allocation12 + $0xf4] ss:$8 sps:$4 sm:$0xff]  }
 0x1c7   : > { %13953 = vmatpush3.bf16.msra.mxu0 %v17609_v53  ;;  %13574 = vmatprep.mubr.msk.f32.mxu0 %vm17048_vm0, %v20580_v7  ;;  %v1474_v53 = vand.u32 4294901760, %v1473_v46 }
 0x1c8   : > { %13954 = vmatprep.subr.bf16.mxu0 %v17047_v0  ;;  %14124 = vmatpush3.bf16.msra.mxu1 %v13979_v49 }
 0x1c9   : > { %14125 = vmatprep.subr.bf16.mxu1 %v17047_v0  ;;  %v17865_v55 = vsub.f32 %v1473_v46, %v1474_v53 }
 0x1cb   : > { %13956 = vmatpush3.bf16.msra.mxu0 %v17615_v57 }
 0x1cc   : > { %13957 = vmatprep.subr.bf16.mxu0 %v17047_v0  ;;  %14127 = vmatpush3.bf16.msra.mxu1 %v13982_v16 }
 0x1cd   : > { %14128 = vmatprep.subr.bf16.mxu1 %v17047_v0 }
 0x1cf   : > { %13959 = vmatpush3.bf16.msra.mxu0 %v17640_v11  ;;  %v20584_v11 = vmov 0 }
 0x1d0   : > { %13960 = vmatprep.subr.bf16.mxu0 %v17047_v0  ;;  %14130 = vmatpush3.bf16.msra.mxu1 %v13985_v17  ;;  %v20585_v11 = vsel %vm17991_vm6, 4294967295, %v20584_v11 }
 0x1d1   : > { %14131 = vmatprep.subr.bf16.mxu1 %v17047_v0  ;;  %20586 = vst [vmem:[#allocation36_spill] sm:$0xff] %v20585_v11 }
 0x1d3   : > { %13962 = vmatpush3.bf16.msra.mxu0 %v17671_v41  ;;  %v641_v41 = vsel %vm17985_vm3, 0, %v640_v13 }
 0x1d4   : > { %13963 = vmatprep.subr.bf16.mxu0 %v17047_v0  ;;  %14133 = vmatpush3.bf16.msra.mxu1 %v13988_v18  ;;  %642 = vst [vmem:[#allocation2 + $0x10] sm:$0x1] %v641_v41 }
 0x1d5   : > { %14134 = vmatprep.subr.bf16.mxu1 %v17047_v0 }
 0x1d7   : > { %13965 = vmatpush3.bf16.msra.mxu0 %v17703_v27  ;;  %v673_v27 = vld [vmem:[#allocation2 + $0x10] sm:$0x10] }
 0x1d8   : > { %13966 = vmatprep.subr.bf16.mxu0 %v17047_v0  ;;  %14136 = vmatpush3.bf16.msra.mxu1 %v13991_v22 }
 0x1d9   : > { %14137 = vmatprep.subr.bf16.mxu1 %v17047_v0 }
 0x1db   : > { %13968 = vmatpush3.bf16.msra.mxu0 %v17720_v52  ;;  %v646_v52 = vld [vmem:[#allocation2 + $0x20] sm:$0x1] }
 0x1dc   : > { %13969 = vmatprep.subr.bf16.mxu0 %v17047_v0  ;;  %14139 = vmatpush3.bf16.msra.mxu1 %v13994_v31 }
 0x1dd   : > { %14140 = vmatprep.subr.bf16.mxu1 %v17047_v0 }
 0x1df   : > { %13971 = vmatpush3.bf16.msra.mxu0 %v17725_v33 }
 0x1e0   : > { %13972 = vmatprep.subr.bf16.mxu0 %v17047_v0  ;;  %14142 = vmatpush3.bf16.msra.mxu1 %v13997_v32 }
 0x1e1   : > { %14143 = vmatprep.subr.bf16.mxu1 %v17047_v0 }
 0x1e3   : > { %13974 = vmatpush3.bf16.msra.mxu0 %v17776_v38  ;;  %13820 = vmatmul.mubr.f32.vlgmr.msra.gmra.mrb[0].mxu1 %v1473_v46  ;;  %v15513_v38 = vld [vmem:[#allocation12 + $0xb0] ss:$8 sps:$4 sm:$0xff]  }
 0x1e4   : > { %13975 = vmatprep.subr.bf16.mxu0 %v17047_v0  ;;  %14145 = vmatpush3.bf16.msra.mxu1 %v17553_v15 }
 0x1e5   : > { %14146 = vmatprep.subr.bf16.mxu1 %v17047_v0  ;;  %13854 = vmatprep.mubr.msk.f32.mxu1 %vm17048_vm0, %v20580_v7 }
 0x1e6   : > { %13575 = vmatmul.mubr.f32.vlgmr.msra.gmra.mrb[0].mxu0 %v17781_v60 }
 0x1e7   : > { %13977 = vmatpush3.bf16.msra.mxu0 %v13976_v54  ;;  %13609 = vmatprep.mubr.msk.f32.mxu0 %vm17048_vm0, %v20580_v7  ;;  %v15524_v54 = vld [vmem:[#allocation12 + $0xe4] ss:$8 sps:$4 sm:$0xff]  }
 0x1e8   : > { %13978 = vmatprep.subr.bf16.mxu0 %v17047_v0  ;;  %14148 = vmatpush3.bf16.msra.mxu1 %v17561_v20 }
 0x1e9   : > { %14149 = vmatprep.subr.bf16.mxu1 %v17047_v0 }
 0x1eb   : > { %13980 = vmatpush3.bf16.msra.mxu0 %v13979_v49  ;;  %v658_v49 = vld [vmem:[#allocation2 + $0x40] sm:$0x1] }
 0x1ec   : > { %13981 = vmatprep.subr.bf16.mxu0 %v17047_v0  ;;  %14151 = vmatpush3.bf16.msra.mxu1 %v17563_v21 }
 0x1ed   : > { %14152 = vmatprep.subr.bf16.mxu1 %v17047_v0 }
 0x1ef   : > { %13983 = vmatpush3.bf16.msra.mxu0 %v13982_v16  ;;  %v659_v16 = vsel %vm17985_vm3, 0, %v658_v49 }
 0x1f0   : > { %13984 = vmatprep.subr.bf16.mxu0 %v17047_v0  ;;  %14154 = vmatpush3.bf16.msra.mxu1 %v17601_v50  ;;  %660 = vst [vmem:[#allocation2 + $0x40] sm:$0x1] %v659_v16 }
 0x1f1   : > { %14155 = vmatprep.subr.bf16.mxu1 %v17047_v0 }
 0x1f3   : > { %13986 = vmatpush3.bf16.msra.mxu0 %v13985_v17 }
 0x1f4   : > { %13987 = vmatprep.subr.bf16.mxu0 %v17047_v0  ;;  %14157 = vmatpush3.bf16.msra.mxu1 %v17642_v12 }
 0x1f5   : > { %14158 = vmatprep.subr.bf16.mxu1 %v17047_v0 }
 0x1f7   : > { %13989 = vmatpush3.bf16.msra.mxu0 %v13988_v18  ;;  %v15525_v18 = vld [vmem:[#allocation12 + $0xf0] ss:$8 sps:$4 sm:$0xff]  }
 0x1f8   : > { %13990 = vmatprep.subr.bf16.mxu0 %v17047_v0  ;;  %14160 = vmatpush3.bf16.msra.mxu1 %v17673_v42 }
 0x1f9   : > { %14161 = vmatprep.subr.bf16.mxu1 %v17047_v0 }
 0x1fb   : > { %13992 = vmatpush3.bf16.msra.mxu0 %v13991_v22  ;;  %v15534_v22 = vld [vmem:[#allocation12 + $0x4] ss:$8 sps:$4 sm:$0xff]  }
 0x1fc   : > { %13993 = vmatprep.subr.bf16.mxu0 %v17047_v0  ;;  %14163 = vmatpush3.bf16.msra.mxu1 %v17705_v28 }
 0x1fd   : > { %14164 = vmatprep.subr.bf16.mxu1 %v17047_v0 }
 0x1ff   : > { %13995 = vmatpush3.bf16.msra.mxu0 %v13994_v31 }
 0x200   : > { %13996 = vmatprep.subr.bf16.mxu0 %v17047_v0  ;;  %14166 = vmatpush3.bf16.msra.mxu1 %v17715_v45 }
 0x201   : > { %14167 = vmatprep.subr.bf16.mxu1 %v17047_v0 }
 0x203   : > { %13998 = vmatpush3.bf16.msra.mxu0 %v13997_v32  ;;  %13855 = vmatmul.mubr.f32.vlgmr.msra.gmra.mrb[0].mxu1 %v1474_v53 }
 0x204   : > { %13999 = vmatprep.subr.bf16.mxu0 %v17047_v0  ;;  %14169 = vmatpush3.bf16.msra.mxu1 %v17731_v51 }
 0x205   : > { %14170 = vmatprep.subr.bf16.mxu1 %v17047_v0  ;;  %13889 = vmatprep.mubr.msk.f32.mxu1 %vm17048_vm0, %v20580_v7 }
 0x206   : > { %13610 = vmatmul.mubr.f32.vlgmr.msra.gmra.mrb[0].mxu0 %v17784_v30  ;;  %v685_v30 = vld [vmem:[#allocation2 + $0x30] sm:$0x10] }
 0x207   : > { %14001 = vmatpush3.bf16.msra.mxu0 %v17553_v15  ;;  %13644 = vmatprep.mubr.msk.f32.mxu0 %vm17048_vm0, %v20580_v7 }
 0x208   : > { %14002 = vmatprep.subr.bf16.mxu0 %v17047_v0  ;;  %14172 = vmatpush3.bf16.msra.mxu1 %v17737_v62 }
 0x209   : > { %14173 = vmatprep.subr.bf16.mxu1 %v17047_v0 }
 0x20b   : > { %14004 = vmatpush3.bf16.msra.mxu0 %v17561_v20 }
 0x20c   : > { %14005 = vmatprep.subr.bf16.mxu0 %v17047_v0  ;;  %14175 = vmatpush3.bf16.msra.mxu1 %v17745_v9 }
 0x20d   : > { %14176 = vmatprep.subr.bf16.mxu1 %v17047_v0 }
 0x20f   : > { %14007 = vmatpush3.bf16.msra.mxu0 %v17563_v21 }
 0x210   : > { %14008 = vmatprep.subr.bf16.mxu0 %v17047_v0  ;;  %14178 = vmatpush3.bf16.msra.mxu1 %v17751_v25 }
 0x211   : > { %14179 = vmatprep.subr.bf16.mxu1 %v17047_v0 }
 0x213   : > { %14010 = vmatpush3.bf16.msra.mxu0 %v17601_v50 }
 0x214   : > { %14011 = vmatprep.subr.bf16.mxu0 %v17047_v0  ;;  %14181 = vmatpush3.bf16.msra.mxu1 %v17759_v56 }
 0x215   : > { %14182 = vmatprep.subr.bf16.mxu1 %v17047_v0 }
 0x217   : > { %14013 = vmatpush3.bf16.msra.mxu0 %v17642_v12 }
 0x218   : > { %14014 = vmatprep.subr.bf16.mxu0 %v17047_v0  ;;  %14184 = vmatpush3.bf16.msra.mxu1 %v17765_v6 }
 0x219   : > { %14185 = vmatprep.subr.bf16.mxu1 %v17047_v0 }
 0x21b   : > { %14016 = vmatpush3.bf16.msra.mxu0 %v17673_v42 }
 0x21c   : > { %14017 = vmatprep.subr.bf16.mxu0 %v17047_v0  ;;  %14187 = vmatpush3.bf16.msra.mxu1 %v17771_v43 }
 0x21d   : > { %14188 = vmatprep.subr.bf16.mxu1 %v17047_v0 }
 0x21f   : > { %14019 = vmatpush3.bf16.msra.mxu0 %v17705_v28 }
 0x220   : > { %14020 = vmatprep.subr.bf16.mxu0 %v17047_v0  ;;  %14190 = vmatpush3.bf16.msra.mxu1 %v17773_v19 }
 0x221   : > { %14191 = vmatprep.subr.bf16.mxu1 %v17047_v0 }
 0x223   : > { %14022 = vmatpush3.bf16.msra.mxu0 %v17715_v45  ;;  %13890 = vmatmul.mubr.f32.vlgmr.msra.gmra.mrb[0].mxu1 %v17792_v5 }
 0x224   : > { %14023 = vmatprep.subr.bf16.mxu0 %v17047_v0  ;;  %14193 = vmatpush3.bf16.msra.mxu1 %v17553_v15 }
 0x225   : > { %14194 = vmatprep.subr.bf16.mxu1 %v17047_v0  ;;  %13924 = vmatprep.mubr.msk.f32.mxu1 %vm17048_vm0, %v20580_v7 }
 0x226   : > { %13645 = vmatmul.mubr.f32.vlgmr.msra.gmra.mrb[0].mxu0 %v833_v39  ;;  %v686_v39 = vsel %vm17991_vm6, 0, %v685_v30 }
 0x227   : > { %14025 = vmatpush3.bf16.msra.mxu0 %v17731_v51  ;;  %13679 = vmatprep.mubr.msk.f32.mxu0 %vm17048_vm0, %v20580_v7  ;;  %v647_v51 = vsel %vm17985_vm3, 0, %v646_v52  ;;  %687 = vst [vmem:[#allocation2 + $0x30] sm:$0x10] %v686_v39  ;;  %v16554_v52 = vld [vmem:[%s17517_s2] sm:$0xff] }
 0x228   : > { %14026 = vmatprep.subr.bf16.mxu0 %v17047_v0  ;;  %14196 = vmatpush3.bf16.msra.mxu1 %v17561_v20  ;;  %648 = vst [vmem:[#allocation2 + $0x20] sm:$0x1] %v647_v51  ;;  %v16555_v51 = vld [vmem:[%s17517_s2 + $0x8] sm:$0xff] }
 0x229   : > { %14197 = vmatprep.subr.bf16.mxu1 %v17047_v0 }
 0x22b   : > { %14028 = vmatpush3.bf16.msra.mxu0 %v17737_v62  ;;  %v649_v62 = vld [vmem:[#allocation2 + $0x28] sm:$0x1] }
 0x22c   : > { %14029 = vmatprep.subr.bf16.mxu0 %v17047_v0  ;;  %14199 = vmatpush3.bf16.msra.mxu1 %v17563_v21 }
 0x22d   : > { %14200 = vmatprep.subr.bf16.mxu1 %v17047_v0 }
 0x22f   : > { %14031 = vmatpush3.bf16.msra.mxu0 %v17745_v9  ;;  %v679_v9 = vld [vmem:[#allocation2 + $0x20] sm:$0x10] }
 0x230   : > { %14032 = vmatprep.subr.bf16.mxu0 %v17047_v0  ;;  %14202 = vmatpush3.bf16.msra.mxu1 %v17601_v50 }
 0x231   : > { %14203 = vmatprep.subr.bf16.mxu1 %v17047_v0 }
 0x233   : > { %14034 = vmatpush3.bf16.msra.mxu0 %v17751_v25  ;;  %v15512_v25 = vld [vmem:[#allocation12 + $0xa4] ss:$8 sps:$4 sm:$0xff]  }
 0x234   : > { %14035 = vmatprep.subr.bf16.mxu0 %v17047_v0  ;;  %14205 = vmatpush3.bf16.msra.mxu1 %v17642_v12 }
 0x235   : > { %14206 = vmatprep.subr.bf16.mxu1 %v17047_v0 }
 0x237   : > { %14037 = vmatpush3.bf16.msra.mxu0 %v17759_v56  ;;  %v650_v56 = vsel %vm17985_vm3, 0, %v649_v62 }
 0x238   : > { %14038 = vmatprep.subr.bf16.mxu0 %v17047_v0  ;;  %14208 = vmatpush3.bf16.msra.mxu1 %v17673_v42  ;;  %651 = vst [vmem:[#allocation2 + $0x28] sm:$0x1] %v650_v56  ;;  %v16557_v56 = vld [vmem:[%s17517_s2 + $0x18] sm:$0xff] }
 0x239   : > { %14209 = vmatprep.subr.bf16.mxu1 %v17047_v0 }
 0x23b   : > { %14040 = vmatpush3.bf16.msra.mxu0 %v17765_v6  ;;  %v680_v6 = vsel %vm17991_vm6, 0, %v679_v9  ;;  %v16556_v9 = vld [vmem:[%s17517_s2 + $0x10] sm:$0xff] }
 0x23c   : > { %14041 = vmatprep.subr.bf16.mxu0 %v17047_v0  ;;  %14211 = vmatpush3.bf16.msra.mxu1 %v17705_v28  ;;  %681 = vst [vmem:[#allocation2 + $0x20] sm:$0x10] %v680_v6 }
 0x23d   : > { %14212 = vmatprep.subr.bf16.mxu1 %v17047_v0 }
 0x23f   : > { %14043 = vmatpush3.bf16.msra.mxu0 %v17771_v43  ;;  %v15510_v43 = vld [vmem:[#allocation12 + $0xa0] ss:$8 sps:$4 sm:$0xff]  }
 0x240   : > { %14044 = vmatprep.subr.bf16.mxu0 %v17047_v0  ;;  %14214 = vmatpush3.bf16.msra.mxu1 %v17715_v45 }
 0x243   : > { %14046 = vmatpush3.bf16.msra.mxu0 %v17773_v19  ;;  %13925 = vmatmul.mubr.f32.vlgmr.msra.gmra.mrb[0].mxu1 %v17792_v5  ;;  %v15515_v19 = vld [vmem:[#allocation12 + $0xb4] ss:$8 sps:$4 sm:$0xff]   ;;  %v15522_v5 = vld [vmem:[#allocation12 + $0xe0] ss:$8 sps:$4 sm:$0xff]  }
 0x244   : > { %14047 = vmatprep.subr.bf16.mxu0 %v17047_v0 }
 0x246   : > { %13680 = vmatmul.mubr.f32.vlgmr.msra.gmra.mrb[0].mxu0 %v17781_v60 }
 0x247   : > { %14049 = vmatpush3.bf16.msra.mxu0 %v17553_v15  ;;  %13714 = vmatprep.mubr.msk.f32.mxu0 %vm17048_vm0, %v20580_v7 }
 0x248   : > { %14050 = vmatprep.subr.bf16.mxu0 %v17047_v0 }
 0x24b   : > { %14052 = vmatpush3.bf16.msra.mxu0 %v17561_v20 }
 0x24c   : > { %14053 = vmatprep.subr.bf16.mxu0 %v17047_v0 }
 0x24f   : > { %14055 = vmatpush3.bf16.msra.mxu0 %v17563_v21 }
 0x250   : > { %14056 = vmatprep.subr.bf16.mxu0 %v17047_v0 }
 0x253   : > { %14058 = vmatpush3.bf16.msra.mxu0 %v17601_v50 }
 0x254   : > { %14059 = vmatprep.subr.bf16.mxu0 %v17047_v0 }
 0x257   : > { %14061 = vmatpush3.bf16.msra.mxu0 %v17642_v12 }
 0x258   : > { %14062 = vmatprep.subr.bf16.mxu0 %v17047_v0 }
 0x25b   : > { %14064 = vmatpush3.bf16.msra.mxu0 %v17673_v42 }
 0x25c   : > { %14065 = vmatprep.subr.bf16.mxu0 %v17047_v0 }
 0x25f   : > { %14067 = vmatpush3.bf16.msra.mxu0 %v17705_v28 }
 0x260   : > { %14068 = vmatprep.subr.bf16.mxu0 %v17047_v0 }
 0x263   : > { %14070 = vmatpush3.bf16.msra.mxu0 %v17715_v45 }
 0x264   : > { %14071 = vmatprep.subr.bf16.mxu0 %v17047_v0 }
 0x266   : > { %13715 = vmatmul.mubr.f32.vlgmr.msra.gmra.mrb[0].mxu0 %v17781_v60  ;;  %v653_v60 = vsel %vm17985_vm3, 0, %v652_v1 }
 0x267   : > { %14073 = vmatpush3.bf16.msra.mxu0 %v17553_v15  ;;  %13749 = vmatprep.mubr.msk.f32.mxu0 %vm17048_vm0, %v20580_v7  ;;  %v1476_v15 = vand.u32 4294901760, %v17865_v55  ;;  %654 = vst [vmem:[#allocation2 + $0x30] sm:$0x1] %v653_v60  ;;  %v691_v7 = vld [vmem:[#allocation2 + $0x40] sm:$0x10] }
 0x268   : > { %14074 = vmatprep.subr.bf16.mxu0 %v17047_v0  ;;  %v692_v17 = vsel %vm17991_vm6, 0, %v691_v7 }
 0x269   : > { %693 = vst [vmem:[#allocation2 + $0x40] sm:$0x10] %v692_v17 }
 0x26b   : > { %14076 = vmatpush3.bf16.msra.mxu0 %v17561_v20  ;;  %v15506_v20 = vld [vmem:[#allocation12 + $0x84] ss:$8 sps:$4 sm:$0xff]  }
 0x26c   : > { %14077 = vmatprep.subr.bf16.mxu0 %v17047_v0 }
 0x26f   : > { %14079 = vmatpush3.bf16.msra.mxu0 %v17563_v21 }
 0x270   : > { %14080 = vmatprep.subr.bf16.mxu0 %v17047_v0 }
 0x273   : > { %14082 = vmatpush3.bf16.msra.mxu0 %v17601_v50  ;;  %v15504_v50 = vld [vmem:[#allocation12 + $0x80] ss:$8 sps:$4 sm:$0xff]  }
 0x274   : > { %14083 = vmatprep.subr.bf16.mxu0 %v17047_v0 }
 0x277   : > { %14085 = vmatpush3.bf16.msra.mxu0 %v17642_v12  ;;  %v670_v12 = vld [vmem:[#allocation2 + $0x8] sm:$0x10] }
 0x278   : > { %14086 = vmatprep.subr.bf16.mxu0 %v17047_v0  ;;  %v671_v37 = vsel %vm17991_vm6, 0, %v670_v12  ;;  %v2042_v12 = vlaneseq }
 0x279   : > { %672 = vst [vmem:[#allocation2 + $0x8] sm:$0x10] %v671_v37  ;;  %v694_v37 = vld [vmem:[#allocation2 + $0x48] sm:$0x10] }
 0x27a   : > { %v18039_v13 = vshrl.u32 %v2042_v12, 7  ;;  %v695_v41 = vsel %vm17991_vm6, 0, %v694_v37  ;;  %v18068_v12 = vld [vmem:[#allocation2] sm:$0x1f] }
 0x27b   : > { %14088 = vmatpush3.bf16.msra.mxu0 %v17673_v42  ;;  %v643_v42 = vld [vmem:[#allocation2 + $0x18] sm:$0x1]  ;;  %696 = vst [vmem:[#allocation2 + $0x48] sm:$0x10] %v695_v41  ;;  %v18072_v37 = vcombine.low %v18068_v12, %v18068_v12 }
 0x27c   : > { %14089 = vmatprep.subr.bf16.mxu0 %v17047_v0  ;;  %v644_v61 = vsel %vm17985_vm3, 0, %v643_v42  ;;  %20587 = vst [vmem:[#allocation37_spill] sm:$0xff] %v18039_v13 }
 0x27d   : > { %645 = vst [vmem:[#allocation2 + $0x18] sm:$0x1] %v644_v61  ;;  %v2039_v61 = vld [vmem:[#allocation9] sm:$0x1] }
 0x27f   : > { %14091 = vmatpush3.bf16.msra.mxu0 %v17705_v28  ;;  %v674_v28 = vsel %vm17991_vm6, 0, %v673_v27 }
 0x280   : > { %14092 = vmatprep.subr.bf16.mxu0 %v17047_v0  ;;  %v638_v0 = vsel %vm17985_vm3, 0, %v637_v3  ;;  %675 = vst [vmem:[#allocation2 + $0x10] sm:$0x10] %v674_v28 }
 0x281   : > { %639 = vst [vmem:[#allocation2 + $0x8] sm:$0x1] %v638_v0 }
 0x283   : > { %14094 = vmatpush3.bf16.msra.mxu0 %v17715_v45  ;;  %v676_v45 = vld [vmem:[#allocation2 + $0x18] sm:$0x10] }
 0x284   : > { %2539 = vmatprep.subr.bf16.mxu0 %v15506_v20  ;;  %v677_v33 = vsel %vm17991_vm6, 0, %v676_v45  ;;  %v661_v20 = vld [vmem:[#allocation2 + $0x48] sm:$0x1] }
 0x285   : > { %678 = vst [vmem:[#allocation2 + $0x18] sm:$0x10] %v677_v33 }
 0x286   : > { %13750 = vmatmul.mubr.f32.vlgmr.msra.gmra.mrb[2].mxu0 %v1476_v15 }
 0x287   : > { %2540 = vmatpush1.bf16.msra.mxu0 %v15504_v50  ;;  %2571 = vmatprep.mubr.bf16.mxu0 %v17050_v36  ;;  %v662_v50 = vsel %vm17985_vm3, 0, %v661_v20 }
 0x288   : > { %2541 = vmatprep.subr.bf16.mxu0 %v15509_v14  ;;  %663 = vst [vmem:[#allocation2 + $0x48] sm:$0x1] %v662_v50  ;;  %v2037_v14 = vld [vmem:[#allocation7] sm:$0x1] }
 0x28b   : > { %2542 = vmatpush1.bf16.msra.mxu0 %v15507_v58 }
 0x28c   : > { %2543 = vmatprep.subr.bf16.mxu0 %v15512_v25 }
 0x28f   : > { %2544 = vmatpush1.bf16.msra.mxu0 %v15510_v43 }
 0x290   : > { %2545 = vmatprep.subr.bf16.mxu0 %v15515_v19  ;;  %v16558_v19 = vld [vmem:[%s17517_s2 + $0x20] sm:$0xff] }
 0x293   : > { %2546 = vmatpush1.bf16.msra.mxu0 %v15513_v38 }
 0x294   : > { %2547 = vmatprep.subr.bf16.mxu0 %v15518_v44 }
 0x297   : > { %2548 = vmatpush1.bf16.msra.mxu0 %v15516_v10 }
 0x298   : > { %2549 = vmatprep.subr.bf16.mxu0 %v15521_v63 }
 0x29b   : > { %2550 = vmatpush1.bf16.msra.mxu0 %v15519_v4 }
 0x29c   : > { %2551 = vmatprep.subr.bf16.mxu0 %v15524_v54 }
 0x29f   : > { %2552 = vmatpush1.bf16.msra.mxu0 %v15522_v5 }
 0x2a0   : > { %2553 = vmatprep.subr.bf16.mxu0 %v15527_v23 }
 0x2a3   : > { %2554 = vmatpush1.bf16.msra.mxu0 %v15525_v18 }
 0x2a4   : > { %2716 = vmatprep.subr.bf16.mxu0 %v15534_v22 }
 0x316   : > { %v17983_v21 = vpop.f32.mrb[0].mxu1 }
 0x317   : > { %v13926_v57 = vpop.f32.mrb[1].mxu1 }
 0x339   : > { %v1387_v31 = vpop.f32.mrb[0].mxu0 }
 0x33a   : > { %v13716_v32 = vpop.f32.mrb[1].mxu0  ;;  %v2032_v53 = vmul.f32 %v1387_v31, %v1387_v31 }
 0x359   : > { %v1478_v46 = vpop.f32.mrb[2].mxu0 }
 0x35a   : > { %v14983_v55 = vadd.f32 %v17983_v21, %v1478_v46  ;;  %v13751_v15 = vpop.f32.mrb[3].mxu0  ;;  %v18042_v21 = vsub.s32 0, %v18039_v13 }
 0x35c   : > { %v2033_v57 = vsub.f32 %v14983_v55, %v2032_v53  ;;  %20588 = vst [vmem:[#allocation38_spill] sm:$0xff] %v18042_v21 }
 0x35e   : > { %v2034_v3 = vmax.f32 %v2033_v57, 0.0 }
 0x360   : > { %v2035_v0 = vadd.f32 1e-06, %v2034_v3 }
 0x362   : > { %16452 = vrsqrt.f32 %v2035_v0 }
 0x36c   : > { %v16453_v42 = vpop.eup %16452 }
 0x36d   : > { %v2038_v58 = vmul.f32 %v16453_v42, %v2037_v14 }
 0x36f   : > { %v2040_v27 = vmul.f32 %v2038_v58, %v1387_v31  ;;  %v2045_v28 = vrot.slane %v2038_v58, %v18042_v21 }
 0x371   : > { %v2041_v45 = vsub.f32 %v2039_v61, %v2040_v27  ;;  %v2046_v33 = vmul.f32 %v16554_v52, %v2045_v28  ;;  %v2047_v62 = vmul.f32 %v16555_v51, %v2045_v28  ;;  %v2048_v25 = vmul.f32 %v16556_v9, %v2045_v28 }
 0x372   : > { %v2049_v6 = vmul.f32 %v16557_v56, %v2045_v28  ;;  %v2050_v38 = vmul.f32 %v16558_v19, %v2045_v28  ;;  %v2051_v44 = vmul.f32 %v16559_v47, %v2045_v28  ;;  %v2052_v24 = vmul.f32 %v16560_v59, %v2045_v28 }
 0x373   : > { %v2058_v43 = vrot.slane %v2041_v45, %v18042_v21  ;;  %v2053_v34 = vmul.f32 %v16561_v29, %v2045_v28  ;;  %v12429_v52 = vcombine.high %v18068_v12, %v18068_v12  ;;  %v2316_v9 = vshrl.u32 %v18072_v37, 16 }
 0x375   : > { %v2060_v8 = vadd.f32 %v2058_v43, %v2046_v33  ;;  %v2061_v10 = vadd.f32 %v2058_v43, %v2047_v62  ;;  %v2062_v1 = vadd.f32 %v2058_v43, %v2048_v25  ;;  %v2063_v26 = vadd.f32 %v2058_v43, %v2049_v6 }
 0x376   : > { %v18056_v63 = vadd.f32 %v2058_v43, %v2050_v38  ;;  %v18058_v60 = vadd.f32 %v2058_v43, %v2051_v44  ;;  %v18060_v48 = vadd.f32 %v2058_v43, %v2052_v24  ;;  %v18062_v30 = vadd.f32 %v2058_v43, %v2053_v34 }
 0x377   : > { %v12412_v35 = vmul.f32 -1.442695, %v2060_v8  ;;  %v12413_v39 = vmul.f32 -1.442695, %v2061_v10  ;;  %v12414_v40 = vmul.f32 -1.442695, %v2062_v1 }
 0x378   : > { %v12415_v4 = vmul.f32 -1.442695, %v2063_v26  ;;  %v12416_v54 = vmul.f32 -1.442695, %v18056_v63  ;;  %v12417_v5 = vmul.f32 -1.442695, %v18058_v60 }
 0x379   : > { %16454 = vpow2.f32 %v12412_v35  ;;  %v12418_v23 = vmul.f32 -1.442695, %v18060_v48  ;;  %v12419_v49 = vmul.f32 -1.442695, %v18062_v30  ;;  %v2319_v25 = vshll.u32 %v18072_v37, 16 }
 0x37a   : > { %16456 = vpow2.f32 %v12413_v39  ;;  %v2228_v37 = vld [vmem:[#allocation2 + $0x28] sm:$0x1f] }
 0x37b   : > { %16458 = vpow2.f32 %v12414_v40 }
 0x37c   : > { %16460 = vpow2.f32 %v12415_v4 }
 0x37d   : > { %16462 = vpow2.f32 %v12416_v54 }
 0x37e   : > { %16464 = vpow2.f32 %v12417_v5 }
 0x37f   : > { %16466 = vpow2.f32 %v12418_v23 }
 0x380   : > { %16468 = vpow2.f32 %v12419_v49 }
 0x383   : > { %v16455_v7 = vpop.eup %16454 }
 0x384   : > { %v16457_v16 = vpop.eup %16456  ;;  %v2092_v17 = vadd.f32 1.0, %v16455_v7 }
 0x385   : > { %v16459_v18 = vpop.eup %16458  ;;  %v2093_v22 = vadd.f32 1.0, %v16457_v16 }
 0x386   : > { %v16461_v31 = vpop.eup %16460  ;;  %v2094_v32 = vadd.f32 1.0, %v16459_v18  ;;  %16470 = vrcp.f32 %v2092_v17  ;;  %v2216_v17 = vld [vmem:[#allocation2 + $0x8] sm:$0x1f]  ;;  %v2219_v18 = vld [vmem:[#allocation2 + $0x10] sm:$0x1f] }
 0x387   : > { %v16463_v46 = vpop.eup %16462  ;;  %v2095_v53 = vadd.f32 1.0, %v16461_v31  ;;  %16472 = vrcp.f32 %v2093_v22 }
 0x388   : > { %v16465_v55 = vpop.eup %16464  ;;  %v2096_v15 = vadd.f32 1.0, %v16463_v46  ;;  %16474 = vrcp.f32 %v2094_v32  ;;  %v2222_v46 = vld [vmem:[#allocation2 + $0x18] sm:$0x1f] }
 0x389   : > { %v16467_v20 = vpop.eup %16466  ;;  %v2097_v50 = vadd.f32 1.0, %v16465_v55  ;;  %16476 = vrcp.f32 %v2095_v53 }
 0x38a   : > { %v16469_v57 = vpop.eup %16468  ;;  %v2098_v3 = vadd.f32 1.0, %v16467_v20  ;;  %16478 = vrcp.f32 %v2096_v15 }
 0x38b   : > { %v2099_v0 = vadd.f32 1.0, %v16469_v57  ;;  %16480 = vrcp.f32 %v2097_v50  ;;  %v2225_v50 = vld [vmem:[#allocation2 + $0x20] sm:$0x1f] }
 0x38c   : > { %16482 = vrcp.f32 %v2098_v3 }
 0x38d   : > { %16484 = vrcp.f32 %v2099_v0 }
 0x390   : > { %v16471_v14 = vpop.eup %16470 }
 0x391   : > { %v16473_v41 = vpop.eup %16472  ;;  %v2116_v42 = vmul.f32 %v16471_v14, %v2060_v8 }
 0x392   : > { %v16475_v58 = vpop.eup %16474  ;;  %v2117_v61 = vmul.f32 %v16473_v41, %v2061_v10 }
 0x393   : > { %v16477_v27 = vpop.eup %16476  ;;  %v2118_v28 = vmul.f32 %v16475_v58, %v2062_v1  ;;  %v13270_v45 = vpack.c.bf16 %v2116_v42, %v2116_v42 }
 0x394   : > { %v16479_v33 = vpop.eup %16478  ;;  %v2119_v51 = vmul.f32 %v16477_v27, %v2063_v26  ;;  %v13271_v62 = vpack.c.bf16 %v2117_v61, %v2117_v61  ;;  %v2231_v27 = vld [vmem:[#allocation2 + $0x30] sm:$0x1f] }
 0x395   : > { %v16481_v56 = vpop.eup %16480  ;;  %v2120_v6 = vmul.f32 %v16479_v33, %v18056_v63  ;;  %v13272_v43 = vpack.c.bf16 %v2118_v28, %v2118_v28  ;;  %v2149_v19 = vshrl.u32 %v13270_v45, 16  ;;  %v2152_v38 = vshll.u32 %v13270_v45, 16 }
 0x396   : > { %v16483_v47 = vpop.eup %16482  ;;  %v2121_v44 = vmul.f32 %v16481_v56, %v18058_v60  ;;  %v13273_v59 = vpack.c.bf16 %v2119_v51, %v2119_v51  ;;  %v2156_v24 = vshrl.u32 %v13271_v62, 16  ;;  %v2159_v29 = vshll.u32 %v13271_v62, 16  ;;  %v2234_v51 = vld [vmem:[#allocation2 + $0x38] sm:$0x1f] }
 0x397   : > { %v16485_v34 = vpop.eup %16484  ;;  %v2122_v8 = vmul.f32 %v16483_v47, %v18060_v48  ;;  %v13274_v10 = vpack.c.bf16 %v2120_v6, %v2120_v6  ;;  %v2151_v1 = vrot.slane %v2149_v19, 7  ;;  %v2163_v26 = vshrl.u32 %v13272_v43, 16 }
 0x398   : > { %v2123_v35 = vmul.f32 %v16485_v34, %v18062_v30  ;;  %v13275_v39 = vpack.c.bf16 %v2121_v44, %v2121_v44  ;;  %v2158_v40 = vrot.slane %v2156_v24, 7  ;;  %v2166_v63 = vshll.u32 %v13272_v43, 16 }
 0x399   : > { %v13276_v4 = vpack.c.bf16 %v2122_v8, %v2122_v8  ;;  %v2154_v54 = vor.u32 %v2152_v38, %v2151_v1  ;;  %v2165_v5 = vrot.slane %v2163_v26, 7  ;;  %v2170_v23 = vshrl.u32 %v13273_v59, 16  ;;  %v2237_v38 = vld [vmem:[#allocation2 + $0x40] sm:$0x1f] }
 0x39a   : > { %v13277_v49 = vpack.c.bf16 %v2123_v35, %v2123_v35  ;;  %v2161_v60 = vor.u32 %v2159_v29, %v2158_v40  ;;  %v2173_v7 = vshll.u32 %v13273_v59, 16  ;;  %v2177_v16 = vshrl.u32 %v13274_v10, 16 }
 0x39b   : > { %v2168_v22 = vor.u32 %v2166_v63, %v2165_v5  ;;  %v2172_v48 = vrot.slane %v2170_v23, 7  ;;  %v2180_v31 = vshll.u32 %v13274_v10, 16  ;;  %v2184_v32 = vshrl.u32 %v13275_v39, 16 }
 0x39c   : > { %v20589_v30 = vmov 0  ;;  %v2179_v53 = vrot.slane %v2177_v16, 7  ;;  %v2187_v55 = vshll.u32 %v13275_v39, 16  ;;  %v2191_v15 = vshrl.u32 %v13276_v4, 16 }
 0x39d   : > { %v20590_v30 = vsel %vm18084_vm9, 4294967295, %v20589_v30  ;;  %v2194_v20 = vshll.u32 %v13276_v4, 16  ;;  %v2175_v57 = vor.u32 %v2173_v7, %v2172_v48  ;;  %v2186_v3 = vrot.slane %v2184_v32, 7 }
 0x39e   : > { %20591 = vst [vmem:[#allocation39_spill] sm:$0xff] %v20590_v30  ;;  %v2198_v0 = vshrl.u32 %v13277_v49, 16  ;;  %v2201_v14 = vshll.u32 %v13277_v49, 16  ;;  %v2182_v41 = vor.u32 %v2180_v31, %v2179_v53  ;;  %v2193_v42 = vrot.slane %v2191_v15, 7 }
 0x39f   : > { %v2217_v58 = vsel %vm18084_vm9, %v2154_v54, %v2216_v17  ;;  %v2220_v61 = vsel %vm18084_vm9, %v2161_v60, %v2219_v18  ;;  %v2189_v28 = vor.u32 %v2187_v55, %v2186_v3  ;;  %v2223_v45 = vsel %vm18084_vm9, %v2168_v22, %v2222_v46 }
 0x3a0   : > { %2218 = vst [vmem:[#allocation2 + $0x8] sm:$0x1f] %v2217_v58  ;;  %2221 = vst [vmem:[#allocation2 + $0x10] sm:$0x1f] %v2220_v61  ;;  %v2226_v33 = vsel %vm18084_vm9, %v2175_v57, %v2225_v50  ;;  %v2200_v62 = vrot.slane %v2198_v0, 7  ;;  %v2196_v56 = vor.u32 %v2194_v20, %v2193_v42  ;;  %v2318_v6 = vrot.slane %v2316_v9, 4 }
 0x3a1   : > { %v2321_v43 = vrot.slane %v2319_v25, 5  ;;  %2224 = vst [vmem:[#allocation2 + $0x18] sm:$0x1f] %v2223_v45  ;;  %2227 = vst [vmem:[#allocation2 + $0x20] sm:$0x1f] %v2226_v33  ;;  %v2229_v19 = vsel %vm18084_vm9, %v2182_v41, %v2228_v37  ;;  %v2232_v47 = vsel %vm18084_vm9, %v2189_v28, %v2231_v27  ;;  %v2325_v24 = vshll.u32 %v12429_v52, 16 }
 0x3a2   : > { %2230 = vst [vmem:[#allocation2 + $0x28] sm:$0x1f] %v2229_v19  ;;  %v2203_v44 = vor.u32 %v2201_v14, %v2200_v62  ;;  %2233 = vst [vmem:[#allocation2 + $0x30] sm:$0x1f] %v2232_v47  ;;  %v2235_v59 = vsel %vm18084_vm9, %v2196_v56, %v2234_v51  ;;  %v20592_v48 = vmov 0 }
 0x3a3   : > { %2236 = vst [vmem:[#allocation2 + $0x38] sm:$0x1f] %v2235_v59  ;;  %v2322_v25 = vor.u32 %v2321_v43, %v2318_v6  ;;  %v2327_v40 = vrot.slane %v2325_v24, 5  ;;  %v20593_v48 = vsel %vm18113_vm12, 4294967295, %v20592_v48  ;;  %v15532_v42 = vld [vmem:[#allocation12] ss:$8 sps:$4 sm:$0xff]  }
 0x3a4   : > { %v2238_v9 = vsel %vm18084_vm9, %v2203_v44, %v2237_v38  ;;  %20594 = vst [vmem:[#allocation40_spill] sm:$0xff] %v20593_v48  ;;  %v15537_v6 = vld [vmem:[#allocation12 + $0x14] ss:$8 sps:$4 sm:$0xff]   ;;  %v15535_v24 = vld [vmem:[#allocation12 + $0x10] ss:$8 sps:$4 sm:$0xff]  }
 0x3a5   : > { %2239 = vst [vmem:[#allocation2 + $0x40] sm:$0x1f] %v2238_v9  ;;  %v2323_v39 = vrot.slane %v2322_v25, 4  ;;  %v5047_v48 = vld [vmem:[#allocation18 + $0xf0] sm:$0xff] }
 0x3a7   : > { %v2265_v29 = vld [vmem:[#allocation2 + $0x8] sm:$0x1f]  ;;  %v2266_v34 = vld [vmem:[#allocation2 + $0x10] sm:$0x1f]  ;;  %v2328_v0 = vsel %vm18113_vm12, %v2323_v39, %v2327_v40 }
 0x3a8   : > { %v12430_v8 = vcombine.low %v2265_v29, %v2265_v29  ;;  %v12431_v10 = vcombine.high %v2265_v29, %v2265_v29  ;;  %v2267_v1 = vld [vmem:[#allocation2 + $0x18] sm:$0x1f]  ;;  %v12432_v26 = vcombine.low %v2266_v34, %v2266_v34  ;;  %v18107_v35 = vld [vmem:[#allocation2 + $0x20] sm:$0x1f]  ;;  %v12433_v5 = vcombine.high %v2266_v34, %v2266_v34 }
 0x3a9   : > { %v12434_v63 = vcombine.low %v2267_v1, %v2267_v1  ;;  %v2269_v60 = vld [vmem:[#allocation2 + $0x28] sm:$0x1f]  ;;  %v12436_v7 = vcombine.low %v18107_v35, %v18107_v35  ;;  %v12435_v31 = vcombine.high %v2267_v1, %v2267_v1  ;;  %v2270_v27 = vld [vmem:[#allocation2 + $0x30] sm:$0x1f]  ;;  %v12437_v29 = vcombine.high %v18107_v35, %v18107_v35  ;;  %v15544_v1 = vld [vmem:[#allocation12 + $0x24] ss:$8 sps:$4 sm:$0xff]  }
 0x3aa   : > { %v2330_v4 = vshrl.u32 %v12430_v8, 16  ;;  %v2333_v54 = vshll.u32 %v12430_v8, 16  ;;  %v2344_v23 = vshrl.u32 %v12432_v26, 16  ;;  %v2347_v12 = vshll.u32 %v12432_v26, 16  ;;  %v2271_v62 = vld [vmem:[#allocation2 + $0x38] sm:$0x1f] }
 0x3ab   : > { %v2358_v52 = vshrl.u32 %v12434_v63, 16  ;;  %v2361_v49 = vshll.u32 %v12434_v63, 16  ;;  %v2339_v18 = vshll.u32 %v12431_v10, 16  ;;  %v12438_v15 = vcombine.low %v2269_v60, %v2269_v60 }
 0x3ac   : > { %v2332_v16 = vrot.slane %v2330_v4, 4  ;;  %v2335_v17 = vrot.slane %v2333_v54, 5  ;;  %v2346_v22 = vrot.slane %v2344_v23, 4  ;;  %v2349_v32 = vrot.slane %v2347_v12, 5 }
 0x3ad   : > { %v2360_v46 = vrot.slane %v2358_v52, 4  ;;  %v2363_v53 = vrot.slane %v2361_v49, 5  ;;  %v2372_v57 = vshrl.u32 %v12436_v7, 16  ;;  %v2375_v3 = vshll.u32 %v12436_v7, 16  ;;  %v15547_v52 = vld [vmem:[#allocation12 + $0x34] ss:$8 sps:$4 sm:$0xff]  }
 0x3ae   : > { %v2336_v55 = vor.u32 %v2335_v17, %v2332_v16  ;;  %v2350_v20 = vor.u32 %v2349_v32, %v2346_v22  ;;  %v2341_v37 = vrot.slane %v2339_v18, 5  ;;  %v2386_v41 = vshrl.u32 %v12438_v15, 16  ;;  %v15545_v22 = vld [vmem:[#allocation12 + $0x30] ss:$8 sps:$4 sm:$0xff]  }
 0x3af   : > { %v2364_v50 = vor.u32 %v2363_v53, %v2360_v46  ;;  %v2353_v58 = vshll.u32 %v12433_v5, 16  ;;  %v2367_v61 = vshll.u32 %v12435_v31, 16  ;;  %v2389_v51 = vshll.u32 %v12438_v15, 16  ;;  %v15542_v5 = vld [vmem:[#allocation12 + $0x20] ss:$8 sps:$4 sm:$0xff]  }
 0x3b0   : > { %v2337_v14 = vrot.slane %v2336_v55, 4  ;;  %v2351_v45 = vrot.slane %v2350_v20, 4  ;;  %v2374_v43 = vrot.slane %v2372_v57, 4  ;;  %v2377_v19 = vrot.slane %v2375_v3, 5  ;;  %v15554_v55 = vld [vmem:[#allocation12 + $0x44] ss:$8 sps:$4 sm:$0xff]  }
 0x3b1   : > { %v2365_v33 = vrot.slane %v2364_v50, 4  ;;  %v2388_v38 = vrot.slane %v2386_v41, 4  ;;  %v2391_v47 = vrot.slane %v2389_v51, 5  ;;  %v12440_v44 = vcombine.low %v2270_v27, %v2270_v27  ;;  %v15552_v3 = vld [vmem:[#allocation12 + $0x40] ss:$8 sps:$4 sm:$0xff]  }
 0x3b2   : > { %v2342_v28 = vsel %vm18113_vm12, %v2337_v14, %v2341_v37  ;;  %v2355_v59 = vrot.slane %v2353_v58, 5  ;;  %v2369_v9 = vrot.slane %v2367_v61, 5  ;;  %v12442_v25 = vcombine.low %v2271_v62, %v2271_v62  ;;  %v15557_v41 = vld [vmem:[#allocation12 + $0x54] ss:$8 sps:$4 sm:$0xff]   ;;  %v15555_v61 = vld [vmem:[#allocation12 + $0x50] ss:$8 sps:$4 sm:$0xff]  }
 0x3b3   : > { %v12444_v56 = vcombine.low %v2328_v0, %v2342_v28  ;;  %v12439_v34 = vcombine.high %v2269_v60, %v2269_v60  ;;  %v2378_v26 = vor.u32 %v2377_v19, %v2374_v43  ;;  %v2392_v39 = vor.u32 %v2391_v47, %v2388_v38  ;;  %v15565_v43 = vld [vmem:[#allocation12 + $0x70] ss:$8 sps:$4 sm:$0xff]   ;;  %v15571_v19 = vld [vmem:[#allocation12 + $0x104] ss:$8 sps:$4 sm:$0xff]   ;;  %v15569_v38 = vld [vmem:[#allocation12 + $0x100] ss:$8 sps:$4 sm:$0xff]  }
 0x3b4   : > { %v2356_v8 = vsel %vm18113_vm12, %v2351_v45, %v2355_v59  ;;  %v2370_v10 = vsel %vm18113_vm12, %v2365_v33, %v2369_v9  ;;  %v2400_v40 = vshrl.u32 %v12440_v44, 16  ;;  %v2403_v63 = vshll.u32 %v12440_v44, 16  ;;  %v15564_v45 = vld [vmem:[#allocation12 + $0x64] ss:$8 sps:$4 sm:$0xff]   ;;  %v15574_v44 = vld [vmem:[#allocation12 + $0x114] ss:$8 sps:$4 sm:$0xff]  }
 0x3b5   : > { %2572 = vmatmul.mubr.bf16.vlgmr.msra.gmra.mrb[4].mxu0 %v12444_v56  ;;  %v2414_v4 = vshrl.u32 %v12442_v25, 16  ;;  %v2417_v54 = vshll.u32 %v12442_v25, 16  ;;  %v2381_v23 = vshll.u32 %v12437_v29, 16  ;;  %v2395_v12 = vshll.u32 %v12439_v34, 16  ;;  %v15568_v47 = vld [vmem:[#allocation2] ss:$8 sps:$4 sm:$0xff]  }
 0x3b6   : > { %2717 = vmatpush1.bf16.msra.mxu0 %v15532_v42  ;;  %2581 = vmatprep.mubr.bf16.mxu0 %v17050_v36  ;;  %v12445_v35 = vcombine.low %v2356_v8, %v2370_v10  ;;  %v2379_v49 = vrot.slane %v2378_v26, 4  ;;  %v2393_v60 = vrot.slane %v2392_v39, 4  ;;  %v2402_v7 = vrot.slane %v2400_v40, 4  ;;  %v15572_v59 = vld [vmem:[#allocation12 + $0x110] ss:$8 sps:$4 sm:$0xff]  }
 0x3b7   : > { %2718 = vmatprep.subr.bf16.mxu0 %v15537_v6  ;;  %v2405_v16 = vrot.slane %v2403_v63, 5  ;;  %v2416_v17 = vrot.slane %v2414_v4, 4  ;;  %v2419_v18 = vrot.slane %v2417_v54, 5  ;;  %v2383_v31 = vrot.slane %v2381_v23, 5  ;;  %v15567_v6 = vld [vmem:[#allocation12 + $0x74] ss:$8 sps:$4 sm:$0xff]  }
 0x3b8   : > { %v2397_v32 = vrot.slane %v2395_v12, 5  ;;  %v12441_v46 = vcombine.high %v2270_v27, %v2270_v27  ;;  %v12443_v53 = vcombine.high %v2271_v62, %v2271_v62  ;;  %v15562_v62 = vld [vmem:[#allocation12 + $0x60] ss:$8 sps:$4 sm:$0xff]   ;;  %v15578_v9 = vld [vmem:[#allocation12 + $0x124] ss:$8 sps:$4 sm:$0xff]  }
 0x3b9   : > { %v2384_v15 = vsel %vm18113_vm12, %v2379_v49, %v2383_v31  ;;  %v2406_v50 = vor.u32 %v2405_v16, %v2402_v7  ;;  %v2420_v57 = vor.u32 %v2419_v18, %v2416_v17  ;;  %v15576_v25 = vld [vmem:[#allocation12 + $0x120] ss:$8 sps:$4 sm:$0xff]   ;;  %v15581_v29 = vld [vmem:[#allocation12 + $0x134] ss:$8 sps:$4 sm:$0xff]   ;;  %v15579_v34 = vld [vmem:[#allocation12 + $0x130] ss:$8 sps:$4 sm:$0xff]  }
 0x3ba   : > { %2719 = vmatpush1.bf16.msra.mxu0 %v15535_v24  ;;  %v2398_v20 = vsel %vm18113_vm12, %v2393_v60, %v2397_v32  ;;  %v2409_v0 = vshll.u32 %v12441_v46, 16  ;;  %v2423_v14 = vshll.u32 %v12443_v53, 16  ;;  %v15575_v24 = vld [vmem:[#allocation2 + $0x10] ss:$8 sps:$4 sm:$0xff]   ;;  %v15583_v10 = vld [vmem:[#allocation12 + $0x140] ss:$8 sps:$4 sm:$0xff]  }
 0x3bb   : > { %2720 = vmatprep.subr.bf16.mxu0 %v15544_v1  ;;  %v12446_v37 = vcombine.low %v2384_v15, %v2398_v20  ;;  %v2407_v42 = vrot.slane %v2406_v50, 4  ;;  %v2421_v58 = vrot.slane %v2420_v57, 4  ;;  %v15585_v8 = vld [vmem:[#allocation12 + $0x144] ss:$8 sps:$4 sm:$0xff]   ;;  %v15588_v26 = vld [vmem:[#allocation12 + $0x154] ss:$8 sps:$4 sm:$0xff]  }
 0x3bc   : > { %v2411_v27 = vrot.slane %v2409_v0, 5  ;;  %v2425_v28 = vrot.slane %v2423_v14, 5  ;;  %v15582_v1 = vld [vmem:[#allocation2 + $0x20] ss:$8 sps:$4 sm:$0xff]   ;;  %v15586_v63 = vld [vmem:[#allocation12 + $0x150] ss:$8 sps:$4 sm:$0xff]  }
 0x3bd   : > { %2582 = vmatmul.mubr.bf16.gmra.mrb[8].mxu0 %v12445_v35  ;;  %v2789_v39 = vld [vmem:[#allocation2] sm:$0x1e]  ;;  %v2790_v40 = vld [vmem:[#allocation2 + $0x8] sm:$0x1e]  ;;  %v15590_v35 = vld [vmem:[#allocation12 + $0x160] ss:$8 sps:$4 sm:$0xff]  }
 0x3be   : > { %2721 = vmatpush1.bf16.msra.mxu0 %v15542_v5  ;;  %2591 = vmatprep.mubr.bf16.mxu0 %v17050_v36  ;;  %v2412_v33 = vsel %vm18113_vm12, %v2407_v42, %v2411_v27  ;;  %v2426_v51 = vsel %vm18113_vm12, %v2421_v58, %v2425_v28  ;;  %v15592_v4 = vld [vmem:[#allocation12 + $0x164] ss:$8 sps:$4 sm:$0xff]   ;;  %v12484_v54 = vcombine.low %v2789_v39, %v2789_v39  ;;  %v15595_v49 = vld [vmem:[#allocation12 + $0x174] ss:$8 sps:$4 sm:$0xff]   ;;  %v20595_v16 = vmov 0 }
 0x3bf   : > { %2722 = vmatprep.subr.bf16.mxu0 %v15547_v52  ;;  %v12447_v56 = vcombine.low %v2412_v33, %v2426_v51  ;;  %v12485_v5 = vcombine.high %v2789_v39, %v2789_v39  ;;  %v12486_v23 = vcombine.low %v2790_v40, %v2790_v40  ;;  %v12487_v12 = vcombine.high %v2790_v40, %v2790_v40  ;;  %v15589_v52 = vld [vmem:[#allocation2 + $0x30] ss:$8 sps:$4 sm:$0xff]   ;;  %v15593_v32 = vld [vmem:[#allocation12 + $0x170] ss:$8 sps:$4 sm:$0xff]  }
 0x3c0   : > { %v12500_v60 = vrot.slane %v12484_v54, 9  ;;  %v20596_v16 = vsel %vm18142_vm15, 4294967295, %v20595_v16  ;;  %v2792_v31 = vld [vmem:[#allocation2 + $0x18] sm:$0x1e]  ;;  %v15605_v14 = vld [vmem:[#allocation12 + $0x194] ss:$8 sps:$4 sm:$0xff]  }
 0x3c1   : > { %v2842_v7 = vrot.slane %v12485_v5, 5  ;;  %20597 = vst [vmem:[#allocation41_spill] sm:$0xff] %v20596_v16  ;;  %v12501_v17 = vrot.slane %v12486_v23, 9  ;;  %v2846_v18 = vrot.slane %v12487_v12, 5  ;;  %v15602_v53 = vld [vmem:[#allocation12 + $0x184] ss:$8 sps:$4 sm:$0xff]   ;;  %v12490_v50 = vcombine.low %v2792_v31, %v2792_v31 }
 0x3c2   : > { %2723 = vmatpush1.bf16.msra.mxu0 %v15545_v22  ;;  %v2791_v22 = vld [vmem:[#allocation2 + $0x10] sm:$0x1e]  ;;  %v12491_v57 = vcombine.high %v2792_v31, %v2792_v31  ;;  %v2794_v27 = vld [vmem:[#allocation2 + $0x28] sm:$0x1e] }
 0x3c3   : > { %2724 = vmatprep.subr.bf16.mxu0 %v15554_v55  ;;  %v2843_v46 = vsel %vm18142_vm15, %v12500_v60, %v2842_v7  ;;  %v12488_v55 = vcombine.low %v2791_v22, %v2791_v22  ;;  %v2847_v15 = vsel %vm18142_vm15, %v12501_v17, %v2846_v18  ;;  %v12489_v20 = vcombine.high %v2791_v22, %v2791_v22  ;;  %v15603_v28 = vld [vmem:[#allocation12 + $0x190] ss:$8 sps:$4 sm:$0xff]   ;;  %v15625_v5 = vld [vmem:[#allocation12 + $0x1d4] ss:$8 sps:$4 sm:$0xff]   ;;  %v15632_v60 = vld [vmem:[#allocation12 + $0x1e4] ss:$8 sps:$4 sm:$0xff]  }
 0x3c4   : > { %v12508_v0 = vcombine.low %v2843_v46, %v2847_v15  ;;  %v12503_v42 = vrot.slane %v12490_v50, 9  ;;  %v2854_v58 = vrot.slane %v12491_v57, 5  ;;  %v15630_v18 = vld [vmem:[#allocation12 + $0x1e0] ss:$8 sps:$4 sm:$0xff]   ;;  %v15635_v31 = vld [vmem:[#allocation12 + $0x1f4] ss:$8 sps:$4 sm:$0xff]  }
 0x3c5   : > { %2592 = vmatmul.mubr.bf16.gmra.mrb[12].mxu0 %v12446_v37  ;;  %v12502_v37 = vrot.slane %v12488_v55, 9  ;;  %v15639_v46 = vld [vmem:[#allocation12 + $0x204] ss:$8 sps:$4 sm:$0xff]   ;;  %v15636_v55 = vld [vmem:[#allocation2 + $0x8] ss:$8 sps:$4 sm:$0xff]  }
 0x3c6   : > { %2725 = vmatpush1.bf16.msra.mxu0 %v15552_v3  ;;  %2601 = vmatprep.mubr.bf16.mxu0 %v17050_v36  ;;  %v15600_v3 = vld [vmem:[#allocation12 + $0x180] ss:$8 sps:$4 sm:$0xff]   ;;  %v15642_v15 = vld [vmem:[#allocation12 + $0x214] ss:$8 sps:$4 sm:$0xff]  }
 0x3c7   : > { %2726 = vmatprep.subr.bf16.mxu0 %v15557_v41  ;;  %v2850_v41 = vrot.slane %v12489_v20, 5  ;;  %v15640_v20 = vld [vmem:[#allocation12 + $0x210] ss:$8 sps:$4 sm:$0xff]   ;;  %v3291_v57 = vld [vmem:[#allocation2 + $0x10] sm:$0x1f] }
 0x3c8   : > { %v3290_v50 = vld [vmem:[#allocation2 + $0x8] sm:$0x1f] }
 0x3ca   : > { %2727 = vmatpush1.bf16.msra.mxu0 %v15555_v61  ;;  %v2793_v61 = vld [vmem:[#allocation2 + $0x20] sm:$0x1e] }
 0x3cb   : > { %2728 = vmatprep.subr.bf16.mxu0 %v15564_v45  ;;  %v15612_v45 = vld [vmem:[#allocation12 + $0x1a4] ss:$8 sps:$4 sm:$0xff]   ;;  %v12492_v33 = vcombine.low %v2793_v61, %v2793_v61  ;;  %v12493_v51 = vcombine.high %v2793_v61, %v2793_v61 }
 0x3cd   : > { %2602 = vmatmul.mubr.bf16.gmra.mrb[16].mxu0 %v12447_v56  ;;  %v2855_v56 = vsel %vm18142_vm15, %v12503_v42, %v2854_v58  ;;  %v15649_v42 = vld [vmem:[#allocation12 + $0x234] ss:$8 sps:$4 sm:$0xff]  }
 0x3ce   : > { %2729 = vmatpush1.bf16.msra.mxu0 %v15562_v62  ;;  %2748 = vmatprep.mubr.bf16.mxu0 %v17050_v36  ;;  %v2851_v62 = vsel %vm18142_vm15, %v12502_v37, %v2850_v41  ;;  %v15644_v37 = vld [vmem:[#allocation12 + $0x220] ss:$8 sps:$4 sm:$0xff]   ;;  %v15643_v41 = vld [vmem:[#allocation2 + $0x18] ss:$8 sps:$4 sm:$0xff]  }
 0x3cf   : > { %2730 = vmatprep.subr.bf16.mxu0 %v15567_v6  ;;  %v12494_v6 = vcombine.low %v2794_v27, %v2794_v27 }
 0x3d2   : > { %2731 = vmatpush1.bf16.msra.mxu0 %v15565_v43  ;;  %v12495_v43 = vcombine.high %v2794_v27, %v2794_v27 }
 0x3d3   : > { %2984 = vmatprep.subr.bf16.mxu0 %v15571_v19  ;;  %v15610_v19 = vld [vmem:[#allocation12 + $0x1a0] ss:$8 sps:$4 sm:$0xff]  }
 0x3d5   : > { %2749 = vmatmul.mubr.bf16.vlgmr.msra.gmra.mrb[4].mxu0 %v15568_v47  ;;  %v15615_v47 = vld [vmem:[#allocation12 + $0x1b4] ss:$8 sps:$4 sm:$0xff]  }
 0x3d6   : > { %2985 = vmatpush1.bf16.msra.mxu0 %v15569_v38  ;;  %2758 = vmatprep.mubr.bf16.mxu0 %v17050_v36  ;;  %v12509_v38 = vcombine.low %v2851_v62, %v2855_v56  ;;  %v3293_v62 = vld [vmem:[#allocation2 + $0x20] sm:$0x1f] }
 0x3d7   : > { %2986 = vmatprep.subr.bf16.mxu0 %v15574_v44  ;;  %v12504_v44 = vrot.slane %v12492_v33, 9  ;;  %v15653_v33 = vld [vmem:[#allocation12 + $0x244] ss:$8 sps:$4 sm:$0xff]  }
 0x3da   : > { %2987 = vmatpush1.bf16.msra.mxu0 %v15572_v59  ;;  %v2858_v59 = vrot.slane %v12493_v51, 5  ;;  %v3292_v51 = vld [vmem:[#allocation2 + $0x18] sm:$0x1f] }
 0x3db   : > { %2988 = vmatprep.subr.bf16.mxu0 %v15578_v9  ;;  %v2862_v9 = vrot.slane %v12495_v43, 5 }
 0x3dd   : > { %2759 = vmatmul.mubr.bf16.gmra.mrb[8].mxu0 %v15575_v24  ;;  %v2796_v24 = vld [vmem:[#allocation2 + $0x38] sm:$0x1e] }
 0x3de   : > { %2989 = vmatpush1.bf16.msra.mxu0 %v15576_v25  ;;  %2768 = vmatprep.mubr.bf16.mxu0 %v17050_v36  ;;  %v2795_v25 = vld [vmem:[#allocation2 + $0x30] sm:$0x1e]  ;;  %v12498_v40 = vcombine.low %v2796_v24, %v2796_v24 }
 0x3df   : > { %2990 = vmatprep.subr.bf16.mxu0 %v15581_v29  ;;  %v15613_v29 = vld [vmem:[#allocation12 + $0x1b0] ss:$8 sps:$4 sm:$0xff]  }
 0x3e2   : > { %2991 = vmatpush1.bf16.msra.mxu0 %v15579_v34  ;;  %v18156_v34 = vld [vmem:[#allocation3] sm:$0xff] }
 0x3e3   : > { %2992 = vmatprep.subr.bf16.mxu0 %v15585_v8  ;;  %v15622_v8 = vld [vmem:[#allocation12 + $0x1c4] ss:$8 sps:$4 sm:$0xff]  }
 0x3e5   : > { %2769 = vmatmul.mubr.bf16.gmra.mrb[12].mxu0 %v15582_v1  ;;  %v12497_v1 = vcombine.high %v2795_v25, %v2795_v25 }
 0x3e6   : > { %2993 = vmatpush1.bf16.msra.mxu0 %v15583_v10  ;;  %2778 = vmatprep.mubr.bf16.mxu0 %v17050_v36  ;;  %v12496_v10 = vcombine.low %v2795_v25, %v2795_v25  ;;  %v12551_v25 = vcombine.high %v3291_v57, %v3291_v57 }
 0x3e7   : > { %2994 = vmatprep.subr.bf16.mxu0 %v15588_v26  ;;  %v2859_v26 = vsel %vm18142_vm15, %v12504_v44, %v2858_v59  ;;  %v2866_v12 = vrot.slane %v12497_v1, 5  ;;  %v12554_v44 = vcombine.low %v3293_v62, %v3293_v62  ;;  %v15650_v59 = vld [vmem:[#allocation2 + $0x28] ss:$8 sps:$4 sm:$0xff]  }
 0x3e8   : > { %v12506_v23 = vrot.slane %v12496_v10, 9 }
 0x3ea   : > { %2995 = vmatpush1.bf16.msra.mxu0 %v15586_v63  ;;  %v12499_v63 = vcombine.high %v2796_v24, %v2796_v24  ;;  %v2867_v7 = vsel %vm18142_vm15, %v12506_v23, %v2866_v12 }
 0x3eb   : > { %2996 = vmatprep.subr.bf16.mxu0 %v15592_v4  ;;  %v15620_v4 = vld [vmem:[#allocation12 + $0x1c0] ss:$8 sps:$4 sm:$0xff]  }
 0x3ed   : > { %2779 = vmatmul.mubr.bf16.gmra.mrb[16].mxu0 %v15589_v52  ;;  %v2870_v52 = vrot.slane %v12499_v63, 5 }
 0x3ee   : > { %2997 = vmatpush1.bf16.msra.mxu0 %v15590_v35  ;;  %3016 = vmatprep.mubr.bf16.mxu0 %v17050_v36  ;;  %v12507_v35 = vrot.slane %v12498_v40, 9  ;;  %v15660_v40 = vld [vmem:[#allocation12 + $0x264] ss:$8 sps:$4 sm:$0xff]  }
 0x3ef   : > { %2998 = vmatprep.subr.bf16.mxu0 %v15595_v49  ;;  %v15623_v49 = vld [vmem:[#allocation12 + $0x1d0] ss:$8 sps:$4 sm:$0xff]  }
 0x3f0   : > { %v2871_v17 = vsel %vm18142_vm15, %v12507_v35, %v2870_v52  ;;  %v15658_v35 = vld [vmem:[#allocation12 + $0x260] ss:$8 sps:$4 sm:$0xff]  }
 0x3f1   : > { %v12511_v22 = vcombine.low %v2867_v7, %v2871_v17  ;;  %v15657_v17 = vld [vmem:[#allocation2 + $0x38] ss:$8 sps:$4 sm:$0xff]  }
 0x3f2   : > { %2999 = vmatpush1.bf16.msra.mxu0 %v15593_v32  ;;  %v15633_v32 = vld [vmem:[#allocation12 + $0x1f0] ss:$8 sps:$4 sm:$0xff]  }
 0x3f3   : > { %3201 = vmatprep.subr.bf16.mxu0 %v15602_v53  ;;  %v15637_v53 = vld [vmem:[#allocation12 + $0x200] ss:$8 sps:$4 sm:$0xff]  }
 0x3f5   : > { %3017 = vmatmul.mubr.bf16.vlgmr.msra.gmra.mrb[4].mxu0 %v12508_v0  ;;  %v12548_v0 = vcombine.low %v3290_v50, %v3290_v50 }
 0x3f6   : > { %3202 = vmatpush1.bf16.msra.mxu0 %v15600_v3  ;;  %3026 = vmatprep.mubr.bf16.mxu0 %v17050_v36  ;;  %v12505_v36 = vrot.slane %v12494_v6, 9  ;;  %v15646_v3 = vld [vmem:[#allocation12 + $0x224] ss:$8 sps:$4 sm:$0xff]  }
 0x3f7   : > { %3203 = vmatprep.subr.bf16.mxu0 %v15605_v14  ;;  %v12550_v14 = vcombine.low %v3291_v57, %v3291_v57  ;;  %v3339_v58 = vshrl.u32 %v12548_v0, 16  ;;  %v3342_v61 = vshll.u32 %v12548_v0, 16  ;;  %v15670_v0 = vld [vmem:[#allocation12 + $0x284] ss:$8 sps:$4 sm:$0xff]  }
 0x3f8   : > { %v2863_v39 = vsel %vm18142_vm15, %v12505_v36, %v2862_v9  ;;  %v15656_v36 = vld [vmem:[#allocation12 + $0x254] ss:$8 sps:$4 sm:$0xff]   ;;  %v12549_v9 = vcombine.high %v3290_v50, %v3290_v50 }
 0x3f9   : > { %v12510_v54 = vcombine.low %v2859_v26, %v2863_v39  ;;  %v3353_v27 = vshrl.u32 %v12550_v14, 16  ;;  %v3341_v56 = vrot.slane %v3339_v58, 4  ;;  %v3344_v6 = vrot.slane %v3342_v61, 5 }
 0x3fa   : > { %3204 = vmatpush1.bf16.msra.mxu0 %v15603_v28  ;;  %v3356_v28 = vshll.u32 %v12550_v14, 16  ;;  %v3381_v26 = vshrl.u32 %v12554_v44, 16  ;;  %v3384_v39 = vshll.u32 %v12554_v44, 16  ;;  %v3348_v63 = vshll.u32 %v12549_v9, 16 }
 0x3fb   : > { %3205 = vmatprep.subr.bf16.mxu0 %v15612_v45  ;;  %v15647_v45 = vld [vmem:[#allocation12 + $0x230] ss:$8 sps:$4 sm:$0xff]   ;;  %v3355_v43 = vrot.slane %v3353_v27, 4  ;;  %v3345_v24 = vor.u32 %v3344_v6, %v3341_v56  ;;  %v18185_v27 = vld [vmem:[#allocation2 + $0x38] sm:$0x1f] }
 0x3fc   : > { %v3386_v7 = vrot.slane %v3384_v39, 5  ;;  %v15673_v56 = vld [vmem:[#allocation12 + $0x294] ss:$8 sps:$4 sm:$0xff]  }
 0x3fd   : > { %3027 = vmatmul.mubr.bf16.gmra.mrb[8].mxu0 %v12509_v38  ;;  %v15651_v38 = vld [vmem:[#allocation12 + $0x240] ss:$8 sps:$4 sm:$0xff]   ;;  %v3346_v23 = vrot.slane %v3345_v24, 4 }
 0x3fe   : > { %3206 = vmatpush1.bf16.msra.mxu0 %v15610_v19  ;;  %3036 = vmatprep.mubr.bf16.mxu0 %v18156_v34  ;;  %v3358_v19 = vrot.slane %v3356_v28, 5  ;;  %v18187_v28 = vld [vmem:[#allocation2 + $0x40] sm:$0x1f] }
 0x3ff   : > { %3207 = vmatprep.subr.bf16.mxu0 %v15615_v47  ;;  %v12552_v47 = vcombine.low %v3292_v51, %v3292_v51  ;;  %v12562_v44 = vcombine.low %v18187_v28, %v18187_v28 }
 0x401   : > { %v3367_v10 = vshrl.u32 %v12552_v47, 16  ;;  %v3370_v1 = vshll.u32 %v12552_v47, 16  ;;  %v12560_v47 = vcombine.low %v18185_v27, %v18185_v27 }
 0x402   : > { %3208 = vmatpush1.bf16.msra.mxu0 %v15613_v29  ;;  %v3359_v29 = vor.u32 %v3358_v19, %v3355_v43 }
 0x403   : > { %3209 = vmatprep.subr.bf16.mxu0 %v15622_v8  ;;  %v15654_v8 = vld [vmem:[#allocation12 + $0x250] ss:$8 sps:$4 sm:$0xff]   ;;  %v3369_v52 = vrot.slane %v3367_v10, 4  ;;  %v15680_v10 = vld [vmem:[#allocation12 + $0x2a4] ss:$8 sps:$4 sm:$0xff]   ;;  %v3423_v39 = vshrl.u32 %v12560_v47, 16 }
 0x404   : > { %v3360_v12 = vrot.slane %v3359_v29, 4 }
 0x405   : > { %3037 = vmatmul.mubr.bf16.gmra.mrb[12].mxu0 %v12510_v54  ;;  %v18172_v54 = vld [vmem:[#allocation2 + $0x28] sm:$0x1f] }
 0x406   : > { %3210 = vmatpush1.bf16.msra.mxu0 %v15620_v4  ;;  %3046 = vmatprep.mubr.bf16.mxu0 %v18156_v34  ;;  %v3362_v4 = vshll.u32 %v12551_v25, 16  ;;  %v12557_v9 = vcombine.high %v18172_v54, %v18172_v54  ;;  %v15671_v25 = vld [vmem:[#allocation12 + $0x290] ss:$8 sps:$4 sm:$0xff]  }
 0x407   : > { %3211 = vmatprep.subr.bf16.mxu0 %v15625_v5  ;;  %v18174_v5 = vld [vmem:[#allocation2 + $0x30] sm:$0x1f] }
 0x408   : > { %v12559_v24 = vcombine.high %v18174_v5, %v18174_v5 }
 0x40a   : > { %3212 = vmatpush1.bf16.msra.mxu0 %v15623_v49  ;;  %v3372_v49 = vrot.slane %v3370_v1, 5 }
 0x40b   : > { %3213 = vmatprep.subr.bf16.mxu0 %v15632_v60  ;;  %v3383_v60 = vrot.slane %v3381_v26, 4 }
 0x40c   : > { %v3373_v57 = vor.u32 %v3372_v49, %v3369_v52 }
 0x40d   : > { %3047 = vmatmul.mubr.bf16.gmra.mrb[16].mxu0 %v12511_v22  ;;  %v3350_v22 = vrot.slane %v3348_v63, 5  ;;  %v3437_v63 = vshrl.u32 %v12562_v44, 16 }
 0x40e   : > { %3214 = vmatpush1.bf16.msra.mxu0 %v15630_v18  ;;  %3233 = vmatprep.mubr.bf16.mxu0 %v18156_v34  ;;  %v15663_v18 = vld [vmem:[#allocation12 + $0x274] ss:$8 sps:$4 sm:$0xff]  }
 0x40f   : > { %3215 = vmatprep.subr.bf16.mxu0 %v15635_v31  ;;  %v12556_v31 = vcombine.low %v18172_v54, %v18172_v54  ;;  %v3404_v54 = vshll.u32 %v12557_v9, 16 }
 0x411   : > { %v3395_v14 = vshrl.u32 %v12556_v31, 16 }
 0x412   : > { %3216 = vmatpush1.bf16.msra.mxu0 %v15633_v32  ;;  %v12558_v32 = vcombine.low %v18174_v5, %v18174_v5  ;;  %v15683_v5 = vld [vmem:[#allocation12 + $0x2b4] ss:$8 sps:$4 sm:$0xff]  }
 0x413   : > { %3562 = vmatprep.subr.bf16.mxu0 %v15639_v46  ;;  %v3364_v46 = vrot.slane %v3362_v4, 5  ;;  %v3397_v6 = vrot.slane %v3395_v14, 4  ;;  %v3440_v4 = vshll.u32 %v12562_v44, 16 }
 0x415   : > { %3234 = vmatmul.mubr.bf16.vlgmr.msra.gmra.mrb[4].mxu0 %v15636_v55  ;;  %v12553_v55 = vcombine.high %v3292_v51, %v3292_v51  ;;  %v3365_v50 = vsel %vm18113_vm12, %v3360_v12, %v3364_v46  ;;  %v3374_v51 = vrot.slane %v3373_v57, 4  ;;  %v3418_v12 = vshll.u32 %v12559_v24, 16 }
 0x416   : > { %3563 = vmatpush1.bf16.msra.mxu0 %v15637_v53  ;;  %3243 = vmatprep.mubr.bf16.mxu0 %v18156_v34  ;;  %v3351_v53 = vsel %vm18113_vm12, %v3346_v23, %v3350_v22  ;;  %v15678_v23 = vld [vmem:[#allocation12 + $0x2a0] ss:$8 sps:$4 sm:$0xff]   ;;  %v3406_v22 = vrot.slane %v3404_v54, 5 }
 0x417   : > { %3564 = vmatprep.subr.bf16.mxu0 %v15642_v15  ;;  %v12555_v15 = vcombine.high %v3293_v62, %v3293_v62  ;;  %v3376_v58 = vshll.u32 %v12553_v55, 16  ;;  %v3420_v46 = vrot.slane %v3418_v12, 5  ;;  %v12563_v55 = vcombine.high %v18187_v28, %v18187_v28  ;;  %v18230_v12 = vld [vmem:[#allocation2 + $0x30] sm:$0x1e] }
 0x419   : > { %v3390_v61 = vshll.u32 %v12555_v15, 16  ;;  %v3652_v15 = vld [vmem:[#allocation2 + $0x10] sm:$0x1e]  ;;  %v3446_v28 = vshll.u32 %v12563_v55, 16 }
 0x41a   : > { %3565 = vmatpush1.bf16.msra.mxu0 %v15640_v20  ;;  %v15661_v20 = vld [vmem:[#allocation12 + $0x270] ss:$8 sps:$4 sm:$0xff]  }
 0x41b   : > { %3566 = vmatprep.subr.bf16.mxu0 %v15646_v3  ;;  %v3387_v3 = vor.u32 %v3386_v7, %v3383_v60  ;;  %v3425_v60 = vrot.slane %v3423_v39, 4  ;;  %v3448_v9 = vrot.slane %v3446_v28, 5 }
 0x41d   : > { %3244 = vmatmul.mubr.bf16.gmra.mrb[8].mxu0 %v15643_v41  ;;  %v3409_v41 = vshrl.u32 %v12558_v32, 16  ;;  %v3388_v62 = vrot.slane %v3387_v3, 4 }
 0x41e   : > { %3567 = vmatpush1.bf16.msra.mxu0 %v15644_v37  ;;  %3253 = vmatprep.mubr.bf16.mxu0 %v18156_v34  ;;  %v3398_v37 = vshll.u32 %v12556_v31, 16  ;;  %v3651_v31 = vld [vmem:[#allocation2 + $0x8] sm:$0x1e] }
 0x41f   : > { %3568 = vmatprep.subr.bf16.mxu0 %v15649_v42  ;;  %v3412_v42 = vshll.u32 %v12558_v32, 16  ;;  %v3411_v19 = vrot.slane %v3409_v41, 4  ;;  %v15681_v32 = vld [vmem:[#allocation12 + $0x2b0] ss:$8 sps:$4 sm:$0xff]   ;;  %v12584_v14 = vcombine.low %v3651_v31, %v3651_v31  ;;  %v12586_v41 = vcombine.low %v3652_v15, %v3652_v15 }
 0x420   : > { %v3400_v43 = vrot.slane %v3398_v37, 5  ;;  %v12585_v37 = vcombine.high %v3651_v31, %v3651_v31  ;;  %v5018_v31 = vld [vmem:[#allocation18 + $0x8] sm:$0xff] }
 0x421   : > { %v5081_v55 = vand.u32 4294901760, %v5018_v31 }
 0x422   : > { %3569 = vmatpush1.bf16.msra.mxu0 %v15647_v45  ;;  %v12564_v45 = vcombine.low %v3351_v53, %v3365_v50  ;;  %v3401_v1 = vor.u32 %v3400_v43, %v3397_v6  ;;  %v12561_v53 = vcombine.high %v18185_v27, %v18185_v27  ;;  %v15690_v50 = vld [vmem:[#allocation12 + $0x2c4] ss:$8 sps:$4 sm:$0xff]   ;;  %v12600_v6 = vrot.slane %v12584_v14, 9 }
 0x423   : > { %3570 = vmatprep.subr.bf16.mxu0 %v15653_v33  ;;  %v15668_v33 = vld [vmem:[#allocation12 + $0x280] ss:$8 sps:$4 sm:$0xff]  }
 0x424   : > { %v3402_v52 = vrot.slane %v3401_v1, 4  ;;  %v3432_v27 = vshll.u32 %v12561_v53, 16 }
 0x425   : > { %3254 = vmatmul.mubr.bf16.gmra.mrb[12].mxu0 %v15650_v59  ;;  %v3378_v59 = vrot.slane %v3376_v58, 5  ;;  %v3653_v58 = vld [vmem:[#allocation2 + $0x18] sm:$0x1e] }
 0x426   : > { %3571 = vmatpush1.bf16.msra.mxu0 %v15651_v38  ;;  %3263 = vmatprep.mubr.bf16.mxu0 %v18156_v34  ;;  %v3414_v38 = vrot.slane %v3412_v42, 5  ;;  %v12587_v42 = vcombine.high %v3652_v15, %v3652_v15  ;;  %v12588_v43 = vcombine.low %v3653_v58, %v3653_v58  ;;  %v12589_v44 = vcombine.high %v3653_v58, %v3653_v58  ;;  %v5023_v58 = vld [vmem:[#allocation18 + $0x30] sm:$0xff] }
 0x427   : > { %3572 = vmatprep.subr.bf16.mxu0 %v15656_v36  ;;  %v3392_v36 = vrot.slane %v3390_v61, 5  ;;  %v3379_v29 = vsel %vm18113_vm12, %v3374_v51, %v3378_v59  ;;  %v15688_v61 = vld [vmem:[#allocation12 + $0x2c0] ss:$8 sps:$4 sm:$0xff]   ;;  %v3654_v51 = vld [vmem:[#allocation2 + $0x20] sm:$0x1e] }
 0x428   : > { %v3415_v26 = vor.u32 %v3414_v38, %v3411_v19  ;;  %v3701_v19 = vrot.slane %v12585_v37, 5  ;;  %v12601_v38 = vrot.slane %v12586_v41, 9  ;;  %v15691_v59 = vld [vmem:[#allocation12 + $0x2d0] ss:$8 sps:$4 sm:$0xff]   ;;  %v12591_v24 = vcombine.high %v3654_v51, %v3654_v51 }
 0x429   : > { %v18220_v39 = vrot.slane %v12588_v43, 9 }
 0x42a   : > { %3573 = vmatpush1.bf16.msra.mxu0 %v15654_v8  ;;  %v3393_v8 = vsel %vm18113_vm12, %v3388_v62, %v3392_v36  ;;  %v3416_v49 = vrot.slane %v3415_v26, 4  ;;  %v3434_v36 = vrot.slane %v3432_v27, 5  ;;  %v3702_v1 = vsel %vm18142_vm15, %v12600_v6, %v3701_v19 }
 0x42b   : > { %3574 = vmatprep.subr.bf16.mxu0 %v15660_v40  ;;  %v3426_v40 = vshll.u32 %v12560_v47, 16  ;;  %v3705_v47 = vrot.slane %v12587_v42, 5  ;;  %v5021_v42 = vld [vmem:[#allocation18 + $0x20] sm:$0xff]  ;;  %v18251_v27 = vsub.f32 %v5018_v31, %v5081_v55 }
 0x42c   : > { %v3421_v57 = vsel %vm18113_vm12, %v3416_v49, %v3420_v46  ;;  %v5017_v46 = vld [vmem:[#allocation18] sm:$0xff] }
 0x42d   : > { %3264 = vmatmul.mubr.bf16.gmra.mrb[16].mxu0 %v15657_v17  ;;  %v3428_v7 = vrot.slane %v3426_v40, 5  ;;  %v3439_v17 = vrot.slane %v3437_v63, 4  ;;  %v3706_v26 = vsel %vm18142_vm15, %v12601_v38, %v3705_v47  ;;  %v18222_v40 = vrot.slane %v12589_v44, 5  ;;  %v18224_v63 = vld [vmem:[#allocation2 + $0x28] sm:$0x1e] }
 0x42e   : > { %3575 = vmatpush1.bf16.msra.mxu0 %v15658_v35  ;;  %3594 = vmatprep.mubr.bf16.mxu0 %v18156_v34  ;;  %v12565_v35 = vcombine.low %v3379_v29, %v3393_v8  ;;  %v15700_v29 = vld [vmem:[#allocation12 + $0x2e4] ss:$8 sps:$4 sm:$0xff]   ;;  %v12608_v49 = vcombine.low %v3702_v1, %v3706_v26  ;;  %v15713_v47 = vld [vmem:[#allocation12 + $0x314] ss:$8 sps:$4 sm:$0xff]  }
 0x42f   : > { %3576 = vmatprep.subr.bf16.mxu0 %v15663_v18  ;;  %v3442_v18 = vrot.slane %v3440_v4, 5  ;;  %v3429_v3 = vor.u32 %v3428_v7, %v3425_v60  ;;  %v15698_v4 = vld [vmem:[#allocation12 + $0x2e0] ss:$8 sps:$4 sm:$0xff]   ;;  %v15710_v60 = vld [vmem:[#allocation12 + $0x304] ss:$8 sps:$4 sm:$0xff]   ;;  %v3710_v7 = vsel %vm18142_vm15, %v18220_v39, %v18222_v40 }
 0x430   : > { %v5030_v1 = vld [vmem:[#allocation18 + $0x68] sm:$0xff]  ;;  %v5032_v26 = vld [vmem:[#allocation18 + $0x78] sm:$0xff] }
 0x431   : > { %v3430_v62 = vrot.slane %v3429_v3, 4  ;;  %v5024_v3 = vld [vmem:[#allocation18 + $0x38] sm:$0xff] }
 0x432   : > { %3577 = vmatpush1.bf16.msra.mxu0 %v15661_v20  ;;  %v3407_v20 = vsel %vm18113_vm12, %v3402_v52, %v3406_v22  ;;  %v15701_v52 = vld [vmem:[#allocation12 + $0x2f0] ss:$8 sps:$4 sm:$0xff]   ;;  %v12594_v22 = vcombine.low %v18230_v12, %v18230_v12  ;;  %v5093_v41 = vand.u32 4294901760, %v5024_v3  ;;  %v3657_v40 = vld [vmem:[#allocation2 + $0x38] sm:$0x1e] }
 0x433   : > { %3843 = vmatprep.subr.bf16.mxu0 %v15670_v0  ;;  %v3443_v0 = vor.u32 %v3442_v18, %v3439_v17  ;;  %v3435_v8 = vsel %vm18113_vm12, %v3430_v62, %v3434_v36  ;;  %v12592_v17 = vcombine.low %v18224_v63, %v18224_v63  ;;  %v12593_v18 = vcombine.high %v18224_v63, %v18224_v63  ;;  %v5025_v62 = vld [vmem:[#allocation18 + $0x40] sm:$0xff]  ;;  %v15721_v63 = vld [vmem:[#allocation12 + $0x330] ss:$8 sps:$4 sm:$0xff]  }
 0x434   : > { %v5091_v36 = vand.u32 4294901760, %v5021_v42 }
 0x435   : > { %3595 = vmatmul.mubr.bf16.vlgmr.msra.gmra.mrb[4].mxu0 %v12564_v45  ;;  %v12566_v45 = vcombine.low %v3407_v20, %v3421_v57  ;;  %v5019_v20 = vld [vmem:[#allocation18 + $0x10] sm:$0xff]  ;;  %v5022_v57 = vld [vmem:[#allocation18 + $0x28] sm:$0xff] }
 0x436   : > { %3844 = vmatpush1.bf16.msra.mxu0 %v15668_v33  ;;  %3604 = vmatprep.mubr.bf16.mxu0 %v18156_v34  ;;  %v15693_v33 = vld [vmem:[#allocation12 + $0x2d4] ss:$8 sps:$4 sm:$0xff]   ;;  %v5087_v14 = vand.u32 4294901760, %v5019_v20  ;;  %v5089_v37 = vand.u32 4294901760, %v5022_v57 }
 0x437   : > { %3845 = vmatprep.subr.bf16.mxu0 %v15673_v56  ;;  %v3444_v56 = vrot.slane %v3443_v0, 4  ;;  %v12595_v0 = vcombine.high %v18230_v12, %v18230_v12 }
 0x438   : > { %v18259_v43 = vsub.f32 %v5019_v20, %v5087_v14  ;;  %v18261_v19 = vpack.c.bf16 %v5093_v41, %v5089_v37  ;;  %v18263_v38 = vsub.f32 %v5022_v57, %v5089_v37  ;;  %v15711_v20 = vld [vmem:[#allocation12 + $0x310] ss:$8 sps:$4 sm:$0xff]  }
 0x439   : > { %v3721_v39 = vrot.slane %v12595_v0, 5 }
 0x43a   : > { %3846 = vmatpush1.bf16.msra.mxu0 %v15671_v25  ;;  %v12590_v25 = vcombine.low %v3654_v51, %v3654_v51  ;;  %v5028_v51 = vld [vmem:[#allocation18 + $0x58] sm:$0xff] }
 0x43b   : > { %3847 = vmatprep.subr.bf16.mxu0 %v15680_v10  ;;  %v3449_v10 = vsel %vm18113_vm12, %v3444_v56, %v3448_v9  ;;  %v15708_v56 = vld [vmem:[#allocation12 + $0x300] ss:$8 sps:$4 sm:$0xff]   ;;  %v5095_v9 = vand.u32 4294901760, %v5023_v58 }
 0x43c   : > { %v18226_v54 = vrot.slane %v12590_v25, 9  ;;  %v5027_v25 = vld [vmem:[#allocation18 + $0x50] sm:$0xff] }
 0x43d   : > { %3605 = vmatmul.mubr.bf16.gmra.mrb[8].mxu0 %v12565_v35  ;;  %v12567_v35 = vcombine.low %v3435_v8, %v3449_v10  ;;  %v5101_v8 = vand.u32 4294901760, %v5028_v51  ;;  %v5099_v10 = vand.u32 4294901760, %v5025_v62 }
 0x43e   : > { %3848 = vmatpush1.bf16.msra.mxu0 %v15678_v23  ;;  %3614 = vmatprep.mubr.bf16.mxu0 %v18156_v34  ;;  %v18228_v23 = vrot.slane %v12591_v24, 5 }
 0x43f   : > { %3849 = vmatprep.subr.bf16.mxu0 %v15683_v5  ;;  %v15703_v5 = vld [vmem:[#allocation12 + $0x2f4] ss:$8 sps:$4 sm:$0xff]   ;;  %v18298_v57 = vsub.f32 %v5025_v62, %v5099_v10 }
 0x440   : > { %v3714_v53 = vsel %vm18142_vm15, %v18226_v54, %v18228_v23  ;;  %v3717_v54 = vrot.slane %v12593_v18, 5  ;;  %v12605_v23 = vrot.slane %v12594_v22, 9  ;;  %v15730_v18 = vld [vmem:[#allocation12 + $0x344] ss:$8 sps:$4 sm:$0xff]   ;;  %v12596_v22 = vcombine.low %v3657_v40, %v3657_v40 }
 0x442   : > { %3850 = vmatpush1.bf16.msra.mxu0 %v15681_v32  ;;  %v5020_v32 = vld [vmem:[#allocation18 + $0x18] sm:$0xff]  ;;  %v3722_v0 = vsel %vm18142_vm15, %v12605_v23, %v3721_v39 }
 0x443   : > { %3851 = vmatprep.subr.bf16.mxu0 %v15690_v50  ;;  %v5085_v15 = vand.u32 4294901760, %v5020_v32  ;;  %v5083_v50 = vand.u32 4294901760, %v5017_v46  ;;  %v15743_v39 = vld [vmem:[#allocation12 + $0x374] ss:$8 sps:$4 sm:$0xff]  }
 0x445   : > { %3615 = vmatmul.mubr.bf16.gmra.mrb[12].mxu0 %v12566_v45  ;;  %v18253_v28 = vsub.f32 %v5020_v32, %v5085_v15  ;;  %v18255_v45 = vsub.f32 %v5017_v46, %v5083_v50  ;;  %v18257_v6 = vpack.c.bf16 %v5087_v14, %v5083_v50  ;;  %v18291_v46 = vsub.f32 %v5028_v51, %v5101_v8  ;;  %v15720_v14 = vld [vmem:[#allocation12 + $0x324] ss:$8 sps:$4 sm:$0xff]  }
 0x446   : > { %3852 = vmatpush1.bf16.msra.mxu0 %v15688_v61  ;;  %3624 = vmatprep.mubr.bf16.mxu0 %v18156_v34  ;;  %v18249_v61 = vpack.c.bf16 %v5085_v15, %v5081_v55  ;;  %v5103_v55 = vand.u32 4294901760, %v5027_v25  ;;  %v5031_v15 = vld [vmem:[#allocation18 + $0x70] sm:$0xff] }
 0x447   : > { %3853 = vmatprep.subr.bf16.mxu0 %v15693_v33  ;;  %v5026_v33 = vld [vmem:[#allocation18 + $0x48] sm:$0xff]  ;;  %v18267_v44 = vpack.c.bf16 %v18253_v28, %v18251_v27  ;;  %v18273_v24 = vpack.c.bf16 %v18259_v43, %v18255_v45 }
 0x448   : > { %20598 = vst [vmem:[#allocation42_spill] sm:$0xff] %v18249_v61 }
 0x449   : > { %20599 = vst [vmem:[#allocation43_spill] sm:$0xff] %v18267_v44  ;;  %20600 = vst [vmem:[#allocation44_spill] sm:$0xff] %v18273_v24  ;;  %14344 = vmatprep.subr.bf16.mxu1 %v18267_v44 }
 0x44a   : > { %3854 = vmatpush1.bf16.msra.mxu0 %v15691_v59  ;;  %v18269_v59 = vsub.f32 %v5024_v3, %v5093_v41  ;;  %14346 = vmatpush1.bf16.msra.mxu1 %v18273_v24  ;;  %v5109_v3 = vand.u32 4294901760, %v5032_v26  ;;  %v18305_v41 = vpack.c.bf16 %v5103_v55, %v5099_v10  ;;  %v15723_v10 = vld [vmem:[#allocation12 + $0x334] ss:$8 sps:$4 sm:$0xff]  }
 0x44b   : > { %3855 = vmatprep.subr.bf16.mxu0 %v15700_v29  ;;  %v5097_v29 = vand.u32 4294901760, %v5026_v33  ;;  %v5054_v24 = vld [vmem:[#allocation18 + $0x128] sm:$0xff] }
 0x44c   : > { %20606 = vst [vmem:[#allocation50_spill] sm:$0xff] %v18305_v41  ;;  %v18313_v62 = vsub.f32 %v5032_v26, %v5109_v3  ;;  %v12604_v26 = vrot.slane %v12592_v17, 9 }
 0x44d   : > { %3625 = vmatmul.mubr.bf16.gmra.mrb[16].mxu0 %v12567_v35  ;;  %v18280_v35 = vpack.c.bf16 %v5095_v9, %v5091_v36  ;;  %v18287_v31 = vpack.c.bf16 %v5101_v8, %v5097_v29  ;;  %v18289_v32 = vsub.f32 %v5026_v33, %v5097_v29  ;;  %v12609_v8 = vcombine.low %v3710_v7, %v3714_v53  ;;  %v3658_v7 = vld [vmem:[#allocation2 + $0x40] sm:$0x1e] }
 0x44e   : > { %3856 = vmatpush1.bf16.msra.mxu0 %v15698_v4  ;;  %3875 = vmatprep.mubr.bf16.mxu0 %v18156_v34  ;;  %v18278_v4 = vpack.c.bf16 %v18269_v59, %v18263_v38  ;;  %v12597_v53 = vcombine.high %v3657_v40, %v3657_v40  ;;  %v3718_v12 = vsel %vm18142_vm15, %v12604_v26, %v3717_v54  ;;  %v15738_v54 = vld [vmem:[#allocation12 + $0x360] ss:$8 sps:$4 sm:$0xff]   ;;  %v15741_v40 = vld [vmem:[#allocation12 + $0x370] ss:$8 sps:$4 sm:$0xff]  }
 0x44f   : > { %3857 = vmatprep.subr.bf16.mxu0 %v15703_v5  ;;  %20602 = vst [vmem:[#allocation46_spill] sm:$0xff] %v18280_v35  ;;  %v18282_v5 = vsub.f32 %v5021_v42, %v5091_v36  ;;  %20603 = vst [vmem:[#allocation47_spill] sm:$0xff] %v18287_v31  ;;  %v18303_v37 = vpack.c.bf16 %v18291_v46, %v18289_v32  ;;  %v18307_v42 = vsub.f32 %v5027_v25, %v5103_v55 }
 0x450   : > { %20601 = vst [vmem:[#allocation45_spill] sm:$0xff] %v18278_v4  ;;  %14348 = vmatprep.subr.bf16.mxu1 %v18278_v4  ;;  %v12599_v55 = vcombine.high %v3658_v7, %v3658_v7  ;;  %v5051_v4 = vld [vmem:[#allocation18 + $0x110] sm:$0xff] }
 0x451   : > { %20605 = vst [vmem:[#allocation49_spill] sm:$0xff] %v18303_v37 }
 0x452   : > { %3858 = vmatpush1.bf16.msra.mxu0 %v15701_v52  ;;  %v18284_v52 = vsub.f32 %v5023_v58, %v5095_v9  ;;  %v15718_v9 = vld [vmem:[#allocation12 + $0x320] ss:$8 sps:$4 sm:$0xff]  }
 0x453   : > { %4061 = vmatprep.subr.bf16.mxu0 %v15710_v60  ;;  %v5029_v60 = vld [vmem:[#allocation18 + $0x60] sm:$0xff] }
 0x454   : > { %v18296_v50 = vpack.c.bf16 %v18284_v52, %v18282_v5  ;;  %v5107_v58 = vand.u32 4294901760, %v5029_v60 }
 0x455   : > { %3876 = vmatmul.mubr.bf16.vlgmr.msra.gmra.mrb[4].mxu0 %v12608_v49  ;;  %v5105_v49 = vand.u32 4294901760, %v5030_v1 }
 0x456   : > { %4062 = vmatpush1.bf16.msra.mxu0 %v15708_v56  ;;  %3885 = vmatprep.mubr.bf16.mxu0 %v18156_v34  ;;  %20604 = vst [vmem:[#allocation48_spill] sm:$0xff] %v18296_v50  ;;  %v5111_v56 = vand.u32 4294901760, %v5031_v15  ;;  %v18320_v36 = vsub.f32 %v5029_v60, %v5107_v58  ;;  %v12598_v60 = vcombine.low %v3658_v7, %v3658_v7  ;;  %v15747_v7 = vld [vmem:[#allocation12 + $0x384] ss:$8 sps:$4 sm:$0xff]  }
 0x457   : > { %4063 = vmatprep.subr.bf16.mxu0 %v15713_v47  ;;  %v18309_v33 = vpack.c.bf16 %v5109_v3, %v5105_v49  ;;  %v18311_v51 = vsub.f32 %v5030_v1, %v5105_v49  ;;  %14350 = vmatpush1.bf16.msra.mxu1 %v18296_v50  ;;  %v18318_v47 = vpack.c.bf16 %v18307_v42, %v18298_v57  ;;  %v15733_v49 = vld [vmem:[#allocation12 + $0x354] ss:$8 sps:$4 sm:$0xff]   ;;  %v12606_v3 = vrot.slane %v12596_v22, 9 }
 0x458   : > { %14352 = vmatprep.subr.bf16.mxu1 %v18303_v37  ;;  %v18323_v25 = vpack.c.bf16 %v5111_v56, %v5107_v58  ;;  %v18325_v29 = vsub.f32 %v5031_v15, %v5111_v56  ;;  %v15728_v15 = vld [vmem:[#allocation12 + $0x340] ss:$8 sps:$4 sm:$0xff]   ;;  %v12607_v58 = vrot.slane %v12598_v60, 9  ;;  %v3729_v56 = vrot.slane %v12599_v55, 5  ;;  %v15750_v22 = vld [vmem:[#allocation12 + $0x394] ss:$8 sps:$4 sm:$0xff]  }
 0x459   : > { %20607 = vst [vmem:[#allocation51_spill] sm:$0xff] %v18309_v33  ;;  %20608 = vst [vmem:[#allocation52_spill] sm:$0xff] %v18318_v47  ;;  %v18339_v1 = vpack.c.bf16 %v18313_v62, %v18311_v51  ;;  %v4151_v60 = vld [vmem:[#allocation2 + $0x18] sm:$0x1f] }
 0x45a   : > { %4064 = vmatpush1.bf16.msra.mxu0 %v15711_v20  ;;  %20609 = vst [vmem:[#allocation53_spill] sm:$0xff] %v18323_v25  ;;  %v18356_v17 = vpack.c.bf16 %v18325_v29, %v18320_v36  ;;  %v12610_v20 = vcombine.low %v3718_v12, %v3722_v0  ;;  %v3730_v26 = vsel %vm18142_vm15, %v12607_v58, %v3729_v56  ;;  %v15754_v12 = vld [vmem:[#allocation12 + $0x3a4] ss:$8 sps:$4 sm:$0xff]   ;;  %v4150_v0 = vld [vmem:[#allocation2 + $0x10] sm:$0x1f] }
 0x45b   : > { %4065 = vmatprep.subr.bf16.mxu0 %v15720_v14  ;;  %20610 = vst [vmem:[#allocation54_spill] sm:$0xff] %v18339_v1  ;;  %14354 = vmatpush1.bf16.msra.mxu1 %v18318_v47  ;;  %v3725_v14 = vrot.slane %v12597_v53, 5  ;;  %v15748_v53 = vld [vmem:[#allocation12 + $0x390] ss:$8 sps:$4 sm:$0xff]   ;;  %v15752_v55 = vld [vmem:[#allocation12 + $0x3a0] ss:$8 sps:$4 sm:$0xff]  }
 0x45c   : > { %20611 = vst [vmem:[#allocation55_spill] sm:$0xff] %v18356_v17  ;;  %14356 = vmatprep.subr.bf16.mxu1 %v18339_v1  ;;  %v18401_v47 = vld [vmem:[#allocation2 + $0x40] sm:$0x1f] }
 0x45d   : > { %3886 = vmatmul.mubr.bf16.gmra.mrb[8].mxu0 %v12609_v8  ;;  %v15740_v8 = vld [vmem:[#allocation12 + $0x364] ss:$8 sps:$4 sm:$0xff]  }
 0x45e   : > { %4066 = vmatpush1.bf16.msra.mxu0 %v15718_v9  ;;  %3895 = vmatprep.mubr.bf16.mxu0 %v18156_v34  ;;  %v15731_v9 = vld [vmem:[#allocation12 + $0x350] ss:$8 sps:$4 sm:$0xff]  }
 0x45f   : > { %4067 = vmatprep.subr.bf16.mxu0 %v15723_v10  ;;  %14358 = vmatpush1.bf16.msra.mxu1 %v18356_v17  ;;  %v3726_v10 = vsel %vm18142_vm15, %v12606_v3, %v3725_v14  ;;  %v12650_v3 = vcombine.low %v4151_v60, %v4151_v60  ;;  %v15755_v14 = vld [vmem:[#allocation12 + $0x3b0] ss:$8 sps:$4 sm:$0xff]  }
 0x460   : > { %v12611_v23 = vcombine.low %v3726_v10, %v3730_v26  ;;  %v18373_v26 = vld [vmem:[#allocation2 + $0x20] sm:$0x1f] }
 0x461   : > { %v4216_v10 = vshll.u32 %v12650_v3, 16 }
 0x462   : > { %4068 = vmatpush1.bf16.msra.mxu0 %v15721_v63  ;;  %v15745_v63 = vld [vmem:[#allocation12 + $0x380] ss:$8 sps:$4 sm:$0xff]  }
 0x463   : > { %4069 = vmatprep.subr.bf16.mxu0 %v15730_v18  ;;  %v15744_v18 = vld [vmem:[#allocation2 + $0x10] ss:$8 sps:$4 sm:$0xff]  }
 0x465   : > { %3896 = vmatmul.mubr.bf16.gmra.mrb[12].mxu0 %v12610_v20  ;;  %v15751_v20 = vld [vmem:[#allocation2 + $0x20] ss:$8 sps:$4 sm:$0xff]  }
 0x466   : > { %4070 = vmatpush1.bf16.msra.mxu0 %v15728_v15  ;;  %3905 = vmatprep.mubr.bf16.mxu0 %v18156_v34  ;;  %v12648_v15 = vcombine.low %v4150_v0, %v4150_v0 }
 0x467   : > { %4071 = vmatprep.subr.bf16.mxu0 %v15733_v49  ;;  %v15757_v49 = vld [vmem:[#allocation12 + $0x3b4] ss:$8 sps:$4 sm:$0xff]  }
 0x468   : > { %v4199_v58 = vshrl.u32 %v12648_v15, 16  ;;  %v4202_v56 = vshll.u32 %v12648_v15, 16  ;;  %v15762_v15 = vld [vmem:[#allocation12 + $0x3d0] ss:$8 sps:$4 sm:$0xff]  }
 0x46a   : > { %4072 = vmatpush1.bf16.msra.mxu0 %v15731_v9  ;;  %v15761_v9 = vld [vmem:[#allocation12 + $0x3c4] ss:$8 sps:$4 sm:$0xff]  }
 0x46b   : > { %4073 = vmatprep.subr.bf16.mxu0 %v15740_v8  ;;  %v4213_v8 = vshrl.u32 %v12650_v3, 16  ;;  %v18382_v3 = vld [vmem:[#allocation2 + $0x30] sm:$0x1f] }
 0x46d   : > { %3906 = vmatmul.mubr.bf16.gmra.mrb[16].mxu0 %v12611_v23  ;;  %v15759_v23 = vld [vmem:[#allocation12 + $0x3c0] ss:$8 sps:$4 sm:$0xff]  }
 0x46e   : > { %4074 = vmatpush1.bf16.msra.mxu0 %v15738_v54  ;;  %4093 = vmatprep.mubr.bf16.mxu0 %v18156_v34  ;;  %v18375_v54 = vld [vmem:[#allocation2 + $0x28] sm:$0x1f] }
 0x46f   : > { %4075 = vmatprep.subr.bf16.mxu0 %v15743_v39  ;;  %v4201_v39 = vrot.slane %v4199_v58, 4 }
 0x472   : > { %4076 = vmatpush1.bf16.msra.mxu0 %v15741_v40  ;;  %v4204_v40 = vrot.slane %v4202_v56, 5 }
 0x473   : > { %4422 = vmatprep.subr.bf16.mxu0 %v15747_v7  ;;  %v15758_v7 = vld [vmem:[#allocation2 + $0x30] ss:$8 sps:$4 sm:$0xff]  }
 0x475   : > { %4094 = vmatmul.mubr.bf16.vlgmr.msra.gmra.mrb[4].mxu0 %v15744_v18  ;;  %v12652_v18 = vcombine.low %v18373_v26, %v18373_v26 }
 0x476   : > { %4423 = vmatpush1.bf16.msra.mxu0 %v15745_v63  ;;  %4103 = vmatprep.mubr.bf16.mxu0 %v18156_v34  ;;  %v15764_v63 = vld [vmem:[#allocation12 + $0x3d4] ss:$8 sps:$4 sm:$0xff]  }
 0x477   : > { %4424 = vmatprep.subr.bf16.mxu0 %v15750_v22  ;;  %v12654_v22 = vcombine.low %v18375_v54, %v18375_v54  ;;  %v4227_v58 = vshrl.u32 %v12652_v18, 16  ;;  %v4230_v56 = vshll.u32 %v12652_v18, 16 }
 0x479   : > { %v4244_v30 = vshll.u32 %v12654_v22, 16 }
 0x47a   : > { %4425 = vmatpush1.bf16.msra.mxu0 %v15748_v53  ;;  %v4215_v53 = vrot.slane %v4213_v8, 4  ;;  %v18384_v8 = vld [vmem:[#allocation2 + $0x38] sm:$0x1f] }
 0x47b   : > { %4426 = vmatprep.subr.bf16.mxu0 %v15754_v12  ;;  %v4218_v12 = vrot.slane %v4216_v10, 5  ;;  %v15766_v10 = vld [vmem:[#allocation12 + $0x3e0] ss:$8 sps:$4 sm:$0xff]   ;;  %v4246_v18 = vrot.slane %v4244_v30, 5  ;;  %v15778_v30 = vld [vmem:[#allocation12 + $0x404] ss:$8 sps:$4 sm:$0xff]  }
 0x47d   : > { %4104 = vmatmul.mubr.bf16.gmra.mrb[8].mxu0 %v15751_v20  ;;  %v12651_v20 = vcombine.high %v4151_v60, %v4151_v60  ;;  %v4219_v11 = vor.u32 %v4218_v12, %v4215_v53  ;;  %v12656_v60 = vcombine.low %v18382_v3, %v18382_v3  ;;  %v12653_v12 = vcombine.high %v18373_v26, %v18373_v26 }
 0x47e   : > { %4427 = vmatpush1.bf16.msra.mxu0 %v15752_v55  ;;  %4113 = vmatprep.mubr.bf16.mxu0 %v18156_v34  ;;  %v12649_v55 = vcombine.high %v4150_v0, %v4150_v0  ;;  %v15765_v0 = vld [vmem:[#allocation2 + $0x40] ss:$8 sps:$4 sm:$0xff]  }
 0x47f   : > { %4428 = vmatprep.subr.bf16.mxu0 %v15757_v49  ;;  %v4205_v49 = vor.u32 %v4204_v40, %v4201_v39  ;;  %v15771_v39 = vld [vmem:[#allocation12 + $0x3f4] ss:$8 sps:$4 sm:$0xff]   ;;  %v4229_v40 = vrot.slane %v4227_v58, 4  ;;  %v4220_v1 = vrot.slane %v4219_v11, 4  ;;  %v4255_v58 = vshrl.u32 %v12656_v60, 16 }
 0x480   : > { %v4208_v2 = vshll.u32 %v12649_v55, 16  ;;  %v12655_v55 = vcombine.high %v18375_v54, %v18375_v54 }
 0x482   : > { %4429 = vmatpush1.bf16.msra.mxu0 %v15755_v14  ;;  %v15768_v14 = vld [vmem:[#allocation12 + $0x3e4] ss:$8 sps:$4 sm:$0xff]   ;;  %v4210_v53 = vrot.slane %v4208_v2, 5  ;;  %v18397_v2 = vld [vmem:[#allocation2 + $0x48] sm:$0x1f] }
 0x483   : > { %4430 = vmatprep.subr.bf16.mxu0 %v15761_v9  ;;  %v4241_v9 = vshrl.u32 %v12654_v22, 16  ;;  %v12658_v22 = vcombine.low %v18384_v8, %v18384_v8 }
 0x485   : > { %4114 = vmatmul.mubr.bf16.gmra.mrb[12].mxu0 %v15758_v7  ;;  %v4222_v7 = vshll.u32 %v12651_v20, 16  ;;  %v4243_v17 = vrot.slane %v4241_v9, 4  ;;  %v4269_v54 = vshrl.u32 %v12658_v22, 16  ;;  %v4272_v9 = vshll.u32 %v12658_v22, 16 }
 0x486   : > { %4431 = vmatpush1.bf16.msra.mxu0 %v15759_v23  ;;  %4123 = vmatprep.mubr.bf16.mxu0 %v18156_v34  ;;  %v4206_v23 = vrot.slane %v4205_v49, 4  ;;  %v12660_v22 = vcombine.low %v18401_v47, %v18401_v47 }
 0x487   : > { %4432 = vmatprep.subr.bf16.mxu0 %v15764_v63  ;;  %v4232_v63 = vrot.slane %v4230_v56, 5  ;;  %v4224_v20 = vrot.slane %v4222_v7, 5  ;;  %v4258_v56 = vshll.u32 %v12656_v60, 16  ;;  %v15776_v7 = vld [vmem:[#allocation12 + $0x400] ss:$8 sps:$4 sm:$0xff]   ;;  %v4274_v60 = vrot.slane %v4272_v9, 5 }
 0x488   : > { %v4211_v11 = vsel %vm18113_vm12, %v4206_v23, %v4210_v53  ;;  %v12662_v23 = vcombine.low %v18397_v2, %v18397_v2  ;;  %v4283_v9 = vshrl.u32 %v12660_v22, 16 }
 0x489   : > { %v4233_v49 = vor.u32 %v4232_v63, %v4229_v40  ;;  %v4225_v26 = vsel %vm18113_vm12, %v4220_v1, %v4224_v20  ;;  %v4260_v53 = vrot.slane %v4258_v56, 5  ;;  %v4271_v1 = vrot.slane %v4269_v54, 4 }
 0x48a   : > { %4433 = vmatpush1.bf16.msra.mxu0 %v15762_v15  ;;  %v15769_v15 = vld [vmem:[#allocation12 + $0x3f0] ss:$8 sps:$4 sm:$0xff]   ;;  %v12657_v20 = vcombine.high %v18382_v3, %v18382_v3 }
 0x48b   : > { %4434 = vmatprep.subr.bf16.mxu0 %v15768_v14  ;;  %v4247_v14 = vor.u32 %v4246_v18, %v4243_v17  ;;  %v15781_v17 = vld [vmem:[#allocation12 + $0x414] ss:$8 sps:$4 sm:$0xff]   ;;  %v4234_v40 = vrot.slane %v4233_v49, 4  ;;  %v4257_v18 = vrot.slane %v4255_v58, 4  ;;  %v4297_v58 = vshrl.u32 %v12662_v23, 16 }
 0x48c   : > { %v4275_v54 = vor.u32 %v4274_v60, %v4271_v1  ;;  %v4264_v3 = vshll.u32 %v12657_v20, 16 }
 0x48d   : > { %4124 = vmatmul.mubr.bf16.gmra.mrb[16].mxu0 %v15765_v0  ;;  %v4236_v0 = vshll.u32 %v12653_v12, 16  ;;  %v4248_v63 = vrot.slane %v4247_v14, 4  ;;  %v15788_v14 = vld [vmem:[#allocation12 + $0x424] ss:$8 sps:$4 sm:$0xff]   ;;  %v4261_v56 = vor.u32 %v4260_v53, %v4257_v18  ;;  %v15789_v18 = vld [vmem:[#allocation12 + $0x430] ss:$8 sps:$4 sm:$0xff]  }
 0x48e   : > { %4435 = vmatpush1.bf16.msra.mxu0 %v15766_v10  ;;  %4454 = vmatprep.mubr.bf16.mxu0 %v18156_v34  ;;  %v4250_v10 = vshll.u32 %v12655_v55, 16  ;;  %v18418_v53 = vld [vmem:[#allocation3] sm:$0xff]  ;;  %v4266_v1 = vrot.slane %v4264_v3, 5  ;;  %v15799_v3 = vld [vmem:[#allocation12 + $0x450] ss:$8 sps:$4 sm:$0xff]  }
 0x48f   : > { %4436 = vmatprep.subr.bf16.mxu0 %v15771_v39  ;;  %v12664_v39 = vcombine.low %v4211_v11, %v4225_v26  ;;  %v4238_v12 = vrot.slane %v4236_v0, 5  ;;  %v12659_v11 = vcombine.high %v18384_v8, %v18384_v8  ;;  %v4300_v26 = vshll.u32 %v12662_v23, 16  ;;  %v15786_v0 = vld [vmem:[#allocation12 + $0x420] ss:$8 sps:$4 sm:$0xff]   ;;  %v15791_v8 = vld [vmem:[#allocation12 + $0x434] ss:$8 sps:$4 sm:$0xff]  }
 0x490   : > { %v4252_v55 = vrot.slane %v4250_v10, 5  ;;  %20612 = vst [vmem:[#allocation56_spill] sm:$0xff] %v18418_v53 }
 0x491   : > { %v4278_v10 = vshll.u32 %v12659_v11, 16 }
 0x492   : > { %4437 = vmatpush1.bf16.msra.mxu0 %v15769_v15  ;;  %v15779_v15 = vld [vmem:[#allocation12 + $0x410] ss:$8 sps:$4 sm:$0xff]   ;;  %v4253_v49 = vsel %vm18113_vm12, %v4248_v63, %v4252_v55  ;;  %v4262_v63 = vrot.slane %v4261_v56, 4  ;;  %v4285_v55 = vrot.slane %v4283_v9, 4  ;;  %v15801_v56 = vld [vmem:[#allocation12 + $0x454] ss:$8 sps:$4 sm:$0xff]  }
 0x493   : > { %4703 = vmatprep.subr.bf16.mxu0 %v15778_v30  ;;  %v4239_v30 = vsel %vm18113_vm12, %v4234_v40, %v4238_v12  ;;  %v4302_v40 = vrot.slane %v4300_v26, 5  ;;  %v4276_v12 = vrot.slane %v4275_v54, 4  ;;  %v4280_v60 = vrot.slane %v4278_v10, 5 }
 0x494   : > { %v4267_v11 = vsel %vm18113_vm12, %v4262_v63, %v4266_v1 }
 0x495   : > { %4455 = vmatmul.mubr.bf16.vlgmr.msra.gmra.mrb[4].mxu0 %v12664_v39  ;;  %v12663_v39 = vcombine.high %v18397_v2, %v18397_v2  ;;  %v15798_v2 = vld [vmem:[#allocation12 + $0x444] ss:$8 sps:$4 sm:$0xff]  }
 0x496   : > { %4704 = vmatpush1.bf16.msra.mxu0 %v15776_v7  ;;  %4464 = vmatprep.mubr.bf16.mxu0 %v18156_v34  ;;  %v4286_v34 = vshll.u32 %v12660_v22, 16  ;;  %v12665_v7 = vcombine.low %v4239_v30, %v4253_v49  ;;  %v12661_v22 = vcombine.high %v18401_v47, %v18401_v47  ;;  %v4281_v30 = vsel %vm18113_vm12, %v4276_v12, %v4280_v60 }
 0x497   : > { %4705 = vmatprep.subr.bf16.mxu0 %v15781_v17  ;;  %v4299_v17 = vrot.slane %v4297_v58, 4  ;;  %v4306_v20 = vshll.u32 %v12663_v39, 16  ;;  %v12666_v26 = vcombine.low %v4267_v11, %v4281_v30  ;;  %v15809_v11 = vld [vmem:[#allocation12 + $0x470] ss:$8 sps:$4 sm:$0xff]  }
 0x498   : > { %v4288_v23 = vrot.slane %v4286_v34, 5  ;;  %v4292_v58 = vshll.u32 %v12661_v22, 16  ;;  %v4511_v34 = vld [vmem:[#allocation2 + $0x10] sm:$0x1e] }
 0x499   : > { %v4308_v9 = vrot.slane %v4306_v20, 5  ;;  %v12684_v39 = vcombine.low %v4511_v34, %v4511_v34  ;;  %v4514_v20 = vld [vmem:[#allocation2 + $0x28] sm:$0x1e] }
 0x49a   : > { %4706 = vmatpush1.bf16.msra.mxu0 %v15779_v15  ;;  %v4303_v15 = vor.u32 %v4302_v40, %v4299_v17  ;;  %v4289_v49 = vor.u32 %v4288_v23, %v4285_v55  ;;  %v4294_v10 = vrot.slane %v4292_v58, 5  ;;  %v12685_v40 = vcombine.high %v4511_v34, %v4511_v34  ;;  %v15806_v55 = vld [vmem:[#allocation12 + $0x460] ss:$8 sps:$4 sm:$0xff]  }
 0x49b   : > { %4707 = vmatprep.subr.bf16.mxu0 %v15788_v14  ;;  %v15796_v14 = vld [vmem:[#allocation12 + $0x440] ss:$8 sps:$4 sm:$0xff]   ;;  %v12700_v1 = vrot.slane %v12684_v39, 9 }
 0x49c   : > { %v4304_v54 = vrot.slane %v4303_v15, 4  ;;  %v4290_v47 = vrot.slane %v4289_v49, 4  ;;  %v4561_v60 = vrot.slane %v12685_v40, 5  ;;  %v4513_v15 = vld [vmem:[#allocation2 + $0x20] sm:$0x1e] }
 0x49d   : > { %4465 = vmatmul.mubr.bf16.gmra.mrb[8].mxu0 %v12665_v7  ;;  %v12688_v30 = vcombine.low %v4513_v15, %v4513_v15  ;;  %v12689_v49 = vcombine.high %v4513_v15, %v4513_v15 }
 0x49e   : > { %4708 = vmatpush1.bf16.msra.mxu0 %v15786_v0  ;;  %4474 = vmatprep.mubr.bf16.mxu0 %v18418_v53  ;;  %v4512_v0 = vld [vmem:[#allocation2 + $0x18] sm:$0x1e]  ;;  %v4309_v7 = vsel %vm18113_vm12, %v4304_v54, %v4308_v9  ;;  %v4295_v17 = vsel %vm18113_vm12, %v4290_v47, %v4294_v10 }
 0x49f   : > { %4709 = vmatprep.subr.bf16.mxu0 %v15791_v8  ;;  %v15808_v8 = vld [vmem:[#allocation12 + $0x464] ss:$8 sps:$4 sm:$0xff]   ;;  %v12686_v63 = vcombine.low %v4512_v0, %v4512_v0  ;;  %v12687_v12 = vcombine.high %v4512_v0, %v4512_v0  ;;  %v12667_v23 = vcombine.low %v4295_v17, %v4309_v7  ;;  %v12702_v9 = vrot.slane %v12688_v30, 9 }
 0x4a0   : > { %v4569_v47 = vrot.slane %v12689_v49, 5  ;;  %v4516_v10 = vld [vmem:[#allocation2 + $0x38] sm:$0x1e] }
 0x4a1   : > { %v12701_v22 = vrot.slane %v12686_v63, 9  ;;  %v12694_v40 = vcombine.low %v4516_v10, %v4516_v10  ;;  %v12695_v63 = vcombine.high %v4516_v10, %v4516_v10 }
 0x4a2   : > { %4710 = vmatpush1.bf16.msra.mxu0 %v15789_v18  ;;  %v15811_v18 = vld [vmem:[#allocation12 + $0x474] ss:$8 sps:$4 sm:$0xff]   ;;  %v4570_v7 = vsel %vm18142_vm15, %v12702_v9, %v4569_v47 }
 0x4a3   : > { %4711 = vmatprep.subr.bf16.mxu0 %v15798_v2  ;;  %v4565_v2 = vrot.slane %v12687_v12, 5 }
 0x4a5   : > { %4475 = vmatmul.mubr.bf16.gmra.mrb[12].mxu0 %v12666_v26  ;;  %v4566_v58 = vsel %vm18142_vm15, %v12701_v22, %v4565_v2  ;;  %v12690_v26 = vcombine.low %v4514_v20, %v4514_v20  ;;  %v4517_v22 = vld [vmem:[#allocation2 + $0x40] sm:$0x1e] }
 0x4a6   : > { %4712 = vmatpush1.bf16.msra.mxu0 %v15796_v14  ;;  %4484 = vmatprep.mubr.bf16.mxu0 %v18418_v53  ;;  %v4562_v14 = vsel %vm18142_vm15, %v12700_v1, %v4561_v60  ;;  %v4581_v1 = vrot.slane %v12695_v63, 5  ;;  %v4518_v60 = vld [vmem:[#allocation2 + $0x48] sm:$0x1e]  ;;  %v12696_v30 = vcombine.low %v4517_v22, %v4517_v22  ;;  %v12697_v49 = vcombine.high %v4517_v22, %v4517_v22 }
 0x4a7   : > { %4713 = vmatprep.subr.bf16.mxu0 %v15801_v56  ;;  %v12691_v56 = vcombine.high %v4514_v20, %v4514_v20  ;;  %v12708_v54 = vcombine.low %v4562_v14, %v4566_v58  ;;  %v12703_v34 = vrot.slane %v12690_v26, 9  ;;  %v12698_v2 = vcombine.low %v4518_v60, %v4518_v60 }
 0x4a8   : > { %v12699_v15 = vcombine.high %v4518_v60, %v4518_v60  ;;  %v12706_v58 = vrot.slane %v12696_v30, 9  ;;  %v4585_v26 = vrot.slane %v12697_v49, 5 }
 0x4a9   : > { %v4573_v0 = vrot.slane %v12691_v56, 5  ;;  %v12707_v56 = vrot.slane %v12698_v2, 9  ;;  %v5039_v2 = vld [vmem:[#allocation18 + $0xb0] sm:$0xff] }
 0x4aa   : > { %4714 = vmatpush1.bf16.msra.mxu0 %v15799_v3  ;;  %v4515_v3 = vld [vmem:[#allocation2 + $0x30] sm:$0x1e]  ;;  %v4586_v9 = vsel %vm18142_vm15, %v12706_v58, %v4585_v26 }
 0x4ab   : > { %4715 = vmatprep.subr.bf16.mxu0 %v15808_v8  ;;  %v12692_v8 = vcombine.low %v4515_v3, %v4515_v3  ;;  %v4574_v39 = vsel %vm18142_vm15, %v12703_v34, %v4573_v0  ;;  %v12693_v17 = vcombine.high %v4515_v3, %v4515_v3  ;;  %v5034_v0 = vld [vmem:[#allocation18 + $0x88] sm:$0xff]  ;;  %v5036_v3 = vld [vmem:[#allocation18 + $0x98] sm:$0xff] }
 0x4ac   : > { %v12709_v12 = vcombine.low %v4570_v7, %v4574_v39  ;;  %v5113_v10 = vand.u32 4294901760, %v5034_v0  ;;  %v5117_v7 = vand.u32 4294901760, %v5036_v3  ;;  %v5035_v39 = vld [vmem:[#allocation18 + $0x90] sm:$0xff] }
 0x4ad   : > { %4485 = vmatmul.mubr.bf16.gmra.mrb[16].mxu0 %v12667_v23  ;;  %v4577_v23 = vrot.slane %v12693_v17, 5  ;;  %v5038_v17 = vld [vmem:[#allocation18 + $0xa8] sm:$0xff]  ;;  %v5119_v63 = vand.u32 4294901760, %v5035_v39 }
 0x4ae   : > { %4716 = vmatpush1.bf16.msra.mxu0 %v15806_v55  ;;  %4735 = vmatprep.mubr.bf16.mxu0 %v18418_v53  ;;  %v12704_v55 = vrot.slane %v12692_v8, 9  ;;  %v5033_v8 = vld [vmem:[#allocation18 + $0x80] sm:$0xff]  ;;  %v18464_v60 = vsub.f32 %v5036_v3, %v5117_v7  ;;  %v5042_v3 = vld [vmem:[#allocation18 + $0xc8] sm:$0xff] }
 0x4af   : > { %4717 = vmatprep.subr.bf16.mxu0 %v15811_v18  ;;  %v12705_v18 = vrot.slane %v12694_v40, 9  ;;  %v5115_v40 = vand.u32 4294901760, %v5033_v8 }
 0x4b0   : > { %v4578_v20 = vsel %vm18142_vm15, %v12704_v55, %v4577_v23  ;;  %v5121_v55 = vand.u32 4294901760, %v5038_v17  ;;  %v5037_v23 = vld [vmem:[#allocation18 + $0xa0] sm:$0xff]  ;;  %20615 = vst [vmem:[#allocation59_spill] sm:$0xff] %v18464_v60 }
 0x4b1   : > { %v5123_v26 = vand.u32 4294901760, %v5037_v23 }
 0x4b2   : > { %4718 = vmatpush1.bf16.msra.mxu0 %v15809_v11  ;;  %v4582_v11 = vsel %vm18142_vm15, %v12705_v18, %v4581_v1  ;;  %v18460_v18 = vpack.c.bf16 %v5117_v7, %v5113_v10  ;;  %v18462_v1 = vsub.f32 %v5034_v0, %v5113_v10  ;;  %v18472_v30 = vsub.f32 %v5038_v17, %v5121_v55  ;;  %v5044_v10 = vld [vmem:[#allocation18 + $0xd8] sm:$0xff]  ;;  %v5043_v17 = vld [vmem:[#allocation18 + $0xd0] sm:$0xff] }
 0x4b3   : > { %14216 = vmatprep.subr.bf16.mxu0 %v18249_v61  ;;  %v12710_v14 = vcombine.low %v4578_v20, %v4582_v11  ;;  %v18468_v20 = vsub.f32 %v5033_v8, %v5115_v40  ;;  %v18470_v11 = vsub.f32 %v5035_v39, %v5119_v63  ;;  %v5129_v7 = vand.u32 4294901760, %v5042_v3  ;;  %v5041_v39 = vld [vmem:[#allocation18 + $0xc0] sm:$0xff] }
 0x4b4   : > { %20613 = vst [vmem:[#allocation57_spill] sm:$0xff] %v18460_v18  ;;  %20614 = vst [vmem:[#allocation58_spill] sm:$0xff] %v18462_v1  ;;  %v18476_v49 = vpack.c.bf16 %v18464_v60, %v18462_v1  ;;  %v5133_v8 = vand.u32 4294901760, %v5044_v10 }
 0x4b5   : > { %4736 = vmatmul.mubr.bf16.vlgmr.msra.gmra.mrb[4].mxu0 %v12708_v54  ;;  %v4589_v54 = vrot.slane %v12699_v15, 5  ;;  %v18466_v15 = vpack.c.bf16 %v5119_v63, %v5115_v40  ;;  %20617 = vst [vmem:[#allocation61_spill] sm:$0xff] %v18468_v20  ;;  %20618 = vst [vmem:[#allocation62_spill] sm:$0xff] %v18470_v11  ;;  %v5046_v40 = vld [vmem:[#allocation18 + $0xe8] sm:$0xff] }
 0x4b6   : > { %4745 = vmatprep.mubr.bf16.mxu0 %v18418_v53  ;;  %14218 = vmatpush1.bf16.msra.mxu0 %v18257_v6  ;;  %20619 = vst [vmem:[#allocation63_spill] sm:$0xff] %v18472_v30  ;;  %20620 = vst [vmem:[#allocation64_spill] sm:$0xff] %v18476_v49 }
 0x4b7   : > { %14220 = vmatprep.subr.bf16.mxu0 %v18261_v19  ;;  %v4590_v47 = vsel %vm18142_vm15, %v12707_v56, %v4589_v54  ;;  %20616 = vst [vmem:[#allocation60_spill] sm:$0xff] %v18466_v15  ;;  %v18485_v56 = vpack.c.bf16 %v18470_v11, %v18468_v20  ;;  %v5127_v54 = vand.u32 4294901760, %v5039_v2  ;;  %14360 = vmatprep.subr.bf16.mxu1 %v18476_v49 }
 0x4b8   : > { %v12711_v34 = vcombine.low %v4586_v9, %v4590_v47  ;;  %v18493_v47 = vsub.f32 %v5037_v23, %v5123_v26  ;;  %v5048_v23 = vld [vmem:[#allocation18 + $0xf8] sm:$0xff] }
 0x4b9   : > { %20623 = vst [vmem:[#allocation67_spill] sm:$0xff] %v18485_v56  ;;  %14362 = vmatpush1.bf16.msra.mxu1 %v18485_v56  ;;  %v18499_v0 = vsub.f32 %v5039_v2, %v5127_v54  ;;  %v5045_v2 = vld [vmem:[#allocation18 + $0xe0] sm:$0xff]  ;;  %v5141_v16 = vand.u32 4294901760, %v5048_v23 }
 0x4ba   : > { %14222 = vmatpush1.bf16.msra.mxu0 %v18280_v35  ;;  %20625 = vst [vmem:[#allocation69_spill] sm:$0xff] %v18493_v47  ;;  %v5079_v35 = vld [vmem:[#allocation18 + $0x1f0] sm:$0xff] }
 0x4bb   : > { %14224 = vmatprep.subr.bf16.mxu0 %v18287_v31  ;;  %20627 = vst [vmem:[#allocation71_spill] sm:$0xff] %v18499_v0  ;;  %v18504_v63 = vpack.c.bf16 %v18499_v0, %v18493_v47  ;;  %v5076_v0 = vld [vmem:[#allocation18 + $0x1d8] sm:$0xff] }
 0x4bd   : > { %4746 = vmatmul.mubr.bf16.gmra.mrb[8].mxu0 %v12709_v12  ;;  %v5040_v12 = vld [vmem:[#allocation18 + $0xb8] sm:$0xff]  ;;  %20628 = vst [vmem:[#allocation72_spill] sm:$0xff] %v18504_v63 }
 0x4be   : > { %4755 = vmatprep.mubr.bf16.mxu0 %v18418_v53  ;;  %14226 = vmatpush1.bf16.msra.mxu0 %v18305_v41  ;;  %v5125_v22 = vand.u32 4294901760, %v5040_v12  ;;  %v5075_v41 = vld [vmem:[#allocation18 + $0x1d0] sm:$0xff] }
 0x4bf   : > { %14228 = vmatprep.subr.bf16.mxu0 %v18309_v33  ;;  %v5199_v31 = vand.u32 4294901760, %v5075_v41 }
 0x4c0   : > { %v18480_v58 = vsub.f32 %v5040_v12, %v5125_v22  ;;  %v5131_v12 = vand.u32 4294901760, %v5041_v39 }
 0x4c2   : > { %14230 = vmatpush1.bf16.msra.mxu0 %v18323_v25  ;;  %20622 = vst [vmem:[#allocation66_spill] sm:$0xff] %v18480_v58  ;;  %v18491_v9 = vpack.c.bf16 %v18480_v58, %v18472_v30  ;;  %v18516_v56 = vsub.f32 %v5041_v39, %v5131_v12  ;;  %v5143_v39 = vand.u32 4294901760, %v5047_v48  ;;  %v5078_v58 = vld [vmem:[#allocation18 + $0x1e8] sm:$0xff]  ;;  %v5080_v30 = vld [vmem:[#allocation18 + $0x1f8] sm:$0xff] }
 0x4c3   : > { %14232 = vmatprep.subr.bf16.mxu0 %v18460_v18  ;;  %v5205_v20 = vand.u32 4294901760, %v5080_v30 }
 0x4c4   : > { %20624 = vst [vmem:[#allocation68_spill] sm:$0xff] %v18491_v9  ;;  %14364 = vmatprep.subr.bf16.mxu1 %v18491_v9  ;;  %20633 = vst [vmem:[#allocation77_spill] sm:$0xff] %v18516_v56 }
 0x4c5   : > { %4756 = vmatmul.mubr.bf16.gmra.mrb[12].mxu0 %v12710_v14  ;;  %v18478_v14 = vpack.c.bf16 %v5125_v22, %v5121_v55  ;;  %v5135_v55 = vand.u32 4294901760, %v5043_v17  ;;  %v5137_v22 = vand.u32 4294901760, %v5046_v40  ;;  %14366 = vmatpush1.bf16.msra.mxu1 %v18504_v63  ;;  %v5049_v63 = vld [vmem:[#allocation18 + $0x100] sm:$0xff] }
 0x4c6   : > { %4765 = vmatprep.mubr.bf16.mxu0 %v18418_v53  ;;  %14234 = vmatpush1.bf16.msra.mxu0 %v18466_v15  ;;  %v18511_v53 = vsub.f32 %v5044_v10, %v5133_v8  ;;  %v18528_v10 = vsub.f32 %v5048_v23, %v5141_v16  ;;  %v5052_v23 = vld [vmem:[#allocation18 + $0x118] sm:$0xff]  ;;  %v5147_v44 = vand.u32 4294901760, %v5049_v63 }
 0x4c7   : > { %20621 = vst [vmem:[#allocation65_spill] sm:$0xff] %v18478_v14  ;;  %14236 = vmatprep.subr.bf16.mxu0 %v18478_v14  ;;  %v18514_v9 = vpack.c.bf16 %v5135_v55, %v5131_v12  ;;  %v18518_v49 = vsub.f32 %v5043_v17, %v5135_v55  ;;  %v18520_v37 = vsub.f32 %v5046_v40, %v5137_v22  ;;  %v5050_v55 = vld [vmem:[#allocation18 + $0x108] sm:$0xff] }
 0x4c8   : > { %20631 = vst [vmem:[#allocation75_spill] sm:$0xff] %v18511_v53  ;;  %20638 = vst [vmem:[#allocation82_spill] sm:$0xff] %v18528_v10  ;;  %v18547_v12 = vsub.f32 %v5047_v48, %v5143_v39  ;;  %v5153_v48 = vand.u32 4294901760, %v5054_v24 }
 0x4c9   : > { %20632 = vst [vmem:[#allocation76_spill] sm:$0xff] %v18514_v9  ;;  %20634 = vst [vmem:[#allocation78_spill] sm:$0xff] %v18518_v49  ;;  %v18539_v17 = vpack.c.bf16 %v18528_v10, %v18520_v37 }
 0x4ca   : > { %20635 = vst [vmem:[#allocation79_spill] sm:$0xff] %v18520_v37  ;;  %20643 = vst [vmem:[#allocation87_spill] sm:$0xff] %v18547_v12 }
 0x4cb   : > { %20640 = vst [vmem:[#allocation84_spill] sm:$0xff] %v18539_v17 }
 0x4cd   : > { %4766 = vmatmul.mubr.bf16.gmra.mrb[16].mxu0 %v12711_v34  ;;  %v18497_v34 = vpack.c.bf16 %v5127_v54, %v5123_v26  ;;  %v18507_v26 = vpack.c.bf16 %v5133_v8, %v5129_v7  ;;  %v18509_v54 = vsub.f32 %v5042_v3, %v5129_v7  ;;  %v18526_v3 = vpack.c.bf16 %v5141_v16, %v5137_v22 }
 0x4ce   : > { %v5139_v7 = vand.u32 4294901760, %v5045_v2  ;;  %v18533_v8 = vpack.c.bf16 %v18518_v49, %v18516_v56  ;;  %v5145_v22 = vand.u32 4294901760, %v5050_v55  ;;  %v5069_v56 = vld [vmem:[#allocation18 + $0x1a0] sm:$0xff] }
 0x4cf   : > { %20626 = vst [vmem:[#allocation70_spill] sm:$0xff] %v18497_v34  ;;  %14238 = vmatpush1.bf16.msra.mxu0 %v18497_v34  ;;  %20629 = vst [vmem:[#allocation73_spill] sm:$0xff] %v18507_v26  ;;  %v18524_v50 = vpack.c.bf16 %v18511_v53, %v18509_v54  ;;  %v5055_v34 = vld [vmem:[#allocation18 + $0x130] sm:$0xff] }
 0x4d0   : > { %20630 = vst [vmem:[#allocation74_spill] sm:$0xff] %v18509_v54  ;;  %20637 = vst [vmem:[#allocation81_spill] sm:$0xff] %v18526_v3  ;;  %14240 = vmatprep.subr.bf16.mxu0 %v18507_v26  ;;  %v18541_v40 = vsub.f32 %v5045_v2, %v5139_v7  ;;  %v18545_v16 = vpack.c.bf16 %v5143_v39, %v5139_v7  ;;  %v5056_v7 = vld [vmem:[#allocation18 + $0x138] sm:$0xff]  ;;  %v5053_v39 = vld [vmem:[#allocation18 + $0x120] sm:$0xff] }
 0x4d1   : > { %20636 = vst [vmem:[#allocation80_spill] sm:$0xff] %v18524_v50  ;;  %20639 = vst [vmem:[#allocation83_spill] sm:$0xff] %v18533_v8  ;;  %14368 = vmatprep.subr.bf16.mxu1 %v18524_v50  ;;  %v5149_v50 = vand.u32 4294901760, %v5052_v23  ;;  %v5157_v26 = vand.u32 4294901760, %v5056_v7  ;;  %v5071_v54 = vld [vmem:[#allocation18 + $0x1b0] sm:$0xff] }
 0x4d2   : > { %20641 = vst [vmem:[#allocation85_spill] sm:$0xff] %v18541_v40  ;;  %14370 = vmatpush1.bf16.msra.mxu1 %v18533_v8  ;;  %20642 = vst [vmem:[#allocation86_spill] sm:$0xff] %v18545_v16  ;;  %v18552_v2 = vpack.c.bf16 %v18547_v12, %v18541_v40  ;;  %v18564_v12 = vsub.f32 %v5049_v63, %v5147_v44  ;;  %v5191_v33 = vand.u32 4294901760, %v5071_v54 }
 0x4d3   : > { %14242 = vmatpush1.bf16.msra.mxu0 %v18514_v9  ;;  %14372 = vmatprep.subr.bf16.mxu1 %v18539_v17  ;;  %v18555_v8 = vpack.c.bf16 %v5149_v50, %v5145_v22  ;;  %v18557_v9 = vsub.f32 %v5050_v55, %v5145_v22  ;;  %v18559_v17 = vsub.f32 %v5052_v23, %v5149_v50  ;;  %v5155_v23 = vand.u32 4294901760, %v5053_v39 }
 0x4d4   : > { %14244 = vmatprep.subr.bf16.mxu0 %v18526_v3  ;;  %20644 = vst [vmem:[#allocation88_spill] sm:$0xff] %v18552_v2  ;;  %v5151_v3 = vand.u32 4294901760, %v5051_v4  ;;  %20649 = vst [vmem:[#allocation93_spill] sm:$0xff] %v18564_v12  ;;  %v18574_v55 = vpack.c.bf16 %v5157_v26, %v5153_v48  ;;  %v18576_v50 = vsub.f32 %v5056_v7, %v5157_v26  ;;  %v5058_v7 = vld [vmem:[#allocation18 + $0x148] sm:$0xff] }
 0x4d5   : > { %20645 = vst [vmem:[#allocation89_spill] sm:$0xff] %v18555_v8  ;;  %20646 = vst [vmem:[#allocation90_spill] sm:$0xff] %v18557_v9  ;;  %v18572_v15 = vpack.c.bf16 %v18559_v17, %v18557_v9 }
 0x4d6   : > { %20647 = vst [vmem:[#allocation91_spill] sm:$0xff] %v18559_v17  ;;  %14374 = vmatpush1.bf16.msra.mxu1 %v18552_v2  ;;  %v18562_v14 = vpack.c.bf16 %v5151_v3, %v5147_v44  ;;  %v18566_v40 = vsub.f32 %v5051_v4, %v5151_v3  ;;  %20653 = vst [vmem:[#allocation97_spill] sm:$0xff] %v18574_v55  ;;  %v5159_v44 = vand.u32 4294901760, %v5055_v34 }
 0x4d7   : > { %14246 = vmatpush1.bf16.msra.mxu0 %v18545_v16  ;;  %v18568_v16 = vsub.f32 %v5054_v24, %v5153_v48  ;;  %20652 = vst [vmem:[#allocation96_spill] sm:$0xff] %v18572_v15  ;;  %20654 = vst [vmem:[#allocation98_spill] sm:$0xff] %v18576_v50  ;;  %14376 = vmatprep.subr.bf16.mxu1 %v18572_v15  ;;  %v18589_v4 = vsub.f32 %v5053_v39, %v5155_v23  ;;  %v5060_v48 = vld [vmem:[#allocation18 + $0x158] sm:$0xff]  ;;  %v5057_v39 = vld [vmem:[#allocation18 + $0x140] sm:$0xff]  ;;  %v5161_v15 = vand.u32 4294901760, %v5058_v7 }
 0x4d8   : > { %20648 = vst [vmem:[#allocation92_spill] sm:$0xff] %v18562_v14  ;;  %20650 = vst [vmem:[#allocation94_spill] sm:$0xff] %v18566_v40  ;;  %14248 = vmatprep.subr.bf16.mxu0 %v18555_v8  ;;  %v18581_v22 = vpack.c.bf16 %v18566_v40, %v18564_v12  ;;  %v18593_v63 = vpack.c.bf16 %v5159_v44, %v5155_v23  ;;  %v18595_v26 = vsub.f32 %v5055_v34, %v5159_v44  ;;  %v5064_v34 = vld [vmem:[#allocation18 + $0x178] sm:$0xff]  ;;  %v5061_v8 = vld [vmem:[#allocation18 + $0x160] sm:$0xff] }
 0x4d9   : > { %20651 = vst [vmem:[#allocation95_spill] sm:$0xff] %v18568_v16  ;;  %v18587_v24 = vpack.c.bf16 %v18576_v50, %v18568_v16  ;;  %20657 = vst [vmem:[#allocation101_spill] sm:$0xff] %v18589_v4  ;;  %v5165_v2 = vand.u32 4294901760, %v5060_v48  ;;  %v5163_v23 = vand.u32 4294901760, %v5057_v39  ;;  %v5063_v50 = vld [vmem:[#allocation18 + $0x170] sm:$0xff]  ;;  %v5066_v16 = vld [vmem:[#allocation18 + $0x188] sm:$0xff] }
 0x4da   : > { %20655 = vst [vmem:[#allocation99_spill] sm:$0xff] %v18581_v22  ;;  %14378 = vmatpush1.bf16.msra.mxu1 %v18581_v22  ;;  %20658 = vst [vmem:[#allocation102_spill] sm:$0xff] %v18593_v63  ;;  %v18600_v3 = vpack.c.bf16 %v18595_v26, %v18589_v4  ;;  %v5059_v22 = vld [vmem:[#allocation18 + $0x150] sm:$0xff]  ;;  %v18606_v4 = vsub.f32 %v5058_v7, %v5161_v15  ;;  %v5068_v40 = vld [vmem:[#allocation18 + $0x198] sm:$0xff]  ;;  %v5175_v7 = vand.u32 4294901760, %v5063_v50 }
 0x4db   : > { %14250 = vmatpush1.bf16.msra.mxu0 %v18562_v14  ;;  %20656 = vst [vmem:[#allocation100_spill] sm:$0xff] %v18587_v24  ;;  %20659 = vst [vmem:[#allocation103_spill] sm:$0xff] %v18595_v26  ;;  %14380 = vmatprep.subr.bf16.mxu1 %v18587_v24  ;;  %v5167_v44 = vand.u32 4294901760, %v5059_v22  ;;  %v5173_v24 = vand.u32 4294901760, %v5064_v34  ;;  %v18604_v26 = vpack.c.bf16 %v5165_v2, %v5161_v15  ;;  %v5065_v12 = vld [vmem:[#allocation18 + $0x180] sm:$0xff] }
 0x4dc   : > { %14252 = vmatprep.subr.bf16.mxu0 %v18574_v55  ;;  %20660 = vst [vmem:[#allocation104_spill] sm:$0xff] %v18600_v3  ;;  %v5062_v55 = vld [vmem:[#allocation18 + $0x168] sm:$0xff]  ;;  %v18641_v49 = vsub.f32 %v5063_v50, %v5175_v7 }
 0x4dd   : > { %v5169_v14 = vand.u32 4294901760, %v5062_v55  ;;  %20661 = vst [vmem:[#allocation105_spill] sm:$0xff] %v18604_v26  ;;  %v18612_v17 = vpack.c.bf16 %v5167_v44, %v5163_v23  ;;  %v18614_v9 = vsub.f32 %v5059_v22, %v5167_v44  ;;  %v18624_v15 = vsub.f32 %v5064_v34, %v5173_v24  ;;  %v5072_v44 = vld [vmem:[#allocation18 + $0x1b8] sm:$0xff] }
 0x4de   : > { %14382 = vmatpush1.bf16.msra.mxu1 %v18600_v3  ;;  %v18610_v3 = vsub.f32 %v5057_v39, %v5163_v23  ;;  %v5177_v22 = vand.u32 4294901760, %v5066_v16  ;;  %v5070_v23 = vld [vmem:[#allocation18 + $0x1a8] sm:$0xff] }
 0x4df   : > { %14254 = vmatpush1.bf16.msra.mxu0 %v18593_v63  ;;  %v18608_v63 = vsub.f32 %v5060_v48, %v5165_v2  ;;  %20662 = vst [vmem:[#allocation106_spill] sm:$0xff] %v18612_v17  ;;  %v18616_v10 = vpack.c.bf16 %v5173_v24, %v5169_v14  ;;  %v18618_v37 = vsub.f32 %v5062_v55, %v5169_v14  ;;  %v5171_v2 = vand.u32 4294901760, %v5061_v8  ;;  %v5067_v48 = vld [vmem:[#allocation18 + $0x190] sm:$0xff] }
 0x4e0   : > { %14256 = vmatprep.subr.bf16.mxu0 %v18604_v26  ;;  %v18629_v39 = vpack.c.bf16 %v18614_v9, %v18610_v3  ;;  %v5181_v14 = vand.u32 4294901760, %v5068_v40  ;;  %v5179_v55 = vand.u32 4294901760, %v5065_v12  ;;  %v18646_v25 = vsub.f32 %v5066_v16, %v5177_v22 }
 0x4e1   : > { %20663 = vst [vmem:[#allocation107_spill] sm:$0xff] %v18616_v10  ;;  %v18622_v18 = vpack.c.bf16 %v18608_v63, %v18606_v4  ;;  %v18635_v24 = vpack.c.bf16 %v18624_v15, %v18618_v37  ;;  %v18637_v34 = vpack.c.bf16 %v5175_v7, %v5171_v2  ;;  %v18639_v26 = vsub.f32 %v5061_v8, %v5171_v2 }
 0x4e2   : > { %20665 = vst [vmem:[#allocation109_spill] sm:$0xff] %v18629_v39  ;;  %v18648_v53 = vsub.f32 %v5068_v40, %v5181_v14  ;;  %v18656_v50 = vsub.f32 %v5065_v12, %v5179_v55  ;;  %v5185_v2 = vand.u32 4294901760, %v5070_v23  ;;  %v5189_v7 = vand.u32 4294901760, %v5072_v44 }
 0x4e3   : > { %20664 = vst [vmem:[#allocation108_spill] sm:$0xff] %v18622_v18  ;;  %14258 = vmatpush1.bf16.msra.mxu0 %v18612_v17  ;;  %14384 = vmatprep.subr.bf16.mxu1 %v18622_v18  ;;  %20666 = vst [vmem:[#allocation110_spill] sm:$0xff] %v18635_v24  ;;  %v18644_v17 = vpack.c.bf16 %v5181_v14, %v5177_v22  ;;  %v5183_v18 = vand.u32 4294901760, %v5067_v48  ;;  %v18654_v8 = vpack.c.bf16 %v18641_v49, %v18639_v26 }
 0x4e4   : > { %20667 = vst [vmem:[#allocation111_spill] sm:$0xff] %v18637_v34  ;;  %14386 = vmatpush1.bf16.msra.mxu1 %v18629_v39  ;;  %14260 = vmatprep.subr.bf16.mxu0 %v18616_v10  ;;  %v5074_v39 = vld [vmem:[#allocation18 + $0x1c8] sm:$0xff]  ;;  %v18660_v40 = vpack.c.bf16 %v18648_v53, %v18646_v25  ;;  %v5187_v14 = vand.u32 4294901760, %v5069_v56  ;;  %v18667_v10 = vpack.c.bf16 %v5189_v7, %v5185_v2 }
 0x4e5   : > { %20668 = vst [vmem:[#allocation112_spill] sm:$0xff] %v18644_v17  ;;  %14388 = vmatprep.subr.bf16.mxu1 %v18635_v24  ;;  %20669 = vst [vmem:[#allocation113_spill] sm:$0xff] %v18654_v8  ;;  %v18662_v16 = vpack.c.bf16 %v5183_v18, %v5179_v55  ;;  %v18664_v22 = vsub.f32 %v5067_v48, %v5183_v18  ;;  %v5073_v24 = vld [vmem:[#allocation18 + $0x1c0] sm:$0xff]  ;;  %v18669_v12 = vsub.f32 %v5070_v23, %v5185_v2 }
 0x4e6   : > { %20670 = vst [vmem:[#allocation114_spill] sm:$0xff] %v18660_v40  ;;  %20672 = vst [vmem:[#allocation116_spill] sm:$0xff] %v18667_v10  ;;  %v18671_v47 = vsub.f32 %v5072_v44, %v5189_v7  ;;  %v18679_v48 = vsub.f32 %v5069_v56, %v5187_v14  ;;  %v5193_v55 = vand.u32 4294901760, %v5074_v39  ;;  %v18686_v44 = vsub.f32 %v5071_v54, %v5191_v33  ;;  %v5077_v7 = vld [vmem:[#allocation18 + $0x1e0] sm:$0xff] }
 0x4e7   : > { %20671 = vst [vmem:[#allocation115_spill] sm:$0xff] %v18662_v16  ;;  %14262 = vmatpush1.bf16.msra.mxu0 %v18637_v34  ;;  %v18677_v18 = vpack.c.bf16 %v18664_v22, %v18656_v50  ;;  %v5197_v34 = vand.u32 4294901760, %v5076_v0  ;;  %v5195_v2 = vand.u32 4294901760, %v5073_v24  ;;  %v5201_v54 = vand.u32 4294901760, %v5078_v58 }
 0x4e8   : > { %14264 = vmatprep.subr.bf16.mxu0 %v18644_v17  ;;  %14390 = vmatpush1.bf16.msra.mxu1 %v18654_v8  ;;  %v18684_v23 = vpack.c.bf16 %v18671_v47, %v18669_v12  ;;  %v18688_v8 = vpack.c.bf16 %v5191_v33, %v5187_v14  ;;  %v18691_v56 = vsub.f32 %v5074_v39, %v5193_v55 }
 0x4e9   : > { %20673 = vst [vmem:[#allocation117_spill] sm:$0xff] %v18677_v18  ;;  %14392 = vmatprep.subr.bf16.mxu1 %v18660_v40  ;;  %v18693_v17 = vsub.f32 %v5076_v0, %v5197_v34  ;;  %v18695_v11 = vpack.c.bf16 %v5197_v34, %v5193_v55  ;;  %v18697_v40 = vsub.f32 %v5073_v24, %v5195_v2  ;;  %v5203_v0 = vand.u32 4294901760, %v5077_v7 }
 0x4ea   : > { %20674 = vst [vmem:[#allocation118_spill] sm:$0xff] %v18684_v23  ;;  %20675 = vst [vmem:[#allocation119_spill] sm:$0xff] %v18688_v8  ;;  %v18703_v33 = vpack.c.bf16 %v18686_v44, %v18679_v48  ;;  %v18705_v39 = vsub.f32 %v5075_v41, %v5199_v31  ;;  %v18712_v24 = vsub.f32 %v5078_v58, %v5201_v54  ;;  %v5207_v55 = vand.u32 4294901760, %v5079_v35 }
 0x4eb   : > { %14266 = vmatpush1.bf16.msra.mxu0 %v18662_v16  ;;  %20676 = vst [vmem:[#allocation120_spill] sm:$0xff] %v18695_v11  ;;  %v18710_v34 = vpack.c.bf16 %v18693_v17, %v18691_v56  ;;  %v18714_v14 = vsub.f32 %v5080_v30, %v5205_v20  ;;  %v20383_v41 = vand.u32 4294901760, %v18253_v28  ;;  %v18725_v16 = vpack.c.bf16 %v5205_v20, %v5201_v54 }
 0x4ec   : > { %14268 = vmatprep.subr.bf16.mxu0 %v18667_v10  ;;  %14394 = vmatpush1.bf16.msra.mxu1 %v18677_v18  ;;  %20677 = vst [vmem:[#allocation121_spill] sm:$0xff] %v18703_v33  ;;  %v18716_v10 = vpack.c.bf16 %v5199_v31, %v5195_v2  ;;  %v20382_v18 = vand.u32 4294901760, %v18251_v27  ;;  %v18729_v30 = vsub.f32 %v5077_v7, %v5203_v0 }
 0x4ed   : > { %14396 = vmatprep.subr.bf16.mxu1 %v18684_v23  ;;  %20678 = vst [vmem:[#allocation122_spill] sm:$0xff] %v18710_v34  ;;  %v18723_v23 = vpack.c.bf16 %v18705_v39, %v18697_v40  ;;  %20681 = vst [vmem:[#allocation125_spill] sm:$0xff] %v18725_v16  ;;  %v18731_v31 = vsub.f32 %v5079_v35, %v5207_v55  ;;  %v5241_v2 = vsub.f32 %v18253_v28, %v20383_v41 }
 0x4ee   : > { %20679 = vst [vmem:[#allocation123_spill] sm:$0xff] %v18716_v10  ;;  %v5229_v58 = vsub.f32 %v18251_v27, %v20382_v18  ;;  %v18742_v20 = vpack.c.bf16 %v18714_v14, %v18712_v24  ;;  %v18744_v54 = vpack.c.bf16 %v5207_v55, %v5203_v0  ;;  %v20388_v0 = vand.u32 4294901760, %v18606_v4 }
 0x4ef   : > { %14270 = vmatpush1.bf16.msra.mxu0 %v18688_v8  ;;  %20680 = vst [vmem:[#allocation124_spill] sm:$0xff] %v18723_v23  ;;  %v5242_v7 = vand.u32 4294901760, %v5241_v2  ;;  %v18751_v18 = vpack.c.bf16 %v18731_v31, %v18729_v30  ;;  %v20391_v55 = vand.u32 4294901760, %v18608_v63  ;;  %v20396_v2 = vand.u32 4294901760, %v18610_v3 }
 0x4f0   : > { %14272 = vmatprep.subr.bf16.mxu0 %v18695_v11  ;;  %14398 = vmatpush1.bf16.msra.mxu1 %v18703_v33  ;;  %20682 = vst [vmem:[#allocation126_spill] sm:$0xff] %v18742_v20  ;;  %20683 = vst [vmem:[#allocation127_spill] sm:$0xff] %v18744_v54  ;;  %v5230_v35 = vand.u32 4294901760, %v5229_v58  ;;  %v5469_v58 = vsub.f32 %v18606_v4, %v20388_v0  ;;  %v20405_v0 = vand.u32 4294901760, %v18624_v15  ;;  %v20418_v8 = vand.u32 4294901760, %v18671_v47 }
 0x4f1   : > { %14400 = vmatprep.subr.bf16.mxu1 %v18710_v34  ;;  %20684 = vst [vmem:[#allocation128_spill] sm:$0xff] %v18751_v18 }
 0x4f2   : > { %v18753_v41 = vpack.c.bf16 %v5242_v7, %v5230_v35  ;;  %v20399_v35 = vand.u32 4294901760, %v18614_v9  ;;  %v5481_v7 = vsub.f32 %v18608_v63, %v20391_v55  ;;  %v20406_v55 = vand.u32 4294901760, %v18639_v26 }
 0x4f3   : > { %14274 = vmatpush1.bf16.msra.mxu0 %v18716_v10  ;;  %v20408_v10 = vand.u32 4294901760, %v18646_v25 }
 0x4f4   : > { %14276 = vmatprep.subr.bf16.mxu0 %v18725_v16  ;;  %14402 = vmatpush1.bf16.msra.mxu1 %v18723_v23  ;;  %20685 = vst [vmem:[#allocation129_spill] sm:$0xff] %v18753_v41  ;;  %v5475_v23 = vsub.f32 %v18610_v3, %v20396_v2  ;;  %v5487_v34 = vsub.f32 %v18614_v9, %v20399_v35  ;;  %v5482_v33 = vand.u32 4294901760, %v5481_v7  ;;  %v20407_v2 = vand.u32 4294901760, %v18641_v49 }
 0x4f5   : > { %14404 = vmatprep.subr.bf16.mxu1 %v18742_v20  ;;  %v5470_v20 = vand.u32 4294901760, %v5469_v58  ;;  %v5505_v58 = vsub.f32 %v18624_v15, %v20405_v0  ;;  %v5499_v7 = vsub.f32 %v18639_v26, %v20406_v55 }
 0x4f7   : > { %14278 = vmatpush1.bf16.msra.mxu0 %v18744_v54  ;;  %v5488_v54 = vand.u32 4294901760, %v5487_v34  ;;  %v18786_v16 = vpack.c.bf16 %v5482_v33, %v5470_v20  ;;  %v5506_v11 = vand.u32 4294901760, %v5505_v58  ;;  %v20411_v34 = vand.u32 4294901760, %v18648_v53 }
 0x4f8   : > { %14280 = vmatprep.subr.bf16.mxu0 %v18753_v41  ;;  %14406 = vmatpush1.bf16.msra.mxu1 %v18751_v18  ;;  %v20402_v18 = vand.u32 4294901760, %v18618_v37  ;;  %v5500_v0 = vand.u32 4294901760, %v5499_v7  ;;  %v5517_v33 = vsub.f32 %v18646_v25, %v20408_v10  ;;  %v20415_v20 = vand.u32 4294901760, %v18664_v22 }
 0x4f9   : > { %14408 = vmatprep.subr.bf16.mxu1 %v18249_v61  ;;  %v5476_v61 = vand.u32 4294901760, %v5475_v23  ;;  %20686 = vst [vmem:[#allocation130_spill] sm:$0xff] %v18786_v16  ;;  %v5511_v23 = vsub.f32 %v18641_v49, %v20407_v2  ;;  %v20417_v58 = vand.u32 4294901760, %v18669_v12 }
 0x4fa   : > { %v5493_v41 = vsub.f32 %v18618_v37, %v20402_v18  ;;  %v5518_v2 = vand.u32 4294901760, %v5517_v33  ;;  %v5535_v10 = vsub.f32 %v18664_v22, %v20415_v20 }
 0x4fb   : > { %v18792_v18 = vpack.c.bf16 %v5488_v54, %v5476_v61  ;;  %v5512_v61 = vand.u32 4294901760, %v5511_v23  ;;  %v5529_v54 = vsub.f32 %v18648_v53, %v20411_v34  ;;  %v5541_v23 = vsub.f32 %v18669_v12, %v20417_v58 }
 0x4fc   : > { %v5494_v35 = vand.u32 4294901760, %v5493_v41  ;;  %v20413_v41 = vand.u32 4294901760, %v18656_v50  ;;  %v20419_v34 = vand.u32 4294901760, %v18679_v48 }
 0x4fd   : > { %20687 = vst [vmem:[#allocation131_spill] sm:$0xff] %v18792_v18  ;;  %v20420_v18 = vand.u32 4294901760, %v18686_v44  ;;  %v5542_v16 = vand.u32 4294901760, %v5541_v23  ;;  %v20426_v23 = vand.u32 4294901760, %v18705_v39 }
 0x4fe   : > { %v18803_v55 = vpack.c.bf16 %v5506_v11, %v5494_v35  ;;  %v5523_v7 = vsub.f32 %v18656_v50, %v20413_v41  ;;  %v18816_v11 = vpack.c.bf16 %v5512_v61, %v5500_v0  ;;  %v5530_v35 = vand.u32 4294901760, %v5529_v54 }
 0x4ff   : > { %v5553_v41 = vsub.f32 %v18671_v47, %v20418_v8  ;;  %v5547_v0 = vsub.f32 %v18679_v48, %v20419_v34  ;;  %v20422_v61 = vand.u32 4294901760, %v18691_v56 }
 0x500   : > { %20688 = vst [vmem:[#allocation132_spill] sm:$0xff] %v18803_v55  ;;  %20689 = vst [vmem:[#allocation133_spill] sm:$0xff] %v18816_v11  ;;  %v5524_v33 = vand.u32 4294901760, %v5523_v7  ;;  %v5536_v55 = vand.u32 4294901760, %v5535_v10  ;;  %v18826_v20 = vpack.c.bf16 %v5530_v35, %v5518_v2  ;;  %v5559_v10 = vsub.f32 %v18686_v44, %v20420_v18 }
 0x501   : > { %v5554_v58 = vand.u32 4294901760, %v5553_v41  ;;  %v20423_v7 = vand.u32 4294901760, %v18693_v17  ;;  %v5548_v8 = vand.u32 4294901760, %v5547_v0  ;;  %v5565_v2 = vsub.f32 %v18691_v56, %v20422_v61 }
 0x502   : > { %20690 = vst [vmem:[#allocation134_spill] sm:$0xff] %v18826_v20  ;;  %v18832_v54 = vpack.c.bf16 %v5536_v55, %v5524_v33  ;;  %v20425_v35 = vand.u32 4294901760, %v18697_v40  ;;  %v5560_v55 = vand.u32 4294901760, %v5559_v10  ;;  %v20693_v33 = vand.u32 4294901760, %v18251_v27 }
 0x503   : > { %v18843_v34 = vpack.c.bf16 %v5554_v58, %v5542_v16  ;;  %v5577_v41 = vsub.f32 %v18693_v17, %v20423_v7  ;;  %v20694_v18 = vand.u32 4294901760, %v18253_v28  ;;  %v5583_v16 = vsub.f32 %v18705_v39, %v20426_v23 }
 0x504   : > { %20691 = vst [vmem:[#allocation135_spill] sm:$0xff] %v18832_v54  ;;  %v5566_v54 = vand.u32 4294901760, %v5565_v2  ;;  %v5571_v61 = vsub.f32 %v18697_v40, %v20425_v35  ;;  %v18860_v58 = vpack.c.bf16 %v5560_v55, %v5548_v8  ;;  %v20428_v7 = vand.u32 4294901760, %v18712_v24 }
 0x505   : > { %20692 = vst [vmem:[#allocation136_spill] sm:$0xff] %v18843_v34  ;;  %v18852_v0 = vpack.c.bf16 %v20694_v18, %v20693_v33  ;;  %v5578_v10 = vand.u32 4294901760, %v5577_v41  ;;  %v20430_v27 = vand.u32 4294901760, %v18714_v14  ;;  %v5584_v28 = vand.u32 4294901760, %v5583_v16 }
 0x506   : > { %20696 = vst [vmem:[#allocation138_spill] sm:$0xff] %v18860_v58  ;;  %v5572_v34 = vand.u32 4294901760, %v5571_v61  ;;  %v20433_v18 = vand.u32 4294901760, %v18729_v30  ;;  %v20434_v2 = vand.u32 4294901760, %v18731_v31  ;;  %v5589_v35 = vsub.f32 %v18712_v24, %v20428_v7 }
 0x507   : > { %20695 = vst [vmem:[#allocation137_spill] sm:$0xff] %v18852_v0  ;;  %v18866_v33 = vpack.c.bf16 %v5578_v10, %v5566_v54  ;;  %v5601_v8 = vsub.f32 %v18714_v14, %v20430_v27  ;;  %v18887_v58 = vsub.s32 1, %v18039_v13 }
 0x508   : > { %v18874_v55 = vpack.c.bf16 %v5584_v28, %v5572_v34  ;;  %v5595_v61 = vsub.f32 %v18729_v30, %v20433_v18  ;;  %v5607_v41 = vsub.f32 %v18731_v31, %v20434_v2  ;;  %v5590_v54 = vand.u32 4294901760, %v5589_v35 }
 0x509   : > { %20697 = vst [vmem:[#allocation139_spill] sm:$0xff] %v18866_v33  ;;  %v5602_v16 = vand.u32 4294901760, %v5601_v8  ;;  %20701 = vst [vmem:[#allocation143_spill] sm:$0xff] %v18887_v58 }
 0x50a   : > { %20698 = vst [vmem:[#allocation140_spill] sm:$0xff] %v18874_v55  ;;  %v5596_v10 = vand.u32 4294901760, %v5595_v61  ;;  %v5608_v23 = vand.u32 4294901760, %v5607_v41  ;;  %v4792_v55 = vld [vmem:[#allocation13] sm:$0x3] }
 0x50b   : > { %v18882_v0 = vpack.c.bf16 %v5602_v16, %v5590_v54  ;;  %v4797_v18 = vrot.slane %v4792_v55, %v18042_v21  ;;  %v4801_v2 = vrot.slane %v4792_v55, %v18887_v58 }
 0x50c   : > { %v18884_v7 = vpack.c.bf16 %v5608_v23, %v5596_v10 }
 0x50d   : > { %20699 = vst [vmem:[#allocation141_spill] sm:$0xff] %v18882_v0 }
 0x50e   : > { %20700 = vst [vmem:[#allocation142_spill] sm:$0xff] %v18884_v7 }
 0x588   : > { %v4737_v33 = vpop.f32.mrb[4].mxu0 }
 0x589   : > { %v4739_v27 = vpop.f32.mrb[5].mxu0  ;;  %v18895_v54 = vadd.f32 %v4797_v18, %v4737_v33 }
 0x58a   : > { %v4741_v34 = vpop.f32.mrb[6].mxu0  ;;  %v18899_v7 = vadd.f32 %v4801_v2, %v4739_v27 }
 0x58b   : > { %v4743_v28 = vpop.f32.mrb[7].mxu0  ;;  %v18891_v8 = vadd.f32 %v4797_v18, %v4741_v34  ;;  %20704 = vst [vmem:[#allocation146_spill] sm:$0xff] %v18895_v54 }
 0x58c   : > { %v18893_v41 = vadd.f32 %v4801_v2, %v4743_v28  ;;  %20706 = vst [vmem:[#allocation148_spill] sm:$0xff] %v18899_v7 }
 0x58d   : > { %20702 = vst [vmem:[#allocation144_spill] sm:$0xff] %v18891_v8  ;;  %v4945_v21 = vadd.f32 %v18891_v8, %v18895_v54 }
 0x58e   : > { %20703 = vst [vmem:[#allocation145_spill] sm:$0xff] %v18893_v41  ;;  %v4958_v55 = vadd.f32 %v18893_v41, %v18899_v7 }
 0x590   : > { %v4747_v35 = vpop.f32.mrb[8].mxu0 }
 0x591   : > { %v4749_v61 = vpop.f32.mrb[9].mxu0  ;;  %v18897_v16 = vadd.f32 %v4797_v18, %v4747_v35 }
 0x592   : > { %v4751_v23 = vpop.f32.mrb[10].mxu0  ;;  %v18901_v13 = vadd.f32 %v4801_v2, %v4749_v61 }
 0x593   : > { %20705 = vst [vmem:[#allocation147_spill] sm:$0xff] %v18897_v16  ;;  %v4753_v10 = vpop.f32.mrb[11].mxu0  ;;  %v4946_v34 = vadd.f32 %v4945_v21, %v18897_v16  ;;  %v18908_v28 = vadd.f32 %v4797_v18, %v4751_v23 }
 0x594   : > { %20707 = vst [vmem:[#allocation149_spill] sm:$0xff] %v18901_v13  ;;  %v4959_v33 = vadd.f32 %v4958_v55, %v18901_v13  ;;  %v18911_v58 = vadd.f32 %v4801_v2, %v4753_v10 }
 0x595   : > { %20708 = vst [vmem:[#allocation150_spill] sm:$0xff] %v18908_v28  ;;  %v4947_v54 = vadd.f32 %v4946_v34, %v18908_v28 }
 0x596   : > { %20709 = vst [vmem:[#allocation151_spill] sm:$0xff] %v18911_v58  ;;  %v4960_v11 = vadd.f32 %v4959_v33, %v18911_v58  ;;  %v20716_v33 = vand.u32 4294901760, %v18606_v4 }
 0x598   : > { %v4757_v35 = vpop.f32.mrb[12].mxu0 }
 0x599   : > { %v18913_v0 = vadd.f32 %v4797_v18, %v4757_v35  ;;  %v4759_v27 = vpop.f32.mrb[13].mxu0 }
 0x59a   : > { %v18915_v61 = vadd.f32 %v4801_v2, %v4759_v27  ;;  %v4761_v20 = vpop.f32.mrb[14].mxu0 }
 0x59b   : > { %20710 = vst [vmem:[#allocation152_spill] sm:$0xff] %v18913_v0  ;;  %v4763_v8 = vpop.f32.mrb[15].mxu0  ;;  %v4948_v21 = vadd.f32 %v4947_v54, %v18913_v0  ;;  %v18920_v23 = vadd.f32 %v4797_v18, %v4761_v20  ;;  %v20717_v20 = vand.u32 4294901760, %v18608_v63 }
 0x59c   : > { %20711 = vst [vmem:[#allocation153_spill] sm:$0xff] %v18915_v61  ;;  %v4961_v55 = vadd.f32 %v4960_v11, %v18915_v61  ;;  %v18923_v10 = vadd.f32 %v4801_v2, %v4763_v8  ;;  %v20719_v11 = vand.u32 4294901760, %v18610_v3  ;;  %v20720_v8 = vand.u32 4294901760, %v18614_v9 }
 0x59d   : > { %20712 = vst [vmem:[#allocation154_spill] sm:$0xff] %v18920_v23  ;;  %v4949_v35 = vadd.f32 %v4948_v21, %v18920_v23  ;;  %v18935_v54 = vpack.c.bf16 %v20717_v20, %v20716_v33  ;;  %v20724_v33 = vand.u32 4294901760, %v18618_v37  ;;  %v20725_v3 = vand.u32 4294901760, %v18624_v15 }
 0x59e   : > { %20713 = vst [vmem:[#allocation155_spill] sm:$0xff] %v18923_v10  ;;  %v4962_v1 = vadd.f32 %v4961_v55, %v18923_v10  ;;  %v18941_v0 = vpack.c.bf16 %v20720_v8, %v20719_v11  ;;  %v20462_v8 = vand.u32 4294901760, %v18255_v45  ;;  %v20731_v37 = vand.u32 4294901760, %v18648_v53 }
 0x59f   : > { %20718 = vst [vmem:[#allocation158_spill] sm:$0xff] %v18935_v54  ;;  %v18955_v9 = vpack.c.bf16 %v20725_v3, %v20724_v33  ;;  %v20733_v15 = vand.u32 4294901760, %v18656_v50  ;;  %v20461_v33 = vand.u32 4294901760, %v18259_v43  ;;  %v20736_v50 = vand.u32 4294901760, %v18669_v12 }
 0x5a0   : > { %v4767_v16 = vpop.f32.mrb[16].mxu0  ;;  %20721 = vst [vmem:[#allocation159_spill] sm:$0xff] %v18941_v0  ;;  %v5235_v53 = vsub.f32 %v18255_v45, %v20462_v8 }
 0x5a1   : > { %v18926_v60 = vadd.f32 %v4797_v18, %v4767_v16  ;;  %v4769_v27 = vpop.f32.mrb[17].mxu0  ;;  %20726 = vst [vmem:[#allocation162_spill] sm:$0xff] %v18955_v9 }
 0x5a2   : > { %v18929_v34 = vadd.f32 %v4801_v2, %v4769_v27  ;;  %v4771_v28 = vpop.f32.mrb[18].mxu0 }
 0x5a3   : > { %20714 = vst [vmem:[#allocation156_spill] sm:$0xff] %v18926_v60  ;;  %v4950_v16 = vadd.f32 %v4949_v35, %v18926_v60  ;;  %v18944_v21 = vadd.f32 %v4797_v18, %v4771_v28  ;;  %v4773_v55 = vpop.f32.mrb[19].mxu0  ;;  %v20727_v35 = vand.u32 4294901760, %v18639_v26  ;;  %v20728_v18 = vand.u32 4294901760, %v18641_v49 }
 0x5a4   : > { %20715 = vst [vmem:[#allocation157_spill] sm:$0xff] %v18929_v34  ;;  %v4963_v27 = vadd.f32 %v4962_v1, %v18929_v34  ;;  %v18947_v23 = vadd.f32 %v4801_v2, %v4773_v55 }
 0x5a5   : > { %20722 = vst [vmem:[#allocation160_spill] sm:$0xff] %v18944_v21  ;;  %v4951_v4 = vadd.f32 %v4950_v16, %v18944_v21  ;;  %v18961_v28 = vpack.c.bf16 %v20728_v18, %v20727_v35  ;;  %v20730_v16 = vand.u32 4294901760, %v18646_v25  ;;  %v20739_v18 = vand.u32 4294901760, %v18679_v48 }
 0x5a6   : > { %20723 = vst [vmem:[#allocation161_spill] sm:$0xff] %v18947_v23  ;;  %v4964_v63 = vadd.f32 %v4963_v27, %v18947_v23  ;;  %v20734_v27 = vand.u32 4294901760, %v18664_v22  ;;  %v20737_v22 = vand.u32 4294901760, %v18671_v47  ;;  %v20463_v48 = vand.u32 4294901760, %v18284_v52 }
 0x5a7   : > { %v4952_v20 = vrot.slane %v4951_v4, 4  ;;  %20729 = vst [vmem:[#allocation163_spill] sm:$0xff] %v18961_v28  ;;  %v18968_v55 = vpack.c.bf16 %v20731_v37, %v20730_v16  ;;  %v20777_v28 = vld [vmem:[#allocation53_spill] sm:$0xff] }
 0x5a8   : > { %v4965_v1 = vrot.slane %v4964_v63, 4  ;;  %v18974_v26 = vpack.c.bf16 %v20734_v27, %v20733_v15  ;;  %v18986_v35 = vpack.c.bf16 %v20737_v22, %v20736_v50  ;;  %v20743_v50 = vand.u32 4294901760, %v18693_v17 }
 0x5a9   : > { %v4953_v2 = vadd.f32 %v4952_v20, %v4951_v4  ;;  %20732 = vst [vmem:[#allocation164_spill] sm:$0xff] %v18968_v55  ;;  %v20460_v4 = vand.u32 4294901760, %v18263_v38  ;;  %v20773_v55 = vld [vmem:[#allocation71_spill] sm:$0xff] }
 0x5aa   : > { %v4966_v11 = vadd.f32 %v4965_v1, %v4964_v63  ;;  %20735 = vst [vmem:[#allocation165_spill] sm:$0xff] %v18974_v26  ;;  %v20465_v63 = vand.u32 4294901760, %v18269_v59  ;;  %20738 = vst [vmem:[#allocation166_spill] sm:$0xff] %v18986_v35  ;;  %v20740_v1 = vand.u32 4294901760, %v18686_v44 }
 0x5ab   : > { %v4954_v49 = vrot.slane %v4953_v2, 2  ;;  %v5253_v47 = vsub.f32 %v18263_v38, %v20460_v4 }
 0x5ac   : > { %v4967_v3 = vrot.slane %v4966_v11, 2  ;;  %v18992_v16 = vpack.c.bf16 %v20740_v1, %v20739_v18  ;;  %v5265_v12 = vsub.f32 %v18269_v59, %v20465_v63  ;;  %v20745_v18 = vand.u32 4294901760, %v18697_v40 }
 0x5ad   : > { %v4955_v20 = vadd.f32 %v4954_v49, %v4953_v2  ;;  %v5247_v2 = vsub.f32 %v18259_v43, %v20461_v33  ;;  %v5236_v49 = vand.u32 4294901760, %v5235_v53  ;;  %v20746_v1 = vand.u32 4294901760, %v18705_v39 }
 0x5ae   : > { %v4968_v25 = vadd.f32 %v4967_v3, %v4966_v11  ;;  %20741 = vst [vmem:[#allocation167_spill] sm:$0xff] %v18992_v16  ;;  %v20464_v11 = vand.u32 4294901760, %v18282_v5  ;;  %v20742_v3 = vand.u32 4294901760, %v18691_v56  ;;  %v5254_v53 = vand.u32 4294901760, %v5253_v47 }
 0x5af   : > { %v4956_v37 = vrot.slane %v4955_v20, 1  ;;  %v19015_v4 = vpack.c.bf16 %v20746_v1, %v20745_v18  ;;  %v5248_v8 = vand.u32 4294901760, %v5247_v2  ;;  %v5266_v17 = vand.u32 4294901760, %v5265_v12 }
 0x5b0   : > { %v4969_v15 = vrot.slane %v4968_v25, 1  ;;  %v19009_v22 = vpack.c.bf16 %v20743_v50, %v20742_v3  ;;  %v5271_v40 = vsub.f32 %v18284_v52, %v20463_v48  ;;  %v20469_v39 = vand.u32 4294901760, %v18291_v46 }
 0x5b1   : > { %v4957_v44 = vadd.f32 %v4956_v37, %v4955_v20  ;;  %20747 = vst [vmem:[#allocation169_spill] sm:$0xff] %v19015_v4  ;;  %v19020_v20 = vsub.f32 %v18282_v5, %v20464_v11  ;;  %v20467_v2 = vand.u32 4294901760, %v18298_v57  ;;  %v20468_v3 = vand.u32 4294901760, %v18311_v51 }
 0x5b2   : > { %v4970_v27 = vadd.f32 %v4969_v15, %v4968_v25  ;;  %20744 = vst [vmem:[#allocation168_spill] sm:$0xff] %v19009_v22  ;;  %v20470_v25 = vand.u32 4294901760, %v18289_v32  ;;  %v20466_v15 = vand.u32 4294901760, %v18307_v42  ;;  %v20749_v47 = vand.u32 4294901760, %v18714_v14 }
 0x5b3   : > { %v4971_v33 = vmul.f32 0.015625, %v4957_v44  ;;  %v20751_v50 = vand.u32 4294901760, %v18729_v30  ;;  %v20752_v18 = vand.u32 4294901760, %v18731_v31  ;;  %v20472_v63 = vand.u32 4294901760, %v18313_v62 }
 0x5b4   : > { %v4972_v56 = vmul.f32 0.015625, %v4970_v27  ;;  %v20748_v27 = vand.u32 4294901760, %v18712_v24  ;;  %v5277_v11 = vsub.f32 %v18289_v32, %v20470_v25  ;;  %v19054_v14 = vpack.c.bf16 %v5248_v8, %v5236_v49 }
 0x5b5   : > { %v19026_v37 = vand.u32 4294901760, %v4971_v33  ;;  %v19044_v1 = vpack.c.bf16 %v20752_v18, %v20751_v50  ;;  %v5260_v30 = vand.u32 4294901760, %v19020_v20  ;;  %v5283_v50 = vsub.f32 %v18298_v57, %v20467_v2 }
 0x5b6   : > { %v19031_v44 = vand.u32 4294901760, %v4972_v56  ;;  %v19038_v12 = vpack.c.bf16 %v20749_v47, %v20748_v27  ;;  %20754 = vst [vmem:[#allocation172_spill] sm:$0xff] %v19054_v14  ;;  %v19056_v27 = vpack.c.bf16 %v5266_v17, %v5254_v53  ;;  %v5272_v47 = vand.u32 4294901760, %v5271_v40 }
 0x5b7   : > { %20753 = vst [vmem:[#allocation171_spill] sm:$0xff] %v19044_v1  ;;  %v19047_v48 = vsub.f32 %v4971_v33, %v19026_v37  ;;  %v5289_v33 = vsub.f32 %v18291_v46, %v20469_v39  ;;  %v5295_v49 = vsub.f32 %v18307_v42, %v20466_v15  ;;  %v5301_v20 = vsub.f32 %v18311_v51, %v20468_v3  ;;  %v20760_v39 = vld [vmem:[#allocation62_spill] sm:$0xff] }
 0x5b8   : > { %20750 = vst [vmem:[#allocation170_spill] sm:$0xff] %v19038_v12  ;;  %v5210_v24 = vsub.f32 %v4972_v56, %v19031_v44  ;;  %20755 = vst [vmem:[#allocation173_spill] sm:$0xff] %v19056_v27  ;;  %v4976_v56 = vmul.f32 %v18893_v41, %v18893_v41  ;;  %v5278_v17 = vand.u32 4294901760, %v5277_v11  ;;  %v5313_v40 = vsub.f32 %v18313_v62, %v20472_v63  ;;  %v20757_v41 = vld [vmem:[#allocation59_spill] sm:$0xff] }
 0x5b9   : > { %v20471_v31 = vand.u32 4294901760, %v19047_v48  ;;  %v4974_v15 = vmul.f32 %v18899_v7, %v18899_v7  ;;  %v4978_v2 = vmul.f32 %v18901_v13, %v18901_v13  ;;  %v5290_v11 = vand.u32 4294901760, %v5289_v33 }
 0x5ba   : > { %5813 = vmatprep.mubr.f32.mxu1 %v5210_v24  ;;  %v5211_v8 = vand.u32 4294901760, %v5210_v24  ;;  %v5284_v25 = vand.u32 4294901760, %v5283_v50  ;;  %v20483_v18 = vand.u32 4294901760, %v20757_v41  ;;  %v5296_v7 = vand.u32 4294901760, %v5295_v49  ;;  %v20761_v50 = vld [vmem:[#allocation46_spill] sm:$0xff]  ;;  %v20763_v49 = vld [vmem:[#allocation47_spill] sm:$0xff] }
 0x5bb   : > { %v5218_v53 = vsub.f32 %v19047_v48, %v20471_v31  ;;  %5816 = vmatmul.mubr.f32.vlgmr.msra.gmra.mrb[2].mxu1 %v19047_v48  ;;  %v20756_v31 = vld [vmem:[#allocation58_spill] sm:$0xff]  ;;  %v5002_v1 = vadd.f32 %v4976_v56, %v4974_v15  ;;  %v5302_v4 = vand.u32 4294901760, %v5301_v20  ;;  %v20758_v13 = vand.u32 4294901760, %v18320_v36 }
 0x5bc   : > { %14410 = vmatpush1.bf16.msra.mxu1 %v18257_v6  ;;  %5953 = vmatprep.mubr.f32.mxu1 %v5211_v8  ;;  %v5212_v3 = vsub.f32 %v5210_v24, %v5211_v8  ;;  %v20484_v63 = vand.u32 4294901760, %v20756_v31  ;;  %v20759_v24 = vld [vmem:[#allocation61_spill] sm:$0xff]  ;;  %v20492_v35 = vand.u32 4294901760, %v20760_v39  ;;  %v4980_v33 = vmul.f32 %v18911_v58, %v18911_v58 }
 0x5bd   : > { %14412 = vmatprep.subr.bf16.mxu1 %v18261_v19  ;;  %v5219_v22 = vand.u32 4294901760, %v5218_v53  ;;  %v5307_v16 = vsub.f32 %v18320_v36, %v20758_v13  ;;  %v20488_v8 = vand.u32 4294901760, %v20759_v24  ;;  %v5003_v26 = vadd.f32 %v5002_v1, %v4978_v2  ;;  %v20767_v53 = vld [vmem:[#allocation63_spill] sm:$0xff] }
 0x5be   : > { %v5213_v12 = vand.u32 4294901760, %v5212_v3  ;;  %v5314_v15 = vand.u32 4294901760, %v5313_v40  ;;  %v20762_v3 = vand.u32 4294901760, %v18325_v29  ;;  %v19103_v13 = vpack.c.bf16 %v5272_v47, %v5260_v30 }
 0x5bf   : > { %v5325_v2 = vsub.f32 %v20756_v31, %v20484_v63  ;;  %v5337_v1 = vsub.f32 %v20757_v41, %v20483_v18  ;;  %v19117_v20 = vpack.c.bf16 %v5296_v7, %v5284_v25  ;;  %v5331_v30 = vsub.f32 %v20759_v24, %v20488_v8  ;;  %v20772_v8 = vld [vmem:[#allocation69_spill] sm:$0xff] }
 0x5c0   : > { %14414 = vmatpush1.bf16.msra.mxu1 %v20761_v50  ;;  %5214 = vmatprep.mubr.f32.mxu0 %v5213_v12  ;;  %v5319_v56 = vsub.f32 %v18325_v29, %v20762_v3  ;;  %20764 = vst [vmem:[#allocation58_spill] sm:$0xff] %v19103_v13  ;;  %v4982_v12 = vmul.f32 %v18915_v61, %v18915_v61  ;;  %v20768_v3 = vld [vmem:[#allocation66_spill] sm:$0xff]  ;;  %v5308_v7 = vand.u32 4294901760, %v5307_v16 }
 0x5c1   : > { %5220 = vmatmul.mubr.f32.vlgmr.msra.gmra.mrb[20].mxu0 %v5219_v22  ;;  %14416 = vmatprep.subr.bf16.mxu1 %v20763_v49  ;;  %v19115_v22 = vpack.c.bf16 %v5290_v11, %v5278_v17  ;;  %20766 = vst [vmem:[#allocation61_spill] sm:$0xff] %v19117_v20  ;;  %v5343_v47 = vsub.f32 %v20760_v39, %v20492_v35  ;;  %v20497_v18 = vand.u32 4294901760, %v20768_v3  ;;  %v20769_v61 = vld [vmem:[#allocation50_spill] sm:$0xff]  ;;  %v20771_v11 = vld [vmem:[#allocation51_spill] sm:$0xff]  ;;  %v5326_v58 = vand.u32 4294901760, %v5325_v2 }
 0x5c2   : > { %14282 = vmatpush1.bf16.msra.mxu0 %v19054_v14  ;;  %5611 = vmatprep.mubr.f32.mxu0 %v19031_v44  ;;  %v5004_v63 = vadd.f32 %v5003_v26, %v4980_v33  ;;  %v19129_v17 = vpack.c.bf16 %v5314_v15, %v5302_v4  ;;  %v5320_v25 = vand.u32 4294901760, %v5319_v56  ;;  %v4984_v40 = vmul.f32 %v18923_v10, %v18923_v10  ;;  %v20774_v26 = vld [vmem:[#allocation74_spill] sm:$0xff]  ;;  %v20775_v4 = vld [vmem:[#allocation75_spill] sm:$0xff]  ;;  %v20778_v33 = vld [vmem:[#allocation77_spill] sm:$0xff] }
 0x5c3   : > { %20765 = vst [vmem:[#allocation59_spill] sm:$0xff] %v19115_v22  ;;  %14284 = vmatprep.subr.bf16.mxu0 %v19056_v27  ;;  %v5338_v27 = vand.u32 4294901760, %v5337_v1  ;;  %v5332_v16 = vand.u32 4294901760, %v5331_v30  ;;  %v5344_v56 = vand.u32 4294901760, %v5343_v47  ;;  %v20776_v2 = vand.u32 4294901760, %v20767_v53  ;;  %v20779_v15 = vld [vmem:[#allocation78_spill] sm:$0xff] }
 0x5c4   : > { %14418 = vmatpush1.bf16.msra.mxu1 %v20769_v61  ;;  %20770 = vst [vmem:[#allocation62_spill] sm:$0xff] %v19129_v17  ;;  %v5005_v35 = vadd.f32 %v5004_v63, %v4982_v12  ;;  %v5361_v63 = vsub.f32 %v20768_v3, %v20497_v18  ;;  %v4986_v12 = vmul.f32 %v18929_v34, %v18929_v34  ;;  %v20782_v47 = vand.u32 4294901760, %v20772_v8  ;;  %v20784_v18 = vld [vmem:[#allocation82_spill] sm:$0xff] }
 0x5c5   : > { %14420 = vmatprep.subr.bf16.mxu1 %v20771_v11  ;;  %v5349_v1 = vsub.f32 %v20767_v53, %v20776_v2  ;;  %v19152_v30 = vpack.c.bf16 %v5320_v25, %v5308_v7  ;;  %v20785_v34 = vand.u32 4294901760, %v20773_v55  ;;  %v20786_v10 = vand.u32 4294901760, %v20774_v26 }
 0x5c6   : > { %14286 = vmatpush1.bf16.msra.mxu0 %v19103_v13  ;;  %v5355_v2 = vsub.f32 %v20772_v8, %v20782_v47  ;;  %v20783_v13 = vld [vmem:[#allocation79_spill] sm:$0xff]  ;;  %v5006_v54 = vadd.f32 %v5005_v35, %v4984_v40  ;;  %v20787_v25 = vand.u32 4294901760, %v20775_v4  ;;  %v19170_v47 = vpack.c.bf16 %v5338_v27, %v5326_v58  ;;  %v20793_v58 = vld [vmem:[#allocation65_spill] sm:$0xff] }
 0x5c7   : > { %14288 = vmatprep.subr.bf16.mxu0 %v19115_v22  ;;  %v20780_v22 = vld [vmem:[#allocation57_spill] sm:$0xff]  ;;  %20781 = vst [vmem:[#allocation46_spill] sm:$0xff] %v19152_v30  ;;  %v5367_v14 = vsub.f32 %v20773_v55, %v20785_v34  ;;  %v5373_v7 = vsub.f32 %v20774_v26, %v20786_v10  ;;  %v19172_v0 = vpack.c.bf16 %v5344_v56, %v5332_v16  ;;  %v5350_v35 = vand.u32 4294901760, %v5349_v1 }
 0x5c8   : > { %14422 = vmatpush1.bf16.msra.mxu1 %v20777_v28  ;;  %20788 = vst [vmem:[#allocation47_spill] sm:$0xff] %v19170_v47  ;;  %v5362_v40 = vand.u32 4294901760, %v5361_v63  ;;  %v5007_v9 = vadd.f32 %v5006_v54, %v4986_v12  ;;  %v4988_v34 = vmul.f32 %v18947_v23, %v18947_v23  ;;  %v20791_v10 = vand.u32 4294901760, %v20778_v33  ;;  %v20796_v1 = vld [vmem:[#allocation85_spill] sm:$0xff]  ;;  %v20797_v12 = vld [vmem:[#allocation87_spill] sm:$0xff] }
 0x5c9   : > { %14424 = vmatprep.subr.bf16.mxu1 %v20780_v22  ;;  %v5385_v22 = vsub.f32 %v20775_v4, %v20787_v25  ;;  %20789 = vst [vmem:[#allocation63_spill] sm:$0xff] %v19172_v0  ;;  %v20792_v25 = vand.u32 4294901760, %v20779_v15  ;;  %v20794_v27 = vand.u32 4294901760, %v20783_v13  ;;  %v20795_v54 = vand.u32 4294901760, %v20784_v18  ;;  %v20802_v23 = vld [vmem:[#allocation73_spill] sm:$0xff] }
 0x5ca   : > { %14290 = vmatpush1.bf16.msra.mxu0 %v19117_v20  ;;  %v20790_v20 = vld [vmem:[#allocation60_spill] sm:$0xff]  ;;  %v5379_v28 = vsub.f32 %v20778_v33, %v20791_v10  ;;  %v5356_v10 = vand.u32 4294901760, %v5355_v2  ;;  %v5374_v33 = vand.u32 4294901760, %v5373_v7  ;;  %v5008_v26 = vadd.f32 %v5007_v9, %v4988_v34  ;;  %v20808_v34 = vld [vmem:[#allocation94_spill] sm:$0xff] }
 0x5cb   : > { %14292 = vmatprep.subr.bf16.mxu0 %v19129_v17  ;;  %v5391_v17 = vsub.f32 %v20779_v15, %v20792_v25  ;;  %v5397_v16 = vsub.f32 %v20783_v13, %v20794_v27  ;;  %v5409_v56 = vsub.f32 %v20784_v18, %v20795_v54  ;;  %v5386_v25 = vand.u32 4294901760, %v5385_v22  ;;  %v20799_v15 = vld [vmem:[#allocation90_spill] sm:$0xff]  ;;  %v20800_v13 = vld [vmem:[#allocation91_spill] sm:$0xff] }
 0x5cc   : > { %14426 = vmatpush1.bf16.msra.mxu1 %v20790_v20  ;;  %v5368_v20 = vand.u32 4294901760, %v5367_v14  ;;  %v20514_v27 = vand.u32 4294901760, %v20799_v15  ;;  %v20801_v54 = vld [vmem:[#allocation70_spill] sm:$0xff]  ;;  %v5380_v63 = vand.u32 4294901760, %v5379_v28  ;;  %v20803_v14 = vand.u32 4294901760, %v20796_v1  ;;  %v20807_v28 = vld [vmem:[#allocation93_spill] sm:$0xff] }
 0x5cd   : > { %14428 = vmatprep.subr.bf16.mxu1 %v20793_v58  ;;  %v19194_v58 = vpack.c.bf16 %v5362_v40, %v5350_v35  ;;  %v5392_v18 = vand.u32 4294901760, %v5391_v17  ;;  %v5410_v2 = vand.u32 4294901760, %v5409_v56  ;;  %v20804_v7 = vand.u32 4294901760, %v20797_v12  ;;  %v20813_v17 = vld [vmem:[#allocation81_spill] sm:$0xff] }
 0x5ce   : > { %14294 = vmatpush1.bf16.msra.mxu0 %v19152_v30  ;;  %v5398_v30 = vand.u32 4294901760, %v5397_v16  ;;  %v5403_v22 = vsub.f32 %v20796_v1, %v20803_v14  ;;  %v19207_v40 = vpack.c.bf16 %v5368_v20, %v5356_v10  ;;  %v19209_v9 = vpack.c.bf16 %v5386_v25, %v5374_v33  ;;  %v20811_v20 = vld [vmem:[#allocation98_spill] sm:$0xff]  ;;  %v20812_v25 = vld [vmem:[#allocation76_spill] sm:$0xff] }
 0x5cf   : > { %14296 = vmatprep.subr.bf16.mxu0 %v19170_v47  ;;  %20798 = vst [vmem:[#allocation66_spill] sm:$0xff] %v19194_v58  ;;  %v5415_v35 = vsub.f32 %v20797_v12, %v20804_v7  ;;  %v5421_v16 = vsub.f32 %v20799_v15, %v20514_v27  ;;  %v20809_v56 = vand.u32 4294901760, %v20800_v13  ;;  %v20810_v7 = vld [vmem:[#allocation95_spill] sm:$0xff]  ;;  %v5009_v33 = vrot.slane %v5008_v26, 4 }
 0x5d0   : > { %14430 = vmatpush1.bf16.msra.mxu1 %v20801_v54  ;;  %20805 = vst [vmem:[#allocation50_spill] sm:$0xff] %v19207_v40  ;;  %20806 = vst [vmem:[#allocation51_spill] sm:$0xff] %v19209_v9  ;;  %v19224_v4 = vpack.c.bf16 %v5392_v18, %v5380_v63  ;;  %v5404_v47 = vand.u32 4294901760, %v5403_v22  ;;  %v20816_v27 = vand.u32 4294901760, %v20807_v28  ;;  %v20818_v54 = vld [vmem:[#allocation101_spill] sm:$0xff]  ;;  %v20820_v63 = vand.u32 4294901760, %v20810_v7 }
 0x5d1   : > { %14432 = vmatprep.subr.bf16.mxu1 %v20802_v23  ;;  %v5433_v14 = vsub.f32 %v20800_v13, %v20809_v56  ;;  %v5416_v23 = vand.u32 4294901760, %v5415_v35  ;;  %v20819_v13 = vld [vmem:[#allocation103_spill] sm:$0xff]  ;;  %v5422_v18 = vand.u32 4294901760, %v5421_v16  ;;  %v20821_v22 = vand.u32 4294901760, %v20811_v20 }
 0x5d2   : > { %14298 = vmatpush1.bf16.msra.mxu0 %v19172_v0  ;;  %20814 = vst [vmem:[#allocation69_spill] sm:$0xff] %v19224_v4  ;;  %v5427_v56 = vsub.f32 %v20807_v28, %v20816_v27  ;;  %v20817_v0 = vand.u32 4294901760, %v20808_v34  ;;  %v5010_v35 = vadd.f32 %v5009_v33, %v5008_v26 }
 0x5d3   : > { %14300 = vmatprep.subr.bf16.mxu0 %v19194_v58  ;;  %v19226_v58 = vpack.c.bf16 %v5410_v2, %v5398_v30  ;;  %v5434_v30 = vand.u32 4294901760, %v5433_v14  ;;  %v5445_v2 = vsub.f32 %v20810_v7, %v20820_v63  ;;  %v5457_v27 = vsub.f32 %v20811_v20, %v20821_v22 }
 0x5d4   : > { %14434 = vmatpush1.bf16.msra.mxu1 %v20812_v25  ;;  %v5439_v10 = vsub.f32 %v20808_v34, %v20817_v0  ;;  %v20823_v0 = vld [vmem:[#allocation89_spill] sm:$0xff]  ;;  %v19246_v25 = vpack.c.bf16 %v5416_v23, %v5404_v47  ;;  %v20825_v14 = vand.u32 4294901760, %v20818_v54  ;;  %v20826_v63 = vand.u32 4294901760, %v20819_v13  ;;  %v20828_v47 = vld [vmem:[#allocation92_spill] sm:$0xff] }
 0x5d5   : > { %14436 = vmatprep.subr.bf16.mxu1 %v20813_v17  ;;  %20815 = vst [vmem:[#allocation71_spill] sm:$0xff] %v19226_v58  ;;  %v5428_v17 = vand.u32 4294901760, %v5427_v56  ;;  %v19256_v26 = vpack.c.bf16 %v5434_v30, %v5422_v18  ;;  %v5446_v33 = vand.u32 4294901760, %v5445_v2  ;;  %v5458_v22 = vand.u32 4294901760, %v5457_v27  ;;  %v20832_v18 = vld [vmem:[#allocation102_spill] sm:$0xff]  ;;  %v20833_v30 = vld [vmem:[#allocation105_spill] sm:$0xff] }
 0x5d6   : > { %14302 = vmatpush1.bf16.msra.mxu0 %v19207_v40  ;;  %v20822_v40 = vld [vmem:[#allocation86_spill] sm:$0xff]  ;;  %20824 = vst [vmem:[#allocation85_spill] sm:$0xff] %v19246_v25  ;;  %v5440_v16 = vand.u32 4294901760, %v5439_v10  ;;  %v5463_v7 = vsub.f32 %v20819_v13, %v20826_v63  ;;  %v5011_v23 = vrot.slane %v5010_v35, 2 }
 0x5d7   : > { %14304 = vmatprep.subr.bf16.mxu0 %v19209_v9  ;;  %v5451_v9 = vsub.f32 %v20818_v54, %v20825_v14  ;;  %20827 = vst [vmem:[#allocation87_spill] sm:$0xff] %v19256_v26  ;;  %v19264_v63 = vpack.c.bf16 %v5458_v22, %v5446_v33  ;;  %v20839_v33 = vld [vmem:[#allocation112_spill] sm:$0xff]  ;;  %v20840_v22 = vld [vmem:[#allocation131_spill] sm:$0xff] }
 0x5d8   : > { %14438 = vmatpush1.bf16.msra.mxu1 %v20822_v40  ;;  %v19261_v10 = vpack.c.bf16 %v5440_v16, %v5428_v17  ;;  %v5464_v14 = vand.u32 4294901760, %v5463_v7  ;;  %v20835_v17 = vld [vmem:[#allocation106_spill] sm:$0xff] }
 0x5d9   : > { %14440 = vmatprep.subr.bf16.mxu1 %v20823_v0  ;;  %v5452_v56 = vand.u32 4294901760, %v5451_v9  ;;  %20831 = vst [vmem:[#allocation93_spill] sm:$0xff] %v19264_v63  ;;  %v20836_v9 = vld [vmem:[#allocation107_spill] sm:$0xff]  ;;  %v20837_v7 = vld [vmem:[#allocation130_spill] sm:$0xff] }
 0x5da   : > { %14306 = vmatpush1.bf16.msra.mxu0 %v19224_v4  ;;  %v20829_v4 = vld [vmem:[#allocation97_spill] sm:$0xff]  ;;  %20830 = vst [vmem:[#allocation90_spill] sm:$0xff] %v19261_v10 }
 0x5db   : > { %14308 = vmatprep.subr.bf16.mxu0 %v19226_v58  ;;  %v5012_v58 = vadd.f32 %v5011_v23, %v5010_v35  ;;  %v19269_v2 = vpack.c.bf16 %v5464_v14, %v5452_v56  ;;  %v20838_v35 = vld [vmem:[#allocation111_spill] sm:$0xff]  ;;  %v20841_v23 = vld [vmem:[#allocation132_spill] sm:$0xff] }
 0x5dc   : > { %14442 = vmatpush1.bf16.msra.mxu1 %v20828_v47  ;;  %v20842_v56 = vld [vmem:[#allocation115_spill] sm:$0xff] }
 0x5dd   : > { %14444 = vmatprep.subr.bf16.mxu1 %v20829_v4  ;;  %20834 = vst [vmem:[#allocation94_spill] sm:$0xff] %v19269_v2  ;;  %v5013_v27 = vrot.slane %v5012_v58, 1 }
 0x5de   : > { %14310 = vmatpush1.bf16.msra.mxu0 %v19246_v25  ;;  %v20852_v25 = vld [vmem:[#allocation125_spill] sm:$0xff] }
 0x5df   : > { %14312 = vmatprep.subr.bf16.mxu0 %v19256_v26  ;;  %v5014_v16 = vadd.f32 %v5013_v27, %v5012_v58  ;;  %v20845_v26 = vld [vmem:[#allocation134_spill] sm:$0xff]  ;;  %v20848_v58 = vld [vmem:[#allocation120_spill] sm:$0xff]  ;;  %v20849_v27 = vld [vmem:[#allocation135_spill] sm:$0xff] }
 0x5e0   : > { %14446 = vmatpush1.bf16.msra.mxu1 %v20832_v18 }
 0x5e1   : > { %14448 = vmatprep.subr.bf16.mxu1 %v20833_v30  ;;  %v5016_v14 = vmul.f32 0.015625, %v5014_v16 }
 0x5e2   : > { %14314 = vmatpush1.bf16.msra.mxu0 %v19261_v10  ;;  %v20844_v10 = vld [vmem:[#allocation133_spill] sm:$0xff] }
 0x5e3   : > { %14316 = vmatprep.subr.bf16.mxu0 %v19264_v63  ;;  %v20843_v63 = vld [vmem:[#allocation116_spill] sm:$0xff] }
 0x5e4   : > { %14450 = vmatpush1.bf16.msra.mxu1 %v20835_v17 }
 0x5e5   : > { %14452 = vmatprep.subr.bf16.mxu1 %v20836_v9 }
 0x5e6   : > { %14318 = vmatpush1.bf16.msra.mxu0 %v19269_v2  ;;  %v20846_v2 = vld [vmem:[#allocation119_spill] sm:$0xff] }
 0x5e7   : > { %14320 = vmatprep.subr.bf16.mxu0 %v20837_v7  ;;  %v19285_v7 = vand.u32 4294901760, %v5016_v14 }
 0x5e8   : > { %14454 = vmatpush1.bf16.msra.mxu1 %v20838_v35 }
 0x5e9   : > { %14456 = vmatprep.subr.bf16.mxu1 %v20839_v33  ;;  %20847 = vst [vmem:[#allocation98_spill] sm:$0xff] %v19285_v7  ;;  %v19292_v16 = vsub.f32 %v5016_v14, %v19285_v7  ;;  %v20860_v7 = vld [vmem:[#allocation137_spill] sm:$0xff] }
 0x5ea   : > { %14322 = vmatpush1.bf16.msra.mxu0 %v20840_v22  ;;  %v20850_v22 = vld [vmem:[#allocation136_spill] sm:$0xff] }
 0x5eb   : > { %14324 = vmatprep.subr.bf16.mxu0 %v20841_v23  ;;  %v20851_v23 = vld [vmem:[#allocation123_spill] sm:$0xff] }
 0x5ec   : > { %14458 = vmatpush1.bf16.msra.mxu1 %v20842_v56 }
 0x5ed   : > { %14460 = vmatprep.subr.bf16.mxu1 %v20843_v63  ;;  %v20856_v63 = vand.u32 4294901760, %v18255_v45  ;;  %v20864_v45 = vld [vmem:[#allocation146_spill] sm:$0xff] }
 0x5ee   : > { %14326 = vmatpush1.bf16.msra.mxu0 %v20844_v10  ;;  %v20853_v10 = vld [vmem:[#allocation138_spill] sm:$0xff] }
 0x5ef   : > { %14328 = vmatprep.subr.bf16.mxu0 %v20845_v26  ;;  %v20854_v26 = vld [vmem:[#allocation139_spill] sm:$0xff] }
 0x5f0   : > { %14462 = vmatpush1.bf16.msra.mxu1 %v20846_v2  ;;  %v20855_v2 = vld [vmem:[#allocation127_spill] sm:$0xff] }
 0x5f1   : > { %14464 = vmatprep.subr.bf16.mxu1 %v20848_v58  ;;  %v20857_v58 = vand.u32 4294901760, %v18259_v43  ;;  %v4973_v43 = vmul.f32 %v20864_v45, %v20864_v45 }
 0x5f2   : > { %14330 = vmatpush1.bf16.msra.mxu0 %v20849_v27 }
 0x5f3   : > { %14332 = vmatprep.subr.bf16.mxu0 %v20850_v22  ;;  %v19302_v27 = vpack.c.bf16 %v20857_v58, %v20856_v63  ;;  %v20865_v63 = vld [vmem:[#allocation147_spill] sm:$0xff]  ;;  %v20866_v22 = vand.u32 4294901760, %v19047_v48  ;;  %v20871_v48 = vand.u32 4294901760, %v18289_v32 }
 0x5f4   : > { %14466 = vmatpush1.bf16.msra.mxu1 %v20851_v23  ;;  %v20859_v23 = vld [vmem:[#allocation144_spill] sm:$0xff]  ;;  %v4977_v58 = vmul.f32 %v20865_v63, %v20865_v63 }
 0x5f5   : > { %14468 = vmatprep.subr.bf16.mxu1 %v20852_v25  ;;  %20858 = vst [vmem:[#allocation101_spill] sm:$0xff] %v19302_v27  ;;  %v4975_v14 = vmul.f32 %v20859_v23, %v20859_v23  ;;  %v20861_v25 = vand.u32 4294901760, %v18263_v38  ;;  %v20867_v23 = vld [vmem:[#allocation141_spill] sm:$0xff]  ;;  %v20868_v38 = vand.u32 4294901760, %v18282_v5 }
 0x5f6   : > { %14334 = vmatpush1.bf16.msra.mxu0 %v20853_v10  ;;  %v20862_v10 = vand.u32 4294901760, %v18269_v59  ;;  %v20869_v59 = vand.u32 4294901760, %v18284_v52 }
 0x5f7   : > { %14336 = vmatprep.subr.bf16.mxu0 %v20854_v26  ;;  %v4989_v63 = vadd.f32 %v4975_v14, %v4973_v43  ;;  %v20876_v14 = vand.u32 4294901760, %v18298_v57  ;;  %v20877_v43 = vand.u32 4294901760, %v18307_v42  ;;  %v20881_v42 = vand.u32 4294901760, %v18320_v36 }
 0x5f8   : > { %14470 = vmatpush1.bf16.msra.mxu1 %v20855_v2  ;;  %v19312_v26 = vpack.c.bf16 %v20862_v10, %v20861_v25  ;;  %v20863_v2 = vld [vmem:[#allocation140_spill] sm:$0xff]  ;;  %v19328_v25 = vpack.c.bf16 %v20869_v59, %v20868_v38  ;;  %v20870_v10 = vand.u32 4294901760, %v19292_v16  ;;  %v20875_v38 = vld [vmem:[#allocation42_spill] sm:$0xff]  ;;  %v4985_v36 = vmul.f32 %v18926_v60, %v18926_v60 }
 0x5f9   : > { %14472 = vmatprep.subr.bf16.mxu1 %v20860_v7  ;;  %v20873_v7 = vld [vmem:[#allocation142_spill] sm:$0xff]  ;;  %v4990_v5 = vadd.f32 %v4989_v63, %v4977_v58  ;;  %v19349_v32 = vpack.c.bf16 %v20877_v43, %v20876_v14  ;;  %v20879_v63 = vand.u32 4294901760, %v18311_v51  ;;  %v20880_v58 = vand.u32 4294901760, %v18313_v62 }
 0x5fa   : > { %14338 = vmatpush1.bf16.msra.mxu0 %v20863_v2  ;;  %v6496_v45 = vsub.f32 %v19292_v16, %v20870_v10  ;;  %v20883_v51 = vld [vmem:[#allocation154_spill] sm:$0xff]  ;;  %v20884_v43 = vand.u32 4294901760, %v20756_v31 }
 0x5fb   : > { %5957 = vmatmul.mubr.f32.vlgmr.msra.gmra.mrb[2].mxu1 %v20866_v22  ;;  %14340 = vmatprep.subr.bf16.mxu0 %v20867_v23  ;;  %v20872_v22 = vand.u32 4294901760, %v18291_v46  ;;  %v20874_v23 = vld [vmem:[#allocation150_spill] sm:$0xff]  ;;  %v20878_v46 = vld [vmem:[#allocation152_spill] sm:$0xff]  ;;  %v4983_v62 = vmul.f32 %v20883_v51, %v20883_v51 }
 0x5fc   : > { %14474 = vmatpush1.bf16.msra.mxu1 %v19302_v27  ;;  %6220 = vmatprep.mubr.f32.mxu1 %v19031_v44  ;;  %v4979_v52 = vmul.f32 %v20874_v23, %v20874_v23  ;;  %v6497_v59 = vand.u32 4294901760, %v6496_v45  ;;  %v4981_v10 = vmul.f32 %v20878_v46, %v20878_v46  ;;  %v20882_v45 = vand.u32 4294901760, %v18325_v29  ;;  %v20934_v51 = vld [vmem:[#allocation116_spill] sm:$0xff]  ;;  %v20935_v46 = vld [vmem:[#allocation169_spill] sm:$0xff]  ;;  %v20936_v23 = vld [vmem:[#allocation170_spill] sm:$0xff] }
 0x5fd   : > { %14476 = vmatprep.subr.bf16.mxu1 %v19312_v26  ;;  %v19338_v27 = vpack.c.bf16 %v20872_v22, %v20871_v48  ;;  %v19359_v48 = vpack.c.bf16 %v20880_v58, %v20879_v63  ;;  %v20886_v29 = vand.u32 4294901760, %v20759_v24  ;;  %v20889_v63 = vand.u32 4294901760, %v20768_v3 }
 0x5fe   : > { %14342 = vmatpush1.bf16.msra.mxu0 %v20873_v7  ;;  %v4991_v57 = vadd.f32 %v4990_v5, %v4979_v52  ;;  %v19368_v22 = vpack.c.bf16 %v20882_v45, %v20881_v42  ;;  %v20885_v5 = vand.u32 4294901760, %v20757_v41  ;;  %v20888_v41 = vand.u32 4294901760, %v20767_v53  ;;  %v20892_v53 = vld [vmem:[#allocation74_spill] sm:$0xff] }
 0x5ff   : > { %14600 = vmatprep.subr.bf16.mxu0 %v20875_v38  ;;  %v4987_v42 = vmul.f32 %v18944_v21, %v18944_v21  ;;  %v20891_v24 = vand.u32 4294901760, %v20773_v55  ;;  %v20893_v3 = vand.u32 4294901760, %v20892_v53  ;;  %v20900_v55 = vld [vmem:[#allocation78_spill] sm:$0xff]  ;;  %v20914_v21 = vld [vmem:[#allocation73_spill] sm:$0xff] }
 0x600   : > { %14478 = vmatpush1.bf16.msra.mxu1 %v19328_v25  ;;  %v4992_v14 = vadd.f32 %v4991_v57, %v4981_v10  ;;  %v19377_v52 = vpack.c.bf16 %v20885_v5, %v20884_v43  ;;  %v19395_v58 = vpack.c.bf16 %v20889_v63, %v20888_v41  ;;  %v20896_v5 = vld [vmem:[#allocation53_spill] sm:$0xff]  ;;  %v20902_v63 = vld [vmem:[#allocation79_spill] sm:$0xff] }
 0x601   : > { %5613 = vmatmul.mubr.f32.vlgmr.msra.gmra.mrb[20].mxu0 %v19026_v37  ;;  %14480 = vmatprep.subr.bf16.mxu1 %v19338_v27 }
 0x602   : > { %14602 = vmatpush1.bf16.msra.mxu0 %v18257_v6  ;;  %6498 = vmatprep.mubr.f32.mxu0 %v6497_v59  ;;  %v20887_v59 = vand.u32 4294901760, %v20760_v39  ;;  %v4993_v31 = vadd.f32 %v4992_v14, %v4983_v62  ;;  %v20890_v39 = vand.u32 4294901760, %v20772_v8  ;;  %v20894_v14 = vld [vmem:[#allocation75_spill] sm:$0xff]  ;;  %v20898_v8 = vld [vmem:[#allocation77_spill] sm:$0xff] }
 0x603   : > { %14604 = vmatprep.subr.bf16.mxu0 %v18261_v19  ;;  %v20895_v62 = vand.u32 4294901760, %v20894_v14  ;;  %v20906_v14 = vld [vmem:[#allocation60_spill] sm:$0xff] }
 0x604   : > { %14482 = vmatpush1.bf16.msra.mxu1 %v19349_v32  ;;  %v19388_v10 = vpack.c.bf16 %v20887_v59, %v20886_v29  ;;  %v4994_v57 = vadd.f32 %v4993_v31, %v4985_v36  ;;  %v19406_v45 = vpack.c.bf16 %v20891_v24, %v20890_v39  ;;  %v20897_v29 = vld [vmem:[#allocation57_spill] sm:$0xff]  ;;  %v20899_v59 = vand.u32 4294901760, %v20898_v8  ;;  %v20904_v24 = vld [vmem:[#allocation82_spill] sm:$0xff] }
 0x605   : > { %14484 = vmatprep.subr.bf16.mxu1 %v19359_v48  ;;  %v19413_v43 = vpack.c.bf16 %v20895_v62, %v20893_v3  ;;  %v20901_v31 = vand.u32 4294901760, %v20900_v55  ;;  %v20903_v39 = vand.u32 4294901760, %v20902_v63  ;;  %v20905_v53 = vand.u32 4294901760, %v20904_v24  ;;  %v20913_v24 = vld [vmem:[#allocation70_spill] sm:$0xff] }
 0x606   : > { %14606 = vmatpush1.bf16.msra.mxu0 %v20761_v50  ;;  %v4995_v36 = vadd.f32 %v4994_v57, %v4987_v42  ;;  %v20907_v42 = vld [vmem:[#allocation65_spill] sm:$0xff]  ;;  %v20908_v62 = vand.u32 4294901760, %v20796_v1  ;;  %v20909_v8 = vand.u32 4294901760, %v20797_v12  ;;  %v20910_v55 = vand.u32 4294901760, %v20799_v15  ;;  %v20917_v15 = vld [vmem:[#allocation95_spill] sm:$0xff] }
 0x607   : > { %14608 = vmatprep.subr.bf16.mxu0 %v20763_v49  ;;  %v19422_v41 = vpack.c.bf16 %v20901_v31, %v20899_v59  ;;  %v19429_v3 = vpack.c.bf16 %v20905_v53, %v20903_v39  ;;  %v20911_v31 = vld [vmem:[#allocation91_spill] sm:$0xff]  ;;  %v20915_v1 = vand.u32 4294901760, %v20807_v28  ;;  %v20916_v12 = vand.u32 4294901760, %v20808_v34 }
 0x608   : > { %14486 = vmatpush1.bf16.msra.mxu1 %v19368_v22  ;;  %v4996_v57 = vrot.slane %v4995_v36, 4  ;;  %v19438_v59 = vpack.c.bf16 %v20909_v8, %v20908_v62  ;;  %v20912_v63 = vand.u32 4294901760, %v20911_v31  ;;  %v20918_v8 = vand.u32 4294901760, %v20917_v15 }
 0x609   : > { %14488 = vmatprep.subr.bf16.mxu1 %v19377_v52  ;;  %v19454_v62 = vpack.c.bf16 %v20916_v12, %v20915_v1  ;;  %v20922_v28 = vand.u32 4294901760, %v20818_v54  ;;  %v20923_v34 = vand.u32 4294901760, %v20819_v13  ;;  %v20924_v12 = vld [vmem:[#allocation158_spill] sm:$0xff]  ;;  %v20925_v54 = vld [vmem:[#allocation159_spill] sm:$0xff] }
 0x60a   : > { %14610 = vmatpush1.bf16.msra.mxu0 %v20769_v61  ;;  %v19445_v39 = vpack.c.bf16 %v20912_v63, %v20910_v55  ;;  %v4997_v53 = vadd.f32 %v4996_v57, %v4995_v36  ;;  %v20919_v55 = vand.u32 4294901760, %v20811_v20  ;;  %v20920_v63 = vld [vmem:[#allocation76_spill] sm:$0xff]  ;;  %v20921_v57 = vld [vmem:[#allocation81_spill] sm:$0xff]  ;;  %v20926_v13 = vld [vmem:[#allocation162_spill] sm:$0xff] }
 0x60b   : > { %14612 = vmatprep.subr.bf16.mxu0 %v20771_v11  ;;  %v19470_v1 = vpack.c.bf16 %v20923_v34, %v20922_v28  ;;  %v20929_v28 = vld [vmem:[#allocation165_spill] sm:$0xff]  ;;  %v20930_v34 = vld [vmem:[#allocation166_spill] sm:$0xff] }
 0x60c   : > { %14490 = vmatpush1.bf16.msra.mxu1 %v19388_v10  ;;  %v19461_v31 = vpack.c.bf16 %v20919_v55, %v20918_v8  ;;  %v4998_v36 = vrot.slane %v4997_v53, 2  ;;  %v20928_v55 = vld [vmem:[#allocation164_spill] sm:$0xff] }
 0x60d   : > { %14492 = vmatprep.subr.bf16.mxu1 %v19395_v58 }
 0x60e   : > { %14614 = vmatpush1.bf16.msra.mxu0 %v20896_v5  ;;  %v4999_v20 = vadd.f32 %v4998_v36, %v4997_v53  ;;  %v20927_v53 = vld [vmem:[#allocation163_spill] sm:$0xff] }
 0x60f   : > { %14616 = vmatprep.subr.bf16.mxu0 %v20897_v29 }
 0x610   : > { %14494 = vmatpush1.bf16.msra.mxu1 %v19406_v45  ;;  %v5000_v15 = vrot.slane %v4999_v20, 1 }
 0x611   : > { %14496 = vmatprep.subr.bf16.mxu1 %v19413_v43 }
 0x612   : > { %14618 = vmatpush1.bf16.msra.mxu0 %v20906_v14  ;;  %v5001_v8 = vadd.f32 %v5000_v15, %v4999_v20  ;;  %v20932_v20 = vld [vmem:[#allocation167_spill] sm:$0xff]  ;;  %v20933_v15 = vld [vmem:[#allocation168_spill] sm:$0xff] }
 0x613   : > { %14620 = vmatprep.subr.bf16.mxu0 %v20907_v42 }
 0x614   : > { %14498 = vmatpush1.bf16.msra.mxu1 %v19422_v41  ;;  %v5015_v36 = vmul.f32 0.015625, %v5001_v8 }
 0x615   : > { %14500 = vmatprep.subr.bf16.mxu1 %v19429_v3 }
 0x616   : > { %14622 = vmatpush1.bf16.msra.mxu0 %v20913_v24  ;;  %v19490_v60 = vand.u32 4294901760, %v5015_v36 }
 0x617   : > { %14624 = vmatprep.subr.bf16.mxu0 %v20914_v21 }
 0x618   : > { %14502 = vmatpush1.bf16.msra.mxu1 %v19438_v59  ;;  %20931 = vst [vmem:[#allocation103_spill] sm:$0xff] %v19490_v60  ;;  %v19498_v8 = vsub.f32 %v5015_v36, %v19490_v60  ;;  %v20941_v36 = vld [vmem:[#allocation125_spill] sm:$0xff] }
 0x619   : > { %14504 = vmatprep.subr.bf16.mxu1 %v19445_v39 }
 0x61a   : > { %14626 = vmatpush1.bf16.msra.mxu0 %v20920_v63 }
 0x61b   : > { %14628 = vmatprep.subr.bf16.mxu0 %v20921_v57 }
 0x61c   : > { %14506 = vmatpush1.bf16.msra.mxu1 %v19454_v62 }
 0x61d   : > { %14508 = vmatprep.subr.bf16.mxu1 %v19461_v31 }
 0x61e   : > { %14630 = vmatpush1.bf16.msra.mxu0 %v20822_v40 }
 0x61f   : > { %14632 = vmatprep.subr.bf16.mxu0 %v20823_v0 }
 0x620   : > { %14510 = vmatpush1.bf16.msra.mxu1 %v19470_v1 }
 0x621   : > { %14512 = vmatprep.subr.bf16.mxu1 %v20924_v12  ;;  %v20986_v12 = vld [vmem:[#allocation80_spill] sm:$0xff] }
 0x622   : > { %14634 = vmatpush1.bf16.msra.mxu0 %v20828_v47 }
 0x623   : > { %14636 = vmatprep.subr.bf16.mxu0 %v20829_v4 }
 0x624   : > { %14514 = vmatpush1.bf16.msra.mxu1 %v20925_v54  ;;  %v20945_v54 = vld [vmem:[#allocation98_spill] sm:$0xff] }
 0x625   : > { %14516 = vmatprep.subr.bf16.mxu1 %v20926_v13  ;;  %v20944_v13 = vld [vmem:[#allocation172_spill] sm:$0xff] }
 0x626   : > { %14638 = vmatpush1.bf16.msra.mxu0 %v20832_v18 }
 0x627   : > { %14640 = vmatprep.subr.bf16.mxu0 %v20833_v30 }
 0x628   : > { %14518 = vmatpush1.bf16.msra.mxu1 %v20927_v53  ;;  %v20943_v53 = vld [vmem:[#allocation129_spill] sm:$0xff] }
 0x629   : > { %14520 = vmatprep.subr.bf16.mxu1 %v20928_v55  ;;  %v20531_v55 = vand.u32 4294901760, %v19498_v8 }
 0x62a   : > { %14642 = vmatpush1.bf16.msra.mxu0 %v20835_v17 }
 0x62b   : > { %14644 = vmatprep.subr.bf16.mxu0 %v20836_v9 }
 0x62c   : > { %14522 = vmatpush1.bf16.msra.mxu1 %v20929_v28  ;;  %v20938_v28 = vld [vmem:[#allocation120_spill] sm:$0xff] }
 0x62d   : > { %14524 = vmatprep.subr.bf16.mxu1 %v20930_v34  ;;  %v20937_v34 = vld [vmem:[#allocation119_spill] sm:$0xff] }
 0x62e   : > { %14646 = vmatpush1.bf16.msra.mxu0 %v20838_v35 }
 0x62f   : > { %14648 = vmatprep.subr.bf16.mxu0 %v20839_v33 }
 0x630   : > { %14526 = vmatpush1.bf16.msra.mxu1 %v20932_v20  ;;  %v20939_v20 = vld [vmem:[#allocation171_spill] sm:$0xff] }
 0x631   : > { %14528 = vmatprep.subr.bf16.mxu1 %v20933_v15  ;;  %v20940_v15 = vld [vmem:[#allocation123_spill] sm:$0xff] }
 0x632   : > { %14650 = vmatpush1.bf16.msra.mxu0 %v20842_v56 }
 0x633   : > { %14652 = vmatprep.subr.bf16.mxu0 %v20934_v51 }
 0x634   : > { %14530 = vmatpush1.bf16.msra.mxu1 %v20935_v46  ;;  %v20942_v46 = vld [vmem:[#allocation127_spill] sm:$0xff] }
 0x635   : > { %14532 = vmatprep.subr.bf16.mxu1 %v20936_v23  ;;  %v6502_v23 = vsub.f32 %v19498_v8, %v20531_v55  ;;  %v20946_v55 = vld [vmem:[#allocation173_spill] sm:$0xff] }
 0x636   : > { %14654 = vmatpush1.bf16.msra.mxu0 %v20937_v34 }
 0x637   : > { %14656 = vmatprep.subr.bf16.mxu0 %v20938_v28 }
 0x638   : > { %14534 = vmatpush1.bf16.msra.mxu1 %v20939_v20  ;;  %v6503_v20 = vand.u32 4294901760, %v6502_v23  ;;  %v20948_v23 = vld [vmem:[#allocation59_spill] sm:$0xff] }
 0x639   : > { %14536 = vmatprep.subr.bf16.mxu1 %v20875_v38 }
 0x63a   : > { %14658 = vmatpush1.bf16.msra.mxu0 %v20940_v15 }
 0x63b   : > { %6222 = vmatmul.mubr.f32.vlgmr.msra.gmra.mrb[2].mxu1 %v19026_v37  ;;  %14660 = vmatprep.subr.bf16.mxu0 %v20941_v36 }
 0x63c   : > { %14538 = vmatpush1.bf16.msra.mxu1 %v18257_v6  ;;  %6357 = vmatprep.mubr.f32.mxu1 %v19031_v44  ;;  %v20947_v44 = vld [vmem:[#allocation58_spill] sm:$0xff] }
 0x63d   : > { %14540 = vmatprep.subr.bf16.mxu1 %v18261_v19 }
 0x63e   : > { %14662 = vmatpush1.bf16.msra.mxu0 %v20942_v46 }
 0x63f   : > { %14664 = vmatprep.subr.bf16.mxu0 %v20943_v53  ;;  %v20949_v53 = vld [vmem:[#allocation61_spill] sm:$0xff] }
 0x640   : > { %14542 = vmatpush1.bf16.msra.mxu1 %v20761_v50 }
 0x641   : > { %6504 = vmatmul.mubr.f32.vlgmr.msra.gmra.mrb[22].mxu0 %v6503_v20  ;;  %14544 = vmatprep.subr.bf16.mxu1 %v20763_v49  ;;  %v20950_v20 = vld [vmem:[#allocation62_spill] sm:$0xff] }
 0x642   : > { %14666 = vmatpush1.bf16.msra.mxu0 %v20944_v13  ;;  %6895 = vmatprep.mubr.f32.mxu0 %v20945_v54  ;;  %v20951_v13 = vld [vmem:[#allocation46_spill] sm:$0xff] }
 0x643   : > { %14668 = vmatprep.subr.bf16.mxu0 %v20946_v55  ;;  %v20952_v55 = vld [vmem:[#allocation47_spill] sm:$0xff] }
 0x644   : > { %14546 = vmatpush1.bf16.msra.mxu1 %v20769_v61 }
 0x645   : > { %14548 = vmatprep.subr.bf16.mxu1 %v20771_v11 }
 0x646   : > { %14670 = vmatpush1.bf16.msra.mxu0 %v20947_v44  ;;  %v20953_v44 = vld [vmem:[#allocation63_spill] sm:$0xff] }
 0x647   : > { %14672 = vmatprep.subr.bf16.mxu0 %v20948_v23  ;;  %v20954_v23 = vld [vmem:[#allocation66_spill] sm:$0xff] }
 0x648   : > { %14550 = vmatpush1.bf16.msra.mxu1 %v20896_v5 }
 0x649   : > { %14552 = vmatprep.subr.bf16.mxu1 %v20897_v29 }
 0x64a   : > { %14674 = vmatpush1.bf16.msra.mxu0 %v20949_v53  ;;  %v20955_v53 = vld [vmem:[#allocation50_spill] sm:$0xff] }
 0x64b   : > { %14676 = vmatprep.subr.bf16.mxu0 %v20950_v20  ;;  %v20956_v20 = vld [vmem:[#allocation51_spill] sm:$0xff] }
 0x64c   : > { %14554 = vmatpush1.bf16.msra.mxu1 %v20906_v14 }
 0x64d   : > { %14556 = vmatprep.subr.bf16.mxu1 %v20907_v42 }
 0x64e   : > { %14678 = vmatpush1.bf16.msra.mxu0 %v20951_v13  ;;  %v20957_v13 = vld [vmem:[#allocation69_spill] sm:$0xff] }
 0x64f   : > { %14680 = vmatprep.subr.bf16.mxu0 %v20952_v55  ;;  %v20958_v55 = vld [vmem:[#allocation71_spill] sm:$0xff] }
 0x650   : > { %14558 = vmatpush1.bf16.msra.mxu1 %v20913_v24 }
 0x651   : > { %14560 = vmatprep.subr.bf16.mxu1 %v20914_v21 }
 0x652   : > { %14682 = vmatpush1.bf16.msra.mxu0 %v20953_v44  ;;  %v20959_v44 = vld [vmem:[#allocation85_spill] sm:$0xff] }
 0x653   : > { %14684 = vmatprep.subr.bf16.mxu0 %v20954_v23  ;;  %v20960_v23 = vld [vmem:[#allocation87_spill] sm:$0xff] }
 0x654   : > { %14562 = vmatpush1.bf16.msra.mxu1 %v20920_v63 }
 0x655   : > { %14564 = vmatprep.subr.bf16.mxu1 %v20921_v57 }
 0x656   : > { %14686 = vmatpush1.bf16.msra.mxu0 %v20955_v53  ;;  %v20961_v53 = vld [vmem:[#allocation90_spill] sm:$0xff] }
 0x657   : > { %14688 = vmatprep.subr.bf16.mxu0 %v20956_v20  ;;  %v20962_v20 = vld [vmem:[#allocation93_spill] sm:$0xff] }
 0x658   : > { %14566 = vmatpush1.bf16.msra.mxu1 %v20822_v40 }
 0x659   : > { %14568 = vmatprep.subr.bf16.mxu1 %v20823_v0 }
 0x65a   : > { %14690 = vmatpush1.bf16.msra.mxu0 %v20957_v13  ;;  %v20963_v13 = vld [vmem:[#allocation94_spill] sm:$0xff] }
 0x65b   : > { %14692 = vmatprep.subr.bf16.mxu0 %v20958_v55  ;;  %v20964_v55 = vld [vmem:[#allocation130_spill] sm:$0xff] }
 0x65c   : > { %14570 = vmatpush1.bf16.msra.mxu1 %v20828_v47 }
 0x65d   : > { %14572 = vmatprep.subr.bf16.mxu1 %v20829_v4 }
 0x65e   : > { %14694 = vmatpush1.bf16.msra.mxu0 %v20959_v44  ;;  %v20965_v44 = vld [vmem:[#allocation131_spill] sm:$0xff] }
 0x65f   : > { %14696 = vmatprep.subr.bf16.mxu0 %v20960_v23  ;;  %v20966_v23 = vld [vmem:[#allocation132_spill] sm:$0xff] }
 0x660   : > { %14574 = vmatpush1.bf16.msra.mxu1 %v20832_v18 }
 0x661   : > { %14576 = vmatprep.subr.bf16.mxu1 %v20833_v30 }
 0x662   : > { %14698 = vmatpush1.bf16.msra.mxu0 %v20961_v53  ;;  %v20967_v53 = vld [vmem:[#allocation133_spill] sm:$0xff] }
 0x663   : > { %14700 = vmatprep.subr.bf16.mxu0 %v20962_v20  ;;  %v20968_v20 = vld [vmem:[#allocation134_spill] sm:$0xff] }
 0x664   : > { %14578 = vmatpush1.bf16.msra.mxu1 %v20835_v17 }
 0x665   : > { %14580 = vmatprep.subr.bf16.mxu1 %v20836_v9 }
 0x666   : > { %14702 = vmatpush1.bf16.msra.mxu0 %v20963_v13  ;;  %v20969_v13 = vld [vmem:[#allocation135_spill] sm:$0xff] }
 0x667   : > { %14704 = vmatprep.subr.bf16.mxu0 %v20964_v55  ;;  %v20970_v55 = vld [vmem:[#allocation136_spill] sm:$0xff] }
 0x668   : > { %14582 = vmatpush1.bf16.msra.mxu1 %v20838_v35 }
 0x669   : > { %14584 = vmatprep.subr.bf16.mxu1 %v20839_v33 }
 0x66a   : > { %14706 = vmatpush1.bf16.msra.mxu0 %v20965_v44  ;;  %v20971_v44 = vld [vmem:[#allocation138_spill] sm:$0xff] }
 0x66b   : > { %14708 = vmatprep.subr.bf16.mxu0 %v20966_v23  ;;  %v20972_v23 = vld [vmem:[#allocation139_spill] sm:$0xff] }
 0x66c   : > { %14586 = vmatpush1.bf16.msra.mxu1 %v20842_v56 }
 0x66d   : > { %14588 = vmatprep.subr.bf16.mxu1 %v20934_v51 }
 0x66e   : > { %14710 = vmatpush1.bf16.msra.mxu0 %v20967_v53  ;;  %v20973_v53 = vld [vmem:[#allocation141_spill] sm:$0xff] }
 0x66f   : > { %14712 = vmatprep.subr.bf16.mxu0 %v20968_v20  ;;  %v20974_v20 = vld [vmem:[#allocation43_spill] sm:$0xff] }
 0x670   : > { %14590 = vmatpush1.bf16.msra.mxu1 %v20937_v34 }
 0x671   : > { %14592 = vmatprep.subr.bf16.mxu1 %v20938_v28 }
 0x672   : > { %14714 = vmatpush1.bf16.msra.mxu0 %v20969_v13  ;;  %v20975_v13 = vld [vmem:[#allocation44_spill] sm:$0xff] }
 0x673   : > { %14716 = vmatprep.subr.bf16.mxu0 %v20970_v55  ;;  %v20976_v55 = vld [vmem:[#allocation45_spill] sm:$0xff] }
 0x674   : > { %14594 = vmatpush1.bf16.msra.mxu1 %v20940_v15 }
 0x675   : > { %14596 = vmatprep.subr.bf16.mxu1 %v20941_v36 }
 0x676   : > { %14718 = vmatpush1.bf16.msra.mxu0 %v20971_v44  ;;  %v20977_v44 = vld [vmem:[#allocation48_spill] sm:$0xff] }
 0x677   : > { %14720 = vmatprep.subr.bf16.mxu0 %v20972_v23  ;;  %v20978_v23 = vld [vmem:[#allocation49_spill] sm:$0xff] }
 0x678   : > { %14598 = vmatpush1.bf16.msra.mxu1 %v20942_v46 }
 0x67a   : > { %14722 = vmatpush1.bf16.msra.mxu0 %v20863_v2  ;;  %v20979_v2 = vld [vmem:[#allocation52_spill] sm:$0xff] }
 0x67b   : > { %6359 = vmatmul.mubr.f32.vlgmr.msra.gmra.mrb[2].mxu1 %v19026_v37  ;;  %14724 = vmatprep.subr.bf16.mxu0 %v20973_v53  ;;  %v20980_v37 = vld [vmem:[#allocation54_spill] sm:$0xff]  ;;  %v20981_v53 = vld [vmem:[#allocation55_spill] sm:$0xff] }
 0x67e   : > { %14726 = vmatpush1.bf16.msra.mxu0 %v20873_v7  ;;  %v20982_v7 = vld [vmem:[#allocation64_spill] sm:$0xff] }
 0x67f   : > { %14728 = vmatprep.subr.bf16.mxu0 %v20974_v20  ;;  %v20983_v20 = vld [vmem:[#allocation67_spill] sm:$0xff] }
 0x681   : > { %6897 = vmatmul.mubr.f32.vlgmr.msra.gmra.mrb[22].mxu0 %v19490_v60  ;;  %v20984_v60 = vld [vmem:[#allocation68_spill] sm:$0xff] }
 0x682   : > { %14730 = vmatpush1.bf16.msra.mxu0 %v20975_v13  ;;  %7097 = vmatprep.mubr.f32.mxu0 %v19292_v16  ;;  %v20985_v13 = vld [vmem:[#allocation72_spill] sm:$0xff] }
 0x683   : > { %14732 = vmatprep.subr.bf16.mxu0 %v20976_v55  ;;  %v20987_v55 = vld [vmem:[#allocation83_spill] sm:$0xff] }
 0x686   : > { %14734 = vmatpush1.bf16.msra.mxu0 %v20977_v44  ;;  %v20988_v44 = vld [vmem:[#allocation84_spill] sm:$0xff] }
 0x687   : > { %14736 = vmatprep.subr.bf16.mxu0 %v20978_v23  ;;  %v20989_v23 = vld [vmem:[#allocation88_spill] sm:$0xff] }
 0x68a   : > { %14738 = vmatpush1.bf16.msra.mxu0 %v20979_v2  ;;  %v20990_v2 = vld [vmem:[#allocation96_spill] sm:$0xff] }
 0x68b   : > { %14740 = vmatprep.subr.bf16.mxu0 %v20980_v37  ;;  %v20991_v37 = vld [vmem:[#allocation99_spill] sm:$0xff] }
 0x68e   : > { %14742 = vmatpush1.bf16.msra.mxu0 %v20981_v53  ;;  %v20992_v53 = vld [vmem:[#allocation100_spill] sm:$0xff] }
 0x68f   : > { %14744 = vmatprep.subr.bf16.mxu0 %v20982_v7  ;;  %v20993_v7 = vld [vmem:[#allocation104_spill] sm:$0xff] }
 0x692   : > { %14746 = vmatpush1.bf16.msra.mxu0 %v20983_v20  ;;  %v20994_v20 = vld [vmem:[#allocation108_spill] sm:$0xff] }
 0x693   : > { %14748 = vmatprep.subr.bf16.mxu0 %v20984_v60  ;;  %v20995_v60 = vld [vmem:[#allocation109_spill] sm:$0xff] }
 0x696   : > { %14750 = vmatpush1.bf16.msra.mxu0 %v20985_v13  ;;  %v20996_v13 = vld [vmem:[#allocation110_spill] sm:$0xff] }
 0x697   : > { %14752 = vmatprep.subr.bf16.mxu0 %v20986_v12  ;;  %v20997_v12 = vld [vmem:[#allocation113_spill] sm:$0xff] }
 0x69a   : > { %14754 = vmatpush1.bf16.msra.mxu0 %v20987_v55  ;;  %v20998_v55 = vld [vmem:[#allocation114_spill] sm:$0xff] }
 0x69b   : > { %14756 = vmatprep.subr.bf16.mxu0 %v20988_v44  ;;  %v20999_v44 = vld [vmem:[#allocation117_spill] sm:$0xff] }
 0x69e   : > { %14758 = vmatpush1.bf16.msra.mxu0 %v20989_v23  ;;  %v21000_v23 = vld [vmem:[#allocation118_spill] sm:$0xff] }
 0x69f   : > { %14760 = vmatprep.subr.bf16.mxu0 %v20990_v2  ;;  %v21001_v2 = vld [vmem:[#allocation121_spill] sm:$0xff] }
 0x6a2   : > { %14762 = vmatpush1.bf16.msra.mxu0 %v20991_v37  ;;  %v21002_v37 = vld [vmem:[#allocation122_spill] sm:$0xff] }
 0x6a3   : > { %14764 = vmatprep.subr.bf16.mxu0 %v20992_v53  ;;  %v21003_v53 = vld [vmem:[#allocation124_spill] sm:$0xff] }
 0x6a6   : > { %14766 = vmatpush1.bf16.msra.mxu0 %v20993_v7  ;;  %v21004_v7 = vld [vmem:[#allocation126_spill] sm:$0xff] }
 0x6a7   : > { %14768 = vmatprep.subr.bf16.mxu0 %v20994_v20  ;;  %v21005_v20 = vld [vmem:[#allocation128_spill] sm:$0xff] }
 0x6aa   : > { %14770 = vmatpush1.bf16.msra.mxu0 %v20995_v60  ;;  %v21006_v60 = vand.u32 4294901760, %v19292_v16 }
 0x6ab   : > { %14772 = vmatprep.subr.bf16.mxu0 %v20996_v13 }
 0x6ae   : > { %14774 = vmatpush1.bf16.msra.mxu0 %v20997_v12  ;;  %v21007_v12 = vld [vmem:[#allocation137_spill] sm:$0xff] }
 0x6af   : > { %14776 = vmatprep.subr.bf16.mxu0 %v20998_v55  ;;  %v21008_v55 = vand.u32 4294901760, %v19498_v8 }
 0x6b2   : > { %14778 = vmatpush1.bf16.msra.mxu0 %v20999_v44  ;;  %v21009_v44 = vld [vmem:[#allocation101_spill] sm:$0xff] }
 0x6b3   : > { %14780 = vmatprep.subr.bf16.mxu0 %v21000_v23  ;;  %v15849_v23 = vld [vmem:[#allocation19 + $0x170] ss:$8 sps:$4 sm:$0xff]  }
 0x6b6   : > { %14782 = vmatpush1.bf16.msra.mxu0 %v21001_v2 }
 0x6b7   : > { %14784 = vmatprep.subr.bf16.mxu0 %v21002_v37 }
 0x6ba   : > { %14786 = vmatpush1.bf16.msra.mxu0 %v21003_v53  ;;  %v4843_v53 = vld [vmem:[#allocation3 + $0x30] sm:$0x1] }
 0x6bb   : > { %14788 = vmatprep.subr.bf16.mxu0 %v21004_v7  ;;  %v15854_v7 = vld [vmem:[#allocation19 + $0x184] ss:$8 sps:$4 sm:$0xff]  }
 0x6be   : > { %14790 = vmatpush1.bf16.msra.mxu0 %v21005_v20  ;;  %v4844_v20 = vsel %vm17985_vm3, 0, %v4843_v53  ;;  %v4930_v53 = vld [vmem:[#allocation3 + $0x78] sm:$0x10] }
 0x6bf   : > { %14792 = vmatprep.subr.bf16.mxu0 %v20875_v38  ;;  %4845 = vst [vmem:[#allocation3 + $0x30] sm:$0x1] %v4844_v20  ;;  %v4931_v20 = vsel %vm17991_vm6, 0, %v4930_v53  ;;  %v21038_v53 = vld [vmem:[#allocation149_spill] sm:$0xff] }
 0x6c0   : > { %4932 = vst [vmem:[#allocation3 + $0x78] sm:$0x10] %v4931_v20  ;;  %v21039_v20 = vld [vmem:[#allocation151_spill] sm:$0xff] }
 0x6c1   : > { %7100 = vmatmul.mubr.f32.vlgmr.msra.gmra.mrb[22].mxu0 %v19498_v8  ;;  %v4837_v8 = vld [vmem:[#allocation3 + $0x20] sm:$0x1] }
 0x6c2   : > { %14794 = vmatpush1.bf16.msra.mxu0 %v18257_v6  ;;  %7237 = vmatprep.mubr.f32.mxu0 %v21006_v60  ;;  %v4838_v2 = vsel %vm17985_vm3, 0, %v4837_v8  ;;  %v4846_v60 = vld [vmem:[#allocation3 + $0x38] sm:$0x1]  ;;  %v15861_v8 = vld [vmem:[#allocation19 + $0x1b0] ss:$8 sps:$4 sm:$0xff]  }
 0x6c3   : > { %14796 = vmatprep.subr.bf16.mxu0 %v18261_v19  ;;  %4839 = vst [vmem:[#allocation3 + $0x20] sm:$0x1] %v4838_v2 }
 0x6c6   : > { %14798 = vmatpush1.bf16.msra.mxu0 %v20761_v50 }
 0x6c7   : > { %14800 = vmatprep.subr.bf16.mxu0 %v20763_v49 }
 0x6ca   : > { %14802 = vmatpush1.bf16.msra.mxu0 %v20769_v61 }
 0x6cb   : > { %14804 = vmatprep.subr.bf16.mxu0 %v20771_v11 }
 0x6ce   : > { %14806 = vmatpush1.bf16.msra.mxu0 %v20896_v5 }
 0x6cf   : > { %14808 = vmatprep.subr.bf16.mxu0 %v20897_v29 }
 0x6d2   : > { %14810 = vmatpush1.bf16.msra.mxu0 %v20906_v14 }
 0x6d3   : > { %14812 = vmatprep.subr.bf16.mxu0 %v20907_v42 }
 0x6d4   : > { %v19628_v16 = vpop.f32.mrb[20].mxu0 }
 0x6d5   : > { %v19630_v13 = vpop.f32.mrb[21].mxu0 }
 0x6d6   : > { %14814 = vmatpush1.bf16.msra.mxu0 %v20913_v24 }
 0x6d7   : > { %14816 = vmatprep.subr.bf16.mxu0 %v20914_v21 }
 0x6da   : > { %14818 = vmatpush1.bf16.msra.mxu0 %v20920_v63 }
 0x6db   : > { %14820 = vmatprep.subr.bf16.mxu0 %v20921_v57 }
 0x6de   : > { %14822 = vmatpush1.bf16.msra.mxu0 %v20822_v40 }
 0x6df   : > { %14824 = vmatprep.subr.bf16.mxu0 %v20823_v0 }
 0x6e2   : > { %14826 = vmatpush1.bf16.msra.mxu0 %v20828_v47 }
 0x6e3   : > { %14828 = vmatprep.subr.bf16.mxu0 %v20829_v4 }
 0x6e6   : > { %14830 = vmatpush1.bf16.msra.mxu0 %v20832_v18 }
 0x6e7   : > { %14832 = vmatprep.subr.bf16.mxu0 %v20833_v30 }
 0x6ea   : > { %14834 = vmatpush1.bf16.msra.mxu0 %v20835_v17 }
 0x6eb   : > { %14836 = vmatprep.subr.bf16.mxu0 %v20836_v9 }
 0x6ee   : > { %14838 = vmatpush1.bf16.msra.mxu0 %v20838_v35 }
 0x6ef   : > { %14840 = vmatprep.subr.bf16.mxu0 %v20839_v33 }
 0x6f2   : > { %14842 = vmatpush1.bf16.msra.mxu0 %v20842_v56 }
 0x6f3   : > { %14844 = vmatprep.subr.bf16.mxu0 %v20934_v51 }
 0x6f6   : > { %14846 = vmatpush1.bf16.msra.mxu0 %v20937_v34 }
 0x6f7   : > { %14848 = vmatprep.subr.bf16.mxu0 %v20938_v28 }
 0x6fa   : > { %14850 = vmatpush1.bf16.msra.mxu0 %v20940_v15 }
 0x6fb   : > { %14852 = vmatprep.subr.bf16.mxu0 %v20941_v36 }
 0x6fe   : > { %14854 = vmatpush1.bf16.msra.mxu0 %v20942_v46 }
 0x6ff   : > { %14856 = vmatprep.subr.bf16.mxu0 %v21007_v12  ;;  %v4900_v12 = vld [vmem:[#allocation3 + $0x28] sm:$0x10] }
 0x701   : > { %7241 = vmatmul.mubr.f32.vlgmr.msra.gmra.mrb[22].mxu0 %v21008_v55 }
 0x702   : > { %14858 = vmatpush1.bf16.msra.mxu0 %v21009_v44  ;;  %7504 = vmatprep.mubr.f32.mxu0 %v20945_v54  ;;  %v4901_v44 = vsel %vm17991_vm6, 0, %v4900_v12  ;;  %v21025_v12 = vld [vmem:[#allocation38_spill] sm:$0xff] }
 0x703   : > { %14860 = vmatprep.subr.bf16.mxu0 %v19312_v26  ;;  %v21010_v26 = vld [vmem:[#allocation158_spill] sm:$0xff]  ;;  %4902 = vst [vmem:[#allocation3 + $0x28] sm:$0x10] %v4901_v44  ;;  %v17051_v44 = vmov 1966171168  }
 0x706   : > { %14862 = vmatpush1.bf16.msra.mxu0 %v19328_v25  ;;  %v21012_v25 = vld [vmem:[#allocation162_spill] sm:$0xff] }
 0x707   : > { %14864 = vmatprep.subr.bf16.mxu0 %v19338_v27  ;;  %v21011_v27 = vld [vmem:[#allocation159_spill] sm:$0xff] }
 0x70a   : > { %14866 = vmatpush1.bf16.msra.mxu0 %v19349_v32  ;;  %v21013_v32 = vld [vmem:[#allocation163_spill] sm:$0xff] }
 0x70b   : > { %14868 = vmatprep.subr.bf16.mxu0 %v19359_v48  ;;  %v21014_v48 = vld [vmem:[#allocation164_spill] sm:$0xff] }
 0x70e   : > { %14870 = vmatpush1.bf16.msra.mxu0 %v19368_v22  ;;  %v21015_v22 = vld [vmem:[#allocation165_spill] sm:$0xff] }
 0x70f   : > { %14872 = vmatprep.subr.bf16.mxu0 %v19377_v52  ;;  %v21016_v52 = vld [vmem:[#allocation166_spill] sm:$0xff] }
 0x712   : > { %14874 = vmatpush1.bf16.msra.mxu0 %v19388_v10  ;;  %v21017_v10 = vld [vmem:[#allocation167_spill] sm:$0xff] }
 0x713   : > { %14876 = vmatprep.subr.bf16.mxu0 %v19395_v58  ;;  %v21018_v58 = vld [vmem:[#allocation168_spill] sm:$0xff] }
 0x716   : > { %14878 = vmatpush1.bf16.msra.mxu0 %v19406_v45  ;;  %v21019_v45 = vld [vmem:[#allocation169_spill] sm:$0xff] }
 0x717   : > { %14880 = vmatprep.subr.bf16.mxu0 %v19413_v43  ;;  %v21020_v43 = vld [vmem:[#allocation170_spill] sm:$0xff] }
 0x71a   : > { %14882 = vmatpush1.bf16.msra.mxu0 %v19422_v41  ;;  %v21021_v41 = vld [vmem:[#allocation171_spill] sm:$0xff] }
 0x71b   : > { %14884 = vmatprep.subr.bf16.mxu0 %v19429_v3  ;;  %v21022_v3 = vld [vmem:[#allocation103_spill] sm:$0xff] }
 0x71e   : > { %14886 = vmatpush1.bf16.msra.mxu0 %v19438_v59 }
 0x71f   : > { %14888 = vmatprep.subr.bf16.mxu0 %v19445_v39 }
 0x722   : > { %14890 = vmatpush1.bf16.msra.mxu0 %v19454_v62 }
 0x723   : > { %14892 = vmatprep.subr.bf16.mxu0 %v19461_v31  ;;  %v4894_v31 = vld [vmem:[#allocation3 + $0x18] sm:$0x10] }
 0x726   : > { %14894 = vmatpush1.bf16.msra.mxu0 %v19470_v1  ;;  %v15845_v1 = vld [vmem:[#allocation19 + $0x154] ss:$8 sps:$4 sm:$0xff]  }
 0x727   : > { %14896 = vmatprep.subr.bf16.mxu0 %v21010_v26  ;;  %v4903_v26 = vld [vmem:[#allocation3 + $0x30] sm:$0x10] }
 0x72a   : > { %14898 = vmatpush1.bf16.msra.mxu0 %v21011_v27  ;;  %v4906_v27 = vld [vmem:[#allocation3 + $0x38] sm:$0x10] }
 0x72b   : > { %14900 = vmatprep.subr.bf16.mxu0 %v21012_v25  ;;  %v4904_v25 = vsel %vm17991_vm6, 0, %v4903_v26  ;;  %v7680_v26 = vunpack.c.l.s4 %v17051_v44 }
 0x72c   : > { %4905 = vst [vmem:[#allocation3 + $0x30] sm:$0x10] %v4904_v25  ;;  %v21026_v25 = vld [vmem:[#allocation143_spill] sm:$0xff] }
 0x72e   : > { %14902 = vmatpush1.bf16.msra.mxu0 %v21013_v32  ;;  %v4907_v32 = vsel %vm17991_vm6, 0, %v4906_v27  ;;  %v15867_v27 = vld [vmem:[#allocation19 + $0x1d0] ss:$8 sps:$4 sm:$0xff]  }
 0x72f   : > { %14904 = vmatprep.subr.bf16.mxu0 %v21014_v48  ;;  %v15852_v48 = vld [vmem:[#allocation19 + $0x180] ss:$8 sps:$4 sm:$0xff]   ;;  %4908 = vst [vmem:[#allocation3 + $0x38] sm:$0x10] %v4907_v32 }
 0x732   : > { %14906 = vmatpush1.bf16.msra.mxu0 %v21015_v22  ;;  %v15857_v22 = vld [vmem:[#allocation19 + $0x194] ss:$8 sps:$4 sm:$0xff]  }
 0x733   : > { %14908 = vmatprep.subr.bf16.mxu0 %v21016_v52  ;;  %v4849_v52 = vld [vmem:[#allocation3 + $0x40] sm:$0x1] }
 0x736   : > { %14910 = vmatpush1.bf16.msra.mxu0 %v21017_v10  ;;  %v4852_v10 = vld [vmem:[#allocation3 + $0x48] sm:$0x1] }
 0x737   : > { %14912 = vmatprep.subr.bf16.mxu0 %v21018_v58  ;;  %v4855_v58 = vld [vmem:[#allocation3 + $0x50] sm:$0x1] }
 0x73a   : > { %14914 = vmatpush1.bf16.msra.mxu0 %v21019_v45  ;;  %v4850_v45 = vsel %vm17985_vm3, 0, %v4849_v52 }
 0x73b   : > { %14916 = vmatprep.subr.bf16.mxu0 %v21020_v43  ;;  %v4853_v43 = vsel %vm17985_vm3, 0, %v4852_v10  ;;  %4851 = vst [vmem:[#allocation3 + $0x40] sm:$0x1] %v4850_v45  ;;  %v15870_v45 = vld [vmem:[#allocation19 + $0x1e0] ss:$8 sps:$4 sm:$0xff]  }
 0x73c   : > { %4854 = vst [vmem:[#allocation3 + $0x48] sm:$0x1] %v4853_v43 }
 0x73e   : > { %14918 = vmatpush1.bf16.msra.mxu0 %v21021_v41  ;;  %v4856_v41 = vsel %vm17985_vm3, 0, %v4855_v58  ;;  %v7681_v58 = vunpack.c.0.s8 %v7680_v26  ;;  %v21041_v26 = vld [vmem:[#allocation155_spill] sm:$0xff] }
 0x73f   : > { %14920 = vmatprep.subr.bf16.mxu0 %v20875_v38  ;;  %4857 = vst [vmem:[#allocation3 + $0x50] sm:$0x1] %v4856_v41  ;;  %v15875_v41 = vld [vmem:[#allocation19 + $0x1f4] ss:$8 sps:$4 sm:$0xff]  }
 0x741   : > { %7506 = vmatmul.mubr.f32.vlgmr.msra.gmra.mrb[22].mxu0 %v21022_v3 }
 0x742   : > { %14922 = vmatpush1.bf16.msra.mxu0 %v18257_v6  ;;  %7641 = vmatprep.mubr.f32.mxu0 %v20945_v54  ;;  %v15843_v54 = vld [vmem:[#allocation19 + $0x150] ss:$8 sps:$4 sm:$0xff]  }
 0x743   : > { %14924 = vmatprep.subr.bf16.mxu0 %v18261_v19  ;;  %v15828_v19 = vld [vmem:[#allocation19 + $0x100] ss:$8 sps:$4 sm:$0xff]  }
 0x746   : > { %14926 = vmatpush1.bf16.msra.mxu0 %v20761_v50  ;;  %v15831_v50 = vld [vmem:[#allocation19 + $0x110] ss:$8 sps:$4 sm:$0xff]  }
 0x747   : > { %14928 = vmatprep.subr.bf16.mxu0 %v20763_v49  ;;  %v15836_v49 = vld [vmem:[#allocation19 + $0x124] ss:$8 sps:$4 sm:$0xff]  }
 0x74a   : > { %14930 = vmatpush1.bf16.msra.mxu0 %v20769_v61  ;;  %v15830_v61 = vld [vmem:[#allocation19 + $0x104] ss:$8 sps:$4 sm:$0xff]  }
 0x74b   : > { %14932 = vmatprep.subr.bf16.mxu0 %v20771_v11  ;;  %8579 = vmatprep.subr.bf16.mxu1 %v15830_v61  ;;  %v15834_v11 = vld [vmem:[#allocation19 + $0x120] ss:$8 sps:$4 sm:$0xff]  }
 0x74c   : > { %8580 = vmatpush1.bf16.msra.mxu1 %v15828_v19  ;;  %v4912_v19 = vld [vmem:[#allocation3 + $0x48] sm:$0x10] }
 0x74e   : > { %v6360_v59 = vpop.f32.mrb[2].mxu1  ;;  %14934 = vmatpush1.bf16.msra.mxu0 %v20896_v5  ;;  %v15915_v5 = vld [vmem:[#allocation19 + $0x50] ss:$8 sps:$4 sm:$0xff]  }
 0x74f   : > { %v19699_v38 = vadd.f32 %v6360_v59, %v19628_v16  ;;  %v6362_v39 = vpop.f32.mrb[3].mxu1  ;;  %14936 = vmatprep.subr.bf16.mxu0 %v20897_v29  ;;  %v4847_v16 = vsel %vm17985_vm3, 0, %v4846_v60  ;;  %v15864_v60 = vld [vmem:[#allocation19 + $0x1c0] ss:$8 sps:$4 sm:$0xff]  }
 0x750   : > { %v19703_v6 = vadd.f32 %v6362_v39, %v19630_v13  ;;  %v4897_v13 = vld [vmem:[#allocation3 + $0x20] sm:$0x10]  ;;  %4848 = vst [vmem:[#allocation3 + $0x38] sm:$0x1] %v4847_v16  ;;  %v7659_v16 = vld [vmem:[#allocation15] sm:$0x3] }
 0x751   : > { %v4898_v55 = vsel %vm17991_vm6, 0, %v4897_v13  ;;  %v4909_v39 = vld [vmem:[#allocation3 + $0x40] sm:$0x10]  ;;  %v15869_v13 = vld [vmem:[#allocation19 + $0x1d4] ss:$8 sps:$4 sm:$0xff]   ;;  %v7668_v32 = vrot.slane %v7659_v16, %v21026_v25 }
 0x752   : > { %14938 = vmatpush1.bf16.msra.mxu0 %v20906_v14  ;;  %v4888_v14 = vld [vmem:[#allocation3 + $0x8] sm:$0x10]  ;;  %4899 = vst [vmem:[#allocation3 + $0x20] sm:$0x10] %v4898_v55  ;;  %v4910_v61 = vsel %vm17991_vm6, 0, %v4909_v39  ;;  %v7664_v55 = vrot.slane %v7659_v16, %v21025_v12  ;;  %v21027_v39 = vld [vmem:[#allocation37_spill] sm:$0xff] }
 0x753   : > { %14940 = vmatprep.subr.bf16.mxu0 %v20907_v42  ;;  %v4891_v42 = vld [vmem:[#allocation3 + $0x10] sm:$0x10]  ;;  %4911 = vst [vmem:[#allocation3 + $0x40] sm:$0x10] %v4910_v61  ;;  %v15873_v61 = vld [vmem:[#allocation19 + $0x1f0] ss:$8 sps:$4 sm:$0xff]  }
 0x754   : > { %v4892_v62 = vsel %vm17991_vm6, 0, %v4891_v42 }
 0x755   : > { %4893 = vst [vmem:[#allocation3 + $0x10] sm:$0x10] %v4892_v62 }
 0x756   : > { %14942 = vmatpush1.bf16.msra.mxu0 %v20913_v24  ;;  %v4889_v24 = vsel %vm17991_vm6, 0, %v4888_v14  ;;  %v4867_v14 = vld [vmem:[#allocation3 + $0x70] sm:$0x1] }
 0x757   : > { %14944 = vmatprep.subr.bf16.mxu0 %v20914_v21  ;;  %v15833_v21 = vld [vmem:[#allocation19 + $0x114] ss:$8 sps:$4 sm:$0xff]   ;;  %4890 = vst [vmem:[#allocation3 + $0x8] sm:$0x10] %v4889_v24 }
 0x758   : > { %8581 = vmatprep.subr.bf16.mxu1 %v15833_v21  ;;  %v4913_v21 = vsel %vm17991_vm6, 0, %v4912_v19  ;;  %v7684_v19 = vsub.s32 %v7681_v58, %v21027_v39 }
 0x759   : > { %8582 = vmatpush1.bf16.msra.mxu1 %v15831_v50  ;;  %v4915_v50 = vld [vmem:[#allocation3 + $0x50] sm:$0x10]  ;;  %4914 = vst [vmem:[#allocation3 + $0x48] sm:$0x10] %v4913_v21  ;;  %v15884_v21 = vld [vmem:[#allocation19 + $0x4] ss:$8 sps:$4 sm:$0xff]  }
 0x75a   : > { %14946 = vmatpush1.bf16.msra.mxu0 %v20920_v63  ;;  %8583 = vmatprep.subr.bf16.mxu1 %v15836_v49  ;;  %v15840_v63 = vld [vmem:[#allocation19 + $0x140] ss:$8 sps:$4 sm:$0xff]   ;;  %v4918_v49 = vld [vmem:[#allocation3 + $0x58] sm:$0x10] }
 0x75b   : > { %14948 = vmatprep.subr.bf16.mxu0 %v20921_v57  ;;  %v4895_v57 = vsel %vm17991_vm6, 0, %v4894_v31  ;;  %v4868_v31 = vsel %vm17985_vm3, 0, %v4867_v14  ;;  %v21030_v14 = vld [vmem:[#allocation147_spill] sm:$0xff] }
 0x75c   : > { %4896 = vst [vmem:[#allocation3 + $0x18] sm:$0x10] %v4895_v57  ;;  %4869 = vst [vmem:[#allocation3 + $0x70] sm:$0x1] %v4868_v31  ;;  %v21032_v31 = vld [vmem:[#allocation152_spill] sm:$0xff] }
 0x75d   : > { %8584 = vmatpush1.bf16.msra.mxu1 %v15834_v11  ;;  %v15855_v11 = vld [vmem:[#allocation19 + $0x190] ss:$8 sps:$4 sm:$0xff]  }
 0x75e   : > { %14950 = vmatpush1.bf16.msra.mxu0 %v20822_v40  ;;  %v15837_v40 = vld [vmem:[#allocation19 + $0x130] ss:$8 sps:$4 sm:$0xff]  }
 0x75f   : > { %14952 = vmatprep.subr.bf16.mxu0 %v20823_v0  ;;  %v15842_v0 = vld [vmem:[#allocation19 + $0x144] ss:$8 sps:$4 sm:$0xff]  }
 0x762   : > { %14954 = vmatpush1.bf16.msra.mxu0 %v20828_v47  ;;  %v4825_v47 = vld [vmem:[#allocation3] sm:$0x1] }
 0x763   : > { %14956 = vmatprep.subr.bf16.mxu0 %v20829_v4  ;;  %v15839_v4 = vld [vmem:[#allocation19 + $0x134] ss:$8 sps:$4 sm:$0xff]  }
 0x764   : > { %8585 = vmatprep.subr.bf16.mxu1 %v15839_v4  ;;  %v4916_v4 = vsel %vm17991_vm6, 0, %v4915_v50  ;;  %v4876_v50 = vld [vmem:[#allocation3 + $0x88] sm:$0x1] }
 0x765   : > { %8586 = vmatpush1.bf16.msra.mxu1 %v15837_v40  ;;  %v4919_v40 = vsel %vm17991_vm6, 0, %v4918_v49  ;;  %4917 = vst [vmem:[#allocation3 + $0x50] sm:$0x10] %v4916_v4  ;;  %v4936_v49 = vld [vmem:[#allocation3 + $0x88] sm:$0x10] }
 0x766   : > { %14958 = vmatpush1.bf16.msra.mxu0 %v20832_v18  ;;  %8587 = vmatprep.subr.bf16.mxu1 %v15842_v0  ;;  %v7649_v0 = vmul.f32 %v19699_v38, %v19699_v38  ;;  %4920 = vst [vmem:[#allocation3 + $0x58] sm:$0x10] %v4919_v40  ;;  %v4873_v4 = vld [vmem:[#allocation3 + $0x80] sm:$0x1]  ;;  %v4933_v40 = vld [vmem:[#allocation3 + $0x80] sm:$0x10] }
 0x767   : > { %14960 = vmatprep.subr.bf16.mxu0 %v20833_v30  ;;  %v4826_v30 = vsel %vm17985_vm3, 0, %v4825_v47  ;;  %v15860_v47 = vld [vmem:[#allocation19 + $0x1a4] ss:$8 sps:$4 sm:$0xff]  }
 0x768   : > { %4827 = vst [vmem:[#allocation3] sm:$0x1] %v4826_v30 }
 0x769   : > { %8588 = vmatpush1.bf16.msra.mxu1 %v15840_v63  ;;  %v4870_v63 = vld [vmem:[#allocation3 + $0x78] sm:$0x1] }
 0x76a   : > { %14962 = vmatpush1.bf16.msra.mxu0 %v20835_v17  ;;  %v4828_v17 = vld [vmem:[#allocation3 + $0x8] sm:$0x1]  ;;  %8589 = vmatprep.subr.bf16.mxu1 %v15845_v1  ;;  %v4871_v1 = vsel %vm17985_vm3, 0, %v4870_v63 }
 0x76b   : > { %14964 = vmatprep.subr.bf16.mxu0 %v20836_v9  ;;  %v4831_v9 = vld [vmem:[#allocation3 + $0x10] sm:$0x1]  ;;  %4872 = vst [vmem:[#allocation3 + $0x78] sm:$0x1] %v4871_v1 }
 0x76d   : > { %8590 = vmatpush1.bf16.msra.mxu1 %v15843_v54  ;;  %v4921_v54 = vld [vmem:[#allocation3 + $0x60] sm:$0x10] }
 0x76e   : > { %14966 = vmatpush1.bf16.msra.mxu0 %v20838_v35  ;;  %v4829_v35 = vsel %vm17985_vm3, 0, %v4828_v17  ;;  %v7650_v17 = vmul.f32 %v19703_v6, %v19703_v6 }
 0x76f   : > { %14968 = vmatprep.subr.bf16.mxu0 %v20839_v33  ;;  %v4832_v33 = vsel %vm17985_vm3, 0, %v4831_v9  ;;  %4830 = vst [vmem:[#allocation3 + $0x8] sm:$0x1] %v4829_v35  ;;  %v15858_v9 = vld [vmem:[#allocation19 + $0x1a0] ss:$8 sps:$4 sm:$0xff]  }
 0x770   : > { %4833 = vst [vmem:[#allocation3 + $0x10] sm:$0x1] %v4832_v33 }
 0x772   : > { %14970 = vmatpush1.bf16.msra.mxu0 %v20842_v56  ;;  %v4834_v56 = vld [vmem:[#allocation3 + $0x18] sm:$0x1] }
 0x773   : > { %14972 = vmatprep.subr.bf16.mxu0 %v20934_v51  ;;  %v4835_v51 = vsel %vm17985_vm3, 0, %v4834_v56  ;;  %v15863_v56 = vld [vmem:[#allocation19 + $0x1b4] ss:$8 sps:$4 sm:$0xff]  }
 0x774   : > { %4836 = vst [vmem:[#allocation3 + $0x18] sm:$0x1] %v4835_v51  ;;  %v4861_v51 = vld [vmem:[#allocation3 + $0x60] sm:$0x1] }
 0x775   : > { %v4862_v24 = vsel %vm17985_vm3, 0, %v4861_v51  ;;  %v21029_v51 = vld [vmem:[#allocation144_spill] sm:$0xff] }
 0x776   : > { %14974 = vmatpush1.bf16.msra.mxu0 %v20937_v34  ;;  %v15846_v34 = vld [vmem:[#allocation19 + $0x160] ss:$8 sps:$4 sm:$0xff]   ;;  %4863 = vst [vmem:[#allocation3 + $0x60] sm:$0x1] %v4862_v24 }
 0x777   : > { %14976 = vmatprep.subr.bf16.mxu0 %v20938_v28  ;;  %v15848_v28 = vld [vmem:[#allocation19 + $0x164] ss:$8 sps:$4 sm:$0xff]   ;;  %v21031_v24 = vld [vmem:[#allocation150_spill] sm:$0xff] }
 0x778   : > { %8591 = vmatprep.subr.bf16.mxu1 %v15848_v28  ;;  %v4924_v28 = vld [vmem:[#allocation3 + $0x68] sm:$0x10] }
 0x779   : > { %8592 = vmatpush1.bf16.msra.mxu1 %v15846_v34  ;;  %v4925_v2 = vsel %vm17991_vm6, 0, %v4924_v28  ;;  %v21034_v28 = vld [vmem:[#allocation156_spill] sm:$0xff] }
 0x77a   : > { %14978 = vmatpush1.bf16.msra.mxu0 %v20940_v15  ;;  %v15851_v15 = vld [vmem:[#allocation19 + $0x174] ss:$8 sps:$4 sm:$0xff]   ;;  %4926 = vst [vmem:[#allocation3 + $0x68] sm:$0x10] %v4925_v2 }
 0x77b   : > { %14980 = vmatprep.subr.bf16.mxu0 %v20941_v36  ;;  %v4840_v36 = vld [vmem:[#allocation3 + $0x28] sm:$0x1]  ;;  %8593 = vmatprep.subr.bf16.mxu1 %v15851_v15  ;;  %v21037_v2 = vld [vmem:[#allocation145_spill] sm:$0xff] }
 0x77c   : > { %v4841_v37 = vsel %vm17985_vm3, 0, %v4840_v36  ;;  %v15866_v36 = vld [vmem:[#allocation19 + $0x1c4] ss:$8 sps:$4 sm:$0xff]  }
 0x77d   : > { %4842 = vst [vmem:[#allocation3 + $0x28] sm:$0x1] %v4841_v37  ;;  %8594 = vmatpush1.bf16.msra.mxu1 %v15849_v23  ;;  %v4922_v23 = vsel %vm17991_vm6, 0, %v4921_v54  ;;  %v4927_v37 = vld [vmem:[#allocation3 + $0x70] sm:$0x10] }
 0x77e   : > { %14982 = vmatpush1.bf16.msra.mxu0 %v20942_v46  ;;  %v4885_v46 = vld [vmem:[#allocation3] sm:$0x10]  ;;  %8595 = vmatprep.subr.bf16.mxu1 %v15854_v7  ;;  %4923 = vst [vmem:[#allocation3 + $0x60] sm:$0x10] %v4922_v23  ;;  %v4928_v7 = vsel %vm17991_vm6, 0, %v4927_v37 }
 0x77f   : > { %v4886_v29 = vsel %vm17991_vm6, 0, %v4885_v46  ;;  %4929 = vst [vmem:[#allocation3 + $0x70] sm:$0x10] %v4928_v7 }
 0x780   : > { %4887 = vst [vmem:[#allocation3] sm:$0x10] %v4886_v29  ;;  %v4864_v29 = vld [vmem:[#allocation3 + $0x68] sm:$0x1] }
 0x781   : > { %7643 = vmatmul.mubr.f32.vlgmr.msra.gmra.mrb[22].mxu0 %v21022_v3  ;;  %v4858_v3 = vld [vmem:[#allocation3 + $0x58] sm:$0x1]  ;;  %8596 = vmatpush1.bf16.msra.mxu1 %v15852_v48  ;;  %v4865_v62 = vsel %vm17985_vm3, 0, %v4864_v29 }
 0x782   : > { %v4859_v59 = vsel %vm17985_vm3, 0, %v4858_v3  ;;  %8597 = vmatprep.subr.bf16.mxu1 %v15857_v22  ;;  %4866 = vst [vmem:[#allocation3 + $0x68] sm:$0x1] %v4865_v62  ;;  %v15872_v48 = vld [vmem:[#allocation19 + $0x1e4] ss:$8 sps:$4 sm:$0xff]  }
 0x783   : > { %4860 = vst [vmem:[#allocation3 + $0x58] sm:$0x1] %v4859_v59 }
 0x785   : > { %8598 = vmatpush1.bf16.msra.mxu1 %v15855_v11 }
 0x786   : > { %8599 = vmatprep.subr.bf16.mxu1 %v15860_v47 }
 0x789   : > { %8600 = vmatpush1.bf16.msra.mxu1 %v15858_v9  ;;  %v4874_v9 = vsel %vm17985_vm3, 0, %v4873_v4 }
 0x78a   : > { %8601 = vmatprep.subr.bf16.mxu1 %v15863_v56  ;;  %4875 = vst [vmem:[#allocation3 + $0x80] sm:$0x1] %v4874_v9  ;;  %v21028_v56 = vld [vmem:[#allocation146_spill] sm:$0xff] }
 0x78d   : > { %8602 = vmatpush1.bf16.msra.mxu1 %v15861_v8 }
 0x78e   : > { %8603 = vmatprep.subr.bf16.mxu1 %v15866_v36  ;;  %v21036_v36 = vld [vmem:[#allocation148_spill] sm:$0xff] }
 0x791   : > { %8604 = vmatpush1.bf16.msra.mxu1 %v15864_v60 }
 0x792   : > { %8605 = vmatprep.subr.bf16.mxu1 %v15869_v13 }
 0x795   : > { %8606 = vmatpush1.bf16.msra.mxu1 %v15867_v27 }
 0x796   : > { %8607 = vmatprep.subr.bf16.mxu1 %v15872_v48 }
 0x799   : > { %8608 = vmatpush1.bf16.msra.mxu1 %v15870_v45 }
 0x79a   : > { %8609 = vmatprep.subr.bf16.mxu1 %v15875_v41 }
 0x79d   : > { %8610 = vmatpush1.bf16.msra.mxu1 %v15873_v61 }
 0x79e   : > { %8828 = vmatprep.subr.bf16.mxu1 %v15884_v21 }
 0x854   : > { %v7644_v30 = vpop.f32.mrb[22].mxu0 }
 0x855   : > { %v7651_v35 = vsub.f32 %v7644_v30, %v7649_v0  ;;  %v7646_v33 = vpop.f32.mrb[23].mxu0  ;;  %v7673_v30 = vld [vmem:[#allocation16] sm:$0x3] }
 0x856   : > { %v7652_v46 = vsub.f32 %v7646_v33, %v7650_v17 }
 0x857   : > { %v7653_v42 = vmax.f32 %v7651_v35, 0.0  ;;  %v4934_v35 = vsel %vm17991_vm6, 0, %v4933_v40 }
 0x858   : > { %v7654_v57 = vmax.f32 %v7652_v46, 0.0  ;;  %4935 = vst [vmem:[#allocation3 + $0x80] sm:$0x10] %v4934_v35 }
 0x859   : > { %v7655_v34 = vadd.f32 1e-06, %v7653_v42 }
 0x85a   : > { %v7656_v15 = vadd.f32 1e-06, %v7654_v57  ;;  %v21033_v57 = vld [vmem:[#allocation154_spill] sm:$0xff] }
 0x85b   : > { %16486 = vrsqrt.f32 %v7655_v34 }
 0x85c   : > { %16488 = vrsqrt.f32 %v7656_v15  ;;  %v21035_v15 = vld [vmem:[#allocation160_spill] sm:$0xff] }
 0x865   : > { %v16487_v22 = vpop.eup %16486 }
 0x866   : > { %v16489_v52 = vpop.eup %16488  ;;  %v7671_v10 = vmul.f32 %v16487_v22, %v7664_v55  ;;  %v21040_v55 = vld [vmem:[#allocation153_spill] sm:$0xff] }
 0x867   : > { %v7672_v43 = vmul.f32 %v16489_v52, %v7668_v32  ;;  %v21042_v32 = vld [vmem:[#allocation157_spill] sm:$0xff] }
 0x868   : > { %v7674_v3 = vmul.f32 %v19699_v38, %v7671_v10  ;;  %v7698_v0 = vrot.slane %v7671_v10, %v21025_v12  ;;  %v4877_v38 = vsel %vm17985_vm3, 0, %v4876_v50  ;;  %v21043_v22 = vld [vmem:[#allocation161_spill] sm:$0xff] }
 0x869   : > { %v7675_v59 = vmul.f32 %v19703_v6, %v7672_v43  ;;  %v4937_v6 = vsel %vm17991_vm6, 0, %v4936_v49  ;;  %v7702_v17 = vrot.slane %v7672_v43, %v21025_v12  ;;  %4878 = vst [vmem:[#allocation3 + $0x88] sm:$0x1] %v4877_v38 }
 0x86a   : > { %4938 = vst [vmem:[#allocation3 + $0x88] sm:$0x10] %v4937_v6  ;;  %v7703_v46 = vmul.f32 %v7698_v0, %v21028_v56  ;;  %v7705_v29 = vmul.f32 %v7698_v0, %v21029_v51  ;;  %v7707_v42 = vmul.f32 %v7698_v0, %v21030_v14  ;;  %v7709_v62 = vmul.f32 %v7698_v0, %v21031_v24 }
 0x86b   : > { %v7678_v11 = vcombine.low %v7674_v3, %v7675_v59  ;;  %v7711_v63 = vmul.f32 %v7698_v0, %v21032_v31  ;;  %v7713_v1 = vmul.f32 %v7698_v0, %v21033_v57  ;;  %v7715_v34 = vmul.f32 %v7698_v0, %v21034_v28 }
 0x86c   : > { %v7717_v8 = vmul.f32 %v7698_v0, %v21035_v15  ;;  %v7704_v23 = vmul.f32 %v7702_v17, %v21036_v36  ;;  %v7706_v37 = vmul.f32 %v7702_v17, %v21037_v2  ;;  %v7708_v7 = vmul.f32 %v7702_v17, %v21038_v53 }
 0x86d   : > { %v7685_v47 = vrot.slane %v7678_v11, %v7684_v19  ;;  %v7710_v60 = vmul.f32 %v7702_v17, %v21039_v20  ;;  %v7712_v44 = vmul.f32 %v7702_v17, %v21040_v55  ;;  %v7714_v27 = vmul.f32 %v7702_v17, %v21041_v26  ;;  %v15876_v20 = vld [vmem:[#allocation3] ss:$8 sps:$4 sm:$0xff]  }
 0x86e   : > { %v7716_v48 = vmul.f32 %v7702_v17, %v21042_v32  ;;  %v7718_v52 = vmul.f32 %v7702_v17, %v21043_v22  ;;  %v8247_v22 = vshll.u32 %v15876_v20, 16 }
 0x86f   : > { %v7692_v33 = vrot.slane %v7685_v47, %v7684_v19 }
 0x871   : > { %v7694_v54 = vsub.f32 %v7673_v30, %v7692_v33 }
 0x873   : > { %v7723_v16 = vrot.slane %v7694_v54, %v21025_v12  ;;  %v7727_v13 = vrot.slane %v7694_v54, %v21026_v25 }
 0x875   : > { %v19830_v10 = vadd.f32 %v7723_v16, %v7703_v46  ;;  %v19832_v58 = vadd.f32 %v7727_v13, %v7704_v23  ;;  %v19834_v45 = vadd.f32 %v7723_v16, %v7705_v29  ;;  %v19836_v43 = vadd.f32 %v7727_v13, %v7706_v37 }
 0x876   : > { %v19838_v41 = vadd.f32 %v7723_v16, %v7707_v42  ;;  %v19840_v3 = vadd.f32 %v7727_v13, %v7708_v7  ;;  %v19842_v59 = vadd.f32 %v7723_v16, %v7709_v62  ;;  %v19844_v39 = vadd.f32 %v7727_v13, %v7710_v60 }
 0x877   : > { %v19846_v19 = vadd.f32 %v7723_v16, %v7711_v63  ;;  %v19848_v61 = vadd.f32 %v7727_v13, %v7712_v44  ;;  %v19850_v21 = vadd.f32 %v7723_v16, %v7713_v1  ;;  %v19852_v50 = vadd.f32 %v7727_v13, %v7714_v27 }
 0x878   : > { %v19854_v49 = vadd.f32 %v7723_v16, %v7715_v34  ;;  %v19856_v11 = vadd.f32 %v7727_v13, %v7716_v48  ;;  %v19858_v4 = vadd.f32 %v7723_v16, %v7717_v8  ;;  %v19860_v40 = vadd.f32 %v7727_v13, %v7718_v52 }
 0x879   : > { %v12728_v0 = vmul.f32 -1.442695, %v19830_v10  ;;  %v12729_v47 = vmul.f32 -1.442695, %v19832_v58  ;;  %v12730_v38 = vmul.f32 -1.442695, %v19834_v45 }
 0x87a   : > { %v12731_v6 = vmul.f32 -1.442695, %v19836_v43  ;;  %v12732_v30 = vmul.f32 -1.442695, %v19838_v41  ;;  %v12733_v17 = vmul.f32 -1.442695, %v19840_v3 }
 0x87b   : > { %16490 = vpow2.f32 %v12728_v0  ;;  %v12734_v9 = vmul.f32 -1.442695, %v19842_v59  ;;  %v12735_v35 = vmul.f32 -1.442695, %v19844_v39  ;;  %v12736_v33 = vmul.f32 -1.442695, %v19846_v19 }
 0x87c   : > { %16492 = vpow2.f32 %v12729_v47  ;;  %v12737_v56 = vmul.f32 -1.442695, %v19848_v61  ;;  %v12738_v46 = vmul.f32 -1.442695, %v19850_v21  ;;  %v12739_v51 = vmul.f32 -1.442695, %v19852_v50 }
 0x87d   : > { %16494 = vpow2.f32 %v12730_v38  ;;  %v12740_v29 = vmul.f32 -1.442695, %v19854_v49  ;;  %v12741_v14 = vmul.f32 -1.442695, %v19856_v11  ;;  %v12742_v24 = vmul.f32 -1.442695, %v19858_v4 }
 0x87e   : > { %16496 = vpow2.f32 %v12731_v6  ;;  %v12743_v31 = vmul.f32 -1.442695, %v19860_v40  ;;  %v8244_v48 = vshrl.u32 %v15876_v20, 16 }
 0x87f   : > { %16498 = vpow2.f32 %v12732_v30 }
 0x880   : > { %16500 = vpow2.f32 %v12733_v17  ;;  %v19878_v17 = vld [vmem:[#allocation3 + $0x4] ss:$8 sps:$4 sm:$0x11]  }
 0x881   : > { %16502 = vpow2.f32 %v12734_v9 }
 0x882   : > { %16504 = vpow2.f32 %v12735_v35 }
 0x883   : > { %16506 = vpow2.f32 %v12736_v33  ;;  %v19880_v33 = vrot.slane %v8244_v48, 4 }
 0x884   : > { %16508 = vpow2.f32 %v12737_v56  ;;  %v19882_v56 = vrot.slane %v8247_v22, 5 }
 0x885   : > { %v16491_v42 = vpop.eup %16490  ;;  %16510 = vpow2.f32 %v12738_v46 }
 0x886   : > { %v16493_v62 = vpop.eup %16492  ;;  %16512 = vpow2.f32 %v12739_v51  ;;  %v7794_v57 = vadd.f32 1.0, %v16491_v42 }
 0x887   : > { %v16495_v63 = vpop.eup %16494  ;;  %16514 = vpow2.f32 %v12740_v29  ;;  %v7795_v54 = vadd.f32 1.0, %v16493_v62 }
 0x888   : > { %v16497_v1 = vpop.eup %16496  ;;  %16516 = vpow2.f32 %v12741_v14  ;;  %v7796_v34 = vadd.f32 1.0, %v16495_v63  ;;  %v8253_v63 = vshll.u32 %v19878_v17, 16 }
 0x889   : > { %v16499_v28 = vpop.eup %16498  ;;  %16518 = vpow2.f32 %v12742_v24  ;;  %v7797_v8 = vadd.f32 1.0, %v16497_v1 }
 0x88a   : > { %v16501_v15 = vpop.eup %16500  ;;  %16520 = vpow2.f32 %v12743_v31  ;;  %v7798_v23 = vadd.f32 1.0, %v16499_v28 }
 0x88b   : > { %v16503_v36 = vpop.eup %16502  ;;  %16522 = vrcp.f32 %v7794_v57  ;;  %v7799_v37 = vadd.f32 1.0, %v16501_v15 }
 0x88c   : > { %v16505_v2 = vpop.eup %16504  ;;  %16524 = vrcp.f32 %v7795_v54  ;;  %v7800_v7 = vadd.f32 1.0, %v16503_v36 }
 0x88d   : > { %v16507_v53 = vpop.eup %16506  ;;  %16526 = vrcp.f32 %v7796_v34  ;;  %v7801_v16 = vadd.f32 1.0, %v16505_v2 }
 0x88e   : > { %v16509_v60 = vpop.eup %16508  ;;  %16528 = vrcp.f32 %v7797_v8  ;;  %v7802_v55 = vadd.f32 1.0, %v16507_v53 }
 0x88f   : > { %v16511_v13 = vpop.eup %16510  ;;  %16530 = vrcp.f32 %v7798_v23  ;;  %v7803_v26 = vadd.f32 1.0, %v16509_v60 }
 0x890   : > { %v16513_v44 = vpop.eup %16512  ;;  %16532 = vrcp.f32 %v7799_v37  ;;  %v7804_v32 = vadd.f32 1.0, %v16511_v13 }
 0x891   : > { %v16515_v27 = vpop.eup %16514  ;;  %16534 = vrcp.f32 %v7800_v7  ;;  %v7805_v0 = vadd.f32 1.0, %v16513_v44 }
 0x892   : > { %v16517_v52 = vpop.eup %16516  ;;  %16536 = vrcp.f32 %v7801_v16  ;;  %v7806_v38 = vadd.f32 1.0, %v16515_v27 }
 0x893   : > { %v16519_v47 = vpop.eup %16518  ;;  %16538 = vrcp.f32 %v7802_v55  ;;  %v7807_v30 = vadd.f32 1.0, %v16517_v52 }
 0x894   : > { %v16521_v6 = vpop.eup %16520  ;;  %16540 = vrcp.f32 %v7803_v26  ;;  %v7808_v35 = vadd.f32 1.0, %v16519_v47 }
 0x895   : > { %v16523_v9 = vpop.eup %16522  ;;  %16542 = vrcp.f32 %v7804_v32  ;;  %v7809_v51 = vadd.f32 1.0, %v16521_v6 }
 0x896   : > { %v16525_v46 = vpop.eup %16524  ;;  %16544 = vrcp.f32 %v7805_v0  ;;  %v7842_v29 = vmul.f32 %v16523_v9, %v19830_v10  ;;  %v8250_v10 = vor.u32 %v19882_v56, %v19880_v33 }
 0x897   : > { %v16527_v14 = vpop.eup %16526  ;;  %16546 = vrcp.f32 %v7806_v38  ;;  %v7843_v42 = vmul.f32 %v16525_v46, %v19832_v58 }
 0x898   : > { %v16529_v24 = vpop.eup %16528  ;;  %16548 = vrcp.f32 %v7807_v30  ;;  %v7844_v62 = vmul.f32 %v16527_v14, %v19834_v45  ;;  %v19887_v31 = vpack.c.bf16 %v7842_v29, %v7842_v29 }
 0x899   : > { %v16531_v57 = vpop.eup %16530  ;;  %16550 = vrcp.f32 %v7808_v35  ;;  %v7845_v1 = vmul.f32 %v16529_v24, %v19836_v43  ;;  %v13279_v54 = vpack.c.bf16 %v7843_v42, %v7843_v42 }
 0x89a   : > { %v16533_v28 = vpop.eup %16532  ;;  %16552 = vrcp.f32 %v7809_v51  ;;  %v7846_v58 = vmul.f32 %v16531_v57, %v19838_v41  ;;  %v19894_v34 = vpack.c.bf16 %v7844_v62, %v7844_v62  ;;  %v7907_v45 = vshrl.u32 %v19887_v31, 16 }
 0x89b   : > { %v16535_v15 = vpop.eup %16534  ;;  %v7847_v8 = vmul.f32 %v16533_v28, %v19840_v3  ;;  %v13281_v36 = vpack.c.bf16 %v7845_v1, %v7845_v1  ;;  %v7910_v23 = vshll.u32 %v19887_v31, 16  ;;  %v7914_v2 = vshrl.u32 %v13279_v54, 16 }
 0x89c   : > { %v16537_v43 = vpop.eup %16536  ;;  %v7848_v37 = vmul.f32 %v16535_v15, %v19842_v59  ;;  %v19900_v53 = vpack.c.bf16 %v7846_v58, %v7846_v58  ;;  %v19902_v7 = vrot.slane %v7907_v45, 7  ;;  %v7917_v20 = vshll.u32 %v13279_v54, 16 }
 0x89d   : > { %v16539_v41 = vpop.eup %16538  ;;  %v7849_v60 = vmul.f32 %v16537_v43, %v19844_v39  ;;  %v13283_v16 = vpack.c.bf16 %v7847_v8, %v7847_v8  ;;  %v7916_v13 = vrot.slane %v7914_v2, 7  ;;  %v7921_v55 = vshrl.u32 %v19894_v34, 16 }
 0x89e   : > { %v16541_v3 = vpop.eup %16540  ;;  %v7850_v44 = vmul.f32 %v16539_v41, %v19846_v19  ;;  %v19907_v26 = vpack.c.bf16 %v7848_v37, %v7848_v37  ;;  %v7924_v27 = vshll.u32 %v19894_v34, 16  ;;  %v7928_v59 = vshrl.u32 %v13281_v36, 16 }
 0x89f   : > { %v16543_v32 = vpop.eup %16542  ;;  %v7851_v48 = vmul.f32 %v16541_v3, %v19848_v61  ;;  %v13285_v22 = vpack.c.bf16 %v7849_v60, %v7849_v60  ;;  %v19911_v52 = vor.u32 %v7917_v20, %v7916_v13  ;;  %v19913_v0 = vrot.slane %v7921_v55, 7 }
 0x8a0   : > { %v16545_v39 = vpop.eup %16544  ;;  %v7852_v47 = vmul.f32 %v16543_v32, %v19850_v21  ;;  %v19916_v38 = vpack.c.bf16 %v7850_v44, %v7850_v44  ;;  %v7930_v6 = vrot.slane %v7928_v59, 7  ;;  %v7931_v19 = vshll.u32 %v13281_v36, 16 }
 0x8a1   : > { %v16547_v30 = vpop.eup %16546  ;;  %v7853_v9 = vmul.f32 %v16545_v39, %v19852_v50  ;;  %v13287_v35 = vpack.c.bf16 %v7851_v48, %v7851_v48  ;;  %v7935_v46 = vshrl.u32 %v19900_v53, 16  ;;  %v7938_v61 = vshll.u32 %v19900_v53, 16  ;;  %v8035_v48 = vld [vmem:[#allocation3 + $0x10] sm:$0x1f] }
 0x8a2   : > { %v16549_v51 = vpop.eup %16548  ;;  %v7854_v29 = vmul.f32 %v16547_v30, %v19854_v49  ;;  %v19922_v14 = vpack.c.bf16 %v7852_v47, %v7852_v47  ;;  %v19924_v42 = vor.u32 %v7931_v19, %v7930_v6  ;;  %v7942_v21 = vshrl.u32 %v13283_v16, 16  ;;  %v8041_v19 = vld [vmem:[#allocation3 + $0x20] sm:$0x1f]  ;;  %v8044_v30 = vld [vmem:[#allocation3 + $0x28] sm:$0x1f] }
 0x8a3   : > { %v19926_v24 = vpop.eup %16550  ;;  %v7855_v62 = vmul.f32 %v16549_v51, %v19856_v11  ;;  %v13289_v57 = vpack.c.bf16 %v7853_v9, %v7853_v9  ;;  %v7937_v1 = vrot.slane %v7935_v46, 7  ;;  %v7945_v50 = vshll.u32 %v13283_v16, 16 }
 0x8a4   : > { %v16553_v54 = vpop.eup %16552  ;;  %v19929_v28 = vpack.c.bf16 %v7854_v29, %v7854_v29  ;;  %v7944_v58 = vrot.slane %v7942_v21, 7  ;;  %v7949_v45 = vshrl.u32 %v19907_v26, 16  ;;  %v7952_v49 = vshll.u32 %v19907_v26, 16  ;;  %v8050_v29 = vld [vmem:[#allocation3 + $0x38] sm:$0x1f] }
 0x8a5   : > { %v7857_v15 = vmul.f32 %v16553_v54, %v19860_v40  ;;  %v13291_v8 = vpack.c.bf16 %v7855_v62, %v7855_v62  ;;  %v7956_v36 = vshrl.u32 %v13285_v22, 16  ;;  %v7959_v2 = vshll.u32 %v13285_v22, 16  ;;  %v8038_v22 = vld [vmem:[#allocation3 + $0x18] sm:$0x1f]  ;;  %v8053_v54 = vld [vmem:[#allocation3 + $0x40] sm:$0x1f] }
 0x8a6   : > { %v7947_v43 = vor.u32 %v7945_v50, %v7944_v58  ;;  %v7951_v37 = vrot.slane %v7949_v45, 7  ;;  %v7963_v11 = vshrl.u32 %v19916_v38, 16  ;;  %v7966_v53 = vshll.u32 %v19916_v38, 16  ;;  %v8047_v50 = vld [vmem:[#allocation3 + $0x30] sm:$0x1f] }
 0x8a7   : > { %v19936_v20 = vpack.c.bf16 %v7857_v15, %v7857_v15  ;;  %v7958_v41 = vrot.slane %v7956_v36, 7  ;;  %v7970_v60 = vshrl.u32 %v13287_v35, 16  ;;  %v7973_v16 = vshll.u32 %v13287_v35, 16  ;;  %v8056_v36 = vld [vmem:[#allocation3 + $0x48] sm:$0x1f] }
 0x8a8   : > { %v7965_v13 = vrot.slane %v7963_v11, 7  ;;  %v7977_v55 = vshrl.u32 %v19922_v14, 16  ;;  %v7980_v3 = vshll.u32 %v19922_v14, 16  ;;  %v7984_v40 = vshrl.u32 %v13289_v57, 16 }
 0x8a9   : > { %v7961_v44 = vor.u32 %v7959_v2, %v7958_v41  ;;  %v7972_v26 = vrot.slane %v7970_v60, 7  ;;  %v7987_v59 = vshll.u32 %v13289_v57, 16  ;;  %v7991_v32 = vshrl.u32 %v19929_v28, 16  ;;  %v8062_v2 = vld [vmem:[#allocation3 + $0x58] sm:$0x1f] }
 0x8aa   : > { %v7979_v39 = vrot.slane %v7977_v55, 7  ;;  %v7986_v47 = vrot.slane %v7984_v40, 7  ;;  %v7994_v38 = vshll.u32 %v19929_v28, 16  ;;  %v7998_v6 = vshrl.u32 %v13291_v8, 16  ;;  %v8074_v41 = vld [vmem:[#allocation3 + $0x78] sm:$0x1f] }
 0x8ab   : > { %v7975_v9 = vor.u32 %v7973_v16, %v7972_v26  ;;  %v7993_v35 = vrot.slane %v7991_v32, 7  ;;  %v8001_v46 = vshll.u32 %v13291_v8, 16  ;;  %v8012_v51 = vshrl.u32 %v19936_v20, 16  ;;  %v8071_v60 = vld [vmem:[#allocation3 + $0x70] sm:$0x1f] }
 0x8ac   : > { %v7989_v14 = vor.u32 %v7987_v59, %v7986_v47  ;;  %v8000_v21 = vrot.slane %v7998_v6, 7  ;;  %v8015_v62 = vshll.u32 %v19936_v20, 16  ;;  %v7912_v57 = vor.u32 %v7910_v23, %v19902_v7  ;;  %v8059_v7 = vld [vmem:[#allocation3 + $0x50] sm:$0x1f]  ;;  %v4882_v40 = vld [vmem:[#allocation3 + $0x98] sm:$0x1] }
 0x8ad   : > { %v8014_v28 = vrot.slane %v8012_v51, 7  ;;  %v8039_v45 = vsel %vm18084_vm9, %v19911_v52, %v8038_v22  ;;  %v7926_v15 = vor.u32 %v7924_v27, %v19913_v0  ;;  %v7940_v8 = vor.u32 %v7938_v61, %v7937_v1  ;;  %v8068_v52 = vld [vmem:[#allocation3 + $0x68] sm:$0x1f]  ;;  %v8065_v1 = vld [vmem:[#allocation3 + $0x60] sm:$0x1f] }
 0x8ae   : > { %v8003_v11 = vor.u32 %v8001_v46, %v8000_v21  ;;  %v8036_v20 = vsel %vm18084_vm9, %v7912_v57, %v8035_v48  ;;  %8040 = vst [vmem:[#allocation3 + $0x18] sm:$0x1f] %v8039_v45  ;;  %v8045_v31 = vsel %vm18084_vm9, %v19924_v42, %v8044_v30  ;;  %v8051_v23 = vsel %vm18084_vm9, %v7947_v43, %v8050_v29  ;;  %v4879_v26 = vld [vmem:[#allocation3 + $0x90] sm:$0x1] }
 0x8af   : > { %8037 = vst [vmem:[#allocation3 + $0x10] sm:$0x1f] %v8036_v20  ;;  %v8042_v34 = vsel %vm18084_vm9, %v7926_v15, %v8041_v19  ;;  %8046 = vst [vmem:[#allocation3 + $0x28] sm:$0x1f] %v8045_v31  ;;  %v8048_v27 = vsel %vm18084_vm9, %v7940_v8, %v8047_v50  ;;  %v7954_v0 = vor.u32 %v7952_v49, %v7951_v37  ;;  %v4883_v22 = vsel %vm17985_vm3, 0, %v4882_v40 }
 0x8b0   : > { %8052 = vst [vmem:[#allocation3 + $0x38] sm:$0x1f] %v8051_v23  ;;  %v7968_v61 = vor.u32 %v7966_v53, %v7965_v13  ;;  %8043 = vst [vmem:[#allocation3 + $0x20] sm:$0x1f] %v8042_v34  ;;  %v8057_v42 = vsel %vm18084_vm9, %v7961_v44, %v8056_v36  ;;  %v8063_v43 = vsel %vm18084_vm9, %v7975_v9, %v8062_v2  ;;  %v8080_v13 = vld [vmem:[#allocation3 + $0x88] sm:$0x1f] }
 0x8b1   : > { %8049 = vst [vmem:[#allocation3 + $0x30] sm:$0x1f] %v8048_v27  ;;  %v7982_v16 = vor.u32 %v7980_v3, %v7979_v39  ;;  %v7996_v55 = vor.u32 %v7994_v38, %v7993_v35  ;;  %v8054_v59 = vsel %vm18084_vm9, %v7954_v0, %v8053_v54  ;;  %8058 = vst [vmem:[#allocation3 + $0x48] sm:$0x1f] %v8057_v42  ;;  %v4880_v39 = vsel %vm17985_vm3, 0, %v4879_v26 }
 0x8b2   : > { %v8060_v49 = vsel %vm18084_vm9, %v7968_v61, %v8059_v7  ;;  %8064 = vst [vmem:[#allocation3 + $0x58] sm:$0x1f] %v8063_v43  ;;  %v8069_v37 = vsel %vm18084_vm9, %v7989_v14, %v8068_v52  ;;  %v8075_v53 = vsel %vm18084_vm9, %v8003_v11, %v8074_v41  ;;  %8055 = vst [vmem:[#allocation3 + $0x40] sm:$0x1f] %v8054_v59  ;;  %v8251_v6 = vrot.slane %v8250_v10, 4 }
 0x8b3   : > { %8061 = vst [vmem:[#allocation3 + $0x50] sm:$0x1f] %v8060_v49  ;;  %v8066_v3 = vsel %vm18084_vm9, %v7982_v16, %v8065_v1  ;;  %8070 = vst [vmem:[#allocation3 + $0x68] sm:$0x1f] %v8069_v37  ;;  %v8072_v44 = vsel %vm18084_vm9, %v7996_v55, %v8071_v60  ;;  %v8017_v32 = vor.u32 %v8015_v62, %v8014_v28  ;;  %v15882_v31 = vld [vmem:[#allocation19] ss:$8 sps:$4 sm:$0xff]  }
 0x8b4   : > { %8076 = vst [vmem:[#allocation3 + $0x78] sm:$0x1f] %v8075_v53  ;;  %v7856_v48 = vmul.f32 %v19926_v24, %v19858_v4  ;;  %8067 = vst [vmem:[#allocation3 + $0x60] sm:$0x1f] %v8066_v3  ;;  %v8255_v4 = vrot.slane %v8253_v63, 5 }
 0x8b5   : > { %8073 = vst [vmem:[#allocation3 + $0x70] sm:$0x1f] %v8072_v44  ;;  %v8081_v47 = vsel %vm18084_vm9, %v8017_v32, %v8080_v13  ;;  %4884 = vst [vmem:[#allocation3 + $0x98] sm:$0x1] %v4883_v22  ;;  %v15893_v61 = vld [vmem:[#allocation19 + $0x14] ss:$8 sps:$4 sm:$0xff]  }
 0x8b6   : > { %v19988_v38 = vpack.c.bf16 %v7856_v48, %v7856_v48  ;;  %4881 = vst [vmem:[#allocation3 + $0x90] sm:$0x1] %v4880_v39  ;;  %8082 = vst [vmem:[#allocation3 + $0x88] sm:$0x1f] %v8081_v47  ;;  %v15879_v24 = vld [vmem:[#allocation3 + $0x10] ss:$8 sps:$4 sm:$0xff]   ;;  %v8256_v33 = vsel %vm18113_vm12, %v8251_v6, %v8255_v4 }
 0x8b7   : > { %v15881_v19 = vld [vmem:[#allocation3 + $0x14] ss:$8 sps:$4 sm:$0x11]   ;;  %v8258_v30 = vshrl.u32 %v15879_v24, 16  ;;  %v8261_v9 = vshll.u32 %v15879_v24, 16 }
 0x8b8   : > { %v8005_v18 = vshrl.u32 %v19988_v38, 16  ;;  %v8267_v35 = vshll.u32 %v15881_v19, 16  ;;  %v15885_v46 = vld [vmem:[#allocation3 + $0x20] ss:$8 sps:$4 sm:$0xff]   ;;  %v15888_v21 = vld [vmem:[#allocation3 + $0x30] ss:$8 sps:$4 sm:$0xff]  }
 0x8b9   : > { %v15887_v51 = vld [vmem:[#allocation3 + $0x24] ss:$8 sps:$4 sm:$0x11]   ;;  %v8260_v29 = vrot.slane %v8258_v30, 4  ;;  %v8263_v14 = vrot.slane %v8261_v9, 5  ;;  %v8272_v10 = vshrl.u32 %v15885_v46, 16 }
 0x8ba   : > { %v15890_v56 = vld [vmem:[#allocation3 + $0x34] ss:$8 sps:$4 sm:$0x11]   ;;  %v8275_v17 = vshll.u32 %v15885_v46, 16  ;;  %v8281_v57 = vshll.u32 %v15887_v51, 16  ;;  %v8286_v50 = vshrl.u32 %v15888_v21, 16 }
 0x8bb   : > { %v8264_v63 = vor.u32 %v8263_v14, %v8260_v29  ;;  %v8289_v54 = vshll.u32 %v15888_v21, 16  ;;  %v8269_v28 = vrot.slane %v8267_v35, 5  ;;  %v8274_v45 = vrot.slane %v8272_v10, 4  ;;  %v15897_v52 = vld [vmem:[#allocation3 + $0x40] ss:$8 sps:$4 sm:$0xff]  }
 0x8bc   : > { %v8277_v15 = vrot.slane %v8275_v17, 5  ;;  %v8295_v8 = vshll.u32 %v15890_v56, 16  ;;  %v8288_v2 = vrot.slane %v8286_v50, 4  ;;  %v8007_v20 = vrot.slane %v8005_v18, 7  ;;  %v15900_v1 = vld [vmem:[#allocation3 + $0x50] ss:$8 sps:$4 sm:$0xff]  }
 0x8bd   : > { %v8265_v36 = vrot.slane %v8264_v63, 4  ;;  %v8291_v11 = vrot.slane %v8289_v54, 5  ;;  %v8283_v7 = vrot.slane %v8281_v57, 5  ;;  %v15899_v41 = vld [vmem:[#allocation3 + $0x44] ss:$8 sps:$4 sm:$0x11]  }
 0x8be   : > { %v8278_v23 = vor.u32 %v8277_v15, %v8274_v45  ;;  %v8297_v0 = vrot.slane %v8295_v8, 5  ;;  %v15902_v60 = vld [vmem:[#allocation3 + $0x54] ss:$8 sps:$4 sm:$0x11]   ;;  %v8300_v55 = vshrl.u32 %v15897_v52, 16  ;;  %v8303_v26 = vshll.u32 %v15897_v52, 16 }
 0x8bf   : > { %v8270_v34 = vsel %vm18113_vm12, %v8265_v36, %v8269_v28  ;;  %v8292_v27 = vor.u32 %v8291_v11, %v8288_v2  ;;  %v8309_v59 = vshll.u32 %v15899_v41, 16  ;;  %v8314_v49 = vshrl.u32 %v15900_v1, 16  ;;  %v15891_v53 = vld [vmem:[#allocation19 + $0x10] ss:$8 sps:$4 sm:$0xff]   ;;  %v15896_v48 = vld [vmem:[#allocation19 + $0x24] ss:$8 sps:$4 sm:$0xff]  }
 0x8c0   : > { %v12776_v42 = vcombine.low %v8256_v33, %v8270_v34  ;;  %v12777_v43 = vcombine.high %v8256_v33, %v8270_v34  ;;  %v8279_v16 = vrot.slane %v8278_v23, 4  ;;  %v8302_v13 = vrot.slane %v8300_v55, 4  ;;  %v15909_v47 = vld [vmem:[#allocation3 + $0x60] ss:$8 sps:$4 sm:$0xff]   ;;  %v15912_v35 = vld [vmem:[#allocation3 + $0x70] ss:$8 sps:$4 sm:$0xff]  }
 0x8c1   : > { %v8293_v40 = vrot.slane %v8292_v27, 4  ;;  %v8317_v3 = vshll.u32 %v15900_v1, 16  ;;  %v8323_v44 = vshll.u32 %v15902_v60, 16  ;;  %v8305_v22 = vrot.slane %v8303_v26, 5  ;;  %v8077_v30 = vld [vmem:[#allocation3 + $0x80] sm:$0x1f] }
 0x8c2   : > { %8611 = vmatprep.mubr.bf16.mxu1 %v12777_v43  ;;  %v8284_v37 = vsel %vm18113_vm12, %v8279_v16, %v8283_v7  ;;  %v8316_v39 = vrot.slane %v8314_v49, 4  ;;  %v8008_v6 = vshll.u32 %v19988_v38, 16  ;;  %v8311_v24 = vrot.slane %v8309_v59, 5  ;;  %v15911_v18 = vld [vmem:[#allocation3 + $0x64] ss:$8 sps:$4 sm:$0x11]  }
 0x8c3   : > { %8612 = vmatmul.mubr.bf16.vlgmr.msra.gmra.mrb[4].mxu1 %v12776_v42  ;;  %v8298_v32 = vsel %vm18113_vm12, %v8293_v40, %v8297_v0  ;;  %v8319_v19 = vrot.slane %v8317_v3, 5  ;;  %v8306_v9 = vor.u32 %v8305_v22, %v8302_v13  ;;  %v15914_v46 = vld [vmem:[#allocation3 + $0x74] ss:$8 sps:$4 sm:$0x11]   ;;  %v8328_v51 = vshrl.u32 %v15909_v47, 16 }
 0x8c4   : > { %8829 = vmatpush1.bf16.msra.mxu1 %v15882_v31  ;;  %v12779_v4 = vcombine.high %v8284_v37, %v8298_v32  ;;  %v8010_v29 = vor.u32 %v8008_v6, %v8007_v20  ;;  %v15894_v14 = vld [vmem:[#allocation19 + $0x20] ss:$8 sps:$4 sm:$0xff]   ;;  %v12778_v21 = vcombine.low %v8284_v37, %v8298_v32  ;;  %v8325_v56 = vrot.slane %v8323_v44, 5  ;;  %v15905_v63 = vld [vmem:[#allocation19 + $0x34] ss:$8 sps:$4 sm:$0xff]  }
 0x8c5   : > { %8830 = vmatprep.subr.bf16.mxu1 %v15893_v61  ;;  %v8320_v33 = vor.u32 %v8319_v19, %v8316_v39  ;;  %v8331_v10 = vshll.u32 %v15909_v47, 16  ;;  %v4939_v17 = vld [vmem:[#allocation3 + $0x90] sm:$0x10]  ;;  %v8307_v38 = vrot.slane %v8306_v9, 4  ;;  %v8330_v57 = vrot.slane %v8328_v51, 4 }
 0x8c6   : > { %8621 = vmatprep.mubr.bf16.mxu1 %v12779_v4  ;;  %v8342_v50 = vshrl.u32 %v15912_v35, 16  ;;  %v8345_v54 = vshll.u32 %v15912_v35, 16  ;;  %v8337_v15 = vshll.u32 %v15911_v18, 16  ;;  %v8351_v8 = vshll.u32 %v15914_v46, 16  ;;  %v4942_v31 = vld [vmem:[#allocation3 + $0x98] sm:$0x10] }
 0x8c7   : > { %v8321_v28 = vrot.slane %v8320_v33, 4  ;;  %v8333_v45 = vrot.slane %v8331_v10, 5  ;;  %v8312_v36 = vsel %vm18113_vm12, %v8307_v38, %v8311_v24  ;;  %v8078_v20 = vsel %vm18084_vm9, %v8010_v29, %v8077_v30  ;;  %v15903_v7 = vld [vmem:[#allocation19 + $0x30] ss:$8 sps:$4 sm:$0xff]   ;;  %v15908_v27 = vld [vmem:[#allocation19 + $0x44] ss:$8 sps:$4 sm:$0xff]  }
 0x8c8   : > { %8831 = vmatpush1.bf16.msra.mxu1 %v15891_v53  ;;  %v8344_v2 = vrot.slane %v8342_v50, 4  ;;  %v8347_v11 = vrot.slane %v8345_v54, 5  ;;  %8079 = vst [vmem:[#allocation3 + $0x80] sm:$0x1f] %v8078_v20  ;;  %v4940_v41 = vsel %vm17991_vm6, 0, %v4939_v17  ;;  %v4943_v58 = vsel %vm17991_vm6, 0, %v4942_v31 }
 0x8c9   : > { %8832 = vmatprep.subr.bf16.mxu1 %v15896_v48  ;;  %v8326_v23 = vsel %vm18113_vm12, %v8321_v28, %v8325_v56  ;;  %v8334_v52 = vor.u32 %v8333_v45, %v8330_v57  ;;  %4941 = vst [vmem:[#allocation3 + $0x90] sm:$0x10] %v4940_v41  ;;  %v8339_v1 = vrot.slane %v8337_v15, 5  ;;  %v8353_v42 = vrot.slane %v8351_v8, 5  ;;  %4944 = vst [vmem:[#allocation3 + $0x98] sm:$0x10] %v4943_v58 }
 0x8ca   : > { %v12781_v34 = vcombine.high %v8312_v36, %v8326_v23  ;;  %v8348_v0 = vor.u32 %v8347_v11, %v8344_v2  ;;  %v15906_v55 = vld [vmem:[#allocation19 + $0x40] ss:$8 sps:$4 sm:$0xff]   ;;  %v12780_v40 = vcombine.low %v8312_v36, %v8326_v23  ;;  %v15917_v26 = vld [vmem:[#allocation19 + $0x54] ss:$8 sps:$4 sm:$0xff]   ;;  %v15920_v49 = vld [vmem:[#allocation19 + $0x64] ss:$8 sps:$4 sm:$0xff]  }
 0x8cb   : > { %8622 = vmatmul.mubr.bf16.gmra.mrb[8].mxu1 %v12778_v21  ;;  %v8335_v61 = vrot.slane %v8334_v52, 4  ;;  %v15918_v37 = vld [vmem:[#allocation19 + $0x60] ss:$8 sps:$4 sm:$0xff]   ;;  %v15924_v13 = vld [vmem:[#allocation19 + $0x74] ss:$8 sps:$4 sm:$0xff]  }
 0x8cc   : > { %8833 = vmatpush1.bf16.msra.mxu1 %v15894_v14  ;;  %8631 = vmatprep.mubr.bf16.mxu1 %v12781_v34  ;;  %v8349_v60 = vrot.slane %v8348_v0, 4  ;;  %v15921_v3 = vld [vmem:[#allocation3 + $0x8] ss:$16 sps:$4 sm:$0xff]   ;;  %v15949_v33 = vld [vmem:[#allocation3] ss:$16 sps:$4 sm:$0xff]  }
 0x8cd   : > { %8834 = vmatprep.subr.bf16.mxu1 %v15905_v63  ;;  %v8340_v43 = vsel %vm18113_vm12, %v8335_v61, %v8339_v1  ;;  %v15922_v44 = vld [vmem:[#allocation19 + $0x70] ss:$8 sps:$4 sm:$0xff]   ;;  %v15927_v32 = vld [vmem:[#allocation19 + $0x84] ss:$8 sps:$4 sm:$0xff]   ;;  %v15925_v48 = vld [vmem:[#allocation19 + $0x80] ss:$8 sps:$4 sm:$0xff]  }
 0x8ce   : > { %v8354_v16 = vsel %vm18113_vm12, %v8349_v60, %v8353_v42  ;;  %v15930_v22 = vld [vmem:[#allocation19 + $0x94] ss:$8 sps:$4 sm:$0xff]   ;;  %v15928_v39 = vld [vmem:[#allocation19 + $0x90] ss:$8 sps:$4 sm:$0xff]   ;;  %v15933_v47 = vld [vmem:[#allocation19 + $0xa4] ss:$8 sps:$4 sm:$0xff]  }
 0x8cf   : > { %v12783_v59 = vcombine.high %v8340_v43, %v8354_v16  ;;  %v12782_v53 = vcombine.low %v8340_v43, %v8354_v16  ;;  %v15931_v6 = vld [vmem:[#allocation19 + $0xa0] ss:$8 sps:$4 sm:$0xff]   ;;  %v15936_v4 = vld [vmem:[#allocation19 + $0xb4] ss:$8 sps:$4 sm:$0xff]   ;;  %v15934_v24 = vld [vmem:[#allocation19 + $0xb0] ss:$8 sps:$4 sm:$0xff]  }
 0x8d0   : > { %8835 = vmatpush1.bf16.msra.mxu1 %v15903_v7  ;;  %v15939_v19 = vld [vmem:[#allocation19 + $0xc4] ss:$8 sps:$4 sm:$0xff]   ;;  %v15937_v18 = vld [vmem:[#allocation19 + $0xc0] ss:$8 sps:$4 sm:$0xff]   ;;  %v15942_v30 = vld [vmem:[#allocation19 + $0xd4] ss:$8 sps:$4 sm:$0xff]  }
 0x8d1   : > { %8836 = vmatprep.subr.bf16.mxu1 %v15908_v27  ;;  %v15940_v9 = vld [vmem:[#allocation19 + $0xd0] ss:$8 sps:$4 sm:$0xff]   ;;  %v15945_v35 = vld [vmem:[#allocation19 + $0xe4] ss:$8 sps:$4 sm:$0xff]   ;;  %v15943_v46 = vld [vmem:[#allocation19 + $0xe0] ss:$8 sps:$4 sm:$0xff]  }
 0x8d2   : > { %v15948_v51 = vld [vmem:[#allocation19 + $0xf4] ss:$8 sps:$4 sm:$0xff]   ;;  %v15946_v29 = vld [vmem:[#allocation19 + $0xf0] ss:$8 sps:$4 sm:$0xff]   ;;  %v15952_v14 = vld [vmem:[#allocation19 + $0x204] ss:$8 sps:$4 sm:$0xff]  }
 0x8d3   : > { %8632 = vmatmul.mubr.bf16.gmra.mrb[12].mxu1 %v12780_v40  ;;  %v15950_v21 = vld [vmem:[#allocation19 + $0x200] ss:$8 sps:$4 sm:$0xff]   ;;  %v15956_v56 = vld [vmem:[#allocation19 + $0x214] ss:$8 sps:$4 sm:$0xff]   ;;  %v15954_v17 = vld [vmem:[#allocation19 + $0x210] ss:$8 sps:$4 sm:$0xff]  }
 0x8d4   : > { %8837 = vmatpush1.bf16.msra.mxu1 %v15906_v55  ;;  %8641 = vmatprep.mubr.bf16.mxu1 %v12783_v59  ;;  %v15953_v10 = vld [vmem:[#allocation3 + $0x28] ss:$16 sps:$4 sm:$0xff]   ;;  %v15957_v57 = vld [vmem:[#allocation3 + $0x20] ss:$16 sps:$4 sm:$0xff]  }
 0x8d5   : > { %8838 = vmatprep.subr.bf16.mxu1 %v15917_v26  ;;  %v15960_v38 = vld [vmem:[#allocation19 + $0x224] ss:$8 sps:$4 sm:$0xff]   ;;  %v15958_v63 = vld [vmem:[#allocation19 + $0x220] ss:$8 sps:$4 sm:$0xff]   ;;  %v15964_v50 = vld [vmem:[#allocation19 + $0x234] ss:$8 sps:$4 sm:$0xff]  }
 0x8d6   : > { %v15961_v54 = vld [vmem:[#allocation3 + $0x48] ss:$16 sps:$4 sm:$0xff]   ;;  %v15979_v8 = vld [vmem:[#allocation3 + $0x4] ss:$8 sps:$4 sm:$0x11]  }
 0x8d7   : > { %v15962_v28 = vld [vmem:[#allocation19 + $0x230] ss:$8 sps:$4 sm:$0xff]   ;;  %v15968_v45 = vld [vmem:[#allocation19 + $0x244] ss:$8 sps:$4 sm:$0xff]   ;;  %v15966_v11 = vld [vmem:[#allocation19 + $0x240] ss:$8 sps:$4 sm:$0xff]  }
 0x8d8   : > { %8839 = vmatpush1.bf16.msra.mxu1 %v15915_v5  ;;  %v15977_v15 = vld [vmem:[#allocation3] ss:$8 sps:$4 sm:$0xee]   ;;  %v15980_v36 = vld [vmem:[#allocation3 + $0x10] ss:$8 sps:$4 sm:$0xee]  }
 0x8d9   : > { %8840 = vmatprep.subr.bf16.mxu1 %v15920_v49  ;;  %v15982_v2 = vld [vmem:[#allocation3 + $0x14] ss:$8 sps:$4 sm:$0x11]   ;;  %v15972_v20 = vld [vmem:[#allocation19 + $0x254] ss:$8 sps:$4 sm:$0xff]   ;;  %v12872_v7 = vrot.slane %v15977_v15, 9 }
 0x8da   : > { %v15965_v31 = vld [vmem:[#allocation3 + $0x40] ss:$16 sps:$4 sm:$0xff]   ;;  %v15969_v23 = vld [vmem:[#allocation3 + $0x68] ss:$16 sps:$4 sm:$0xff]   ;;  %v8983_v52 = vrot.slane %v15979_v8, 5  ;;  %v12873_v41 = vrot.slane %v15980_v36, 9 }
 0x8db   : > { %8642 = vmatmul.mubr.bf16.gmra.mrb[16].mxu1 %v12782_v53  ;;  %v8987_v34 = vrot.slane %v15982_v2, 5  ;;  %v15970_v27 = vld [vmem:[#allocation19 + $0x250] ss:$8 sps:$4 sm:$0xff]   ;;  %v15976_v0 = vld [vmem:[#allocation19 + $0x264] ss:$8 sps:$4 sm:$0xff]  }
 0x8dc   : > { %8841 = vmatpush1.bf16.msra.mxu1 %v15918_v37  ;;  %8860 = vmatprep.mubr.bf16.mxu1 %v15921_v3  ;;  %v20021_v58 = vsel %vm18142_vm15, %v12872_v7, %v8983_v52  ;;  %v15974_v60 = vld [vmem:[#allocation19 + $0x260] ss:$8 sps:$4 sm:$0xff]   ;;  %v15985_v43 = vld [vmem:[#allocation19 + $0x274] ss:$8 sps:$4 sm:$0xff]   ;;  %v15983_v55 = vld [vmem:[#allocation19 + $0x270] ss:$8 sps:$4 sm:$0xff]  }
 0x8dd   : > { %8842 = vmatprep.subr.bf16.mxu1 %v15924_v13  ;;  %v20025_v1 = vsel %vm18142_vm15, %v12873_v41, %v8987_v34  ;;  %v15973_v42 = vld [vmem:[#allocation3 + $0x60] ss:$16 sps:$4 sm:$0xff]   ;;  %v16039_v2 = vld [vmem:[#allocation3 + $0x64] ss:$8 sps:$4 sm:$0x11]  }
 0x8de   : > { %v12881_v16 = vcombine.high %v20021_v58, %v20025_v1  ;;  %v15988_v40 = vld [vmem:[#allocation19 + $0x284] ss:$8 sps:$4 sm:$0xff]   ;;  %v15986_v26 = vld [vmem:[#allocation19 + $0x280] ss:$8 sps:$4 sm:$0xff]   ;;  %v15991_v59 = vld [vmem:[#allocation19 + $0x294] ss:$8 sps:$4 sm:$0xff]  }
 0x8df   : > { %v15989_v5 = vld [vmem:[#allocation19 + $0x290] ss:$8 sps:$4 sm:$0xff]   ;;  %v15994_v49 = vld [vmem:[#allocation19 + $0x2a4] ss:$8 sps:$4 sm:$0xff]   ;;  %v15992_v37 = vld [vmem:[#allocation19 + $0x2a0] ss:$8 sps:$4 sm:$0xff]  }
 0x8e0   : > { %8843 = vmatpush1.bf16.msra.mxu1 %v15922_v44  ;;  %v15997_v53 = vld [vmem:[#allocation19 + $0x2b4] ss:$8 sps:$4 sm:$0xff]   ;;  %v15995_v13 = vld [vmem:[#allocation19 + $0x2b0] ss:$8 sps:$4 sm:$0xff]   ;;  %v16000_v3 = vld [vmem:[#allocation19 + $0x2c4] ss:$8 sps:$4 sm:$0xff]  }
 0x8e1   : > { %8844 = vmatprep.subr.bf16.mxu1 %v15927_v32  ;;  %v15998_v44 = vld [vmem:[#allocation19 + $0x2c0] ss:$8 sps:$4 sm:$0xff]   ;;  %v16003_v32 = vld [vmem:[#allocation19 + $0x2d4] ss:$8 sps:$4 sm:$0xff]   ;;  %v16019_v15 = vld [vmem:[#allocation19 + $0x310] ss:$8 sps:$4 sm:$0xff]  }
 0x8e2   : > { %v16024_v8 = vld [vmem:[#allocation19 + $0x324] ss:$8 sps:$4 sm:$0xff]   ;;  %v16037_v36 = vld [vmem:[#allocation3 + $0x60] ss:$8 sps:$4 sm:$0xee]  }
 0x8e3   : > { %v16022_v7 = vld [vmem:[#allocation19 + $0x320] ss:$8 sps:$4 sm:$0xff]   ;;  %v16033_v41 = vld [vmem:[#allocation19 + $0x334] ss:$8 sps:$4 sm:$0xff]  }
 0x8e4   : > { %8845 = vmatpush1.bf16.msra.mxu1 %v15925_v48  ;;  %v16001_v48 = vld [vmem:[#allocation19 + $0x2d0] ss:$8 sps:$4 sm:$0xff]  }
 0x8e5   : > { %8846 = vmatprep.subr.bf16.mxu1 %v15930_v22  ;;  %v16006_v22 = vld [vmem:[#allocation19 + $0x2e4] ss:$8 sps:$4 sm:$0xff]  }
 0x8e8   : > { %8847 = vmatpush1.bf16.msra.mxu1 %v15928_v39  ;;  %v16013_v39 = vld [vmem:[#allocation3 + $0x20] ss:$8 sps:$4 sm:$0xee]  }
 0x8e9   : > { %8848 = vmatprep.subr.bf16.mxu1 %v15933_v47  ;;  %v16015_v47 = vld [vmem:[#allocation3 + $0x24] ss:$8 sps:$4 sm:$0x11]  }
 0x8ec   : > { %8849 = vmatpush1.bf16.msra.mxu1 %v15931_v6  ;;  %v16016_v6 = vld [vmem:[#allocation3 + $0x30] ss:$8 sps:$4 sm:$0xee]  }
 0x8ed   : > { %8850 = vmatprep.subr.bf16.mxu1 %v15936_v4  ;;  %v16018_v4 = vld [vmem:[#allocation3 + $0x34] ss:$8 sps:$4 sm:$0x11]  }
 0x8f0   : > { %8851 = vmatpush1.bf16.msra.mxu1 %v15934_v24  ;;  %v16004_v24 = vld [vmem:[#allocation19 + $0x2e0] ss:$8 sps:$4 sm:$0xff]  }
 0x8f1   : > { %8852 = vmatprep.subr.bf16.mxu1 %v15939_v19  ;;  %v16009_v19 = vld [vmem:[#allocation19 + $0x2f4] ss:$8 sps:$4 sm:$0xff]  }
 0x8f4   : > { %8853 = vmatpush1.bf16.msra.mxu1 %v15937_v18  ;;  %v12874_v18 = vrot.slane %v16013_v39, 9  ;;  %v16056_v39 = vld [vmem:[#allocation19 + $0x390] ss:$8 sps:$4 sm:$0xff]  }
 0x8f5   : > { %8854 = vmatprep.subr.bf16.mxu1 %v15942_v30  ;;  %v8991_v30 = vrot.slane %v16015_v47, 5  ;;  %v16061_v47 = vld [vmem:[#allocation19 + $0x3a4] ss:$8 sps:$4 sm:$0xff]  }
 0x8f8   : > { %8855 = vmatpush1.bf16.msra.mxu1 %v15940_v9  ;;  %v12875_v9 = vrot.slane %v16016_v6, 9  ;;  %v16059_v6 = vld [vmem:[#allocation19 + $0x3a0] ss:$8 sps:$4 sm:$0xff]  }
 0x8f9   : > { %8856 = vmatprep.subr.bf16.mxu1 %v15945_v35  ;;  %v8995_v35 = vrot.slane %v16018_v4, 5  ;;  %v16064_v4 = vld [vmem:[#allocation19 + $0x3b4] ss:$8 sps:$4 sm:$0xff]  }
 0x8fc   : > { %8857 = vmatpush1.bf16.msra.mxu1 %v15943_v46  ;;  %v16007_v46 = vld [vmem:[#allocation19 + $0x2f0] ss:$8 sps:$4 sm:$0xff]  }
 0x8fd   : > { %8858 = vmatprep.subr.bf16.mxu1 %v15948_v51  ;;  %v16012_v51 = vld [vmem:[#allocation19 + $0x304] ss:$8 sps:$4 sm:$0xff]  }
 0x900   : > { %8859 = vmatpush1.bf16.msra.mxu1 %v15946_v29  ;;  %v16025_v29 = vld [vmem:[#allocation3 + $0x40] ss:$8 sps:$4 sm:$0xee]  }
 0x901   : > { %9237 = vmatprep.subr.bf16.mxu1 %v15952_v14  ;;  %v16027_v14 = vld [vmem:[#allocation3 + $0x44] ss:$8 sps:$4 sm:$0x11]  }
 0x903   : > { %8861 = vmatmul.mubr.bf16.vlgmr.msra.gmra.mrb[4].mxu1 %v15949_v33  ;;  %v8992_v33 = vsel %vm18142_vm15, %v12874_v18, %v8991_v30  ;;  %v16065_v18 = vld [vmem:[#allocation19 + $0x3c0] ss:$8 sps:$4 sm:$0xff]   ;;  %v16070_v30 = vld [vmem:[#allocation19 + $0x3d4] ss:$8 sps:$4 sm:$0xff]  }
 0x904   : > { %8870 = vmatprep.mubr.bf16.mxu1 %v15953_v10  ;;  %9238 = vmatpush1.bf16.msra.mxu1 %v15950_v21  ;;  %v16028_v21 = vld [vmem:[#allocation3 + $0x50] ss:$8 sps:$4 sm:$0xee]   ;;  %v16030_v10 = vld [vmem:[#allocation3 + $0x54] ss:$8 sps:$4 sm:$0x11]  }
 0x905   : > { %9239 = vmatprep.subr.bf16.mxu1 %v15956_v56  ;;  %v8996_v56 = vsel %vm18142_vm15, %v12875_v9, %v8995_v35  ;;  %v16068_v9 = vld [vmem:[#allocation19 + $0x3d0] ss:$8 sps:$4 sm:$0xff]   ;;  %v16073_v35 = vld [vmem:[#allocation19 + $0x3e4] ss:$8 sps:$4 sm:$0xff]  }
 0x906   : > { %v12882_v52 = vcombine.low %v8992_v33, %v8996_v56 }
 0x908   : > { %9240 = vmatpush1.bf16.msra.mxu1 %v15954_v17  ;;  %v16010_v17 = vld [vmem:[#allocation19 + $0x300] ss:$8 sps:$4 sm:$0xff]  }
 0x909   : > { %9241 = vmatprep.subr.bf16.mxu1 %v15960_v38  ;;  %v12880_v38 = vcombine.low %v20021_v58, %v20025_v1 }
 0x90b   : > { %8871 = vmatmul.mubr.bf16.gmra.mrb[8].mxu1 %v15957_v57  ;;  %v12883_v57 = vcombine.high %v8992_v33, %v8996_v56  ;;  %v16077_v33 = vld [vmem:[#allocation3 + $0x10] ss:$16 sps:$4 sm:$0xff]  }
 0x90c   : > { %8880 = vmatprep.mubr.bf16.mxu1 %v15961_v54  ;;  %9242 = vmatpush1.bf16.msra.mxu1 %v15958_v63  ;;  %v16021_v63 = vld [vmem:[#allocation19 + $0x314] ss:$8 sps:$4 sm:$0xff]   ;;  %v8999_v54 = vrot.slane %v16027_v14, 5  ;;  %v16080_v14 = vld [vmem:[#allocation19 + $0x404] ss:$8 sps:$4 sm:$0xff]  }
 0x90d   : > { %9243 = vmatprep.subr.bf16.mxu1 %v15964_v50  ;;  %v12876_v50 = vrot.slane %v16025_v29, 9  ;;  %v16074_v29 = vld [vmem:[#allocation19 + $0x3f0] ss:$8 sps:$4 sm:$0xff]   ;;  %v16084_v56 = vld [vmem:[#allocation19 + $0x414] ss:$8 sps:$4 sm:$0xff]  }
 0x910   : > { %9244 = vmatpush1.bf16.msra.mxu1 %v15962_v28  ;;  %v12877_v28 = vrot.slane %v16028_v21, 9  ;;  %v16078_v21 = vld [vmem:[#allocation19 + $0x400] ss:$8 sps:$4 sm:$0xff]  }
 0x911   : > { %9245 = vmatprep.subr.bf16.mxu1 %v15968_v45  ;;  %v9003_v45 = vrot.slane %v16030_v10, 5  ;;  %v16081_v10 = vld [vmem:[#allocation3 + $0x38] ss:$16 sps:$4 sm:$0xff]  }
 0x913   : > { %8881 = vmatmul.mubr.bf16.gmra.mrb[12].mxu1 %v15965_v31  ;;  %v9004_v31 = vsel %vm18142_vm15, %v12877_v28, %v9003_v45 }
 0x914   : > { %8890 = vmatprep.mubr.bf16.mxu1 %v15969_v23  ;;  %9246 = vmatpush1.bf16.msra.mxu1 %v15966_v11  ;;  %v16040_v11 = vld [vmem:[#allocation3 + $0x70] ss:$8 sps:$4 sm:$0xee]   ;;  %v16042_v23 = vld [vmem:[#allocation3 + $0x74] ss:$8 sps:$4 sm:$0x11]  }
 0x915   : > { %9247 = vmatprep.subr.bf16.mxu1 %v15972_v20  ;;  %v9000_v20 = vsel %vm18142_vm15, %v12876_v50, %v8999_v54  ;;  %v12879_v58 = vrot.slane %v16040_v11, 9  ;;  %v9011_v1 = vrot.slane %v16042_v23, 5 }
 0x916   : > { %v12885_v34 = vcombine.high %v9000_v20, %v9004_v31 }
 0x918   : > { %9248 = vmatpush1.bf16.msra.mxu1 %v15970_v27  ;;  %v12878_v27 = vrot.slane %v16037_v36, 9  ;;  %v16092_v36 = vld [vmem:[#allocation19 + $0x434] ss:$8 sps:$4 sm:$0xff]  }
 0x919   : > { %9249 = vmatprep.subr.bf16.mxu1 %v15976_v0  ;;  %v9007_v0 = vrot.slane %v16039_v2, 5  ;;  %v16089_v2 = vld [vmem:[#allocation3 + $0x58] ss:$16 sps:$4 sm:$0xff]  }
 0x91b   : > { %8891 = vmatmul.mubr.bf16.gmra.mrb[16].mxu1 %v15973_v42  ;;  %v16036_v42 = vld [vmem:[#allocation19 + $0x344] ss:$8 sps:$4 sm:$0xff]  }
 0x91c   : > { %9250 = vmatpush1.bf16.msra.mxu1 %v15974_v60  ;;  %9269 = vmatprep.mubr.bf16.mxu1 %v12881_v16  ;;  %v16031_v60 = vld [vmem:[#allocation19 + $0x330] ss:$8 sps:$4 sm:$0xff]   ;;  %v9012_v16 = vsel %vm18142_vm15, %v12879_v58, %v9011_v1  ;;  %v16094_v58 = vld [vmem:[#allocation19 + $0x440] ss:$8 sps:$4 sm:$0xff]  }
 0x91d   : > { %9251 = vmatprep.subr.bf16.mxu1 %v15985_v43  ;;  %v9008_v43 = vsel %vm18142_vm15, %v12878_v27, %v9007_v0  ;;  %v16093_v1 = vld [vmem:[#allocation3 + $0x50] ss:$16 sps:$4 sm:$0xff]  }
 0x920   : > { %9252 = vmatpush1.bf16.msra.mxu1 %v15983_v55  ;;  %v16034_v55 = vld [vmem:[#allocation19 + $0x340] ss:$8 sps:$4 sm:$0xff]  }
 0x921   : > { %9253 = vmatprep.subr.bf16.mxu1 %v15988_v40  ;;  %v12884_v40 = vcombine.low %v9000_v20, %v9004_v31 }
 0x924   : > { %9254 = vmatpush1.bf16.msra.mxu1 %v15986_v26  ;;  %v16045_v26 = vld [vmem:[#allocation19 + $0x354] ss:$8 sps:$4 sm:$0xff]  }
 0x925   : > { %9255 = vmatprep.subr.bf16.mxu1 %v15991_v59  ;;  %v12887_v59 = vcombine.high %v9008_v43, %v9012_v16 }
 0x928   : > { %9256 = vmatpush1.bf16.msra.mxu1 %v15989_v5  ;;  %v16043_v5 = vld [vmem:[#allocation19 + $0x350] ss:$8 sps:$4 sm:$0xff]  }
 0x929   : > { %9257 = vmatprep.subr.bf16.mxu1 %v15994_v49  ;;  %v16048_v49 = vld [vmem:[#allocation19 + $0x364] ss:$8 sps:$4 sm:$0xff]  }
 0x92c   : > { %9258 = vmatpush1.bf16.msra.mxu1 %v15992_v37  ;;  %v16046_v37 = vld [vmem:[#allocation19 + $0x360] ss:$8 sps:$4 sm:$0xff]  }
 0x92d   : > { %9259 = vmatprep.subr.bf16.mxu1 %v15997_v53  ;;  %v12886_v53 = vcombine.low %v9008_v43, %v9012_v16  ;;  %v16097_v16 = vld [vmem:[#allocation3 + $0x78] ss:$16 sps:$4 sm:$0xff]  }
 0x930   : > { %9260 = vmatpush1.bf16.msra.mxu1 %v15995_v13  ;;  %v16052_v13 = vld [vmem:[#allocation19 + $0x374] ss:$8 sps:$4 sm:$0xff]  }
 0x931   : > { %9261 = vmatprep.subr.bf16.mxu1 %v16000_v3  ;;  %v16049_v3 = vld [vmem:[#allocation3 + $0x18] ss:$16 sps:$4 sm:$0xff]  }
 0x934   : > { %9262 = vmatpush1.bf16.msra.mxu1 %v15998_v44  ;;  %v16050_v44 = vld [vmem:[#allocation19 + $0x370] ss:$8 sps:$4 sm:$0xff]  }
 0x935   : > { %9263 = vmatprep.subr.bf16.mxu1 %v16003_v32  ;;  %v16055_v32 = vld [vmem:[#allocation19 + $0x384] ss:$8 sps:$4 sm:$0xff]  }
 0x938   : > { %9264 = vmatpush1.bf16.msra.mxu1 %v16001_v48  ;;  %v16053_v48 = vld [vmem:[#allocation19 + $0x380] ss:$8 sps:$4 sm:$0xff]  }
 0x939   : > { %9265 = vmatprep.subr.bf16.mxu1 %v16006_v22  ;;  %v16058_v22 = vld [vmem:[#allocation19 + $0x394] ss:$8 sps:$4 sm:$0xff]  }
 0x93c   : > { %9266 = vmatpush1.bf16.msra.mxu1 %v16004_v24  ;;  %v16062_v24 = vld [vmem:[#allocation19 + $0x3b0] ss:$8 sps:$4 sm:$0xff]  }
 0x93d   : > { %9267 = vmatprep.subr.bf16.mxu1 %v16009_v19  ;;  %v16067_v19 = vld [vmem:[#allocation19 + $0x3c4] ss:$8 sps:$4 sm:$0xff]  }
 0x940   : > { %9268 = vmatpush1.bf16.msra.mxu1 %v16007_v46  ;;  %v16071_v46 = vld [vmem:[#allocation19 + $0x3e0] ss:$8 sps:$4 sm:$0xff]  }
 0x941   : > { %9582 = vmatprep.subr.bf16.mxu1 %v16012_v51  ;;  %v16076_v51 = vld [vmem:[#allocation19 + $0x3f4] ss:$8 sps:$4 sm:$0xff]  }
 0x943   : > { %9270 = vmatmul.mubr.bf16.vlgmr.msra.gmra.mrb[4].mxu1 %v12880_v38  ;;  %v16108_v38 = vld [vmem:[#allocation3 + $0x20] ss:$8 sps:$4 sm:$0xff]  }
 0x944   : > { %9279 = vmatprep.mubr.bf16.mxu1 %v12883_v57  ;;  %9583 = vmatpush1.bf16.msra.mxu1 %v16010_v17  ;;  %v16105_v17 = vld [vmem:[#allocation3 + $0x10] ss:$8 sps:$4 sm:$0xff]   ;;  %v9766_v28 = vshrl.u32 %v16108_v38, 16  ;;  %v9769_v45 = vshll.u32 %v16108_v38, 16 }
 0x945   : > { %9584 = vmatprep.subr.bf16.mxu1 %v16021_v63  ;;  %v16082_v63 = vld [vmem:[#allocation19 + $0x410] ss:$8 sps:$4 sm:$0xff]   ;;  %v16088_v57 = vld [vmem:[#allocation19 + $0x424] ss:$8 sps:$4 sm:$0xff]   ;;  %v9752_v50 = vshrl.u32 %v16105_v17, 16  ;;  %v9755_v54 = vshll.u32 %v16105_v17, 16 }
 0x946   : > { %v9768_v31 = vrot.slane %v9766_v28, 4  ;;  %v9771_v23 = vrot.slane %v9769_v45, 5  ;;  %v16146_v28 = vld [vmem:[#allocation3 + $0x44] ss:$8 sps:$4 sm:$0x11]  }
 0x947   : > { %v9754_v11 = vrot.slane %v9752_v50, 4  ;;  %v9757_v20 = vrot.slane %v9755_v54, 5  ;;  %v16143_v50 = vld [vmem:[#allocation3 + $0x34] ss:$8 sps:$4 sm:$0x11]  }
 0x948   : > { %9585 = vmatpush1.bf16.msra.mxu1 %v16019_v15  ;;  %v16086_v15 = vld [vmem:[#allocation19 + $0x420] ss:$8 sps:$4 sm:$0xff]   ;;  %v9772_v0 = vor.u32 %v9771_v23, %v9768_v31  ;;  %v16129_v54 = vld [vmem:[#allocation19 + $0x4d0] ss:$8 sps:$4 sm:$0xff]   ;;  %v16134_v45 = vld [vmem:[#allocation19 + $0x4e4] ss:$8 sps:$4 sm:$0xff]  }
 0x949   : > { %9586 = vmatprep.subr.bf16.mxu1 %v16024_v8  ;;  %v16085_v8 = vld [vmem:[#allocation3 + $0x30] ss:$16 sps:$4 sm:$0xff]   ;;  %v9758_v27 = vor.u32 %v9757_v20, %v9754_v11  ;;  %v9789_v31 = vshll.u32 %v16143_v50, 16 }
 0x94a   : > { %v16132_v23 = vld [vmem:[#allocation19 + $0x4e0] ss:$8 sps:$4 sm:$0xff]   ;;  %v16161_v50 = vld [vmem:[#allocation19 + $0x534] ss:$8 sps:$4 sm:$0xff]  }
 0x94b   : > { %9280 = vmatmul.mubr.bf16.gmra.mrb[8].mxu1 %v12882_v52  ;;  %v16107_v52 = vld [vmem:[#allocation3 + $0x14] ss:$8 sps:$4 sm:$0x11]  }
 0x94c   : > { %9289 = vmatprep.mubr.bf16.mxu1 %v12885_v34  ;;  %9587 = vmatpush1.bf16.msra.mxu1 %v16022_v7  ;;  %v16090_v7 = vld [vmem:[#allocation19 + $0x430] ss:$8 sps:$4 sm:$0xff]  }
 0x94d   : > { %9588 = vmatprep.subr.bf16.mxu1 %v16033_v41  ;;  %v16096_v41 = vld [vmem:[#allocation19 + $0x444] ss:$8 sps:$4 sm:$0xff]   ;;  %v16110_v34 = vld [vmem:[#allocation3 + $0x24] ss:$8 sps:$4 sm:$0x11]  }
 0x94e   : > { %v9775_v43 = vshll.u32 %v16110_v34, 16 }
 0x950   : > { %9589 = vmatpush1.bf16.msra.mxu1 %v16031_v60  ;;  %v16100_v60 = vld [vmem:[#allocation19 + $0x454] ss:$8 sps:$4 sm:$0xff]  }
 0x951   : > { %9590 = vmatprep.subr.bf16.mxu1 %v16036_v42  ;;  %v9761_v42 = vshll.u32 %v16107_v52, 16  ;;  %v16137_v52 = vld [vmem:[#allocation19 + $0x4f4] ss:$8 sps:$4 sm:$0xff]  }
 0x953   : > { %9290 = vmatmul.mubr.bf16.gmra.mrb[12].mxu1 %v12884_v40  ;;  %v9773_v40 = vrot.slane %v9772_v0, 4 }
 0x954   : > { %9299 = vmatprep.mubr.bf16.mxu1 %v12887_v59  ;;  %9591 = vmatpush1.bf16.msra.mxu1 %v16034_v55  ;;  %v9759_v55 = vrot.slane %v9758_v27, 4  ;;  %v16104_v59 = vld [vmem:[#allocation19 + $0x464] ss:$8 sps:$4 sm:$0xff]  }
 0x955   : > { %9592 = vmatprep.subr.bf16.mxu1 %v16045_v26  ;;  %v16098_v26 = vld [vmem:[#allocation19 + $0x450] ss:$8 sps:$4 sm:$0xff]  }
 0x958   : > { %9593 = vmatpush1.bf16.msra.mxu1 %v16043_v5  ;;  %v9763_v5 = vrot.slane %v9761_v42, 5  ;;  %v16165_v42 = vld [vmem:[#allocation3 + $0x70] ss:$8 sps:$4 sm:$0xff]  }
 0x959   : > { %9594 = vmatprep.subr.bf16.mxu1 %v16048_v49  ;;  %v9777_v49 = vrot.slane %v9775_v43, 5  ;;  %v16168_v43 = vld [vmem:[#allocation3 + $0x80] ss:$8 sps:$4 sm:$0xff]  }
 0x95b   : > { %9300 = vmatmul.mubr.bf16.gmra.mrb[16].mxu1 %v12886_v53  ;;  %v20049_v53 = vsel %vm18113_vm12, %v9773_v40, %v9777_v49  ;;  %v16155_v40 = vld [vmem:[#allocation3 + $0x54] ss:$8 sps:$4 sm:$0x11]  }
 0x95c   : > { %9595 = vmatpush1.bf16.msra.mxu1 %v16046_v37  ;;  %9614 = vmatprep.mubr.bf16.mxu1 %v16049_v3  ;;  %v20045_v37 = vsel %vm18113_vm12, %v9759_v55, %v9763_v5  ;;  %v16101_v3 = vld [vmem:[#allocation3 + $0x70] ss:$16 sps:$4 sm:$0xff]  }
 0x95d   : > { %9596 = vmatprep.subr.bf16.mxu1 %v16052_v13  ;;  %v16102_v13 = vld [vmem:[#allocation19 + $0x460] ss:$8 sps:$4 sm:$0xff]  }
 0x960   : > { %9597 = vmatpush1.bf16.msra.mxu1 %v16050_v44  ;;  %v16113_v44 = vld [vmem:[#allocation19 + $0x474] ss:$8 sps:$4 sm:$0xff]  }
 0x961   : > { %9598 = vmatprep.subr.bf16.mxu1 %v16055_v32  ;;  %v12977_v32 = vcombine.high %v20045_v37, %v20049_v53 }
 0x964   : > { %9599 = vmatpush1.bf16.msra.mxu1 %v16053_v48  ;;  %v16111_v48 = vld [vmem:[#allocation19 + $0x470] ss:$8 sps:$4 sm:$0xff]  }
 0x965   : > { %9600 = vmatprep.subr.bf16.mxu1 %v16058_v22  ;;  %v16116_v22 = vld [vmem:[#allocation19 + $0x484] ss:$8 sps:$4 sm:$0xff]  }
 0x968   : > { %9601 = vmatpush1.bf16.msra.mxu1 %v16056_v39  ;;  %v16114_v39 = vld [vmem:[#allocation19 + $0x480] ss:$8 sps:$4 sm:$0xff]  }
 0x969   : > { %9602 = vmatprep.subr.bf16.mxu1 %v16061_v47  ;;  %v16119_v47 = vld [vmem:[#allocation19 + $0x494] ss:$8 sps:$4 sm:$0xff]  }
 0x96c   : > { %9603 = vmatpush1.bf16.msra.mxu1 %v16059_v6  ;;  %v16117_v6 = vld [vmem:[#allocation19 + $0x490] ss:$8 sps:$4 sm:$0xff]  }
 0x96d   : > { %9604 = vmatprep.subr.bf16.mxu1 %v16064_v4  ;;  %v16122_v4 = vld [vmem:[#allocation19 + $0x4a4] ss:$8 sps:$4 sm:$0xff]  }
 0x970   : > { %9605 = vmatpush1.bf16.msra.mxu1 %v16062_v24  ;;  %v16120_v24 = vld [vmem:[#allocation19 + $0x4a0] ss:$8 sps:$4 sm:$0xff]  }
 0x971   : > { %9606 = vmatprep.subr.bf16.mxu1 %v16067_v19  ;;  %v16125_v19 = vld [vmem:[#allocation19 + $0x4b4] ss:$8 sps:$4 sm:$0xff]  }
 0x974   : > { %9607 = vmatpush1.bf16.msra.mxu1 %v16065_v18  ;;  %v16141_v18 = vld [vmem:[#allocation3 + $0x30] ss:$8 sps:$4 sm:$0xff]  }
 0x975   : > { %9608 = vmatprep.subr.bf16.mxu1 %v16070_v30  ;;  %v16144_v30 = vld [vmem:[#allocation3 + $0x40] ss:$8 sps:$4 sm:$0xff]  }
 0x978   : > { %9609 = vmatpush1.bf16.msra.mxu1 %v16068_v9  ;;  %v16123_v9 = vld [vmem:[#allocation19 + $0x4b0] ss:$8 sps:$4 sm:$0xff]  }
 0x979   : > { %9610 = vmatprep.subr.bf16.mxu1 %v16073_v35  ;;  %v16128_v35 = vld [vmem:[#allocation19 + $0x4c4] ss:$8 sps:$4 sm:$0xff]  }
 0x97c   : > { %9611 = vmatpush1.bf16.msra.mxu1 %v16071_v46  ;;  %v9780_v46 = vshrl.u32 %v16141_v18, 16 }
 0x97d   : > { %9612 = vmatprep.subr.bf16.mxu1 %v16076_v51  ;;  %v9783_v51 = vshll.u32 %v16141_v18, 16 }
 0x980   : > { %9613 = vmatpush1.bf16.msra.mxu1 %v16074_v29  ;;  %v9794_v29 = vshrl.u32 %v16144_v30, 16 }
 0x981   : > { %10087 = vmatprep.subr.bf16.mxu1 %v16080_v14  ;;  %v9797_v14 = vshll.u32 %v16144_v30, 16 }
 0x982   : > { %v9796_v17 = vrot.slane %v9794_v29, 4  ;;  %v16147_v29 = vld [vmem:[#allocation19 + $0x510] ss:$8 sps:$4 sm:$0xff]  }
 0x983   : > { %9615 = vmatmul.mubr.bf16.vlgmr.msra.gmra.mrb[4].mxu1 %v16077_v33  ;;  %v16131_v33 = vld [vmem:[#allocation19 + $0x4d4] ss:$8 sps:$4 sm:$0xff]   ;;  %v9799_v38 = vrot.slane %v9797_v14, 5 }
 0x984   : > { %9624 = vmatprep.mubr.bf16.mxu1 %v16081_v10  ;;  %10088 = vmatpush1.bf16.msra.mxu1 %v16078_v21  ;;  %v16126_v21 = vld [vmem:[#allocation19 + $0x4c0] ss:$8 sps:$4 sm:$0xff]   ;;  %v9785_v10 = vrot.slane %v9783_v51, 5 }
 0x985   : > { %10089 = vmatprep.subr.bf16.mxu1 %v16084_v56  ;;  %v9782_v56 = vrot.slane %v9780_v46, 4 }
 0x988   : > { %10090 = vmatpush1.bf16.msra.mxu1 %v16082_v63  ;;  %v16153_v63 = vld [vmem:[#allocation3 + $0x50] ss:$8 sps:$4 sm:$0xff]  }
 0x989   : > { %10091 = vmatprep.subr.bf16.mxu1 %v16088_v57  ;;  %v16156_v57 = vld [vmem:[#allocation3 + $0x60] ss:$8 sps:$4 sm:$0xff]  }
 0x98a   : > { %v9822_v11 = vshrl.u32 %v16156_v57, 16  ;;  %v9825_v20 = vshll.u32 %v16156_v57, 16 }
 0x98b   : > { %9625 = vmatmul.mubr.bf16.gmra.mrb[8].mxu1 %v16085_v8  ;;  %v9800_v8 = vor.u32 %v9799_v38, %v9796_v17 }
 0x98c   : > { %9634 = vmatprep.mubr.bf16.mxu1 %v16089_v2  ;;  %10092 = vmatpush1.bf16.msra.mxu1 %v16086_v15  ;;  %v9786_v15 = vor.u32 %v9785_v10, %v9782_v56  ;;  %v9811_v2 = vshll.u32 %v16153_v63, 16 }
 0x98d   : > { %10093 = vmatprep.subr.bf16.mxu1 %v16092_v36  ;;  %v9808_v36 = vshrl.u32 %v16153_v63, 16  ;;  %v9801_v34 = vrot.slane %v9800_v8, 4  ;;  %v16150_v63 = vld [vmem:[#allocation19 + $0x520] ss:$8 sps:$4 sm:$0xff]  }
 0x98e   : > { %v9813_v0 = vrot.slane %v9811_v2, 5  ;;  %v16164_v2 = vld [vmem:[#allocation19 + $0x544] ss:$8 sps:$4 sm:$0xff]  }
 0x98f   : > { %v9810_v27 = vrot.slane %v9808_v36, 4  ;;  %v16159_v36 = vld [vmem:[#allocation19 + $0x530] ss:$8 sps:$4 sm:$0xff]  }
 0x990   : > { %10094 = vmatpush1.bf16.msra.mxu1 %v16090_v7  ;;  %v9803_v7 = vshll.u32 %v16146_v28, 16 }
 0x991   : > { %10095 = vmatprep.subr.bf16.mxu1 %v16096_v41  ;;  %v9787_v41 = vrot.slane %v9786_v15, 4 }
 0x992   : > { %v9805_v55 = vrot.slane %v9803_v7, 5 }
 0x993   : > { %9635 = vmatmul.mubr.bf16.gmra.mrb[12].mxu1 %v16093_v1  ;;  %v9827_v1 = vrot.slane %v9825_v20, 5 }
 0x994   : > { %9644 = vmatprep.mubr.bf16.mxu1 %v16097_v16  ;;  %10096 = vmatpush1.bf16.msra.mxu1 %v16094_v58  ;;  %v9824_v58 = vrot.slane %v9822_v11, 4  ;;  %v16135_v16 = vld [vmem:[#allocation19 + $0x4f0] ss:$8 sps:$4 sm:$0xff]   ;;  %v9806_v49 = vsel %vm18113_vm12, %v9801_v34, %v9805_v55 }
 0x995   : > { %10097 = vmatprep.subr.bf16.mxu1 %v16100_v60  ;;  %v9791_v60 = vrot.slane %v9789_v31, 5  ;;  %v16177_v31 = vld [vmem:[#allocation3 + $0x10] ss:$8 sps:$4 sm:$0xee]  }
 0x996   : > { %v16182_v34 = vld [vmem:[#allocation3 + $0x24] ss:$8 sps:$4 sm:$0x11]  }
 0x997   : > { %v9792_v5 = vsel %vm18113_vm12, %v9787_v41, %v9791_v60  ;;  %v16180_v41 = vld [vmem:[#allocation3 + $0x20] ss:$8 sps:$4 sm:$0xee]   ;;  %v13032_v60 = vrot.slane %v16177_v31, 9 }
 0x998   : > { %10098 = vmatpush1.bf16.msra.mxu1 %v16098_v26  ;;  %v16140_v26 = vld [vmem:[#allocation19 + $0x504] ss:$8 sps:$4 sm:$0xff]   ;;  %v12978_v57 = vcombine.low %v9792_v5, %v9806_v49  ;;  %v16171_v55 = vld [vmem:[#allocation19 + $0x550] ss:$8 sps:$4 sm:$0xff]  }
 0x999   : > { %10099 = vmatprep.subr.bf16.mxu1 %v16104_v59  ;;  %v16158_v59 = vld [vmem:[#allocation3 + $0x64] ss:$8 sps:$4 sm:$0x11]  }
 0x99b   : > { %9645 = vmatmul.mubr.bf16.gmra.mrb[16].mxu1 %v16101_v3  ;;  %v9828_v3 = vor.u32 %v9827_v1, %v9824_v58  ;;  %v16173_v58 = vld [vmem:[#allocation19 + $0x554] ss:$8 sps:$4 sm:$0xff]  }
 0x99c   : > { %10100 = vmatpush1.bf16.msra.mxu1 %v16102_v13  ;;  %10119 = vmatprep.mubr.bf16.mxu1 %v12977_v32  ;;  %v9814_v13 = vor.u32 %v9813_v0, %v9810_v27  ;;  %v9839_v32 = vshll.u32 %v16165_v42, 16  ;;  %v16162_v27 = vld [vmem:[#allocation19 + $0x540] ss:$8 sps:$4 sm:$0xff]  }
 0x99d   : > { %10101 = vmatprep.subr.bf16.mxu1 %v16113_v44  ;;  %v9836_v44 = vshrl.u32 %v16165_v42, 16  ;;  %v9829_v30 = vrot.slane %v9828_v3, 4 }
 0x99e   : > { %v9815_v18 = vrot.slane %v9814_v13, 4  ;;  %v16185_v13 = vld [vmem:[#allocation19 + $0x574] ss:$8 sps:$4 sm:$0xff]  }
 0x9a0   : > { %10102 = vmatpush1.bf16.msra.mxu1 %v16111_v48  ;;  %v9850_v48 = vshrl.u32 %v16168_v43, 16 }
 0x9a1   : > { %10103 = vmatprep.subr.bf16.mxu1 %v16116_v22  ;;  %v9853_v22 = vshll.u32 %v16168_v43, 16  ;;  %v13033_v43 = vrot.slane %v16180_v41, 9  ;;  %v16237_v41 = vld [vmem:[#allocation3 + $0x70] ss:$8 sps:$4 sm:$0xee]  }
 0x9a2   : > { %v9852_v46 = vrot.slane %v9850_v48, 4  ;;  %v16186_v48 = vld [vmem:[#allocation19 + $0x580] ss:$8 sps:$4 sm:$0xff]  }
 0x9a3   : > { %v9855_v51 = vrot.slane %v9853_v22, 5  ;;  %v16191_v22 = vld [vmem:[#allocation19 + $0x594] ss:$8 sps:$4 sm:$0xff]  }
 0x9a4   : > { %10104 = vmatpush1.bf16.msra.mxu1 %v16114_v39  ;;  %v16138_v39 = vld [vmem:[#allocation19 + $0x500] ss:$8 sps:$4 sm:$0xff]  }
 0x9a5   : > { %10105 = vmatprep.subr.bf16.mxu1 %v16119_v47  ;;  %v9817_v47 = vshll.u32 %v16155_v40, 16  ;;  %v9856_v38 = vor.u32 %v9855_v51, %v9852_v46  ;;  %v16176_v40 = vld [vmem:[#allocation19 + $0x564] ss:$8 sps:$4 sm:$0xff]   ;;  %v16215_v51 = vld [vmem:[#allocation3 + $0x34] ss:$8 sps:$4 sm:$0x11]  }
 0x9a6   : > { %v16213_v46 = vld [vmem:[#allocation3 + $0x30] ss:$8 sps:$4 sm:$0xee]  }
 0x9a7   : > { %v9819_v14 = vrot.slane %v9817_v47, 5  ;;  %v9857_v8 = vrot.slane %v9856_v38, 4  ;;  %v16194_v47 = vld [vmem:[#allocation19 + $0x5a4] ss:$8 sps:$4 sm:$0xff]  }
 0x9a8   : > { %10106 = vmatpush1.bf16.msra.mxu1 %v16117_v6  ;;  %v12976_v6 = vcombine.low %v20045_v37, %v20049_v53  ;;  %v16170_v37 = vld [vmem:[#allocation3 + $0x84] ss:$8 sps:$4 sm:$0x11]   ;;  %v16212_v38 = vld [vmem:[#allocation19 + $0x604] ss:$8 sps:$4 sm:$0xff]  }
 0x9a9   : > { %10107 = vmatprep.subr.bf16.mxu1 %v16122_v4  ;;  %v16149_v4 = vld [vmem:[#allocation19 + $0x514] ss:$8 sps:$4 sm:$0xff]   ;;  %v9820_v53 = vsel %vm18113_vm12, %v9815_v18, %v9819_v14  ;;  %v9859_v28 = vshll.u32 %v16170_v37, 16  ;;  %v16198_v18 = vld [vmem:[#allocation19 + $0x5c0] ss:$8 sps:$4 sm:$0xff]   ;;  %v10266_v37 = vrot.slane %v16215_v51, 5 }
 0x9aa   : > { %v16218_v14 = vld [vmem:[#allocation3 + $0x44] ss:$8 sps:$4 sm:$0x11]   ;;  %v16261_v51 = vld [vmem:[#allocation19 + $0x6a4] ss:$8 sps:$4 sm:$0xff]  }
 0x9ab   : > { %v9861_v20 = vrot.slane %v9859_v28, 5  ;;  %v16228_v28 = vld [vmem:[#allocation3 + $0x60] ss:$8 sps:$4 sm:$0xee]  }
 0x9ac   : > { %10108 = vmatpush1.bf16.msra.mxu1 %v16120_v24  ;;  %v9831_v24 = vshll.u32 %v16158_v59, 16  ;;  %v13037_v31 = vrot.slane %v16228_v28, 9  ;;  %v16284_v28 = vld [vmem:[#allocation19 + $0x714] ss:$8 sps:$4 sm:$0xff]  }
 0x9ad   : > { %10109 = vmatprep.subr.bf16.mxu1 %v16125_v19  ;;  %v12979_v19 = vcombine.high %v9792_v5, %v9806_v49  ;;  %v16174_v5 = vld [vmem:[#allocation19 + $0x560] ss:$8 sps:$4 sm:$0xff]  }
 0x9ae   : > { %v9833_v56 = vrot.slane %v9831_v24, 5  ;;  %v16195_v24 = vld [vmem:[#allocation19 + $0x5b0] ss:$8 sps:$4 sm:$0xff]  }
 0x9b0   : > { %10110 = vmatpush1.bf16.msra.mxu1 %v16123_v9  ;;  %v9838_v9 = vrot.slane %v9836_v44, 4  ;;  %v9834_v10 = vsel %vm18113_vm12, %v9829_v30, %v9833_v56  ;;  %v16183_v44 = vld [vmem:[#allocation19 + $0x570] ss:$8 sps:$4 sm:$0xff]   ;;  %v16203_v30 = vld [vmem:[#allocation19 + $0x5d4] ss:$8 sps:$4 sm:$0xff]   ;;  %v13034_v56 = vrot.slane %v16213_v46, 9 }
 0x9b1   : > { %10111 = vmatprep.subr.bf16.mxu1 %v16128_v35  ;;  %v9841_v35 = vrot.slane %v9839_v32, 5  ;;  %v12980_v0 = vcombine.low %v9820_v53, %v9834_v10  ;;  %v16188_v32 = vld [vmem:[#allocation19 + $0x584] ss:$8 sps:$4 sm:$0xff]   ;;  %v16256_v46 = vld [vmem:[#allocation19 + $0x690] ss:$8 sps:$4 sm:$0xff]  }
 0x9b3   : > { %v9842_v17 = vor.u32 %v9841_v35, %v9838_v9  ;;  %v16201_v9 = vld [vmem:[#allocation19 + $0x5d0] ss:$8 sps:$4 sm:$0xff]   ;;  %v16206_v35 = vld [vmem:[#allocation19 + $0x5e4] ss:$8 sps:$4 sm:$0xff]  }
 0x9b4   : > { %10112 = vmatpush1.bf16.msra.mxu1 %v16126_v21  ;;  %v16167_v21 = vld [vmem:[#allocation3 + $0x74] ss:$8 sps:$4 sm:$0x11]  }
 0x9b5   : > { %10113 = vmatprep.subr.bf16.mxu1 %v16131_v33  ;;  %v16152_v33 = vld [vmem:[#allocation19 + $0x524] ss:$8 sps:$4 sm:$0xff]   ;;  %v9843_v15 = vrot.slane %v9842_v17, 4  ;;  %v16207_v17 = vld [vmem:[#allocation19 + $0x5f0] ss:$8 sps:$4 sm:$0xff]  }
 0x9b8   : > { %10114 = vmatpush1.bf16.msra.mxu1 %v16129_v54  ;;  %v9845_v54 = vshll.u32 %v16167_v21, 16  ;;  %v16204_v21 = vld [vmem:[#allocation19 + $0x5e0] ss:$8 sps:$4 sm:$0xff]  }
 0x9b9   : > { %10115 = vmatprep.subr.bf16.mxu1 %v16134_v45  ;;  %v12981_v45 = vcombine.high %v9820_v53, %v9834_v10  ;;  %v10270_v10 = vrot.slane %v16218_v14, 5  ;;  %v16264_v14 = vld [vmem:[#allocation19 + $0x6b4] ss:$8 sps:$4 sm:$0xff]  }
 0x9ba   : > { %v9847_v11 = vrot.slane %v9845_v54, 5 }
 0x9bc   : > { %10116 = vmatpush1.bf16.msra.mxu1 %v16132_v23  ;;  %v16179_v23 = vld [vmem:[#allocation3 + $0x14] ss:$8 sps:$4 sm:$0x11]   ;;  %v9848_v7 = vsel %vm18113_vm12, %v9843_v15, %v9847_v11 }
 0x9bd   : > { %10117 = vmatprep.subr.bf16.mxu1 %v16137_v52  ;;  %v9862_v52 = vsel %vm18113_vm12, %v9857_v8, %v9861_v20  ;;  %v10258_v42 = vrot.slane %v16179_v23, 5  ;;  %v16210_v15 = vld [vmem:[#allocation19 + $0x600] ss:$8 sps:$4 sm:$0xff]  }
 0x9be   : > { %v12983_v1 = vcombine.high %v9848_v7, %v9862_v52  ;;  %v12982_v49 = vcombine.low %v9848_v7, %v9862_v52  ;;  %v16219_v7 = vld [vmem:[#allocation19 + $0x610] ss:$8 sps:$4 sm:$0xff]   ;;  %v16224_v52 = vld [vmem:[#allocation19 + $0x624] ss:$8 sps:$4 sm:$0xff]  }
 0x9c0   : > { %10118 = vmatpush1.bf16.msra.mxu1 %v16135_v16  ;;  %v10262_v16 = vrot.slane %v16182_v34, 5  ;;  %v16239_v34 = vld [vmem:[#allocation3 + $0x74] ss:$8 sps:$4 sm:$0x11]  }
 0x9c1   : > { %10512 = vmatprep.subr.bf16.mxu1 %v16140_v26  ;;  %v20069_v26 = vsel %vm18142_vm15, %v13032_v60, %v10258_v42  ;;  %v16222_v60 = vld [vmem:[#allocation19 + $0x620] ss:$8 sps:$4 sm:$0xff]  }
 0x9c2   : > { %v20073_v59 = vsel %vm18142_vm15, %v13033_v43, %v10262_v16  ;;  %v16233_v43 = vld [vmem:[#allocation19 + $0x634] ss:$8 sps:$4 sm:$0xff]  }
 0x9c3   : > { %10120 = vmatmul.mubr.bf16.vlgmr.msra.gmra.mrb[4].mxu1 %v12976_v6  ;;  %v13041_v3 = vcombine.high %v20069_v26, %v20073_v59  ;;  %v16192_v6 = vld [vmem:[#allocation19 + $0x5a0] ss:$8 sps:$4 sm:$0xff]   ;;  %v13040_v8 = vcombine.low %v20069_v26, %v20073_v59 }
 0x9c4   : > { %10129 = vmatprep.mubr.bf16.mxu1 %v12979_v19  ;;  %10513 = vmatpush1.bf16.msra.mxu1 %v16138_v39  ;;  %v16189_v39 = vld [vmem:[#allocation19 + $0x590] ss:$8 sps:$4 sm:$0xff]   ;;  %v16200_v19 = vld [vmem:[#allocation19 + $0x5c4] ss:$8 sps:$4 sm:$0xff]  }
 0x9c5   : > { %10514 = vmatprep.subr.bf16.mxu1 %v16149_v4  ;;  %v16197_v4 = vld [vmem:[#allocation19 + $0x5b4] ss:$8 sps:$4 sm:$0xff]  }
 0x9c8   : > { %10515 = vmatpush1.bf16.msra.mxu1 %v16147_v29  ;;  %v16216_v29 = vld [vmem:[#allocation3 + $0x40] ss:$8 sps:$4 sm:$0xee]  }
 0x9c9   : > { %10516 = vmatprep.subr.bf16.mxu1 %v16152_v33  ;;  %v16209_v33 = vld [vmem:[#allocation19 + $0x5f4] ss:$8 sps:$4 sm:$0xff]   ;;  %v13035_v53 = vrot.slane %v16216_v29, 9  ;;  %v16259_v29 = vld [vmem:[#allocation19 + $0x6a0] ss:$8 sps:$4 sm:$0xff]  }
 0x9cb   : > { %10130 = vmatmul.mubr.bf16.gmra.mrb[8].mxu1 %v12978_v57  ;;  %v16227_v57 = vld [vmem:[#allocation3 + $0x54] ss:$8 sps:$4 sm:$0x11]   ;;  %v10271_v54 = vsel %vm18142_vm15, %v13035_v53, %v10270_v10  ;;  %v16273_v10 = vld [vmem:[#allocation19 + $0x6e4] ss:$8 sps:$4 sm:$0xff]  }
 0x9cc   : > { %10139 = vmatprep.mubr.bf16.mxu1 %v12981_v45  ;;  %10517 = vmatpush1.bf16.msra.mxu1 %v16150_v63  ;;  %v16225_v63 = vld [vmem:[#allocation3 + $0x50] ss:$8 sps:$4 sm:$0xee]   ;;  %v16230_v45 = vld [vmem:[#allocation3 + $0x64] ss:$8 sps:$4 sm:$0x11]  }
 0x9cd   : > { %10518 = vmatprep.subr.bf16.mxu1 %v16161_v50  ;;  %v10267_v50 = vsel %vm18142_vm15, %v13034_v56, %v10266_v37  ;;  %v13036_v11 = vrot.slane %v16225_v63, 9  ;;  %v10274_v20 = vrot.slane %v16227_v57, 5  ;;  %v10278_v23 = vrot.slane %v16230_v45, 5  ;;  %v16265_v56 = vld [vmem:[#allocation19 + $0x6c0] ss:$8 sps:$4 sm:$0xff]  }
 0x9ce   : > { %v13042_v42 = vcombine.low %v10267_v50, %v10271_v54  ;;  %v16270_v37 = vld [vmem:[#allocation19 + $0x6d4] ss:$8 sps:$4 sm:$0xff]   ;;  %v16268_v53 = vld [vmem:[#allocation19 + $0x6d0] ss:$8 sps:$4 sm:$0xff]   ;;  %v16280_v57 = vld [vmem:[#allocation19 + $0x704] ss:$8 sps:$4 sm:$0xff]  }
 0x9cf   : > { %v16274_v63 = vld [vmem:[#allocation19 + $0x6f0] ss:$8 sps:$4 sm:$0xff]  }
 0x9d0   : > { %10519 = vmatpush1.bf16.msra.mxu1 %v16159_v36  ;;  %v16221_v36 = vld [vmem:[#allocation19 + $0x614] ss:$8 sps:$4 sm:$0xff]  }
 0x9d1   : > { %10520 = vmatprep.subr.bf16.mxu1 %v16164_v2  ;;  %v13043_v2 = vcombine.high %v10267_v50, %v10271_v54  ;;  %v16278_v50 = vld [vmem:[#allocation19 + $0x700] ss:$8 sps:$4 sm:$0xff]  }
 0x9d2   : > { %v16277_v54 = vld [vmem:[#allocation3 + $0x20] ss:$16 sps:$4 sm:$0xff]   ;;  %v16281_v45 = vld [vmem:[#allocation3 + $0x48] ss:$16 sps:$4 sm:$0xff]  }
 0x9d3   : > { %10140 = vmatmul.mubr.bf16.gmra.mrb[12].mxu1 %v12980_v0  ;;  %v10279_v0 = vsel %vm18142_vm15, %v13037_v31, %v10278_v23 }
 0x9d4   : > { %10149 = vmatprep.mubr.bf16.mxu1 %v12983_v1  ;;  %10521 = vmatpush1.bf16.msra.mxu1 %v16162_v27  ;;  %v10275_v27 = vsel %vm18142_vm15, %v13036_v11, %v10274_v20  ;;  %v16242_v1 = vld [vmem:[#allocation3 + $0x84] ss:$8 sps:$4 sm:$0x11]  }
 0x9d5   : > { %10522 = vmatprep.subr.bf16.mxu1 %v16173_v58  ;;  %v16240_v58 = vld [vmem:[#allocation3 + $0x80] ss:$8 sps:$4 sm:$0xee]   ;;  %v13045_v16 = vcombine.high %v10275_v27, %v10279_v0  ;;  %v10286_v59 = vrot.slane %v16242_v1, 5 }
 0x9d6   : > { %v13039_v26 = vrot.slane %v16240_v58, 9 }
 0x9d8   : > { %10523 = vmatpush1.bf16.msra.mxu1 %v16171_v55  ;;  %v13038_v55 = vrot.slane %v16237_v41, 9  ;;  %v16292_v41 = vld [vmem:[#allocation19 + $0x734] ss:$8 sps:$4 sm:$0xff]  }
 0x9d9   : > { %10524 = vmatprep.subr.bf16.mxu1 %v16176_v40  ;;  %v10282_v40 = vrot.slane %v16239_v34, 5  ;;  %v16289_v34 = vld [vmem:[#allocation3 + $0x68] ss:$16 sps:$4 sm:$0xff]  }
 0x9db   : > { %10150 = vmatmul.mubr.bf16.gmra.mrb[16].mxu1 %v12982_v49  ;;  %v16236_v49 = vld [vmem:[#allocation19 + $0x644] ss:$8 sps:$4 sm:$0xff]  }
 0x9dc   : > { %10525 = vmatpush1.bf16.msra.mxu1 %v16174_v5  ;;  %10544 = vmatprep.mubr.bf16.mxu1 %v13041_v3  ;;  %v16231_v5 = vld [vmem:[#allocation19 + $0x630] ss:$8 sps:$4 sm:$0xff]   ;;  %v10287_v3 = vsel %vm18142_vm15, %v13039_v26, %v10286_v59  ;;  %v16294_v26 = vld [vmem:[#allocation19 + $0x740] ss:$8 sps:$4 sm:$0xff]  }
 0x9dd   : > { %10526 = vmatprep.subr.bf16.mxu1 %v16185_v13  ;;  %v10283_v13 = vsel %vm18142_vm15, %v13038_v55, %v10282_v40  ;;  %v16293_v59 = vld [vmem:[#allocation3 + $0x60] ss:$16 sps:$4 sm:$0xff]  }
 0x9e0   : > { %10527 = vmatpush1.bf16.msra.mxu1 %v16183_v44  ;;  %v16234_v44 = vld [vmem:[#allocation19 + $0x640] ss:$8 sps:$4 sm:$0xff]  }
 0x9e1   : > { %10528 = vmatprep.subr.bf16.mxu1 %v16188_v32  ;;  %v13044_v32 = vcombine.low %v10275_v27, %v10279_v0 }
 0x9e4   : > { %10529 = vmatpush1.bf16.msra.mxu1 %v16186_v48  ;;  %v16245_v48 = vld [vmem:[#allocation19 + $0x654] ss:$8 sps:$4 sm:$0xff]  }
 0x9e5   : > { %10530 = vmatprep.subr.bf16.mxu1 %v16191_v22  ;;  %v13047_v22 = vcombine.high %v10283_v13, %v10287_v3 }
 0x9e8   : > { %10531 = vmatpush1.bf16.msra.mxu1 %v16189_v39  ;;  %v16243_v39 = vld [vmem:[#allocation19 + $0x650] ss:$8 sps:$4 sm:$0xff]  }
 0x9e9   : > { %10532 = vmatprep.subr.bf16.mxu1 %v16194_v47  ;;  %v16248_v47 = vld [vmem:[#allocation19 + $0x664] ss:$8 sps:$4 sm:$0xff]  }
 0x9ec   : > { %10533 = vmatpush1.bf16.msra.mxu1 %v16192_v6  ;;  %v16246_v6 = vld [vmem:[#allocation19 + $0x660] ss:$8 sps:$4 sm:$0xff]  }
 0x9ed   : > { %10534 = vmatprep.subr.bf16.mxu1 %v16197_v4  ;;  %v13046_v4 = vcombine.low %v10283_v13, %v10287_v3  ;;  %v16297_v3 = vld [vmem:[#allocation3 + $0x88] ss:$16 sps:$4 sm:$0xff]  }
 0x9f0   : > { %10535 = vmatpush1.bf16.msra.mxu1 %v16195_v24  ;;  %v16252_v24 = vld [vmem:[#allocation19 + $0x674] ss:$8 sps:$4 sm:$0xff]  }
 0x9f1   : > { %10536 = vmatprep.subr.bf16.mxu1 %v16200_v19  ;;  %v16249_v19 = vld [vmem:[#allocation3 + $0x28] ss:$16 sps:$4 sm:$0xff]  }
 0x9f4   : > { %10537 = vmatpush1.bf16.msra.mxu1 %v16198_v18  ;;  %v16250_v18 = vld [vmem:[#allocation19 + $0x670] ss:$8 sps:$4 sm:$0xff]  }
 0x9f5   : > { %10538 = vmatprep.subr.bf16.mxu1 %v16203_v30  ;;  %v16255_v30 = vld [vmem:[#allocation19 + $0x684] ss:$8 sps:$4 sm:$0xff]  }
 0x9f8   : > { %10539 = vmatpush1.bf16.msra.mxu1 %v16201_v9  ;;  %v16253_v9 = vld [vmem:[#allocation19 + $0x680] ss:$8 sps:$4 sm:$0xff]  }
 0x9f9   : > { %10540 = vmatprep.subr.bf16.mxu1 %v16206_v35  ;;  %v16258_v35 = vld [vmem:[#allocation19 + $0x694] ss:$8 sps:$4 sm:$0xff]  }
 0x9fc   : > { %10541 = vmatpush1.bf16.msra.mxu1 %v16204_v21  ;;  %v16262_v21 = vld [vmem:[#allocation19 + $0x6b0] ss:$8 sps:$4 sm:$0xff]  }
 0x9fd   : > { %10542 = vmatprep.subr.bf16.mxu1 %v16209_v33  ;;  %v16267_v33 = vld [vmem:[#allocation19 + $0x6c4] ss:$8 sps:$4 sm:$0xff]  }
 0xa00   : > { %10543 = vmatpush1.bf16.msra.mxu1 %v16207_v17  ;;  %v16271_v17 = vld [vmem:[#allocation19 + $0x6e0] ss:$8 sps:$4 sm:$0xff]  }
 0xa01   : > { %10858 = vmatprep.subr.bf16.mxu1 %v16212_v38  ;;  %v16276_v38 = vld [vmem:[#allocation19 + $0x6f4] ss:$8 sps:$4 sm:$0xff]  }
 0xa03   : > { %10545 = vmatmul.mubr.bf16.vlgmr.msra.gmra.mrb[4].mxu1 %v13040_v8  ;;  %v16308_v8 = vld [vmem:[#allocation3 + $0x30] ss:$8 sps:$4 sm:$0xff]  }
 0xa04   : > { %10554 = vmatprep.mubr.bf16.mxu1 %v13043_v2  ;;  %10859 = vmatpush1.bf16.msra.mxu1 %v16210_v15  ;;  %v16305_v15 = vld [vmem:[#allocation3 + $0x20] ss:$8 sps:$4 sm:$0xff]   ;;  %v16288_v2 = vld [vmem:[#allocation19 + $0x724] ss:$8 sps:$4 sm:$0xff]   ;;  %v11042_v31 = vshrl.u32 %v16308_v8, 16  ;;  %v11045_v23 = vshll.u32 %v16308_v8, 16 }
 0xa05   : > { %10860 = vmatprep.subr.bf16.mxu1 %v16221_v36  ;;  %v16282_v36 = vld [vmem:[#allocation19 + $0x710] ss:$8 sps:$4 sm:$0xff]   ;;  %v11028_v11 = vshrl.u32 %v16305_v15, 16  ;;  %v11031_v20 = vshll.u32 %v16305_v15, 16 }
 0xa06   : > { %v11044_v58 = vrot.slane %v11042_v31, 4  ;;  %v11047_v1 = vrot.slane %v11045_v23, 5  ;;  %v16346_v31 = vld [vmem:[#allocation3 + $0x54] ss:$8 sps:$4 sm:$0x11]  }
 0xa07   : > { %v11030_v27 = vrot.slane %v11028_v11, 4  ;;  %v11033_v0 = vrot.slane %v11031_v20, 5  ;;  %v16356_v11 = vld [vmem:[#allocation3 + $0x70] ss:$8 sps:$4 sm:$0xff]  }
 0xa08   : > { %10861 = vmatpush1.bf16.msra.mxu1 %v16219_v7  ;;  %v16286_v7 = vld [vmem:[#allocation19 + $0x720] ss:$8 sps:$4 sm:$0xff]   ;;  %v11048_v40 = vor.u32 %v11047_v1, %v11044_v58  ;;  %v16329_v20 = vld [vmem:[#allocation19 + $0x7d0] ss:$8 sps:$4 sm:$0xff]   ;;  %v16334_v23 = vld [vmem:[#allocation19 + $0x7e4] ss:$8 sps:$4 sm:$0xff]  }
 0xa09   : > { %10862 = vmatprep.subr.bf16.mxu1 %v16224_v52  ;;  %v16285_v52 = vld [vmem:[#allocation3 + $0x40] ss:$16 sps:$4 sm:$0xff]   ;;  %v11034_v55 = vor.u32 %v11033_v0, %v11030_v27  ;;  %v11098_v0 = vshrl.u32 %v16356_v11, 16  ;;  %v11101_v58 = vshll.u32 %v16356_v11, 16 }
 0xa0a   : > { %v16332_v1 = vld [vmem:[#allocation19 + $0x7e0] ss:$8 sps:$4 sm:$0xff]  }
 0xa0b   : > { %10555 = vmatmul.mubr.bf16.gmra.mrb[8].mxu1 %v13042_v42  ;;  %v16307_v42 = vld [vmem:[#allocation3 + $0x24] ss:$8 sps:$4 sm:$0x11]  }
 0xa0c   : > { %10564 = vmatprep.mubr.bf16.mxu1 %v13045_v16  ;;  %10863 = vmatpush1.bf16.msra.mxu1 %v16222_v60  ;;  %v16290_v60 = vld [vmem:[#allocation19 + $0x730] ss:$8 sps:$4 sm:$0xff]  }
 0xa0d   : > { %10864 = vmatprep.subr.bf16.mxu1 %v16233_v43  ;;  %v16296_v43 = vld [vmem:[#allocation19 + $0x744] ss:$8 sps:$4 sm:$0xff]   ;;  %v16310_v16 = vld [vmem:[#allocation3 + $0x34] ss:$8 sps:$4 sm:$0x11]  }
 0xa0e   : > { %v11051_v13 = vshll.u32 %v16310_v16, 16 }
 0xa10   : > { %10865 = vmatpush1.bf16.msra.mxu1 %v16231_v5  ;;  %v16300_v5 = vld [vmem:[#allocation19 + $0x754] ss:$8 sps:$4 sm:$0xff]  }
 0xa11   : > { %10866 = vmatprep.subr.bf16.mxu1 %v16236_v49  ;;  %v11037_v49 = vshll.u32 %v16307_v42, 16  ;;  %v16337_v42 = vld [vmem:[#allocation19 + $0x7f4] ss:$8 sps:$4 sm:$0xff]  }
 0xa13   : > { %10565 = vmatmul.mubr.bf16.gmra.mrb[12].mxu1 %v13044_v32  ;;  %v11049_v32 = vrot.slane %v11048_v40, 4 }
 0xa14   : > { %10574 = vmatprep.mubr.bf16.mxu1 %v13047_v22  ;;  %10867 = vmatpush1.bf16.msra.mxu1 %v16234_v44  ;;  %v11035_v44 = vrot.slane %v11034_v55, 4  ;;  %v16304_v22 = vld [vmem:[#allocation19 + $0x764] ss:$8 sps:$4 sm:$0xff]  }
 0xa15   : > { %10868 = vmatprep.subr.bf16.mxu1 %v16245_v48  ;;  %v16298_v48 = vld [vmem:[#allocation19 + $0x750] ss:$8 sps:$4 sm:$0xff]  }
 0xa18   : > { %10869 = vmatpush1.bf16.msra.mxu1 %v16243_v39  ;;  %v11039_v39 = vrot.slane %v11037_v49, 5  ;;  %v11103_v49 = vrot.slane %v11101_v58, 5  ;;  %v16377_v58 = vld [vmem:[#allocation3 + $0x20] ss:$8 sps:$4 sm:$0xee]  }
 0xa19   : > { %10870 = vmatprep.subr.bf16.mxu1 %v16248_v47  ;;  %v11053_v47 = vrot.slane %v11051_v13, 5  ;;  %v16368_v13 = vld [vmem:[#allocation3 + $0x90] ss:$8 sps:$4 sm:$0xff]  }
 0xa1b   : > { %10575 = vmatmul.mubr.bf16.gmra.mrb[16].mxu1 %v13046_v4  ;;  %v20097_v4 = vsel %vm18113_vm12, %v11049_v32, %v11053_v47  ;;  %v16355_v32 = vld [vmem:[#allocation3 + $0x64] ss:$8 sps:$4 sm:$0x11]  }
 0xa1c   : > { %10871 = vmatpush1.bf16.msra.mxu1 %v16246_v6  ;;  %10890 = vmatprep.mubr.bf16.mxu1 %v16249_v19  ;;  %v20093_v6 = vsel %vm18113_vm12, %v11035_v44, %v11039_v39  ;;  %v16301_v19 = vld [vmem:[#allocation3 + $0x80] ss:$16 sps:$4 sm:$0xff]  }
 0xa1d   : > { %10872 = vmatprep.subr.bf16.mxu1 %v16252_v24  ;;  %v16302_v24 = vld [vmem:[#allocation19 + $0x760] ss:$8 sps:$4 sm:$0xff]  }
 0xa20   : > { %10873 = vmatpush1.bf16.msra.mxu1 %v16250_v18  ;;  %v16313_v18 = vld [vmem:[#allocation19 + $0x774] ss:$8 sps:$4 sm:$0xff]  }
 0xa21   : > { %10874 = vmatprep.subr.bf16.mxu1 %v16255_v30  ;;  %v13137_v30 = vcombine.high %v20093_v6, %v20097_v4 }
 0xa24   : > { %10875 = vmatpush1.bf16.msra.mxu1 %v16253_v9  ;;  %v16311_v9 = vld [vmem:[#allocation19 + $0x770] ss:$8 sps:$4 sm:$0xff]  }
 0xa25   : > { %10876 = vmatprep.subr.bf16.mxu1 %v16258_v35  ;;  %v16316_v35 = vld [vmem:[#allocation19 + $0x784] ss:$8 sps:$4 sm:$0xff]  }
 0xa28   : > { %10877 = vmatpush1.bf16.msra.mxu1 %v16256_v46  ;;  %v16314_v46 = vld [vmem:[#allocation19 + $0x780] ss:$8 sps:$4 sm:$0xff]  }
 0xa29   : > { %10878 = vmatprep.subr.bf16.mxu1 %v16261_v51  ;;  %v16319_v51 = vld [vmem:[#allocation19 + $0x794] ss:$8 sps:$4 sm:$0xff]  }
 0xa2c   : > { %10879 = vmatpush1.bf16.msra.mxu1 %v16259_v29  ;;  %v16317_v29 = vld [vmem:[#allocation19 + $0x790] ss:$8 sps:$4 sm:$0xff]  }
 0xa2d   : > { %10880 = vmatprep.subr.bf16.mxu1 %v16264_v14  ;;  %v16322_v14 = vld [vmem:[#allocation19 + $0x7a4] ss:$8 sps:$4 sm:$0xff]  }
 0xa30   : > { %10881 = vmatpush1.bf16.msra.mxu1 %v16262_v21  ;;  %v16320_v21 = vld [vmem:[#allocation19 + $0x7a0] ss:$8 sps:$4 sm:$0xff]  }
 0xa31   : > { %10882 = vmatprep.subr.bf16.mxu1 %v16267_v33  ;;  %v16325_v33 = vld [vmem:[#allocation19 + $0x7b4] ss:$8 sps:$4 sm:$0xff]  }
 0xa34   : > { %10883 = vmatpush1.bf16.msra.mxu1 %v16265_v56  ;;  %v16341_v56 = vld [vmem:[#allocation3 + $0x40] ss:$8 sps:$4 sm:$0xff]  }
 0xa35   : > { %10884 = vmatprep.subr.bf16.mxu1 %v16270_v37  ;;  %v16344_v37 = vld [vmem:[#allocation3 + $0x50] ss:$8 sps:$4 sm:$0xff]  }
 0xa38   : > { %10885 = vmatpush1.bf16.msra.mxu1 %v16268_v53  ;;  %v16323_v53 = vld [vmem:[#allocation19 + $0x7b0] ss:$8 sps:$4 sm:$0xff]  }
 0xa39   : > { %10886 = vmatprep.subr.bf16.mxu1 %v16273_v10  ;;  %v16328_v10 = vld [vmem:[#allocation19 + $0x7c4] ss:$8 sps:$4 sm:$0xff]  }
 0xa3c   : > { %10887 = vmatpush1.bf16.msra.mxu1 %v16271_v17  ;;  %v11056_v17 = vshrl.u32 %v16341_v56, 16 }
 0xa3d   : > { %10888 = vmatprep.subr.bf16.mxu1 %v16276_v38  ;;  %v11059_v38 = vshll.u32 %v16341_v56, 16 }
 0xa40   : > { %10889 = vmatpush1.bf16.msra.mxu1 %v16274_v63  ;;  %v11070_v63 = vshrl.u32 %v16344_v37, 16 }
 0xa41   : > { %11363 = vmatprep.subr.bf16.mxu1 %v16280_v57  ;;  %v11073_v57 = vshll.u32 %v16344_v37, 16  ;;  %v16370_v37 = vld [vmem:[#allocation3 + $0x94] ss:$8 sps:$4 sm:$0x11]  }
 0xa42   : > { %v11072_v15 = vrot.slane %v11070_v63, 4 }
 0xa43   : > { %10891 = vmatmul.mubr.bf16.vlgmr.msra.gmra.mrb[4].mxu1 %v16277_v54  ;;  %v16331_v54 = vld [vmem:[#allocation19 + $0x7d4] ss:$8 sps:$4 sm:$0xff]   ;;  %v11075_v8 = vrot.slane %v11073_v57, 5  ;;  %v16347_v57 = vld [vmem:[#allocation19 + $0x810] ss:$8 sps:$4 sm:$0xff]  }
 0xa44   : > { %10900 = vmatprep.mubr.bf16.mxu1 %v16281_v45  ;;  %11364 = vmatpush1.bf16.msra.mxu1 %v16278_v50  ;;  %v16326_v50 = vld [vmem:[#allocation19 + $0x7c0] ss:$8 sps:$4 sm:$0xff]   ;;  %v11061_v45 = vrot.slane %v11059_v38, 5 }
 0xa45   : > { %11365 = vmatprep.subr.bf16.mxu1 %v16284_v28  ;;  %v11058_v28 = vrot.slane %v11056_v17, 4 }
 0xa48   : > { %11366 = vmatpush1.bf16.msra.mxu1 %v16282_v36  ;;  %v16353_v36 = vld [vmem:[#allocation3 + $0x60] ss:$8 sps:$4 sm:$0xff]  }
 0xa49   : > { %11367 = vmatprep.subr.bf16.mxu1 %v16288_v2  ;;  %v16343_v2 = vld [vmem:[#allocation3 + $0x44] ss:$8 sps:$4 sm:$0x11]  }
 0xa4a   : > { %v11065_v27 = vshll.u32 %v16343_v2, 16  ;;  %v16350_v2 = vld [vmem:[#allocation19 + $0x820] ss:$8 sps:$4 sm:$0xff]  }
 0xa4b   : > { %10901 = vmatmul.mubr.bf16.gmra.mrb[8].mxu1 %v16285_v52  ;;  %v11076_v52 = vor.u32 %v11075_v8, %v11072_v15 }
 0xa4c   : > { %10910 = vmatprep.mubr.bf16.mxu1 %v16289_v34  ;;  %11368 = vmatpush1.bf16.msra.mxu1 %v16286_v7  ;;  %v11062_v7 = vor.u32 %v11061_v45, %v11058_v28  ;;  %v11087_v34 = vshll.u32 %v16353_v36, 16 }
 0xa4d   : > { %11369 = vmatprep.subr.bf16.mxu1 %v16292_v41  ;;  %v11084_v41 = vshrl.u32 %v16353_v36, 16  ;;  %v11077_v16 = vrot.slane %v11076_v52, 4  ;;  %v11135_v36 = vshll.u32 %v16370_v37, 16  ;;  %v16401_v37 = vld [vmem:[#allocation19 + $0x8d0] ss:$8 sps:$4 sm:$0xff]  }
 0xa4e   : > { %v11089_v40 = vrot.slane %v11087_v34, 5  ;;  %v16359_v34 = vld [vmem:[#allocation19 + $0x830] ss:$8 sps:$4 sm:$0xff]  }
 0xa4f   : > { %v11086_v55 = vrot.slane %v11084_v41, 4  ;;  %v11137_v41 = vrot.slane %v11135_v36, 5  ;;  %v16427_v36 = vld [vmem:[#allocation3 + $0x64] ss:$8 sps:$4 sm:$0x11]  }
 0xa50   : > { %11370 = vmatpush1.bf16.msra.mxu1 %v16290_v60  ;;  %v11079_v60 = vshll.u32 %v16346_v31, 16 }
 0xa51   : > { %11371 = vmatprep.subr.bf16.mxu1 %v16296_v43  ;;  %v11063_v43 = vrot.slane %v11062_v7, 4 }
 0xa52   : > { %v11081_v44 = vrot.slane %v11079_v60, 5 }
 0xa53   : > { %10911 = vmatmul.mubr.bf16.gmra.mrb[12].mxu1 %v16293_v59  ;;  %v11067_v59 = vrot.slane %v11065_v27, 5  ;;  %v16364_v27 = vld [vmem:[#allocation19 + $0x844] ss:$8 sps:$4 sm:$0xff]  }
 0xa54   : > { %10920 = vmatprep.mubr.bf16.mxu1 %v16297_v3  ;;  %11372 = vmatpush1.bf16.msra.mxu1 %v16294_v26  ;;  %v16365_v26 = vld [vmem:[#allocation3 + $0x80] ss:$8 sps:$4 sm:$0xff]   ;;  %v11082_v47 = vsel %vm18113_vm12, %v11077_v16, %v11081_v44  ;;  %v16382_v16 = vld [vmem:[#allocation3 + $0x34] ss:$8 sps:$4 sm:$0x11]  }
 0xa55   : > { %11373 = vmatprep.subr.bf16.mxu1 %v16300_v5  ;;  %v11100_v5 = vrot.slane %v11098_v0, 4  ;;  %v16335_v3 = vld [vmem:[#allocation19 + $0x7f0] ss:$8 sps:$4 sm:$0xff]   ;;  %v11068_v39 = vsel %vm18113_vm12, %v11063_v43, %v11067_v59 }
 0xa56   : > { %v13138_v11 = vcombine.low %v11068_v39, %v11082_v47  ;;  %v16380_v43 = vld [vmem:[#allocation3 + $0x30] ss:$8 sps:$4 sm:$0xee]  }
 0xa57   : > { %v16371_v44 = vld [vmem:[#allocation19 + $0x850] ss:$8 sps:$4 sm:$0xff]  }
 0xa58   : > { %11374 = vmatpush1.bf16.msra.mxu1 %v16298_v48  ;;  %v16340_v48 = vld [vmem:[#allocation19 + $0x804] ss:$8 sps:$4 sm:$0xff]  }
 0xa59   : > { %11375 = vmatprep.subr.bf16.mxu1 %v16304_v22  ;;  %v16358_v22 = vld [vmem:[#allocation3 + $0x74] ss:$8 sps:$4 sm:$0x11]  }
 0xa5b   : > { %10921 = vmatmul.mubr.bf16.gmra.mrb[16].mxu1 %v16301_v19  ;;  %v11112_v19 = vshrl.u32 %v16365_v26, 16 }
 0xa5c   : > { %11376 = vmatpush1.bf16.msra.mxu1 %v16302_v24  ;;  %11395 = vmatprep.mubr.bf16.mxu1 %v13137_v30  ;;  %v11090_v24 = vor.u32 %v11089_v40, %v11086_v55  ;;  %v11115_v30 = vshll.u32 %v16365_v26, 16  ;;  %v16362_v55 = vld [vmem:[#allocation19 + $0x840] ss:$8 sps:$4 sm:$0xff]   ;;  %v16373_v26 = vld [vmem:[#allocation19 + $0x854] ss:$8 sps:$4 sm:$0xff]  }
 0xa5d   : > { %11377 = vmatprep.subr.bf16.mxu1 %v16313_v18  ;;  %v11104_v18 = vor.u32 %v11103_v49, %v11100_v5  ;;  %v13192_v5 = vrot.slane %v16377_v58, 9 }
 0xa5e   : > { %v11091_v56 = vrot.slane %v11090_v24, 4  ;;  %v11117_v17 = vrot.slane %v11115_v30, 5  ;;  %v16386_v30 = vld [vmem:[#allocation19 + $0x880] ss:$8 sps:$4 sm:$0xff]  }
 0xa60   : > { %11378 = vmatpush1.bf16.msra.mxu1 %v16311_v9  ;;  %v11126_v9 = vshrl.u32 %v16368_v13, 16 }
 0xa61   : > { %11379 = vmatprep.subr.bf16.mxu1 %v16316_v35  ;;  %v11129_v35 = vshll.u32 %v16368_v13, 16  ;;  %v13193_v13 = vrot.slane %v16380_v43, 9  ;;  %v16439_v43 = vld [vmem:[#allocation3 + $0x84] ss:$8 sps:$4 sm:$0x11]  }
 0xa62   : > { %v11128_v38 = vrot.slane %v11126_v9, 4  ;;  %v16391_v9 = vld [vmem:[#allocation19 + $0x894] ss:$8 sps:$4 sm:$0xff]  }
 0xa63   : > { %v11131_v63 = vrot.slane %v11129_v35, 5  ;;  %v16389_v35 = vld [vmem:[#allocation19 + $0x890] ss:$8 sps:$4 sm:$0xff]  }
 0xa64   : > { %11380 = vmatpush1.bf16.msra.mxu1 %v16314_v46  ;;  %v16338_v46 = vld [vmem:[#allocation19 + $0x800] ss:$8 sps:$4 sm:$0xff]  }
 0xa65   : > { %11381 = vmatprep.subr.bf16.mxu1 %v16319_v51  ;;  %v11093_v51 = vshll.u32 %v16355_v32, 16  ;;  %v11132_v8 = vor.u32 %v11131_v63, %v11128_v38  ;;  %v16376_v32 = vld [vmem:[#allocation19 + $0x864] ss:$8 sps:$4 sm:$0xff]   ;;  %v16418_v63 = vld [vmem:[#allocation3 + $0x54] ss:$8 sps:$4 sm:$0x11]  }
 0xa66   : > { %v16416_v38 = vld [vmem:[#allocation3 + $0x50] ss:$8 sps:$4 sm:$0xee]  }
 0xa67   : > { %v11133_v52 = vrot.slane %v11132_v8, 4  ;;  %v16425_v8 = vld [vmem:[#allocation3 + $0x60] ss:$8 sps:$4 sm:$0xee]  }
 0xa68   : > { %11382 = vmatpush1.bf16.msra.mxu1 %v16317_v29  ;;  %v13136_v29 = vcombine.low %v20093_v6, %v20097_v4  ;;  %v16367_v6 = vld [vmem:[#allocation3 + $0x84] ss:$8 sps:$4 sm:$0x11]  }
 0xa69   : > { %11383 = vmatprep.subr.bf16.mxu1 %v16322_v14  ;;  %v16349_v14 = vld [vmem:[#allocation19 + $0x814] ss:$8 sps:$4 sm:$0xff]   ;;  %v11121_v31 = vshll.u32 %v16367_v6, 16  ;;  %v13195_v6 = vrot.slane %v16416_v38, 9 }
 0xa6a   : > { %v16569_v38 = vld [vmem:[%s17517_s2 + $0x28] sm:$0xff] }
 0xa6b   : > { %v11123_v0 = vrot.slane %v11121_v31, 5  ;;  %v16430_v31 = vld [vmem:[#allocation3 + $0x74] ss:$8 sps:$4 sm:$0x11]  }
 0xa6c   : > { %11384 = vmatpush1.bf16.msra.mxu1 %v16320_v21  ;;  %v11107_v21 = vshll.u32 %v16358_v22, 16  ;;  %v16374_v22 = vld [vmem:[#allocation19 + $0x860] ss:$8 sps:$4 sm:$0xff]   ;;  %v11554_v58 = vrot.slane %v16430_v31, 5 }
 0xa6d   : > { %11385 = vmatprep.subr.bf16.mxu1 %v16325_v33  ;;  %v13139_v33 = vcombine.high %v11068_v39, %v11082_v47  ;;  %v16385_v47 = vld [vmem:[#allocation19 + $0x874] ss:$8 sps:$4 sm:$0xff]  }
 0xa6e   : > { %v11109_v28 = vrot.slane %v11107_v21, 5  ;;  %v16400_v21 = vld [vmem:[#allocation19 + $0x8c4] ss:$8 sps:$4 sm:$0xff]  }
 0xa70   : > { %11386 = vmatpush1.bf16.msra.mxu1 %v16323_v53  ;;  %v11114_v53 = vrot.slane %v11112_v19, 4  ;;  %v16383_v19 = vld [vmem:[#allocation19 + $0x870] ss:$8 sps:$4 sm:$0xff]  }
 0xa71   : > { %11387 = vmatprep.subr.bf16.mxu1 %v16328_v10  ;;  %v11105_v10 = vrot.slane %v11104_v18, 4  ;;  %v16388_v18 = vld [vmem:[#allocation19 + $0x884] ss:$8 sps:$4 sm:$0xff]  }
 0xa72   : > { %v11118_v15 = vor.u32 %v11117_v17, %v11114_v53  ;;  %v16406_v53 = vld [vmem:[#allocation19 + $0x8e4] ss:$8 sps:$4 sm:$0xff]   ;;  %v16415_v17 = vld [vmem:[#allocation3 + $0x44] ss:$8 sps:$4 sm:$0x11]  }
 0xa73   : > { %v11110_v45 = vsel %vm18113_vm12, %v11105_v10, %v11109_v28  ;;  %v16413_v10 = vld [vmem:[#allocation3 + $0x40] ss:$8 sps:$4 sm:$0xee]   ;;  %v11542_v28 = vrot.slane %v16415_v17, 5 }
 0xa74   : > { %11388 = vmatpush1.bf16.msra.mxu1 %v16326_v50  ;;  %v11095_v50 = vrot.slane %v11093_v51, 5  ;;  %v11119_v7 = vrot.slane %v11118_v15, 4  ;;  %v16392_v51 = vld [vmem:[#allocation19 + $0x8a0] ss:$8 sps:$4 sm:$0xff]   ;;  %v16568_v17 = vld [vmem:[%s17517_s2 + $0x20] sm:$0xff] }
 0xa75   : > { %11389 = vmatprep.subr.bf16.mxu1 %v16331_v54  ;;  %v16352_v54 = vld [vmem:[#allocation19 + $0x824] ss:$8 sps:$4 sm:$0xff]  }
 0xa76   : > { %v11096_v4 = vsel %vm18113_vm12, %v11091_v56, %v11095_v50  ;;  %v11124_v60 = vsel %vm18113_vm12, %v11119_v7, %v11123_v0  ;;  %v16403_v56 = vld [vmem:[#allocation19 + $0x8d4] ss:$8 sps:$4 sm:$0xff]   ;;  %v16412_v15 = vld [vmem:[#allocation22 + $0x4] ss:$8 sps:$4 sm:$0xff]  }
 0xa77   : > { %v13140_v40 = vcombine.low %v11096_v4, %v11110_v45  ;;  %v16409_v50 = vld [vmem:[#allocation19 + $0x8f4] ss:$8 sps:$4 sm:$0xff]  }
 0xa78   : > { %11390 = vmatpush1.bf16.msra.mxu1 %v16329_v20  ;;  %v16361_v20 = vld [vmem:[#allocation19 + $0x834] ss:$8 sps:$4 sm:$0xff]  }
 0xa79   : > { %11391 = vmatprep.subr.bf16.mxu1 %v16334_v23  ;;  %v13141_v23 = vcombine.high %v11096_v4, %v11110_v45  ;;  %v11546_v4 = vrot.slane %v16418_v63, 5  ;;  %v16407_v45 = vld [vmem:[#allocation19 + $0x8f0] ss:$8 sps:$4 sm:$0xff]   ;;  %v11907_v63 = vpack.c.bf16 %v16569_v38, %v16568_v17 }
 0xa7c   : > { %11392 = vmatpush1.bf16.msra.mxu1 %v16332_v1  ;;  %v16379_v1 = vld [vmem:[#allocation3 + $0x24] ss:$8 sps:$4 sm:$0x11]  }
 0xa7d   : > { %11393 = vmatprep.subr.bf16.mxu1 %v16337_v42  ;;  %v11138_v42 = vsel %vm18113_vm12, %v11133_v52, %v11137_v41  ;;  %v11534_v49 = vrot.slane %v16379_v1, 5  ;;  %v16421_v52 = vld [vmem:[#allocation22 + $0x14] ss:$8 sps:$4 sm:$0xff]   ;;  %v16419_v1 = vld [vmem:[#allocation22 + $0x10] ss:$8 sps:$4 sm:$0xff]  }
 0xa7e   : > { %v13143_v59 = vcombine.high %v11124_v60, %v11138_v42  ;;  %v13142_v39 = vcombine.low %v11124_v60, %v11138_v42  ;;  %v16424_v60 = vld [vmem:[#allocation22 + $0x24] ss:$8 sps:$4 sm:$0xff]   ;;  %v16437_v42 = vld [vmem:[#allocation3 + $0x80] ss:$8 sps:$4 sm:$0xee]  }
 0xa7f   : > { %v20117_v62 = vsel %vm18142_vm15, %v13192_v5, %v11534_v49  ;;  %v16433_v49 = vld [vmem:[#allocation22 + $0x34] ss:$8 sps:$4 sm:$0xff]  }
 0xa80   : > { %11394 = vmatpush1.bf16.msra.mxu1 %v16335_v3  ;;  %v11538_v3 = vrot.slane %v16382_v16, 5 }
 0xa81   : > { %11788 = vmatprep.subr.bf16.mxu1 %v16340_v48 }
 0xa82   : > { %v20121_v48 = vsel %vm18142_vm15, %v13193_v13, %v11538_v3  ;;  %v13198_v3 = vrot.slane %v16437_v42, 9 }
 0xa83   : > { %11396 = vmatmul.mubr.bf16.vlgmr.msra.gmra.mrb[4].mxu1 %v13136_v29  ;;  %v13201_v24 = vcombine.high %v20117_v62, %v20121_v48  ;;  %v16397_v29 = vld [vmem:[#allocation19 + $0x8b4] ss:$8 sps:$4 sm:$0xff]   ;;  %v13200_v7 = vcombine.low %v20117_v62, %v20121_v48 }
 0xa84   : > { %11405 = vmatprep.mubr.bf16.mxu1 %v13139_v33  ;;  %11789 = vmatpush1.bf16.msra.mxu1 %v16338_v46  ;;  %v16394_v46 = vld [vmem:[#allocation19 + $0x8a4] ss:$8 sps:$4 sm:$0xff]   ;;  %v16398_v33 = vld [vmem:[#allocation19 + $0x8c0] ss:$8 sps:$4 sm:$0xff]   ;;  %v16431_v48 = vld [vmem:[#allocation22 + $0x30] ss:$8 sps:$4 sm:$0xff]  }
 0xa85   : > { %11790 = vmatprep.subr.bf16.mxu1 %v16349_v14  ;;  %v16395_v14 = vld [vmem:[#allocation19 + $0x8b0] ss:$8 sps:$4 sm:$0xff]  }
 0xa88   : > { %11791 = vmatpush1.bf16.msra.mxu1 %v16347_v57  ;;  %v16404_v57 = vld [vmem:[#allocation19 + $0x8e0] ss:$8 sps:$4 sm:$0xff]  }
 0xa89   : > { %11792 = vmatprep.subr.bf16.mxu1 %v16352_v54  ;;  %v13194_v54 = vrot.slane %v16413_v10, 9 }
 0xa8b   : > { %11406 = vmatmul.mubr.bf16.gmra.mrb[8].mxu1 %v13138_v11  ;;  %v11547_v11 = vsel %vm18142_vm15, %v13195_v6, %v11546_v4  ;;  %v11925_v6 = vld [vmem:[#allocation24] sm:$0x3] }
 0xa8c   : > { %11415 = vmatprep.mubr.bf16.mxu1 %v13141_v23  ;;  %11793 = vmatpush1.bf16.msra.mxu1 %v16350_v2  ;;  %v11543_v2 = vsel %vm18142_vm15, %v13194_v54, %v11542_v28  ;;  %v16410_v23 = vld [vmem:[#allocation22] ss:$8 sps:$4 sm:$0xff]   ;;  %v11877_v28 = vld [vmem:[#allocation21] sm:$0x3] }
 0xa8d   : > { %11794 = vmatprep.subr.bf16.mxu1 %v16361_v20  ;;  %v16428_v20 = vld [vmem:[#allocation3 + $0x70] ss:$8 sps:$4 sm:$0xee]   ;;  %v13203_v41 = vcombine.high %v11543_v2, %v11547_v11  ;;  %v13202_v5 = vcombine.low %v11543_v2, %v11547_v11  ;;  %v11882_v4 = vrot.slane %v11877_v28, %v21025_v12 }
 0xa8e   : > { %v13197_v0 = vrot.slane %v16428_v20, 9 }
 0xa90   : > { %11795 = vmatpush1.bf16.msra.mxu1 %v16359_v34  ;;  %v13196_v34 = vrot.slane %v16425_v8, 9  ;;  %v11934_v8 = vrot.slane %v11925_v6, %v21026_v25 }
 0xa91   : > { %11796 = vmatprep.subr.bf16.mxu1 %v16364_v27  ;;  %v11550_v27 = vrot.slane %v16427_v36, 5 }
 0xa93   : > { %11416 = vmatmul.mubr.bf16.gmra.mrb[12].mxu1 %v13140_v40  ;;  %v11551_v16 = vsel %vm18142_vm15, %v13196_v34, %v11550_v27  ;;  %v16440_v40 = vld [vmem:[#allocation3 + $0x90] ss:$8 sps:$4 sm:$0xee]  }
 0xa94   : > { %11425 = vmatprep.mubr.bf16.mxu1 %v13143_v59  ;;  %11797 = vmatpush1.bf16.msra.mxu1 %v16362_v55  ;;  %v11555_v55 = vsel %vm18142_vm15, %v13197_v0, %v11554_v58  ;;  %v16422_v59 = vld [vmem:[#allocation22 + $0x20] ss:$8 sps:$4 sm:$0xff]  }
 0xa95   : > { %11798 = vmatprep.subr.bf16.mxu1 %v16373_v26  ;;  %v16442_v26 = vld [vmem:[#allocation3 + $0x94] ss:$8 sps:$4 sm:$0x11]   ;;  %v13205_v13 = vcombine.high %v11551_v16, %v11555_v55 }
 0xa96   : > { %v11562_v62 = vrot.slane %v16442_v26, 5 }
 0xa98   : > { %11799 = vmatpush1.bf16.msra.mxu1 %v16371_v44  ;;  %v11558_v44 = vrot.slane %v16439_v43, 5 }
 0xa99   : > { %11800 = vmatprep.subr.bf16.mxu1 %v16376_v32  ;;  %v13199_v32 = vrot.slane %v16440_v40, 9 }
 0xa9b   : > { %11426 = vmatmul.mubr.bf16.gmra.mrb[16].mxu1 %v13142_v39  ;;  %v11559_v39 = vsel %vm18142_vm15, %v13198_v3, %v11558_v44 }
 0xa9c   : > { %11801 = vmatpush1.bf16.msra.mxu1 %v16374_v22  ;;  %11820 = vmatprep.mubr.bf16.mxu1 %v13201_v24  ;;  %v16436_v22 = vld [vmem:[#allocation22 + $0x44] ss:$8 sps:$4 sm:$0xff]   ;;  %v16434_v24 = vld [vmem:[#allocation22 + $0x40] ss:$8 sps:$4 sm:$0xff]  }
 0xa9d   : > { %11802 = vmatprep.subr.bf16.mxu1 %v16385_v47  ;;  %v11563_v47 = vsel %vm18142_vm15, %v13199_v32, %v11562_v62 }
 0xa9e   : > { %v13206_v61 = vcombine.low %v11559_v39, %v11563_v47 }
 0xaa0   : > { %11803 = vmatpush1.bf16.msra.mxu1 %v16383_v19  ;;  %v13204_v19 = vcombine.low %v11551_v16, %v11555_v55 }
 0xaa1   : > { %11804 = vmatprep.subr.bf16.mxu1 %v16388_v18  ;;  %v16445_v18 = vld [vmem:[#allocation22 + $0x54] ss:$8 sps:$4 sm:$0xff]  }
 0xaa4   : > { %11805 = vmatpush1.bf16.msra.mxu1 %v16386_v30  ;;  %v13207_v30 = vcombine.high %v11559_v39, %v11563_v47 }
 0xaa5   : > { %11806 = vmatprep.subr.bf16.mxu1 %v16391_v9  ;;  %v16443_v9 = vld [vmem:[#allocation22 + $0x50] ss:$8 sps:$4 sm:$0xff]  }
 0xaa8   : > { %11807 = vmatpush1.bf16.msra.mxu1 %v16389_v35  ;;  %v16448_v35 = vld [vmem:[#allocation22 + $0x64] ss:$8 sps:$4 sm:$0xff]  }
 0xaa9   : > { %11808 = vmatprep.subr.bf16.mxu1 %v16394_v46  ;;  %v16446_v46 = vld [vmem:[#allocation22 + $0x60] ss:$8 sps:$4 sm:$0xff]  }
 0xaac   : > { %11809 = vmatpush1.bf16.msra.mxu1 %v16392_v51  ;;  %v16451_v51 = vld [vmem:[#allocation22 + $0x74] ss:$8 sps:$4 sm:$0xff]  }
 0xaad   : > { %11810 = vmatprep.subr.bf16.mxu1 %v16397_v29  ;;  %v16449_v29 = vld [vmem:[#allocation22 + $0x70] ss:$8 sps:$4 sm:$0xff]  }
 0xab0   : > { %11811 = vmatpush1.bf16.msra.mxu1 %v16395_v14  ;;  %v21047_v14 = vld [vmem:[#allocation56_spill] sm:$0xff] }
 0xab1   : > { %11812 = vmatprep.subr.bf16.mxu1 %v16400_v21  ;;  %v16564_v21 = vld [vmem:[%s17517_s2] sm:$0xff] }
 0xab4   : > { %11813 = vmatpush1.bf16.msra.mxu1 %v16398_v33  ;;  %v16565_v33 = vld [vmem:[%s17517_s2 + $0x8] sm:$0xff] }
 0xab5   : > { %11814 = vmatprep.subr.bf16.mxu1 %v16403_v56  ;;  %v11905_v56 = vpack.c.bf16 %v16565_v33, %v16564_v21 }
 0xab8   : > { %11815 = vmatpush1.bf16.msra.mxu1 %v16401_v37  ;;  %v16566_v37 = vld [vmem:[%s17517_s2 + $0x10] sm:$0xff] }
 0xab9   : > { %11816 = vmatprep.subr.bf16.mxu1 %v16406_v53  ;;  %v16567_v53 = vld [vmem:[%s17517_s2 + $0x18] sm:$0xff] }
 0xaba   : > { %v11906_v10 = vpack.c.bf16 %v16567_v53, %v16566_v37 }
 0xabc   : > { %11817 = vmatpush1.bf16.msra.mxu1 %v16404_v57  ;;  %v16570_v57 = vld [vmem:[%s17517_s2 + $0x30] sm:$0xff] }
 0xabd   : > { %11818 = vmatprep.subr.bf16.mxu1 %v16409_v50  ;;  %v16571_v50 = vld [vmem:[%s17517_s2 + $0x38] sm:$0xff] }
 0xabe   : > { %v11908_v54 = vpack.c.bf16 %v16571_v50, %v16570_v57 }
 0xac0   : > { %11819 = vmatpush1.bf16.msra.mxu1 %v16407_v45  ;;  %v11930_v45 = vrot.slane %v11925_v6, %v21025_v12 }
 0xac1   : > { %12017 = vmatprep.subr.bf16.mxu1 %v16412_v15  ;;  %v11886_v15 = vrot.slane %v11877_v28, %v21026_v25 }
 0xac2   : > { %v14986_v36 = vadd.f32 %v11930_v45, %v11882_v4 }
 0xac3   : > { %11821 = vmatmul.mubr.bf16.vlgmr.msra.gmra.mrb[4].mxu1 %v13200_v7  ;;  %v14988_v2 = vadd.f32 %v11934_v8, %v11886_v15 }
 0xac4   : > { %11830 = vmatprep.mubr.bf16.mxu1 %v13203_v41  ;;  %12018 = vmatpush1.bf16.msra.mxu1 %v16410_v23 }
 0xac5   : > { %12019 = vmatprep.subr.bf16.mxu1 %v16421_v52 }
 0xac8   : > { %12020 = vmatpush1.bf16.msra.mxu1 %v16419_v1 }
 0xac9   : > { %12021 = vmatprep.subr.bf16.mxu1 %v16424_v60 }
 0xacb   : > { %11831 = vmatmul.mubr.bf16.gmra.mrb[8].mxu1 %v13202_v5 }
 0xacc   : > { %11840 = vmatprep.mubr.bf16.mxu1 %v13205_v13  ;;  %12022 = vmatpush1.bf16.msra.mxu1 %v16422_v59 }
 0xacd   : > { %12023 = vmatprep.subr.bf16.mxu1 %v16433_v49 }
 0xad0   : > { %12024 = vmatpush1.bf16.msra.mxu1 %v16431_v48 }
 0xad1   : > { %12025 = vmatprep.subr.bf16.mxu1 %v16436_v22 }
 0xad3   : > { %11841 = vmatmul.mubr.bf16.gmra.mrb[12].mxu1 %v13204_v19 }
 0xad4   : > { %11850 = vmatprep.mubr.bf16.mxu1 %v13207_v30  ;;  %12026 = vmatpush1.bf16.msra.mxu1 %v16434_v24 }
 0xad5   : > { %12027 = vmatprep.subr.bf16.mxu1 %v16445_v18 }
 0xad8   : > { %12028 = vmatpush1.bf16.msra.mxu1 %v16443_v9 }
 0xad9   : > { %12029 = vmatprep.subr.bf16.mxu1 %v16448_v35 }
 0xadb   : > { %11851 = vmatmul.mubr.bf16.gmra.mrb[16].mxu1 %v13206_v61 }
 0xadc   : > { %12030 = vmatpush1.bf16.msra.mxu1 %v16446_v46  ;;  %12049 = vmatprep.mubr.bf16.mxu1 %v21047_v14 }
 0xadd   : > { %12031 = vmatprep.subr.bf16.mxu1 %v16451_v51 }
 0xae0   : > { %12032 = vmatpush1.bf16.msra.mxu1 %v16449_v29 }
 0xae3   : > { %12050 = vmatmul.mubr.bf16.vlgmr.msra.gmra.mrb[4].mxu1 %v11905_v56 }
 0xae4   : > { %12059 = vmatprep.mubr.bf16.mxu1 %v21047_v14 }
 0xaeb   : > { %12060 = vmatmul.mubr.bf16.gmra.mrb[8].mxu1 %v11906_v10 }
 0xaec   : > { %12069 = vmatprep.mubr.bf16.mxu1 %v21047_v14 }
 0xaf3   : > { %12070 = vmatmul.mubr.bf16.gmra.mrb[12].mxu1 %v11907_v63 }
 0xaf4   : > { %12079 = vmatprep.mubr.bf16.mxu1 %v21047_v14 }
 0xafb   : > { %12080 = vmatmul.mubr.bf16.gmra.mrb[16].mxu1 %v11908_v54 }
 0xbb6   : > { %v12051_v11 = vpop.f32.mrb[4].mxu1 }
 0xbb7   : > { %v14987_v20 = vadd.f32 %v14986_v36, %v12051_v11  ;;  %v12053_v31 = vpop.f32.mrb[5].mxu1 }
 0xbb8   : > { %v14989_v23 = vadd.f32 %v14988_v2, %v12053_v31  ;;  %v12055_v7 = vpop.f32.mrb[6].mxu1 }
 0xbb9   : > { %v14991_v52 = vadd.f32 %v14986_v36, %v12055_v7  ;;  %v12057_v41 = vpop.f32.mrb[7].mxu1 }
 0xbba   : > { %v13294_v34 = vpack.c.bf16 %v14989_v23, %v14987_v20  ;;  %v14993_v27 = vadd.f32 %v14988_v2, %v12057_v41 }
 0xbbc   : > { %12170 = vst [vmem:[%s20157_s4] sm:$0xff] %v13294_v34  ;;  %v13295_v12 = vpack.c.bf16 %v14993_v27, %v14991_v52 }
 0xbbe   : > { %12171 = vst [vmem:[%s20157_s4 + $0x8] sm:$0xff] %v13295_v12  ;;  %v12061_v25 = vpop.f32.mrb[8].mxu1 }
 0xbbf   : > { %v14995_v0 = vadd.f32 %v14986_v36, %v12061_v25  ;;  %v12063_v58 = vpop.f32.mrb[9].mxu1 }
 0xbc0   : > { %v14997_v1 = vadd.f32 %v14988_v2, %v12063_v58  ;;  %v12065_v60 = vpop.f32.mrb[10].mxu1 }
 0xbc1   : > { %v14999_v42 = vadd.f32 %v14986_v36, %v12065_v60  ;;  %v12067_v43 = vpop.f32.mrb[11].mxu1 }
 0xbc2   : > { %v13296_v16 = vpack.c.bf16 %v14997_v1, %v14995_v0  ;;  %v15001_v55 = vadd.f32 %v14988_v2, %v12067_v43 }
 0xbc4   : > { %12172 = vst [vmem:[%s20157_s4 + $0x10] sm:$0xff] %v13296_v16  ;;  %v13297_v40 = vpack.c.bf16 %v15001_v55, %v14999_v42 }
 0xbc6   : > { %12173 = vst [vmem:[%s20157_s4 + $0x18] sm:$0xff] %v13297_v40  ;;  %v12071_v26 = vpop.f32.mrb[12].mxu1 }
 0xbc7   : > { %v15003_v59 = vadd.f32 %v14986_v36, %v12071_v26  ;;  %v12073_v5 = vpop.f32.mrb[13].mxu1 }
 0xbc8   : > { %v15005_v49 = vadd.f32 %v14988_v2, %v12073_v5  ;;  %v12075_v13 = vpop.f32.mrb[14].mxu1 }
 0xbc9   : > { %v15007_v3 = vadd.f32 %v14986_v36, %v12075_v13  ;;  %v12077_v44 = vpop.f32.mrb[15].mxu1 }
 0xbca   : > { %v13298_v32 = vpack.c.bf16 %v15005_v49, %v15003_v59  ;;  %v15009_v62 = vadd.f32 %v14988_v2, %v12077_v44 }
 0xbcc   : > { %12174 = vst [vmem:[%s20157_s4 + $0x20] sm:$0xff] %v13298_v32  ;;  %v13299_v48 = vpack.c.bf16 %v15009_v62, %v15007_v3 }
 0xbce   : > { %12175 = vst [vmem:[%s20157_s4 + $0x28] sm:$0xff] %v13299_v48  ;;  %v12081_v22 = vpop.f32.mrb[16].mxu1 }
 0xbcf   : > { %v15011_v39 = vadd.f32 %v14986_v36, %v12081_v22  ;;  %v12083_v47 = vpop.f32.mrb[17].mxu1 }
 0xbd0   : > { %v15013_v24 = vadd.f32 %v14988_v2, %v12083_v47  ;;  %v12085_v19 = vpop.f32.mrb[18].mxu1 }
 0xbd1   : > { %v15015_v18 = vadd.f32 %v14986_v36, %v12085_v19  ;;  %v12087_v30 = vpop.f32.mrb[19].mxu1 }
 0xbd2   : > { %v13300_v9 = vpack.c.bf16 %v15013_v24, %v15011_v39  ;;  %v15017_v35 = vadd.f32 %v14988_v2, %v12087_v30 }
 0xbd4   : > { %12176 = vst [vmem:[%s20157_s4 + $0x30] sm:$0xff] %v13300_v9  ;;  %v13301_v46 = vpack.c.bf16 %v15017_v35, %v15015_v18 }
 0xbd6   : > { %12177 = vst [vmem:[%s20157_s4 + $0x38] sm:$0xff] %v13301_v46 }
 0xbd7   : > { %16951 = shalt.err (!%p16948_p7)
}
 0xbd8   : > { %s16952_s15 = scalar_lea.hbm %s20172_s0, 1024  ;;  %s16956_s20 = scalar_lea.hbm %s21048_s19, 2048 }
 0xbd9   : > { %p16953_p6 = scmp.ne.s32.totalorder %s20172_s0, %s16952_s15  ;;  %p16957_p13 = scmp.lt.u32.totalorder %s20172_s0, %s21048_s19 }
 0xbda   : > { %p16958_p1 = scmp.lt.u32.totalorder %s16956_s20, %s16952_s15  ;;  %p16960_p2 = scmp.lt.u32.totalorder %s16952_s15, %s20172_s0 }
 0xbdb   : > { %p16954_p9 = pnand %p16953_p6, %p21049_p8 }
 0xbdc   : > { %p16959_p3 = por %p16958_p1, %p16957_p13 }
 0xbdd   : > { %p16955_p4 = pneg %p16954_p9 }
 0xbde   : > { %p16961_p10 = por %p16960_p2, %p16959_p3 }
 0xbe0   : > { %p16962_p11 = pnand %p16961_p10, %p16955_p4 }
 0xbe2   : > { %16965 = shalt.err (!%p16962_p11)
}
 0xbe3   : > { %s17053_s22 = smov 128   ;;  %s17054_s14 = smov 8  }
 0xbe4   : > { %15376 = dma.vmem_to_hbm [thread:$0]  (%p21049_p8), %s20167_s24, 1024, %s20172_s0, %s12179_s23, %s17053_s22, %s17053_s22, %s17054_s14  }
 0xbe5 PF: > { %s12207_s29 = sand.u32 1, %s17016_s25   ;;  %p21050_p12 = scmp.ne.s32.totalorder %s20556_s1, 0 }
 0xbe6   : > { %p21051_p0 = scmp.ge.s32.totalorder %s17028_s28, 2  ;;  %s12208_s18 = scalar_lea.sflag [#allocation6], %s12207_s29 }
 0xbe8   : > { %p15420_p5 = pnand %p21051_p0, %p21050_p12 }
 0xbea   : > { %17011 = dma.done.wait (!%p15420_p5), %s12208_s18, 1024  }
 0xbeb   : > { %17013 = vsyncadd (!%p15420_p5), %s12208_s18, 4294966272  ;;  %p32_p7 = scmp.ge.s32.totalorder %s17429_s16, 4   ;;  %s21052_s25 = smov %s17020_s26 }
 0xbec   : > { %s21053_s26 = smov %s17024_s27  ;;  %s21054_s27 = smov %s17440_s13 }
 0xbed   : > { %s21055_s28 = smov %s17429_s16  ;;  %34 = sbr.rel (!%p32_p7) target bundleno = 19 (0x13), region = 171 }
 0xbf4   :  { %12213 = vsyncpa [#allocation5], 1 }
 0xbf5   :  { %12215 = vsyncpa [#allocation5 + $0x1], 1 }
 0xbf6   :  { %12216 = vsyncpa [#allocation8], 1 }
 0xbf7   :  { %12217 = vsyncpa [#allocation11], 1 }
 0xbf8   :  { %12218 = vsyncpa [#allocation14], 1 }
 0xbf9   :  { %12219 = vsyncpa [#allocation17], 1 }
 0xbfa   :  { %12220 = vsyncpa [#allocation20], 1 }
 0xbfb   :  { %12221 = vsyncpa [#allocation23], 1 }
 0xbfc   :  { %12222 = vsyncpa [#allocation6], 1 }
 0xbfd   :  { %12224 = vsyncpa [#allocation6 + $0x1], 1 }

</bundles_post_ra>
